<compile_context>
chip_gen: v7x
topology: tpu7x:2x2x1
jax: 0.10.0
libtpu: 0.0.40
codegen_flags: <defaults>
</compile_context>

<pallas_src>
import functools

import jax
import jax.numpy as jnp
from jax import lax
from jax.experimental import pallas as pl
from jax.experimental.pallas import tpu as pltpu


_LANES = 128       # channel padding target (lane-dense stores, full MXU N)
_HALO_ROWS = 4     # bottom halo rows fetched per tile (exactly the rows used)


def _round_up(x, m):
    return (x + m - 1) // m * m


# ---------------------------------------------------------------------------
# Kernel: one (batch, H-tile) step of Conv3x3+BN+ReLU -> Conv3x3+BN+ReLU.
# ---------------------------------------------------------------------------
def _fused_conv_block_kernel(xm_ref, xh_ref, w1_ref, t1_ref, w2_ref, t2_ref,
                             o_ref, *, true_h):
    # xm_ref: (1, TH, IW, cin_p)   main rows of the padded bf16 input
    # xh_ref: (1, 4,  IW, cin_p)   4 bottom-halo rows (next tile / zero pad)
    # w1_ref: (9*cin_p,  cmid_p)   stage-1 weights (BN scale folded), dy/dx/cin order
    # t1_ref: (1, cmid_p)          stage-1 fused shift (conv bias + BN)
    # w2_ref: (9*cmid_p, cout_p)   stage-2 weights
    # t2_ref: (1, cout_p)          stage-2 fused shift
    # o_ref : (1, TH, W, cout_p)   bf16 output tile
    _, TH, W, cout_p = o_ref.shape
    cin_p = xm_ref.shape[-1]
    cmid_p = t1_ref.shape[-1]
    IW = xm_ref.shape[2]
    PW = IW - 2                      # slab width (multiple of 16)
    M1 = (TH + 2) * PW
    M2 = TH * PW

    r0 = pl.program_id(1) * TH       # first output row of this tile

    # (TH+4)-row window = main rows + 4 halo rows; then stack the three dx
    # (column) taps along channels ONCE.  These are the only shifted copies in
    # the kernel: every per-dy matmul LHS below is a contiguous row slice of xs
    # (untiled leading dim) plus a free reshape -> no relayout in the hot loop.
    xw = jnp.concatenate([xm_ref[0], xh_ref[0]], axis=0)          # (TH+4, IW, cin)
    xs = jnp.concatenate([xw[:, dx:dx + PW, :] for dx in range(3)],
                         axis=-1)                                  # (TH+4, PW, 3*cin)

    # ---- Stage 1: 3 matmuls (K = 3*cin_p), f32 accumulation on the MXU. ----
    acc1 = jnp.zeros((M1, cmid_p), jnp.float32)
    for dy in range(3):
        lhs = xs[dy:dy + TH + 2].reshape(M1, 3 * cin_p)
        acc1 = acc1 + jnp.dot(
            lhs, w1_ref[dy * 3 * cin_p:(dy + 1) * 3 * cin_p, :],
            preferred_element_type=jnp.float32)
    y1 = jnp.maximum(acc1 + t1_ref[...], 0.0).reshape(TH + 2, PW, cmid_p)

    # Slab (j, p) holds the stage-1 output for image row r0-1+j, col p-1.
    # Positions outside the real image are stage-2 zero padding: 2-D bf16 mask
    # (lane-broadcast along channels), applied after the bf16 cast.
    row = r0 - 1 + lax.broadcasted_iota(jnp.int32, (TH + 2, PW, 1), 0)
    col = lax.broadcasted_iota(jnp.int32, (TH + 2, PW, 1), 1) - 1
    valid = (row >= 0) & (row < true_h) & (col >= 0) & (col < W)
    y1 = y1.astype(jnp.bfloat16) * valid.astype(jnp.bfloat16)

    # Stack the stage-2 dx taps once (only shifted copies of stage 2); padding
    # columns are only read by output columns >= W, which are never stored.
    zc = jnp.zeros((TH + 2, 1, cmid_p), jnp.bfloat16)
    y1s = jnp.concatenate(
        [y1,
         jnp.concatenate([y1[:, 1:, :], zc], axis=1),
         jnp.concatenate([y1[:, 2:, :], zc, zc], axis=1)],
        axis=-1)                                                   # (TH+2, PW, 3*cmid)

    # ---- Stage 2: 3 matmuls over the full PW width (junk cols dropped). ----
    acc2 = jnp.zeros((M2, cout_p), jnp.float32)
    for dy in range(3):
        lhs = y1s[dy:dy + TH].reshape(M2, 3 * cmid_p)
        acc2 = acc2 + jnp.dot(
            lhs, w2_ref[dy * 3 * cmid_p:(dy + 1) * 3 * cmid_p, :],
            preferred_element_type=jnp.float32)
    y2 = jnp.maximum(acc2 + t2_ref[...], 0.0).reshape(TH, PW, cout_p)
    o_ref[0] = y2[:, :W, :].astype(o_ref.dtype)


# ---------------------------------------------------------------------------
# Parameter preparation (BN fusion, channel padding, im2col weight layout).
# ---------------------------------------------------------------------------
def _fuse_bn_into_conv(w_hwio, bias, gamma, beta, mean, var, eps=1e-5):
    scale = gamma / jnp.sqrt(var + eps)
    w_folded = w_hwio * scale[None, None, None, :]     # fold BN scale into conv
    shift = beta + scale * (bias - mean)               # conv bias + BN shift
    return w_folded, shift


def _pad_weights(w_hwio, shift, cin_p, cout_p):
    kh, kw, cin, cout = w_hwio.shape
    w_p = jnp.zeros((kh, kw, cin_p, cout_p), jnp.float32)
    w_p = w_p.at[:, :, :cin, :cout].set(w_hwio)
    w_p = w_p.reshape(kh * kw * cin_p, cout_p).astype(jnp.bfloat16)
    t_p = jnp.zeros((1, cout_p), jnp.float32).at[0, :cout].set(shift)
    return w_p, t_p


# ---------------------------------------------------------------------------
# Generation-aware VMEM budget + row-tile chooser.
# ---------------------------------------------------------------------------
def _vmem_budget():
    cap = 64 * 1024 * 1024                      # conservative: v7x per-TC VMEM
    try:
        info = pltpu.get_tpu_info()
        c = int(getattr(info, "vmem_capacity_bytes", 0) or 0)
        if c > 0:
            cap = c
    except Exception:
        pass
    limit = max(32 * 1024 * 1024,
                min(cap - 16 * 1024 * 1024, 100 * 1024 * 1024))
    tile_budget = max(8 * 1024 * 1024, int(limit * 0.85))
    return limit, tile_budget


def _choose_row_tile(N, H, W, cin_p, cmid_p, cout_p, budget):
    """Largest multiple-of-8 row tile whose working set fits the VMEM budget."""
    PW = _round_up(W + 2, 16)
    IW = PW + 2
    h8 = _round_up(max(H, 8), 8)
    best, th = 8, 8
    while th <= h8:
        est = (2 * th * IW * cin_p * 2               # main input block, 2 buffers
               + 2 * _HALO_ROWS * IW * cin_p * 2     # halo block, 2 buffers
               + 2 * th * W * cout_p * 2             # bf16 output block, 2 buffers
               + 9 * cin_p * cmid_p * 2              # stage-1 weights
               + 9 * cmid_p * cout_p * 2             # stage-2 weights
               + (th + 4) * IW * cin_p * 2           # input window
               + (th + 4) * PW * 3 * cin_p * 2       # dx-stacked input slab
               + (th + 2) * PW * cmid_p * 4          # stage-1 f32 accumulator
               + (th + 2) * PW * cmid_p * 2          # y1 (bf16)
               + (th + 2) * PW * 3 * cmid_p * 2      # dx-stacked y1 slab
               + th * PW * cout_p * 4)               # stage-2 f32 accumulator
        if est <= budget:
            best = th
        th += 8
    # Only at batch 1 force >= 2 row tiles so the H axis can shard across the
    # two TensorCores of a v7x chip; at N >= 2 the batch axis already does it.
    if N == 1 and h8 >= 16:
        best = min(best, max(8, (h8 // 2) // 8 * 8))
    return best


# ---------------------------------------------------------------------------
# Public wrapper: NCHW in / NCHW out (bf16), matches conv_block.forward
# (inference-mode BatchNorm).
# ---------------------------------------------------------------------------
@jax.jit
def conv_block_forward(x_nchw, params):
    N, Cin, H, W = x_nchw.shape
    Cout = params["w1"].shape[-1]
    cin_p = _round_up(Cin, _LANES)
    cmid_p = _round_up(Cout, _LANES)
    cout_p = _round_up(Cout, _LANES)

    vmem_limit, tile_budget = _vmem_budget()
    TH = _choose_row_tile(N, H, W, cin_p, cmid_p, cout_p, tile_budget)
    H_t = _round_up(H, TH)
    HT = H_t // TH
    PW = _round_up(W + 2, 16)        # slab width (bf16 flatten-friendly)
    IW = PW + 2                      # padded input width (2 left halo cols)

    # Single bf16 pad/cast: 2 halo rows on top, zeros to H_t + 2 at the bottom
    # (covers the last tile's 4-row halo), 2 halo cols left, zeros to IW on the
    # right, channels padded to cin_p.
    x = jnp.transpose(x_nchw, (0, 2, 3, 1)).astype(jnp.bfloat16)     # -> NHWC
    x_pad = jnp.pad(x, ((0, 0),
                        (2, H_t - H + 2),
                        (2, IW - 2 - W),
                        (0, cin_p - Cin)))

    w1f, t1 = _fuse_bn_into_conv(params["w1"], params["b1"], params["gamma1"],
                                 params["beta1"], params["mean1"], params["var1"])
    w2f, t2 = _fuse_bn_into_conv(params["w2"], params["b2"], params["gamma2"],
                                 params["beta2"], params["mean2"], params["var2"])
    w1_p, t1_p = _pad_weights(w1f, t1, cin_p, cmid_p)
    w2_p, t2_p = _pad_weights(w2f, t2, cmid_p, cout_p)

    kernel = functools.partial(_fused_conv_block_kernel, true_h=H)
    halo_step = TH // _HALO_ROWS

    out_p = pl.pallas_call(
        kernel,
        out_shape=jax.ShapeDtypeStruct((N, H_t, W, cout_p), jnp.bfloat16),
        grid=(N, HT),
        in_specs=[
            # main rows of this tile
            pl.BlockSpec((1, TH, IW, cin_p), lambda n, h: (n, h, 0, 0)),
            # 4-row bottom halo (next tile's first rows / padded zero rows)
            pl.BlockSpec((1, _HALO_ROWS, IW, cin_p),
                         lambda n, h: (n, (h + 1) * halo_step, 0, 0)),
            pl.BlockSpec((9 * cin_p, cmid_p), lambda n, h: (0, 0)),
            pl.BlockSpec((1, cmid_p), lambda n, h: (0, 0)),
            pl.BlockSpec((9 * cmid_p, cout_p), lambda n, h: (0, 0)),
            pl.BlockSpec((1, cout_p), lambda n, h: (0, 0)),
        ],
        out_specs=pl.BlockSpec((1, TH, W, cout_p), lambda n, h: (n, h, 0, 0)),
        compiler_params=pltpu.CompilerParams(
            dimension_semantics=("parallel", "parallel"),
            vmem_limit_bytes=vmem_limit),
    )(x_pad, x_pad, w1_p, t1_p, w2_p, t2_p)

    out = out_p[:, :H, :, :Cout]                   # strip row / channel padding
    return jnp.transpose(out, (0, 3, 1, 2))        # NHWC -> NCHW (bf16)


# ---------------------------------------------------------------------------
# Deterministic synthetic parameters matching conv_block(ch_in, ch_out).
# ---------------------------------------------------------------------------
def init_conv_block_params(key, ch_in, ch_out):
    ks = jax.random.split(key, 12)

    def unif(k, shape, lo=-0.5, hi=0.5):
        return jax.random.uniform(k, shape, jnp.float32, lo, hi)

    return {
        "w1": unif(ks[0], (3, 3, ch_in, ch_out)),
        "b1": unif(ks[1], (ch_out,)),
        "gamma1": unif(ks[2], (ch_out,), 0.5, 1.5),
        "beta1": unif(ks[3], (ch_out,)),
        "mean1": unif(ks[4], (ch_out,)),
        "var1": unif(ks[5], (ch_out,), 0.5, 1.5),
        "w2": unif(ks[6], (3, 3, ch_out, ch_out)),
        "b2": unif(ks[7], (ch_out,)),
        "gamma2": unif(ks[8], (ch_out,), 0.5, 1.5),
        "beta2": unif(ks[9], (ch_out,)),
        "mean2": unif(ks[10], (ch_out,)),
        "var2": unif(ks[11], (ch_out,), 0.5, 1.5),
    }


# ---------------------------------------------------------------------------
# Pure-JAX reference (lax conv) with matching bf16/f32 numerics.
# ---------------------------------------------------------------------------
def _ref_stage(x_bf16, w, b, gamma, beta, mean, var):
    wf, shift = _fuse_bn_into_conv(w, b, gamma, beta, mean, var)
    z = lax.conv_general_dilated(
        x_bf16, wf.astype(jnp.bfloat16), window_strides=(1, 1), padding="SAME",
        dimension_numbers=("NHWC", "HWIO", "NHWC"),
        preferred_element_type=jnp.float32)
    return jnp.maximum(z + shift.reshape(1, 1, 1, -1), 0.0)


def _reference_forward(x_nchw, params):
    x = jnp.transpose(x_nchw, (0, 2, 3, 1)).astype(jnp.bfloat16)
    y1 = _ref_stage(x, params["w1"], params["b1"], params["gamma1"],
                    params["beta1"], params["mean1"], params["var1"])
    y2 = _ref_stage(y1.astype(jnp.bfloat16), params["w2"], params["b2"],
                    params["gamma2"], params["beta2"], params["mean2"],
                    params["var2"])
    return jnp.transpose(y2, (0, 3, 1, 2))


if __name__ == "__main__":
    key = jax.random.PRNGKey(0)
    k_x, k_p = jax.random.split(key)

    N, CH_IN, CH_OUT, H, W = 2, 4, 8, 16, 16
    x = jax.random.normal(k_x, (N, CH_IN, H, W), jnp.float32)   # NCHW like torch
    params = init_conv_block_params(k_p, CH_IN, CH_OUT)

    out = jax.block_until_ready(conv_block_forward(x, params))
    assert out.shape == (N, CH_OUT, H, W), out.shape

    ref = _reference_forward(x, params).astype(jnp.bfloat16)
    out_f = out.astype(jnp.float32)
    ref_f = ref.astype(jnp.float32)
    max_err = float(jnp.max(jnp.abs(out_f - ref_f)))
    assert jnp.allclose(out_f, ref_f, rtol=5e-2, atol=5e-2), max_err

    print("KERNEL_OK")
</pallas_src>

<mosaic_0001>
module attributes {stable_mosaic.version = 11 : i64} {
  func.func @_fused_conv_block_kernel(%arg0: i32, %arg1: i32, %arg2: memref<1x16x34x128xbf16, #tpu.memory_space<vmem>>, %arg3: memref<1x4x34x128xbf16, #tpu.memory_space<vmem>>, %arg4: memref<1152x128xbf16, #tpu.memory_space<vmem>>, %arg5: memref<1x128xf32, #tpu.memory_space<vmem>>, %arg6: memref<1152x128xbf16, #tpu.memory_space<vmem>>, %arg7: memref<1x128xf32, #tpu.memory_space<vmem>>, %arg8: memref<1x16x16x128xbf16, #tpu.memory_space<vmem>>) attributes {dimension_semantics = [#tpu.dimension_semantics<parallel>, #tpu.dimension_semantics<parallel>], iteration_bounds = array<i64: 2, 1>, scalar_prefetch = 0 : i64, scratch_operands = 0 : i64, tpu.core_type = #tpu.core_type<tc>, window_params = [{transform_indices = @transform_0, window_bounds = array<i64: 1, 16, 34, 128>}, {transform_indices = @transform_1, window_bounds = array<i64: 1, 4, 34, 128>}, {pipeline_mode = #tpu.pipeline_mode<synchronous>, transform_indices = @transform_2, window_bounds = array<i64: 1152, 128>}, {pipeline_mode = #tpu.pipeline_mode<synchronous>, transform_indices = @transform_3, window_bounds = array<i64: 1, 128>}, {pipeline_mode = #tpu.pipeline_mode<synchronous>, transform_indices = @transform_4, window_bounds = array<i64: 1152, 128>}, {pipeline_mode = #tpu.pipeline_mode<synchronous>, transform_indices = @transform_5, window_bounds = array<i64: 1, 128>}, {transform_indices = @transform_6, window_bounds = array<i64: 1, 16, 16, 128>}]} {
    %c16_i32 = arith.constant 16 : i32
    %0 = arith.muli %arg1, %c16_i32 : i32
    %c0 = arith.constant 0 : index
    %c0_0 = arith.constant 0 : index
    %c0_1 = arith.constant 0 : index
    %c0_2 = arith.constant 0 : index
    %1 = vector.load %arg2[%c0, %c0_0, %c0_1, %c0_2] : memref<1x16x34x128xbf16, #tpu.memory_space<vmem>>, vector<1x16x34x128xbf16>
    %2 = vector.shape_cast %1 : vector<1x16x34x128xbf16> to vector<16x34x128xbf16>
    %c0_3 = arith.constant 0 : index
    %c0_4 = arith.constant 0 : index
    %c0_5 = arith.constant 0 : index
    %c0_6 = arith.constant 0 : index
    %3 = vector.load %arg3[%c0_3, %c0_4, %c0_5, %c0_6] : memref<1x4x34x128xbf16, #tpu.memory_space<vmem>>, vector<1x4x34x128xbf16>
    %4 = vector.shape_cast %3 : vector<1x4x34x128xbf16> to vector<4x34x128xbf16>
    %5 = tpu.concatenate %2, %4 in 0 : vector<16x34x128xbf16>, vector<4x34x128xbf16> -> vector<20x34x128xbf16>
    %6 = vector.extract_strided_slice %5 {offsets = [0, 0, 0], sizes = [20, 32, 128], strides = [1, 1, 1]} : vector<20x34x128xbf16> to vector<20x32x128xbf16>
    %7 = vector.extract_strided_slice %5 {offsets = [0, 1, 0], sizes = [20, 32, 128], strides = [1, 1, 1]} : vector<20x34x128xbf16> to vector<20x32x128xbf16>
    %8 = vector.extract_strided_slice %5 {offsets = [0, 2, 0], sizes = [20, 32, 128], strides = [1, 1, 1]} : vector<20x34x128xbf16> to vector<20x32x128xbf16>
    %9 = tpu.concatenate %6, %7, %8 in 2 : vector<20x32x128xbf16>, vector<20x32x128xbf16>, vector<20x32x128xbf16> -> vector<20x32x384xbf16>
    %cst = arith.constant 0.000000e+00 : f32
    %10 = vector.broadcast %cst : f32 to vector<576x128xf32>
    %11 = vector.extract_strided_slice %9 {offsets = [0, 0, 0], sizes = [18, 32, 384], strides = [1, 1, 1]} : vector<20x32x384xbf16> to vector<18x32x384xbf16>
    %12 = vector.shape_cast %11 : vector<18x32x384xbf16> to vector<576x384xbf16>
    %c0_7 = arith.constant 0 : index
    %c0_8 = arith.constant 0 : index
    %13 = vector.load %arg4[%c0_7, %c0_8] : memref<1152x128xbf16, #tpu.memory_space<vmem>>, vector<384x128xbf16>
    %cst_9 = arith.constant dense<0.000000e+00> : vector<576x128xf32>
    %14 = tpu.matmul %12, %13, %cst_9 {dimension_numbers = #tpu.dot_dimension_numbers<[1], [0], [0], [1], [0, 0, 1, 1], [], []>} : vector<576x384xbf16>, vector<384x128xbf16>, vector<576x128xf32> -> vector<576x128xf32>
    %15 = arith.addf %10, %14 : vector<576x128xf32>
    %16 = vector.extract_strided_slice %9 {offsets = [1, 0, 0], sizes = [18, 32, 384], strides = [1, 1, 1]} : vector<20x32x384xbf16> to vector<18x32x384xbf16>
    %17 = vector.shape_cast %16 : vector<18x32x384xbf16> to vector<576x384xbf16>
    %c384 = arith.constant 384 : index
    %c0_10 = arith.constant 0 : index
    %18 = vector.load %arg4[%c384, %c0_10] : memref<1152x128xbf16, #tpu.memory_space<vmem>>, vector<384x128xbf16>
    %cst_11 = arith.constant dense<0.000000e+00> : vector<576x128xf32>
    %19 = tpu.matmul %17, %18, %cst_11 {dimension_numbers = #tpu.dot_dimension_numbers<[1], [0], [0], [1], [0, 0, 1, 1], [], []>} : vector<576x384xbf16>, vector<384x128xbf16>, vector<576x128xf32> -> vector<576x128xf32>
    %20 = arith.addf %15, %19 : vector<576x128xf32>
    %21 = vector.extract_strided_slice %9 {offsets = [2, 0, 0], sizes = [18, 32, 384], strides = [1, 1, 1]} : vector<20x32x384xbf16> to vector<18x32x384xbf16>
    %22 = vector.shape_cast %21 : vector<18x32x384xbf16> to vector<576x384xbf16>
    %c768 = arith.constant 768 : index
    %c0_12 = arith.constant 0 : index
    %23 = vector.load %arg4[%c768, %c0_12] : memref<1152x128xbf16, #tpu.memory_space<vmem>>, vector<384x128xbf16>
    %cst_13 = arith.constant dense<0.000000e+00> : vector<576x128xf32>
    %24 = tpu.matmul %22, %23, %cst_13 {dimension_numbers = #tpu.dot_dimension_numbers<[1], [0], [0], [1], [0, 0, 1, 1], [], []>} : vector<576x384xbf16>, vector<384x128xbf16>, vector<576x128xf32> -> vector<576x128xf32>
    %25 = arith.addf %20, %24 : vector<576x128xf32>
    %c0_14 = arith.constant 0 : index
    %c0_15 = arith.constant 0 : index
    %26 = vector.load %arg5[%c0_14, %c0_15] : memref<1x128xf32, #tpu.memory_space<vmem>>, vector<1x128xf32>
    %27 = vector.broadcast %26 : vector<1x128xf32> to vector<576x128xf32>
    %28 = arith.addf %25, %27 : vector<576x128xf32>
    %cst_16 = arith.constant 0.000000e+00 : f32
    %29 = vector.broadcast %cst_16 : f32 to vector<576x128xf32>
    %30 = arith.maximumf %28, %29 : vector<576x128xf32>
    %31 = vector.shape_cast %30 : vector<576x128xf32> to vector<18x32x128xf32>
    %c1_i32 = arith.constant 1 : i32
    %32 = arith.subi %0, %c1_i32 : i32
    %33 = tpu.iota {dimensions = array<i32: 0>} : vector<18x32x1xi32>
    %34 = vector.broadcast %32 : i32 to vector<18x32x1xi32>
    %35 = arith.addi %34, %33 : vector<18x32x1xi32>
    %36 = tpu.iota {dimensions = array<i32: 1>} : vector<18x32x1xi32>
    %c1_i32_17 = arith.constant 1 : i32
    %37 = vector.broadcast %c1_i32_17 : i32 to vector<18x32x1xi32>
    %38 = arith.subi %36, %37 : vector<18x32x1xi32>
    %c0_i32 = arith.constant 0 : i32
    %39 = vector.broadcast %c0_i32 : i32 to vector<18x32x1xi32>
    %40 = arith.cmpi sge, %35, %39 : vector<18x32x1xi32>
    %c16_i32_18 = arith.constant 16 : i32
    %41 = vector.broadcast %c16_i32_18 : i32 to vector<18x32x1xi32>
    %42 = arith.cmpi slt, %35, %41 : vector<18x32x1xi32>
    %43 = arith.andi %40, %42 : vector<18x32x1xi1>
    %c0_i32_19 = arith.constant 0 : i32
    %44 = vector.broadcast %c0_i32_19 : i32 to vector<18x32x1xi32>
    %45 = arith.cmpi sge, %38, %44 : vector<18x32x1xi32>
    %46 = arith.andi %43, %45 : vector<18x32x1xi1>
    %c16_i32_20 = arith.constant 16 : i32
    %47 = vector.broadcast %c16_i32_20 : i32 to vector<18x32x1xi32>
    %48 = arith.cmpi slt, %38, %47 : vector<18x32x1xi32>
    %49 = arith.andi %46, %48 : vector<18x32x1xi1>
    %50 = arith.truncf %31 : vector<18x32x128xf32> to vector<18x32x128xbf16>
    %51 = arith.extui %49 : vector<18x32x1xi1> to vector<18x32x1xi32>
    %52 = arith.sitofp %51 : vector<18x32x1xi32> to vector<18x32x1xf32>
    %53 = arith.truncf %52 : vector<18x32x1xf32> to vector<18x32x1xbf16>
    %54 = vector.broadcast %53 : vector<18x32x1xbf16> to vector<18x32x128xbf16>
    %55 = arith.mulf %50, %54 : vector<18x32x128xbf16>
    %cst_21 = arith.constant 0.000000e+00 : bf16
    %56 = vector.broadcast %cst_21 : bf16 to vector<18x1x128xbf16>
    %57 = vector.extract_strided_slice %55 {offsets = [0, 1, 0], sizes = [18, 31, 128], strides = [1, 1, 1]} : vector<18x32x128xbf16> to vector<18x31x128xbf16>
    %58 = tpu.concatenate %57, %56 in 1 : vector<18x31x128xbf16>, vector<18x1x128xbf16> -> vector<18x32x128xbf16>
    %59 = vector.extract_strided_slice %55 {offsets = [0, 2, 0], sizes = [18, 30, 128], strides = [1, 1, 1]} : vector<18x32x128xbf16> to vector<18x30x128xbf16>
    %60 = tpu.concatenate %59, %56, %56 in 1 : vector<18x30x128xbf16>, vector<18x1x128xbf16>, vector<18x1x128xbf16> -> vector<18x32x128xbf16>
    %61 = tpu.concatenate %55, %58, %60 in 2 : vector<18x32x128xbf16>, vector<18x32x128xbf16>, vector<18x32x128xbf16> -> vector<18x32x384xbf16>
    %cst_22 = arith.constant 0.000000e+00 : f32
    %62 = vector.broadcast %cst_22 : f32 to vector<512x128xf32>
    %63 = vector.extract_strided_slice %61 {offsets = [0, 0, 0], sizes = [16, 32, 384], strides = [1, 1, 1]} : vector<18x32x384xbf16> to vector<16x32x384xbf16>
    %64 = vector.shape_cast %63 : vector<16x32x384xbf16> to vector<512x384xbf16>
    %c0_23 = arith.constant 0 : index
    %c0_24 = arith.constant 0 : index
    %65 = vector.load %arg6[%c0_23, %c0_24] : memref<1152x128xbf16, #tpu.memory_space<vmem>>, vector<384x128xbf16>
    %cst_25 = arith.constant dense<0.000000e+00> : vector<512x128xf32>
    %66 = tpu.matmul %64, %65, %cst_25 {dimension_numbers = #tpu.dot_dimension_numbers<[1], [0], [0], [1], [0, 0, 1, 1], [], []>} : vector<512x384xbf16>, vector<384x128xbf16>, vector<512x128xf32> -> vector<512x128xf32>
    %67 = arith.addf %62, %66 : vector<512x128xf32>
    %68 = vector.extract_strided_slice %61 {offsets = [1, 0, 0], sizes = [16, 32, 384], strides = [1, 1, 1]} : vector<18x32x384xbf16> to vector<16x32x384xbf16>
    %69 = vector.shape_cast %68 : vector<16x32x384xbf16> to vector<512x384xbf16>
    %c384_26 = arith.constant 384 : index
    %c0_27 = arith.constant 0 : index
    %70 = vector.load %arg6[%c384_26, %c0_27] : memref<1152x128xbf16, #tpu.memory_space<vmem>>, vector<384x128xbf16>
    %cst_28 = arith.constant dense<0.000000e+00> : vector<512x128xf32>
    %71 = tpu.matmul %69, %70, %cst_28 {dimension_numbers = #tpu.dot_dimension_numbers<[1], [0], [0], [1], [0, 0, 1, 1], [], []>} : vector<512x384xbf16>, vector<384x128xbf16>, vector<512x128xf32> -> vector<512x128xf32>
    %72 = arith.addf %67, %71 : vector<512x128xf32>
    %73 = vector.extract_strided_slice %61 {offsets = [2, 0, 0], sizes = [16, 32, 384], strides = [1, 1, 1]} : vector<18x32x384xbf16> to vector<16x32x384xbf16>
    %74 = vector.shape_cast %73 : vector<16x32x384xbf16> to vector<512x384xbf16>
    %c768_29 = arith.constant 768 : index
    %c0_30 = arith.constant 0 : index
    %75 = vector.load %arg6[%c768_29, %c0_30] : memref<1152x128xbf16, #tpu.memory_space<vmem>>, vector<384x128xbf16>
    %cst_31 = arith.constant dense<0.000000e+00> : vector<512x128xf32>
    %76 = tpu.matmul %74, %75, %cst_31 {dimension_numbers = #tpu.dot_dimension_numbers<[1], [0], [0], [1], [0, 0, 1, 1], [], []>} : vector<512x384xbf16>, vector<384x128xbf16>, vector<512x128xf32> -> vector<512x128xf32>
    %77 = arith.addf %72, %76 : vector<512x128xf32>
    %c0_32 = arith.constant 0 : index
    %c0_33 = arith.constant 0 : index
    %78 = vector.load %arg7[%c0_32, %c0_33] : memref<1x128xf32, #tpu.memory_space<vmem>>, vector<1x128xf32>
    %79 = vector.broadcast %78 : vector<1x128xf32> to vector<512x128xf32>
    %80 = arith.addf %77, %79 : vector<512x128xf32>
    %cst_34 = arith.constant 0.000000e+00 : f32
    %81 = vector.broadcast %cst_34 : f32 to vector<512x128xf32>
    %82 = arith.maximumf %80, %81 : vector<512x128xf32>
    %83 = vector.shape_cast %82 : vector<512x128xf32> to vector<16x32x128xf32>
    %84 = vector.extract_strided_slice %83 {offsets = [0, 0, 0], sizes = [16, 16, 128], strides = [1, 1, 1]} : vector<16x32x128xf32> to vector<16x16x128xf32>
    %85 = arith.truncf %84 : vector<16x16x128xf32> to vector<16x16x128xbf16>
    %c0_35 = arith.constant 0 : index
    %c0_36 = arith.constant 0 : index
    %c0_37 = arith.constant 0 : index
    %c0_38 = arith.constant 0 : index
    %86 = vector.load %arg8[%c0_35, %c0_36, %c0_37, %c0_38] : memref<1x16x16x128xbf16, #tpu.memory_space<vmem>>, vector<1x16x16x128xbf16>
    %87 = vector.shape_cast %86 : vector<1x16x16x128xbf16> to vector<16x16x128xbf16>
    %88 = vector.shape_cast %85 : vector<16x16x128xbf16> to vector<1x16x16x128xbf16>
    tpu.vector_store %arg8[%c0_35, %c0_36, %c0_37, %c0_38], %88 {strides = array<i32>} : memref<1x16x16x128xbf16, #tpu.memory_space<vmem>>, vector<1x16x16x128xbf16>,
    return
  }
  func.func @transform_0(%arg0: i32, %arg1: i32) -> (i32, i32, i32, i32) {
    %c0_i32 = arith.constant 0 : i32
    %c0_i32_0 = arith.constant 0 : i32
    %c0_i32_1 = arith.constant 0 : i32
    return %arg0, %arg1, %c0_i32, %c0_i32_0 : i32, i32, i32, i32
  }
  func.func @transform_1(%arg0: i32, %arg1: i32) -> (i32, i32, i32, i32) {
    %c1_i32 = arith.constant 1 : i32
    %0 = arith.addi %arg1, %c1_i32 : i32
    %c4_i32 = arith.constant 4 : i32
    %1 = arith.muli %0, %c4_i32 : i32
    %c0_i32 = arith.constant 0 : i32
    %c0_i32_0 = arith.constant 0 : i32
    %c0_i32_1 = arith.constant 0 : i32
    return %arg0, %1, %c0_i32, %c0_i32_0 : i32, i32, i32, i32
  }
  func.func @transform_2(%arg0: i32, %arg1: i32) -> (i32, i32) {
    %c0_i32 = arith.constant 0 : i32
    %c0_i32_0 = arith.constant 0 : i32
    %c0_i32_1 = arith.constant 0 : i32
    return %c0_i32, %c0_i32_0 : i32, i32
  }
  func.func @transform_3(%arg0: i32, %arg1: i32) -> (i32, i32) {
    %c0_i32 = arith.constant 0 : i32
    %c0_i32_0 = arith.constant 0 : i32
    %c0_i32_1 = arith.constant 0 : i32
    return %c0_i32, %c0_i32_0 : i32, i32
  }
  func.func @transform_4(%arg0: i32, %arg1: i32) -> (i32, i32) {
    %c0_i32 = arith.constant 0 : i32
    %c0_i32_0 = arith.constant 0 : i32
    %c0_i32_1 = arith.constant 0 : i32
    return %c0_i32, %c0_i32_0 : i32, i32
  }
  func.func @transform_5(%arg0: i32, %arg1: i32) -> (i32, i32) {
    %c0_i32 = arith.constant 0 : i32
    %c0_i32_0 = arith.constant 0 : i32
    %c0_i32_1 = arith.constant 0 : i32
    return %c0_i32, %c0_i32_0 : i32, i32
  }
  func.func @transform_6(%arg0: i32, %arg1: i32) -> (i32, i32, i32, i32) {
    %c0_i32 = arith.constant 0 : i32
    %c0_i32_0 = arith.constant 0 : i32
    %c0_i32_1 = arith.constant 0 : i32
    return %arg0, %arg1, %c0_i32, %c0_i32_0 : i32, i32, i32, i32
  }
}

</mosaic_0001>

<bundles_post_ra>
// kernel: conv_block_forward.1
= control target key start
LH: loop header
LB: loop body
LE: loop exit
PB: predicated region body
PF: predicated region fallthrough
CT: control target
= control target key end

     0   :  { %s9115_s21 = smov 0   ;;  %s9117_s22 = smov 0   ;;  %s12881_s0 = inlined_call_operand.vmem [shape: bf16[2,20,34,128], index: 0, kind: input, shape index: {}, may-alias: {0,1}]   ;;  %s12882_s1 = inlined_call_operand.vmem [shape: bf16[2,20,34,128], index: 1, kind: input, shape index: {}, may-alias: {0,1}]   ;;  %s12883_s2 = inlined_call_operand.vmem [shape: bf16[1152,128], index: 2, kind: input, shape index: {}]   ;;  %s12884_s3 = inlined_call_operand.vmem [shape: f32[1,128], index: 3, kind: input, shape index: {}]   ;;  %s12885_s4 = inlined_call_operand.vmem [shape: bf16[1152,128], index: 4, kind: input, shape index: {}]   ;;  %s12886_s5 = inlined_call_operand.vmem [shape: f32[1,128], index: 5, kind: input, shape index: {}]   ;;  %s12887_s6 = inlined_call_operand.vmem [shape: bf16[2,16,16,128], index: 6, kind: output, shape index: {}]  }
   0x1   :  { %s9119_s23 = smov 0  }
   0x2 LB: > { %s28_s24 = sadd.s32 1, %s9071_s22  ;;  %p7579_p0 = scmp.ge.s32.totalorder %s9075_s23, 1  ;;  %s9075_s23 = sphi %s9119_s23, %s16_s23   ;;  %s9071_s22 = sphi %s9117_s22, %s13805_s22   ;;  %s9067_s21 = sphi %s9115_s21, %s13804_s21  }
   0x3   : > { %p30_p1 = scmp.ge.s32.totalorder %s28_s24, 2  ;;  %p270_p2 = scmp.lt.s32.totalorder %s9075_s23, 3 }
   0x5   : > { %s13807_s24 = smov (%p30_p1, %s28_s24), 0  ;;  %p271_p3 = pnand %p7579_p0, %p270_p2 }
   0x7   : > { %274 = sbr.rel (%p271_p3) target bundleno = 1603 (0x643), region = 44 }
   0xe   : > { %v8776_v0 = vld [vmem:[%s12883_s2 + $0xc0] sm:$0xff]   ;;  %v12888_v1 = vmov 0   ;;  %p333_p4 = scmp.lt.s32.totalorder %s9067_s21, 1  ;;  %v8778_v3 = vld [vmem:[%s12883_s2 + $0xc8] sm:$0xff]   ;;  %v8781_v5 = vld [vmem:[%s12883_s2 + $0x150] sm:$0xff]   ;;  %vm1217_vm0 = vcmask 1046528  }
   0xf   : > { %1598 = vmatprep.subr.bf16.mxu0 %v12888_v1  ;;  %v8777_v2 = vld [vmem:[%s12883_s2 + $0x140] sm:$0xff]   ;;  %v8779_v4 = vld [vmem:[%s12883_s2 + $0x148] sm:$0xff]   ;;  %v8780_v6 = vld [vmem:[%s12883_s2 + $0xd0] sm:$0xff]   ;;  %vm776_vm1 = vsmask.f32 7424  ;;  %vm4875_vm4 = vcmask 1047552  }
  0x10   : > { %1599 = vmatpush1.bf16.msra.mxu0 %v8776_v0  ;;  %8242 = vmatprep.subr.bf16.mxu1 %v8777_v2  ;;  %s13809_s21 = smov (!%p333_p4, %s9067_s21), 1  ;;  %v8783_v7 = vld [vmem:[%s12883_s2 + $0x158] sm:$0xff]   ;;  %v8785_v9 = vld [vmem:[%s12883_s2 + $0x160] sm:$0xff]   ;;  %v8787_v11 = vld [vmem:[%s12883_s2 + $0x168] sm:$0xff]  }
  0x11   : > { %1600 = vmatprep.subr.bf16.mxu0 %v12888_v1  ;;  %8243 = vmatpush3.bf16.msra.mxu1 %v8777_v2  ;;  %v8782_v8 = vld [vmem:[%s12883_s2 + $0xd8] sm:$0xff]   ;;  %s8746_s17 = smul.u32 400, %s13809_s21  ;;  %v8784_v10 = vld [vmem:[%s12883_s2 + $0xe0] sm:$0xff]   ;;  %v8786_v14 = vld [vmem:[%s12883_s2 + $0xe8] sm:$0xff]  }
  0x12   : > { %8244 = vmatprep.subr.bf16.mxu1 %v8779_v4  ;;  %v8789_v17 = vld [vmem:[%s12883_s2 + $0x170] sm:$0xff]   ;;  %v8790_v22 = vld [vmem:[%s12883_s2 + $0xf8] sm:$0xff]   ;;  %v8794_v33 = vld [vmem:[%s12883_s2 + $0x100] sm:$0xff]  }
  0x13   : > { %s9175_s28 = scalar_lea.vmem %s12881_s0, %s8746_s17  ;;  %v8788_v19 = vld [vmem:[%s12883_s2 + $0xf0] sm:$0xff]   ;;  %v8791_v23 = vld [vmem:[%s12883_s2 + $0x178] sm:$0xff]   ;;  %v8806_v38 = vld [vmem:[%s12883_s2] sm:$0xff]   ;;  %s7861_s9 = sadd.s32 320, %s8746_s17 }
  0x14   : > { %1601 = vmatpush1.bf16.msra.mxu0 %v8778_v3  ;;  %v9182_v12 = vld [vmem:[%s9175_s28 + $0x14] sm:$0xff]   ;;  %v9185_v13 = vld [vmem:[%s9175_s28 + $0x1c] sm:$0xff]   ;;  %v9204_v20 = vld [vmem:[%s9175_s28 + $0x24] ss:$0 sps:$4 sm:$0x11]   ;;  %s9514_s12 = scalar_lea.vmem %s12882_s1, %s7861_s9 }
  0x15   : > { %1602 = vmatprep.subr.bf16.mxu0 %v12888_v1  ;;  %8245 = vmatpush3.bf16.msra.mxu1 %v8779_v4  ;;  %v1223_v15 = vrot.slane %v9182_v12, 1  ;;  %v1224_v16 = vrot.slane %v9185_v13, 1  ;;  %v800_v21 = vshll.u32 %v9182_v12, 16  ;;  %v9215_v24 = vld [vmem:[%s9175_s28 + $0x28] sm:$0xff]   ;;  %v9218_v25 = vld [vmem:[%s9175_s28 + $0x30] sm:$0xff]   ;;  %v798_v26 = vshrl.u32 %v9182_v12, 16  ;;  %vm11325_vm5 = vmand %vm4875_vm4, %vm776_vm1 }
  0x16   : > { %8246 = vmatprep.subr.bf16.mxu1 %v8781_v5  ;;  %v1226_v28 = vrot.slane %v9204_v20, 1  ;;  %v805_v29 = vshll.u32 %v9185_v13, 16  ;;  %v1228_v30 = vrot.slane %v9215_v24, 1  ;;  %v1229_v31 = vrot.slane %v9218_v25, 1  ;;  %v9234_v35 = vld [vmem:[%s9175_s28 + $0x3c] sm:$0xff]   ;;  %v9248_v40 = vld [vmem:[%s9175_s28 + $0x44] sm:$0xff]  }
  0x17   : > { %v9197_v18 = vsel %vm1217_vm0, %v1223_v15, %v1224_v16  ;;  %v802_v27 = vrot.slane %v800_v21, 1  ;;  %v9230_v34 = vld [vmem:[%s9175_s28 + $0x38] ss:$0 sps:$4 sm:$0x11]   ;;  %v8796_v42 = vld [vmem:[%s12883_s2 + $0x108] sm:$0xff]   ;;  %v8799_v43 = vld [vmem:[%s12883_s2 + $0x110] sm:$0xff]  }
  0x18   : > { %1603 = vmatpush1.bf16.msra.mxu0 %v8780_v6  ;;  %13161 = vst [vmem:[#allocation2_spill] sm:$0xff] %v9197_v18  ;;  %8258 = vmatprep.mubr.bf16.mxu1 %v9197_v18  ;;  %v9236_v36 = vrot.slane %v805_v29, 1  ;;  %v9239_v37 = vsel %vm1217_vm0, %v1224_v16, %v1226_v28  ;;  %v9245_v39 = vsel %vm1217_vm0, %v1228_v30, %v1229_v31  ;;  %v1231_v44 = vrot.slane %v9230_v34, 1  ;;  %v8813_v47 = vld [vmem:[%s12883_s2 + $0x8] sm:$0xff]   ;;  %v9280_v50 = vld [vmem:[%s9175_s28 + $0x50] sm:$0xff]   ;;  %v9286_v52 = vld [vmem:[%s9175_s28 + $0x58] sm:$0xff]  }
  0x19   : > { %1604 = vmatprep.subr.bf16.mxu0 %v12888_v1  ;;  %8247 = vmatpush3.bf16.msra.mxu1 %v8781_v5  ;;  %v803_v32 = vor.u32 %v802_v27, %v798_v26  ;;  %13162 = vst [vmem:[#allocation3_spill] sm:$0xff] %v9239_v37  ;;  %13163 = vst [vmem:[#allocation4_spill] sm:$0xff] %v9245_v39  ;;  %v1233_v45 = vrot.slane %v9234_v35, 1  ;;  %v1234_v46 = vrot.slane %v9248_v40, 1  ;;  %v8801_v53 = vld [vmem:[%s12883_s2 + $0x118] sm:$0xff]   ;;  %v8818_v54 = vld [vmem:[%s12883_s2 + $0x10] sm:$0xff]  }
  0x1a   : > { %8248 = vmatprep.subr.bf16.mxu1 %v8783_v7  ;;  %v9274_v48 = vld [vmem:[%s9175_s28 + $0x4c] ss:$0 sps:$4 sm:$0x11]   ;;  %v9277_v49 = vsel %vm1217_vm0, %v1229_v31, %v1231_v44  ;;  %v1238_v56 = vrot.slane %v9280_v50, 1  ;;  %v1239_v57 = vrot.slane %v9286_v52, 1  ;;  %v8804_v58 = vld [vmem:[%s12883_s2 + $0x120] sm:$0xff]  }
  0x1b   : > { %v9253_v41 = vsel %vm776_vm1, %v803_v32, %v9236_v36  ;;  %13164 = vst [vmem:[#allocation5_spill] sm:$0xff] %v9277_v49  ;;  %v9283_v51 = vsel %vm1217_vm0, %v1233_v45, %v1234_v46  ;;  %v1236_v55 = vrot.slane %v9274_v48, 1  ;;  %v9307_v59 = vld [vmem:[%s9175_s28 + $0x60] ss:$0 sps:$4 sm:$0x11]   ;;  %v8822_v60 = vld [vmem:[%s12883_s2 + $0x18] sm:$0xff]  }
  0x1c   : > { %1605 = vmatpush1.bf16.msra.mxu0 %v8782_v8  ;;  %1630 = vmatprep.mubr.bf16.mxu0 %v9253_v41  ;;  %13165 = vst [vmem:[#allocation6_spill] sm:$0xff] %v9283_v51  ;;  %v9316_v62 = vsel %vm1217_vm0, %v1238_v56, %v1239_v57  ;;  %v9319_v63 = vld [vmem:[%s9175_s28 + $0x64] sm:$0xff]   ;;  %v9322_v0 = vld [vmem:[%s9175_s28 + $0x6c] sm:$0xff]   ;;  %v1241_v4 = vrot.slane %v9307_v59, 1  ;;  %v820_v26 = vshll.u32 %v9215_v24, 16  ;;  %v818_v29 = vshrl.u32 %v9215_v24, 16 }
  0x1d   : > { %1606 = vmatprep.subr.bf16.mxu0 %v12888_v1  ;;  %8249 = vmatpush3.bf16.msra.mxu1 %v8783_v7  ;;  %v9313_v61 = vsel %vm1217_vm0, %v1234_v46, %v1236_v55  ;;  %13167 = vst [vmem:[#allocation8_spill] sm:$0xff] %v9316_v62  ;;  %v8807_v2 = vld [vmem:[%s12883_s2 + $0x128] sm:$0xff]   ;;  %v8810_v3 = vld [vmem:[%s12883_s2 + $0x130] sm:$0xff]   ;;  %v8828_v5 = vld [vmem:[%s12883_s2 + $0x20] sm:$0xff]   ;;  %v1243_v6 = vrot.slane %v9319_v63, 1  ;;  %v1244_v7 = vrot.slane %v9322_v0, 1 }
  0x1e   : > { %8250 = vmatprep.subr.bf16.mxu1 %v8785_v9  ;;  %13166 = vst [vmem:[#allocation7_spill] sm:$0xff] %v9313_v61  ;;  %v9341_v8 = vld [vmem:[%s9175_s28 + $0x74] ss:$0 sps:$4 sm:$0x11]   ;;  %v9354_v15 = vld [vmem:[%s9175_s28 + $0x80] sm:$0xff]   ;;  %v822_v31 = vrot.slane %v820_v26, 1 }
  0x1f   : > { %v9357_v16 = vsel %vm1217_vm0, %v1243_v6, %v1244_v7  ;;  %v1249_v28 = vrot.slane %v9354_v15, 1  ;;  %v825_v32 = vshll.u32 %v9218_v25, 16  ;;  %v9402_v45 = vld [vmem:[%s9175_s28 + $0x94] sm:$0xff]  }
  0x20   : > { %1607 = vmatpush1.bf16.msra.mxu0 %v8784_v10  ;;  %v809_v10 = vshrl.u32 %v9185_v13, 16  ;;  %13169 = vst [vmem:[#allocation10_spill] sm:$0xff] %v9357_v16  ;;  %v823_v46 = vor.u32 %v822_v31, %v818_v29  ;;  %v8842_v55 = vld [vmem:[%s12883_s2 + $0x38] sm:$0xff]   ;;  %v925_v18 = vshll.u32 %v9402_v45, 16 }
  0x21   : > { %1608 = vmatprep.subr.bf16.mxu0 %v12888_v1  ;;  %8251 = vmatpush3.bf16.msra.mxu1 %v8785_v9  ;;  %v813_v9 = vshll.u32 %v9204_v20, 16  ;;  %v8816_v20 = vld [vmem:[%s12883_s2 + $0x80] sm:$0xff]  }
  0x22   : > { %8252 = vmatprep.subr.bf16.mxu1 %v8787_v11  ;;  %v9465_v29 = vld [vmem:[%s9175_s28 + $0xbc] sm:$0xff]  }
  0x23   : > { %v815_v21 = vrot.slane %v813_v9, 1 }
  0x24   : > { %1609 = vmatpush1.bf16.msra.mxu0 %v8786_v14  ;;  %v9351_v14 = vsel %vm1217_vm0, %v1239_v57, %v1241_v4  ;;  %v829_v57 = vshrl.u32 %v9218_v25, 16 }
  0x25   : > { %1610 = vmatprep.subr.bf16.mxu0 %v12888_v1  ;;  %8253 = vmatpush3.bf16.msra.mxu1 %v8787_v11  ;;  %v9347_v11 = vld [vmem:[%s9175_s28 + $0x78] sm:$0xff]   ;;  %13168 = vst [vmem:[#allocation9_spill] sm:$0xff] %v9351_v14 }
  0x26   : > { %8254 = vmatprep.subr.bf16.mxu1 %v8789_v17  ;;  %v1248_v27 = vrot.slane %v9347_v11, 1 }
  0x28   : > { %1611 = vmatpush1.bf16.msra.mxu0 %v8788_v19  ;;  %v8812_v19 = vld [vmem:[%s12883_s2 + $0x138] sm:$0xff]   ;;  %v9399_v44 = vsel %vm1217_vm0, %v1248_v27, %v1249_v28 }
  0x29   : > { %1612 = vmatprep.subr.bf16.mxu0 %v12888_v1  ;;  %8255 = vmatpush3.bf16.msra.mxu1 %v8789_v17  ;;  %v8833_v17 = vld [vmem:[%s12883_s2 + $0x28] sm:$0xff]   ;;  %13171 = vst [vmem:[#allocation12_spill] sm:$0xff] %v9399_v44  ;;  %v9459_v27 = vld [vmem:[%s9175_s28 + $0xb4] sm:$0xff]  }
  0x2a   : > { %8256 = vmatprep.subr.bf16.mxu1 %v8791_v23 }
  0x2c   : > { %1613 = vmatpush1.bf16.msra.mxu0 %v8790_v22  ;;  %v1246_v22 = vrot.slane %v9341_v8, 1 }
  0x2d   : > { %1614 = vmatprep.subr.bf16.mxu0 %v12888_v1  ;;  %8257 = vmatpush3.bf16.msra.mxu1 %v8791_v23  ;;  %v811_v23 = vor.u32 %v809_v10, %v9236_v36  ;;  %v8838_v36 = vld [vmem:[%s12883_s2 + $0x30] sm:$0xff]  }
  0x2e   : > { %2384 = vmatprep.subr.bf16.mxu1 %v12888_v1 }
  0x2f   : > { %v9379_v30 = vsel %vm776_vm1, %v811_v23, %v815_v21  ;;  %v9452_v21 = vld [vmem:[%s9175_s28 + $0xb0] ss:$0 sps:$4 sm:$0x11]  }
  0x30   : > { %1615 = vmatpush1.bf16.msra.mxu0 %v8794_v33  ;;  %8259 = vmatmul.mubr.bf16.vlgmr.msra.gmra.mrb[0].mxu1 %v9239_v37  ;;  %v8834_v33 = vld [vmem:[%s12883_s2 + $0x88] sm:$0xff]   ;;  %v909_v37 = vshrl.u32 %v9354_v15, 16 }
  0x31   : > { %1616 = vmatprep.subr.bf16.mxu0 %v12888_v1  ;;  %8262 = vmatprep.mubr.bf16.mxu1 %v9245_v39 }
  0x32   : > { %2385 = vmatpush1.bf16.msra.mxu1 %v8806_v38  ;;  %v9389_v38 = vsel %vm1217_vm0, %v1244_v7, %v1246_v22  ;;  %v845_v22 = vshll.u32 %v9248_v40, 16 }
  0x33   : > { %2386 = vmatprep.subr.bf16.mxu1 %v12888_v1  ;;  %13170 = vst [vmem:[#allocation11_spill] sm:$0xff] %v9389_v38 }
  0x34   : > { %1617 = vmatpush1.bf16.msra.mxu0 %v8796_v42  ;;  %v9392_v42 = vld [vmem:[%s9175_s28 + $0x88] ss:$0 sps:$4 sm:$0x11]  }
  0x35   : > { %1618 = vmatprep.subr.bf16.mxu0 %v12888_v1 }
  0x36   : > { %2387 = vmatpush1.bf16.msra.mxu1 %v8813_v47  ;;  %v827_v47 = vrot.slane %v825_v32, 1  ;;  %v8853_v32 = vld [vmem:[%s12883_s2 + $0x90] sm:$0xff]  }
  0x37   : > { %2388 = vmatprep.subr.bf16.mxu1 %v12888_v1 }
  0x38   : > { %1619 = vmatpush1.bf16.msra.mxu0 %v8799_v43  ;;  %8263 = vmatmul.mubr.bf16.gmra.mrb[4].mxu1 %v9277_v49  ;;  %v9395_v43 = vld [vmem:[%s9175_s28 + $0x8c] sm:$0xff]   ;;  %v9415_v56 = vsel %vm776_vm1, %v823_v46, %v827_v47  ;;  %v831_v6 = vor.u32 %v829_v57, %v827_v47  ;;  %v1261_v46 = vrot.slane %v9452_v21, 1  ;;  %v1263_v47 = vrot.slane %v9459_v27, 1 }
  0x39   : > { %1620 = vmatprep.subr.bf16.mxu0 %v12888_v1  ;;  %8266 = vmatprep.mubr.bf16.mxu1 %v9283_v51  ;;  %13172 = vst [vmem:[#allocation13_spill] sm:$0xff] %v9415_v56  ;;  %v849_v57 = vshrl.u32 %v9248_v40, 16 }
  0x3a   : > { %2389 = vmatpush1.bf16.msra.mxu1 %v8818_v54  ;;  %v1254_v54 = vrot.slane %v9402_v45, 1 }
  0x3b   : > { %2390 = vmatprep.subr.bf16.mxu1 %v12888_v1 }
  0x3c   : > { %1621 = vmatpush1.bf16.msra.mxu0 %v8801_v53  ;;  %v1253_v53 = vrot.slane %v9395_v43, 1 }
  0x3d   : > { %1622 = vmatprep.subr.bf16.mxu0 %v12888_v1 }
  0x3e   : > { %2391 = vmatpush1.bf16.msra.mxu1 %v8822_v60  ;;  %v9431_v4 = vsel %vm1217_vm0, %v1253_v53, %v1254_v54  ;;  %v9485_v53 = vld [vmem:[%s9175_s28 + $0xc4] ss:$0 sps:$4 sm:$0x11]  }
  0x3f   : > { %2392 = vmatprep.subr.bf16.mxu1 %v12888_v1  ;;  %13174 = vst [vmem:[#allocation15_spill] sm:$0xff] %v9431_v4 }
  0x40   : > { %1623 = vmatpush1.bf16.msra.mxu0 %v8804_v58  ;;  %8267 = vmatmul.mubr.bf16.gmra.mrb[8].mxu1 %v9313_v61  ;;  %v833_v58 = vshll.u32 %v9230_v34, 16  ;;  %v8846_v34 = vld [vmem:[%s12883_s2 + $0x40] sm:$0xff]   ;;  %v9664_v61 = vld [vmem:[%s9175_s28 + $0x13c] ss:$0 sps:$4 sm:$0x11]  }
  0x41   : > { %1624 = vmatprep.subr.bf16.mxu0 %v12888_v1  ;;  %8270 = vmatprep.mubr.bf16.mxu1 %v9316_v62  ;;  %v898_v62 = vshrl.u32 %v9347_v11, 16  ;;  %13194 = vst [vmem:[#allocation34_spill] sm:$0xff] %v9664_v61 }
  0x42   : > { %2393 = vmatpush1.bf16.msra.mxu1 %v8828_v5  ;;  %v9434_v5 = vld [vmem:[%s9175_s28 + $0xa8] sm:$0xff]   ;;  %v835_v7 = vrot.slane %v833_v58, 1  ;;  %v853_v58 = vshll.u32 %v9274_v48, 16  ;;  %v8865_v48 = vld [vmem:[%s12883_s2 + $0x60] sm:$0xff]  }
  0x43   : > { %2394 = vmatprep.subr.bf16.mxu1 %v12888_v1 }
  0x44   : > { %1625 = vmatpush1.bf16.msra.mxu0 %v8807_v2  ;;  %v9423_v2 = vld [vmem:[%s9175_s28 + $0x9c] ss:$0 sps:$4 sm:$0x11]   ;;  %v9456_v23 = vsel %vm776_vm1, %v831_v6, %v835_v7  ;;  %v9500_v6 = vld [vmem:[%s9175_s28 + $0xc8] sm:$0xff]  }
  0x45   : > { %1626 = vmatprep.subr.bf16.mxu0 %v12888_v1  ;;  %v1256_v9 = vrot.slane %v9423_v2, 1  ;;  %13175 = vst [vmem:[#allocation16_spill] sm:$0xff] %v9456_v23 }
  0x46   : > { %2395 = vmatpush1.bf16.msra.mxu1 %v8833_v17  ;;  %v1259_v17 = vrot.slane %v9434_v5, 1 }
  0x47   : > { %2396 = vmatprep.subr.bf16.mxu1 %v12888_v1 }
  0x48   : > { %1627 = vmatpush1.bf16.msra.mxu0 %v8810_v3  ;;  %8271 = vmatmul.mubr.bf16.gmra.mrb[12].mxu1 %v9351_v14  ;;  %v9426_v3 = vld [vmem:[%s9175_s28 + $0xa0] sm:$0xff]   ;;  %v9657_v14 = vld [vmem:[%s9175_s28 + $0x134] sm:$0xff]  }
  0x49   : > { %1628 = vmatprep.subr.bf16.mxu0 %v12888_v1  ;;  %8274 = vmatprep.mubr.bf16.mxu1 %v9357_v16  ;;  %v1258_v10 = vrot.slane %v9426_v3, 1  ;;  %v905_v16 = vshll.u32 %v9354_v15, 16  ;;  %13192 = vst [vmem:[#allocation32_spill] sm:$0xff] %v9657_v14 }
  0x4a   : > { %2397 = vmatpush1.bf16.msra.mxu1 %v8838_v36 }
  0x4b   : > { %2398 = vmatprep.subr.bf16.mxu1 %v12888_v1  ;;  %v9469_v31 = vsel %vm1217_vm0, %v1258_v10, %v1259_v17  ;;  %v860_v10 = vshll.u32 %v9280_v50, 16  ;;  %v907_v39 = vrot.slane %v905_v16, 1  ;;  %v920_v16 = vshll.u32 %v9395_v43, 16 }
  0x4c   : > { %1629 = vmatpush1.bf16.msra.mxu0 %v8812_v19  ;;  %v838_v19 = vshrl.u32 %v9234_v35, 16  ;;  %13177 = vst [vmem:[#allocation18_spill] sm:$0xff] %v9469_v31 }
  0x4d   : > { %8330 = vmatprep.subr.bf16.mxu0 %v8816_v20 }
  0x4e   : > { %2399 = vmatpush1.bf16.msra.mxu1 %v8842_v55 }
  0x4f   : > { %1631 = vmatmul.mubr.bf16.vlgmr.msra.gmra.mrb[0].mxu0 %v9182_v12  ;;  %v1251_v12 = vrot.slane %v9392_v42, 1  ;;  %2400 = vmatprep.subr.bf16.mxu1 %v12888_v1 }
  0x50   : > { %8331 = vmatpush3.bf16.msra.mxu0 %v8816_v20  ;;  %1638 = vmatprep.mubr.bf16.mxu0 %v9379_v30  ;;  %v8850_v20 = vld [vmem:[%s12883_s2 + $0x48] sm:$0xff]  }
  0x51   : > { %8275 = vmatmul.mubr.bf16.gmra.mrb[16].mxu1 %v9389_v38  ;;  %8332 = vmatprep.subr.bf16.mxu0 %v8834_v33  ;;  %v9420_v60 = vsel %vm1217_vm0, %v1249_v28, %v1251_v12  ;;  %v9462_v28 = vsel %vm1217_vm0, %v1254_v54, %v1256_v9  ;;  %v1264_v12 = vrot.slane %v9465_v29, 1  ;;  %v8859_v54 = vld [vmem:[%s12883_s2 + $0x58] sm:$0xff]   ;;  %v855_v9 = vrot.slane %v853_v58, 1 }
  0x52   : > { %8278 = vmatprep.mubr.bf16.mxu1 %v9399_v44  ;;  %13173 = vst [vmem:[#allocation14_spill] sm:$0xff] %v9420_v60  ;;  %2401 = vmatpush1.bf16.msra.mxu1 %v8846_v34  ;;  %13176 = vst [vmem:[#allocation17_spill] sm:$0xff] %v9462_v28  ;;  %v9497_v34 = vsel %vm1217_vm0, %v1259_v17, %v1261_v46  ;;  %v1266_v17 = vrot.slane %v9485_v53, 1  ;;  %v9540_v46 = vld [vmem:[%s9175_s28 + $0xd8] ss:$0 sps:$4 sm:$0x11]  }
  0x53   : > { %2402 = vmatprep.subr.bf16.mxu1 %v12888_v1  ;;  %13179 = vst [vmem:[#allocation20_spill] sm:$0xff] %v9497_v34  ;;  %v9506_v7 = vsel %vm1217_vm0, %v1263_v47, %v1264_v12  ;;  %v9543_v47 = vld [vmem:[%s9175_s28 + $0xdc] sm:$0xff]   ;;  %v9644_v44 = vld [vmem:[%s9175_s28 + $0x128] ss:$0 sps:$4 sm:$0x11]  }
  0x54   : > { %8333 = vmatpush3.bf16.msra.mxu0 %v8834_v33  ;;  %v8855_v33 = vld [vmem:[%s12883_s2 + $0x50] sm:$0xff]   ;;  %13180 = vst [vmem:[#allocation21_spill] sm:$0xff] %v9506_v7 }
  0x55   : > { %8334 = vmatprep.subr.bf16.mxu0 %v8853_v32 }
  0x56   : > { %2403 = vmatpush1.bf16.msra.mxu1 %v8850_v20 }
  0x57   : > { %1639 = vmatmul.mubr.bf16.gmra.mrb[4].mxu0 %v9185_v13  ;;  %v840_v13 = vshll.u32 %v9234_v35, 16  ;;  %2404 = vmatprep.subr.bf16.mxu1 %v12888_v1 }
  0x58   : > { %1646 = vmatprep.mubr.bf16.mxu0 %v9415_v56  ;;  %8335 = vmatpush3.bf16.msra.mxu0 %v8853_v32 }
  0x59   : > { %8279 = vmatmul.mubr.bf16.gmra.mrb[20].mxu1 %v9420_v60  ;;  %v842_v26 = vrot.slane %v840_v13, 1  ;;  %v9509_v13 = vld [vmem:[%s9175_s28 + $0xd0] sm:$0xff]  }
  0x5a   : > { %8282 = vmatprep.mubr.bf16.mxu1 %v9431_v4  ;;  %2405 = vmatpush1.bf16.msra.mxu1 %v8855_v33  ;;  %v1269_v20 = vrot.slane %v9509_v13, 1  ;;  %v862_v33 = vrot.slane %v860_v10, 1  ;;  %v9563_v10 = vld [vmem:[%s9175_s28 + $0xec] ss:$0 sps:$4 sm:$0x11]  }
  0x5b   : > { %v843_v36 = vor.u32 %v842_v26, %v838_v19  ;;  %2406 = vmatprep.subr.bf16.mxu1 %v12888_v1  ;;  %v1268_v19 = vrot.slane %v9500_v6, 1  ;;  %v858_v26 = vshrl.u32 %v9280_v50, 16 }
  0x5e   : > { %2407 = vmatpush1.bf16.msra.mxu1 %v8859_v54  ;;  %v9547_v54 = vsel %vm1217_vm0, %v1268_v19, %v1269_v20  ;;  %v8872_v19 = vld [vmem:[%s12883_s2 + $0x98] sm:$0xff]  }
  0x5f   : > { %1647 = vmatmul.mubr.bf16.gmra.mrb[8].mxu0 %v9215_v24  ;;  %v847_v24 = vrot.slane %v845_v22, 1  ;;  %2408 = vmatprep.subr.bf16.mxu1 %v12888_v1  ;;  %v8867_v22 = vld [vmem:[%s12883_s2 + $0x68] sm:$0xff]   ;;  %13183 = vst [vmem:[#allocation24_spill] sm:$0xff] %v9547_v54 }
  0x60   : > { %1654 = vmatprep.mubr.bf16.mxu0 %v9456_v23  ;;  %8336 = vmatprep.subr.bf16.mxu0 %v8872_v19 }
  0x61   : > { %8283 = vmatmul.mubr.bf16.gmra.mrb[24].mxu1 %v9462_v28  ;;  %v9492_v55 = vsel %vm776_vm1, %v843_v36, %v847_v24  ;;  %v865_v36 = vshll.u32 %v9286_v52, 16  ;;  %8337 = vmatpush3.bf16.msra.mxu0 %v8872_v19  ;;  %v878_v19 = vshrl.u32 %v9319_v63, 16 }
  0x62   : > { %8286 = vmatprep.mubr.bf16.mxu1 %v9469_v31  ;;  %13178 = vst [vmem:[#allocation19_spill] sm:$0xff] %v9492_v55  ;;  %2409 = vmatpush1.bf16.msra.mxu1 %v8865_v48  ;;  %v1271_v48 = vrot.slane %v9540_v46, 1  ;;  %v9619_v31 = vld [vmem:[%s9175_s28 + $0x114] ss:$0 sps:$4 sm:$0x11]  }
  0x63   : > { %2410 = vmatprep.subr.bf16.mxu1 %v12888_v1  ;;  %v867_v58 = vrot.slane %v865_v36, 1  ;;  %v9577_v36 = vld [vmem:[%s9175_s28 + $0xf8] sm:$0xff]   ;;  %v1286_v4 = vrot.slane %v9619_v31, 1 }
  0x66   : > { %2411 = vmatpush1.bf16.msra.mxu1 %v8867_v22 }
  0x67   : > { %1655 = vmatmul.mubr.bf16.gmra.mrb[12].mxu0 %v9218_v25  ;;  %v851_v25 = vor.u32 %v849_v57, %v847_v24  ;;  %v9537_v24 = vsel %vm1217_vm0, %v1264_v12, %v1266_v17  ;;  %v9550_v57 = vld [vmem:[%s9175_s28 + $0xe4] sm:$0xff]   ;;  %2412 = vmatprep.subr.bf16.mxu1 %v12888_v1  ;;  %v863_v12 = vor.u32 %v862_v33, %v858_v26  ;;  %v9566_v17 = vld [vmem:[%s9175_s28 + $0xf0] sm:$0xff]   ;;  %v869_v26 = vshrl.u32 %v9286_v52, 16  ;;  %v8873_v1 = vld [vmem:[%s12883_s2 + $0x78] sm:$0xff]  }
  0x68   : > { %1662 = vmatprep.mubr.bf16.mxu0 %v9492_v55  ;;  %13182 = vst [vmem:[#allocation23_spill] sm:$0xff] %v9537_v24  ;;  %v873_v33 = vshll.u32 %v9307_v59, 16 }
  0x69   : > { %8287 = vmatmul.mubr.bf16.gmra.mrb[28].mxu1 %v9497_v34  ;;  %v9533_v32 = vsel %vm776_vm1, %v851_v25, %v855_v9  ;;  %v1274_v25 = vrot.slane %v9550_v57, 1  ;;  %v8871_v9 = vld [vmem:[%s12883_s2 + $0x70] sm:$0xff]   ;;  %v9572_v22 = vsel %vm776_vm1, %v863_v12, %v867_v58  ;;  %v871_v59 = vor.u32 %v869_v26, %v867_v58  ;;  %v8878_v58 = vld [vmem:[%s12883_s2 + $0xa0] sm:$0xff]  }
  0x6a   : > { %8290 = vmatprep.mubr.bf16.mxu1 %v9506_v7  ;;  %13181 = vst [vmem:[#allocation22_spill] sm:$0xff] %v9533_v32  ;;  %13184 = vst [vmem:[#allocation25_spill] sm:$0xff] %v9572_v22  ;;  %2413 = vmatpush1.bf16.msra.mxu1 %v8871_v9  ;;  %v875_v9 = vrot.slane %v873_v33, 1  ;;  %v9598_v7 = vld [vmem:[%s9175_s28 + $0x100] ss:$0 sps:$4 sm:$0x11]  }
  0x6b   : > { %v885_v26 = vshll.u32 %v9322_v0, 16  ;;  %8338 = vmatprep.subr.bf16.mxu0 %v8878_v58  ;;  %v9616_v34 = vld [vmem:[%s9175_s28 + $0x10c] sm:$0xff]  }
  0x6c   : > { %v9607_v33 = vsel %vm776_vm1, %v871_v59, %v875_v9  ;;  %8339 = vmatpush3.bf16.msra.mxu0 %v8878_v58  ;;  %v893_v59 = vshll.u32 %v9341_v8, 16  ;;  %v9628_v9 = vld [vmem:[%s9175_s28 + $0x118] sm:$0xff]  }
  0x6d   : > { %13188 = vst [vmem:[#allocation28_spill] sm:$0xff] %v9607_v33  ;;  %v887_v58 = vrot.slane %v885_v26, 1  ;;  %v900_v26 = vshll.u32 %v9347_v11, 16 }
  0x6e   : > { %v895_v60 = vrot.slane %v893_v59, 1 }
  0x6f   : > { %1663 = vmatmul.mubr.bf16.gmra.mrb[16].mxu0 %v9234_v35  ;;  %v1273_v35 = vrot.slane %v9543_v47, 1  ;;  %v902_v49 = vrot.slane %v900_v26, 1 }
  0x70   : > { %1670 = vmatprep.mubr.bf16.mxu0 %v9533_v32 }
  0x71   : > { %8291 = vmatmul.mubr.bf16.gmra.mrb[32].mxu1 %v9537_v24  ;;  %v13186_v24 = vmov 0   ;;  %v9588_v12 = vsel %vm1217_vm0, %v1273_v35, %v1274_v25  ;;  %v1279_v35 = vrot.slane %v9577_v36, 1 }
  0x72   : > { %8294 = vmatprep.mubr.bf16.mxu1 %v9547_v54  ;;  %v9583_v54 = vsel %vm1217_vm0, %v1269_v20, %v1271_v48  ;;  %2414 = vmatprep.subr.bf16.mxu1 %v13186_v24  ;;  %13187 = vst [vmem:[#allocation27_spill] sm:$0xff] %v9588_v12  ;;  %v880_v20 = vshll.u32 %v9319_v63, 16  ;;  %v1276_v48 = vrot.slane %v9563_v10, 1 }
  0x73   : > { %13185 = vst [vmem:[#allocation26_spill] sm:$0xff] %v9583_v54  ;;  %2415 = vmatpush1.bf16.msra.mxu1 %v8873_v1 }
  0x74   : > { %3218 = vmatprep.subr.bf16.mxu1 %v13186_v24  ;;  %v9613_v1 = vsel %vm1217_vm0, %v1274_v25, %v1276_v48  ;;  %v1281_v25 = vrot.slane %v9598_v7, 1 }
  0x75   : > { %13189 = vst [vmem:[#allocation29_spill] sm:$0xff] %v9613_v1 }
  0x76   : > { %v9660_v59 = vsel %vm1217_vm0, %v1279_v35, %v1281_v25  ;;  %v1294_v25 = vrot.slane %v9657_v14, 1 }
  0x77   : > { %1671 = vmatmul.mubr.bf16.gmra.mrb[20].mxu0 %v9248_v40  ;;  %v1278_v40 = vrot.slane %v9566_v17, 1  ;;  %13193 = vst [vmem:[#allocation33_spill] sm:$0xff] %v9660_v59 }
  0x78   : > { %1678 = vmatprep.mubr.bf16.mxu0 %v9572_v22 }
  0x79   : > { %8295 = vmatmul.mubr.bf16.gmra.mrb[36].mxu1 %v9583_v54  ;;  %v9610_v54 = vld [vmem:[%s9175_s28 + $0x104] sm:$0xff]   ;;  %v9623_v28 = vsel %vm1217_vm0, %v1278_v40, %v1279_v35  ;;  %v1284_v40 = vrot.slane %v9616_v34, 1 }
  0x7a   : > { %8298 = vmatprep.mubr.bf16.mxu1 %v9588_v12  ;;  %v882_v12 = vrot.slane %v880_v20, 1  ;;  %13190 = vst [vmem:[#allocation30_spill] sm:$0xff] %v9623_v28  ;;  %v9631_v20 = vld [vmem:[%s9175_s28 + $0x120] sm:$0xff]   ;;  %v1283_v8 = vrot.slane %v9610_v54, 1 }
  0x7b   : > { %v9685_v26 = vsel %vm1217_vm0, %v1284_v40, %v1286_v4  ;;  %v9699_v4 = vld [vmem:[%s9514_s12 + $0x8] sm:$0xff]  }
  0x7c   : > { %v883_v48 = vor.u32 %v882_v12, %v878_v19  ;;  %v1288_v12 = vrot.slane %v9628_v9, 1  ;;  %v1289_v19 = vrot.slane %v9631_v20, 1  ;;  %v9668_v51 = vsel %vm1217_vm0, %v1283_v8, %v1284_v40  ;;  %13197 = vst [vmem:[#allocation37_spill] sm:$0xff] %v9685_v26  ;;  %13199 = vst [vmem:[#allocation39_spill] sm:$0xff] %v9699_v4 }
  0x7d   : > { %13195 = vst [vmem:[#allocation35_spill] sm:$0xff] %v9668_v51  ;;  %v9702_v40 = vld [vmem:[%s9514_s12 + $0x10] ss:$0 sps:$4 sm:$0x11]   ;;  %v1299_v14 = vrot.slane %v9699_v4, 1 }
  0x7e   : > { %v9653_v38 = vsel %vm776_vm1, %v883_v48, %v887_v58  ;;  %13200 = vst [vmem:[#allocation40_spill] sm:$0xff] %v9702_v40 }
  0x7f   : > { %1679 = vmatmul.mubr.bf16.gmra.mrb[24].mxu0 %v9280_v50  ;;  %v8881_v50 = vld [vmem:[%s12883_s2 + $0xa8] sm:$0xff]   ;;  %13191 = vst [vmem:[#allocation31_spill] sm:$0xff] %v9653_v38 }
  0x80   : > { %1686 = vmatprep.mubr.bf16.mxu0 %v9607_v33  ;;  %8340 = vmatprep.subr.bf16.mxu0 %v8881_v50 }
  0x81   : > { %8299 = vmatmul.mubr.bf16.gmra.mrb[40].mxu1 %v9613_v1  ;;  %v889_v1 = vshrl.u32 %v9322_v0, 16  ;;  %8341 = vmatpush3.bf16.msra.mxu0 %v8881_v50  ;;  %v1291_v50 = vrot.slane %v9644_v44, 1 }
  0x82   : > { %8302 = vmatprep.mubr.bf16.mxu1 %v9623_v28  ;;  %v9650_v28 = vld [vmem:[%s9175_s28 + $0x12c] sm:$0xff]  }
  0x83   : > { %v891_v48 = vor.u32 %v889_v1, %v887_v58  ;;  %v1293_v35 = vrot.slane %v9650_v28, 1  ;;  %v918_v1 = vshrl.u32 %v9395_v43, 16  ;;  %v1296_v58 = vrot.slane %v9664_v61, 1 }
  0x84   : > { %v922_v61 = vrot.slane %v920_v16, 1 }
  0x85   : > { %v9682_v8 = vsel %vm776_vm1, %v891_v48, %v895_v60  ;;  %v9696_v60 = vld [vmem:[%s9514_s12] sm:$0xff]  }
  0x86   : > { %13196 = vst [vmem:[#allocation36_spill] sm:$0xff] %v9682_v8  ;;  %v9709_v48 = vld [vmem:[%s9514_s12 + $0x1c] sm:$0xff]  }
  0x87   : > { %1687 = vmatmul.mubr.bf16.gmra.mrb[28].mxu0 %v9286_v52  ;;  %v913_v52 = vshll.u32 %v9392_v42, 16  ;;  %v9689_v42 = vsel %vm1217_vm0, %v1288_v12, %v1289_v19  ;;  %v933_v12 = vshll.u32 %v9423_v2, 16  ;;  %13202 = vst [vmem:[#allocation42_spill] sm:$0xff] %v9709_v48  ;;  %v927_v2 = vrot.slane %v925_v18, 1 }
  0x88   : > { %1694 = vmatprep.mubr.bf16.mxu0 %v9653_v38  ;;  %13198 = vst [vmem:[#allocation38_spill] sm:$0xff] %v9689_v42 }
  0x89   : > { %8303 = vmatmul.mubr.bf16.gmra.mrb[44].mxu1 %v9660_v59  ;;  %v915_v59 = vrot.slane %v913_v52, 1  ;;  %v9720_v52 = vsel %vm1217_vm0, %v1293_v35, %v1294_v25  ;;  %v935_v18 = vrot.slane %v933_v12, 1  ;;  %v9732_v35 = vld [vmem:[%s9514_s12 + $0x28] sm:$0xff]   ;;  %v9747_v12 = vld [vmem:[%s9514_s12 + $0x30] sm:$0xff]  }
  0x8a   : > { %8306 = vmatprep.mubr.bf16.mxu1 %v9668_v51  ;;  %v903_v51 = vor.u32 %v902_v49, %v898_v62  ;;  %v8866_v49 = vld [vmem:[%s9514_s12 + $0x24] ss:$0 sps:$4 sm:$0x11]   ;;  %v9716_v62 = vsel %vm1217_vm0, %v1289_v19, %v1291_v50  ;;  %13205 = vst [vmem:[#allocation45_spill] sm:$0xff] %v9720_v52  ;;  %v1301_v19 = vrot.slane %v9702_v40, 1  ;;  %v1304_v50 = vrot.slane %v9709_v48, 1 }
  0x8b   : > { %13204 = vst [vmem:[#allocation44_spill] sm:$0xff] %v9716_v62  ;;  %13206 = vst [vmem:[#allocation46_spill] sm:$0xff] %v9732_v35 }
  0x8c   : > { %13210 = vst [vmem:[#allocation50_spill] sm:$0xff] %v9747_v12 }
  0x8f   : > { %1695 = vmatmul.mubr.bf16.gmra.mrb[32].mxu0 %v9319_v63  ;;  %v9705_v63 = vld [vmem:[%s9514_s12 + $0x14] sm:$0xff]  }
  0x90   : > { %1702 = vmatprep.mubr.bf16.mxu0 %v9682_v8  ;;  %13201 = vst [vmem:[#allocation41_spill] sm:$0xff] %v9705_v63 }
  0x91   : > { %8307 = vmatmul.mubr.bf16.gmra.mrb[48].mxu1 %v9685_v26  ;;  %v9712_v26 = vsel %vm776_vm1, %v903_v51, %v907_v39  ;;  %v1298_v51 = vrot.slane %v9696_v60, 1 }
  0x92   : > { %8310 = vmatprep.mubr.bf16.mxu1 %v9689_v42  ;;  %13203 = vst [vmem:[#allocation43_spill] sm:$0xff] %v9712_v26  ;;  %v911_v42 = vor.u32 %v909_v37, %v907_v39  ;;  %v929_v37 = vshrl.u32 %v9402_v45, 16  ;;  %v1306_v39 = vrot.slane %v8866_v49, 1  ;;  %v923_v49 = vor.u32 %v922_v61, %v918_v1 }
  0x93   : > { %v1309_v1 = vrot.slane %v9747_v12, 1 }
  0x94   : > { %v9735_v16 = vsel %vm776_vm1, %v911_v42, %v915_v59  ;;  %v1308_v59 = vrot.slane %v9732_v35, 1  ;;  %v8874_v42 = vld [vmem:[%s9175_s28] sm:$0xff]   ;;  %v9773_v35 = vld [vmem:[%s9175_s28 + $0x8] sm:$0xff]  }
  0x95   : > { %13207 = vst [vmem:[#allocation47_spill] sm:$0xff] %v9735_v16  ;;  %v778_v48 = vshrl.u32 %v8874_v42, 16 }
  0x97   : > { %1703 = vmatmul.mubr.bf16.gmra.mrb[36].mxu0 %v9322_v0  ;;  %v1303_v0 = vrot.slane %v9705_v63, 1  ;;  %v949_v63 = vshrl.u32 %v9434_v5, 16 }
  0x98   : > { %1710 = vmatprep.mubr.bf16.mxu0 %v9712_v26 }
  0x99   : > { %8311 = vmatmul.mubr.bf16.gmra.mrb[52].mxu1 %v9716_v62  ;;  %v9738_v62 = vsel %vm1217_vm0, %v1294_v25, %v1296_v58  ;;  %v940_v25 = vshll.u32 %v9426_v3, 16  ;;  %v9753_v58 = vld [vmem:[%s9514_s12 + $0x38] ss:$0 sps:$4 sm:$0x11]   ;;  %v9765_v61 = vsel %vm1217_vm0, %v1303_v0, %v1304_v50 }
  0x9a   : > { %8314 = vmatprep.mubr.bf16.mxu1 %v9720_v52  ;;  %13208 = vst [vmem:[#allocation48_spill] sm:$0xff] %v9738_v62  ;;  %v9742_v52 = vsel %vm1217_vm0, %v1298_v51, %v1299_v14  ;;  %v9758_v51 = vsel %vm776_vm1, %v923_v49, %v927_v2  ;;  %13213 = vst [vmem:[#allocation53_spill] sm:$0xff] %v9765_v61  ;;  %v780_v49 = vshll.u32 %v8874_v42, 16 }
  0x9b   : > { %13209 = vst [vmem:[#allocation49_spill] sm:$0xff] %v9742_v52  ;;  %13211 = vst [vmem:[#allocation51_spill] sm:$0xff] %v9758_v51  ;;  %v942_v0 = vrot.slane %v940_v25, 1  ;;  %v9792_v25 = vsel %vm1217_vm0, %v1308_v59, %v1309_v1 }
  0x9c   : > { %v782_v4 = vrot.slane %v780_v49, 1  ;;  %13216 = vst [vmem:[#allocation56_spill] sm:$0xff] %v9792_v25 }
  0x9f   : > { %1711 = vmatmul.mubr.bf16.gmra.mrb[40].mxu0 %v9347_v11  ;;  %v945_v11 = vshll.u32 %v9434_v5, 16 }
  0xa0   : > { %1718 = vmatprep.mubr.bf16.mxu0 %v9735_v16 }
  0xa1   : > { %8315 = vmatmul.mubr.bf16.gmra.mrb[56].mxu1 %v9738_v62  ;;  %v9761_v62 = vsel %vm1217_vm0, %v1299_v14, %v1301_v19  ;;  %v931_v14 = vor.u32 %v929_v37, %v927_v2  ;;  %v938_v19 = vshrl.u32 %v9426_v3, 16  ;;  %v947_v12 = vrot.slane %v945_v11, 1  ;;  %v9788_v37 = vld [vmem:[%s9175_s28 + $0x10] ss:$0 sps:$4 sm:$0x11]  }
  0xa2   : > { %8318 = vmatprep.mubr.bf16.mxu1 %v9742_v52  ;;  %13212 = vst [vmem:[#allocation52_spill] sm:$0xff] %v9761_v62  ;;  %v8884_v52 = vld [vmem:[%s12883_s2 + $0xb0] sm:$0xff]   ;;  %v9785_v2 = vsel %vm1217_vm0, %v1304_v50, %v1306_v39  ;;  %v783_v11 = vor.u32 %v782_v4, %v778_v48  ;;  %v789_v50 = vshrl.u32 %v9773_v35, 16  ;;  %v793_v39 = vshll.u32 %v9788_v37, 16 }
  0xa3   : > { %8342 = vmatprep.subr.bf16.mxu0 %v8884_v52  ;;  %v9781_v40 = vsel %vm776_vm1, %v931_v14, %v935_v18  ;;  %13215 = vst [vmem:[#allocation55_spill] sm:$0xff] %v9785_v2  ;;  %v943_v5 = vor.u32 %v942_v0, %v938_v19  ;;  %v953_v18 = vshll.u32 %v9452_v21, 16  ;;  %v960_v21 = vshll.u32 %v9459_v27, 16 }
  0xa4   : > { %8343 = vmatpush3.bf16.msra.mxu0 %v8884_v52  ;;  %13214 = vst [vmem:[#allocation54_spill] sm:$0xff] %v9781_v40  ;;  %v951_v4 = vor.u32 %v949_v63, %v947_v12  ;;  %v795_v48 = vrot.slane %v793_v39, 1  ;;  %v958_v14 = vshrl.u32 %v9459_v27, 16  ;;  %v965_v19 = vshll.u32 %v9465_v29, 16 }
  0xa5   : > { %v978_v39 = vshrl.u32 %v9500_v6, 16 }
  0xa7   : > { %1719 = vmatmul.mubr.bf16.gmra.mrb[44].mxu0 %v9354_v15  ;;  %v1311_v15 = vrot.slane %v9753_v58, 1 }
  0xa8   : > { %1726 = vmatprep.mubr.bf16.mxu0 %v9758_v51 }
  0xa9   : > { %8319 = vmatmul.mubr.bf16.gmra.mrb[60].mxu1 %v9761_v62  ;;  %v785_v62 = vshll.u32 %v9773_v35, 16  ;;  %v9804_v59 = vsel %vm1217_vm0, %v1309_v1, %v1311_v15  ;;  %v962_v15 = vrot.slane %v960_v21, 1  ;;  %v8887_v21 = vld [vmem:[%s12883_s2 + $0xb8] sm:$0xff]  }
  0xaa   : > { %8322 = vmatprep.mubr.bf16.mxu1 %v9765_v61  ;;  %13218 = vst [vmem:[#allocation58_spill] sm:$0xff] %v9804_v59  ;;  %8344 = vmatprep.subr.bf16.mxu0 %v8887_v21 }
  0xab   : > { %v787_v52 = vrot.slane %v785_v62, 1  ;;  %v955_v62 = vrot.slane %v953_v18, 1  ;;  %v963_v27 = vor.u32 %v962_v15, %v958_v14  ;;  %v973_v18 = vshll.u32 %v9485_v53, 16  ;;  %8345 = vmatpush3.bf16.msra.mxu0 %v8887_v21  ;;  %v8982_v14 = vld [vmem:[%s9175_s28 + $0x14] sm:$0xff]   ;;  %v8885_v15 = vld [vmem:[%s12883_s2 + $0x1a8] sm:$0xff]  }
  0xad   : > { %v788_v49 = vsel %vm776_vm1, %v783_v11, %v787_v52  ;;  %v791_v1 = vor.u32 %v789_v50, %v787_v52  ;;  %v9817_v0 = vsel %vm776_vm1, %v951_v4, %v955_v62  ;;  %v8879_v52 = vld [vmem:[%s12883_s2 + $0x188] sm:$0xff]   ;;  %v980_v50 = vshll.u32 %v9500_v6, 16 }
  0xae   : > { %13219 = vst [vmem:[#allocation59_spill] sm:$0xff] %v9817_v0  ;;  %v985_v62 = vshll.u32 %v9509_v13, 16 }
  0xaf   : > { %1727 = vmatmul.mubr.bf16.gmra.mrb[48].mxu0 %v9395_v43  ;;  %v9801_v43 = vsel %vm776_vm1, %v943_v5, %v947_v12  ;;  %v796_v63 = vsel %vm776_vm1, %v791_v1, %v795_v48  ;;  %v967_v12 = vrot.slane %v965_v19, 1  ;;  %v969_v5 = vshrl.u32 %v9465_v29, 16  ;;  %v9859_v48 = vld [vmem:[%s9175_s28 + $0xb4] sm:$0xff]  }
  0xb0   : > { %1734 = vmatprep.mubr.bf16.mxu0 %v9781_v40  ;;  %13217 = vst [vmem:[#allocation57_spill] sm:$0xff] %v9801_v43  ;;  %v975_v29 = vrot.slane %v973_v18, 1  ;;  %v982_v4 = vrot.slane %v980_v50, 1  ;;  %v987_v1 = vrot.slane %v985_v62, 1  ;;  %v8888_v18 = vld [vmem:[%s12883_s2 + $0x1b8] sm:$0xff]  }
  0xb1   : > { %8323 = vmatmul.mubr.bf16.gmra.mrb[64].mxu1 %v9785_v2  ;;  %v9832_v11 = vsel %vm776_vm1, %v963_v27, %v967_v12  ;;  %v971_v53 = vor.u32 %v969_v5, %v967_v12  ;;  %v993_v12 = vshll.u32 %v9540_v46, 16  ;;  %v8886_v27 = vld [vmem:[%s12883_s2 + $0x1b0] sm:$0xff]   ;;  %v8984_v5 = vld [vmem:[%s9175_s28 + $0x1c] sm:$0xff]   ;;  %v1000_v46 = vshll.u32 %v9543_v47, 16 }
  0xb2   : > { %8326 = vmatprep.mubr.bf16.mxu1 %v9792_v25  ;;  %13220 = vst [vmem:[#allocation60_spill] sm:$0xff] %v9832_v11  ;;  %v983_v19 = vor.u32 %v982_v4, %v978_v39  ;;  %v9897_v39 = vld [vmem:[%s9175_s28 + $0xc8] sm:$0xff]   ;;  %v1073_v25 = vshll.u32 %v9644_v44, 16  ;;  %v8895_v44 = vld [vmem:[%s12883_s2 + $0x1d8] sm:$0xff]  }
  0xb3   : > { %v9856_v6 = vsel %vm776_vm1, %v971_v53, %v975_v29  ;;  %v998_v29 = vshrl.u32 %v9543_v47, 16  ;;  %v1002_v50 = vrot.slane %v1000_v46, 1  ;;  %v1005_v53 = vshll.u32 %v9550_v57, 16  ;;  %v8889_v47 = vld [vmem:[%s12883_s2 + $0x1c0] sm:$0xff]  }
  0xb4   : > { %13221 = vst [vmem:[#allocation61_spill] sm:$0xff] %v9856_v6  ;;  %v8990_v46 = vld [vmem:[%s9175_s28 + $0x3c] sm:$0xff]  }
  0xb5   : > { %v1003_v62 = vor.u32 %v1002_v50, %v998_v29  ;;  %v1007_v21 = vrot.slane %v1005_v53, 1  ;;  %v1029_v50 = vshrl.u32 %v9577_v36, 16  ;;  %v1033_v53 = vshll.u32 %v9598_v7, 16 }
  0xb6   : > { %v1040_v7 = vshll.u32 %v9610_v54, 16 }
  0xb7   : > { %1735 = vmatmul.mubr.bf16.gmra.mrb[52].mxu0 %v9402_v45  ;;  %v8877_v45 = vld [vmem:[%s12883_s2 + $0x180] sm:$0xff]   ;;  %v9908_v4 = vsel %vm776_vm1, %v1003_v62, %v1007_v21 }
  0xb8   : > { %1742 = vmatprep.mubr.bf16.mxu0 %v9801_v43  ;;  %13224 = vst [vmem:[#allocation64_spill] sm:$0xff] %v9908_v4  ;;  %v9948_v62 = vld [vmem:[%s9175_s28 + $0xe4] sm:$0xff]  }
  0xb9   : > { %8327 = vmatmul.mubr.bf16.gmra.mrb[68].mxu1 %v9804_v59 }
  0xba   : > { %2416 = vmatprep.mubr.bf16.mxu1 %v788_v49  ;;  %v8882_v49 = vld [vmem:[%s12883_s2 + $0x198] sm:$0xff]  }
  0xbf   : > { %1743 = vmatmul.mubr.bf16.gmra.mrb[56].mxu0 %v9426_v3  ;;  %v8880_v3 = vld [vmem:[%s12883_s2 + $0x190] sm:$0xff]  }
  0xc0   : > { %1750 = vmatprep.mubr.bf16.mxu0 %v9817_v0 }
  0xc1   : > { %2417 = vmatmul.mubr.bf16.vlgmr.msra.gmra.mrb[72].mxu1 %v8874_v42  ;;  %v9835_v42 = vld [vmem:[%s9175_s28 + $0xa8] sm:$0xff]  }
  0xc2   : > { %2424 = vmatprep.mubr.bf16.mxu1 %v796_v63  ;;  %3219 = vmatpush1.bf16.msra.mxu1 %v8877_v45  ;;  %v9871_v45 = vsel %vm776_vm1, %v983_v19, %v987_v1  ;;  %v989_v63 = vshrl.u32 %v9509_v13, 16  ;;  %v995_v13 = vrot.slane %v993_v12, 1  ;;  %v9914_v19 = vld [vmem:[%s9175_s28 + $0xd0] sm:$0xff]   ;;  %v1020_v12 = vshll.u32 %v9566_v17, 16 }
  0xc3   : > { %3220 = vmatprep.subr.bf16.mxu1 %v13186_v24  ;;  %13222 = vst [vmem:[#allocation62_spill] sm:$0xff] %v9871_v45 }
  0xc6   : > { %3221 = vmatpush1.bf16.msra.mxu1 %v8879_v52  ;;  %v991_v52 = vor.u32 %v989_v63, %v987_v1  ;;  %v8988_v1 = vld [vmem:[%s9175_s28 + $0x30] sm:$0xff]  }
  0xc7   : > { %1751 = vmatmul.mubr.bf16.gmra.mrb[60].mxu0 %v9835_v42  ;;  %3222 = vmatprep.subr.bf16.mxu1 %v13186_v24 }
  0xc8   : > { %1758 = vmatprep.mubr.bf16.mxu0 %v9832_v11 }
  0xc9   : > { %2425 = vmatmul.mubr.bf16.gmra.mrb[76].mxu1 %v9773_v35 }
  0xca   : > { %2432 = vmatprep.mubr.bf16.mxu1 %v9253_v41  ;;  %3223 = vmatpush1.bf16.msra.mxu1 %v8880_v3  ;;  %v8883_v41 = vld [vmem:[%s12883_s2 + $0x1a0] sm:$0xff]   ;;  %v9892_v3 = vsel %vm776_vm1, %v991_v52, %v995_v13 }
  0xcb   : > { %3224 = vmatprep.subr.bf16.mxu1 %v13186_v24  ;;  %13223 = vst [vmem:[#allocation63_spill] sm:$0xff] %v9892_v3  ;;  %v9927_v52 = vld [vmem:[%s9175_s28 + $0xdc] sm:$0xff]  }
  0xcc   : > { %v9933_v13 = vld [vmem:[%s12883_s2 + $0x200] sm:$0xff]  }
  0xcd   : > { %8418 = vmatprep.subr.bf16.mxu0 %v9933_v13 }
  0xce   : > { %3225 = vmatpush1.bf16.msra.mxu1 %v8882_v49  ;;  %v8986_v49 = vld [vmem:[%s9175_s28 + $0x28] sm:$0xff]  }
  0xcf   : > { %1759 = vmatmul.mubr.bf16.gmra.mrb[64].mxu0 %v9859_v48  ;;  %3226 = vmatprep.subr.bf16.mxu1 %v13186_v24 }
  0xd0   : > { %1766 = vmatprep.mubr.bf16.mxu0 %v9856_v6 }
  0xd1   : > { %2433 = vmatmul.mubr.bf16.gmra.mrb[80].mxu1 %v8982_v14  ;;  %v1013_v14 = vshll.u32 %v9563_v10, 16  ;;  %v1018_v10 = vshrl.u32 %v9566_v17, 16 }
  0xd2   : > { %2440 = vmatprep.mubr.bf16.mxu1 %v9379_v30  ;;  %3227 = vmatpush1.bf16.msra.mxu1 %v8883_v41  ;;  %v9879_v30 = vld [vmem:[%s9175_s28 + $0xbc] sm:$0xff]   ;;  %v1009_v41 = vshrl.u32 %v9550_v57, 16 }
  0xd3   : > { %3228 = vmatprep.subr.bf16.mxu1 %v13186_v24  ;;  %v1015_v63 = vrot.slane %v1013_v14, 1  ;;  %v1038_v14 = vshrl.u32 %v9610_v54, 16 }
  0xd6   : > { %3229 = vmatpush1.bf16.msra.mxu1 %v8885_v15  ;;  %v1011_v15 = vor.u32 %v1009_v41, %v1007_v21  ;;  %v8992_v21 = vld [vmem:[%s9175_s28 + $0x44] sm:$0xff]  }
  0xd7   : > { %1767 = vmatmul.mubr.bf16.gmra.mrb[68].mxu0 %v9879_v30  ;;  %3230 = vmatprep.subr.bf16.mxu1 %v13186_v24 }
  0xd8   : > { %1774 = vmatprep.mubr.bf16.mxu0 %v9871_v45  ;;  %v9922_v57 = vsel %vm776_vm1, %v1011_v15, %v1015_v63  ;;  %v1045_v15 = vshll.u32 %v9616_v34, 16  ;;  %v9962_v63 = vld [vmem:[%s9175_s28 + $0xf0] sm:$0xff]  }
  0xd9   : > { %2441 = vmatmul.mubr.bf16.gmra.mrb[84].mxu1 %v8984_v5  ;;  %13225 = vst [vmem:[#allocation65_spill] sm:$0xff] %v9922_v57  ;;  %v1025_v5 = vshll.u32 %v9577_v36, 16 }
  0xda   : > { %2448 = vmatprep.mubr.bf16.mxu1 %v9415_v56  ;;  %3231 = vmatpush1.bf16.msra.mxu1 %v8886_v27  ;;  %v1022_v27 = vrot.slane %v1020_v12, 1  ;;  %v8994_v12 = vld [vmem:[%s9175_s28 + $0x50] sm:$0xff]  }
  0xdb   : > { %3232 = vmatprep.subr.bf16.mxu1 %v13186_v24  ;;  %v1027_v17 = vrot.slane %v1025_v5, 1 }
  0xdd   : > { %v1031_v36 = vor.u32 %v1029_v50, %v1027_v17  ;;  %v1053_v50 = vshll.u32 %v9619_v31, 16  ;;  %v1060_v31 = vshll.u32 %v9628_v9, 16 }
  0xde   : > { %3233 = vmatpush1.bf16.msra.mxu1 %v8888_v18  ;;  %v1023_v18 = vor.u32 %v1022_v27, %v1018_v10  ;;  %v1047_v27 = vrot.slane %v1045_v15, 1 }
  0xdf   : > { %1775 = vmatmul.mubr.bf16.gmra.mrb[72].mxu0 %v9897_v39  ;;  %3234 = vmatprep.subr.bf16.mxu1 %v13186_v24 }
  0xe0   : > { %1782 = vmatprep.mubr.bf16.mxu0 %v9892_v3  ;;  %v9940_v29 = vsel %vm776_vm1, %v1023_v18, %v1027_v17  ;;  %v1049_v17 = vshrl.u32 %v9616_v34, 16 }
  0xe1   : > { %2449 = vmatmul.mubr.bf16.gmra.mrb[88].mxu1 %v8986_v49  ;;  %13226 = vst [vmem:[#allocation66_spill] sm:$0xff] %v9940_v29  ;;  %v8891_v49 = vld [vmem:[%s12883_s2 + $0x1c8] sm:$0xff]  }
  0xe2   : > { %2456 = vmatprep.mubr.bf16.mxu1 %v9456_v23  ;;  %3235 = vmatpush1.bf16.msra.mxu1 %v8889_v47  ;;  %v1035_v47 = vrot.slane %v1033_v53, 1  ;;  %v13235_v23 = vld [vmem:[#allocation34_spill] sm:$0xff] }
  0xe3   : > { %3236 = vmatprep.subr.bf16.mxu1 %v13186_v24  ;;  %v1093_v56 = vshll.u32 %v13235_v23, 16 }
  0xe4   : > { %v9957_v41 = vsel %vm776_vm1, %v1031_v36, %v1035_v47  ;;  %v8893_v36 = vld [vmem:[%s12883_s2 + $0x1d0] sm:$0xff]   ;;  %v8996_v47 = vld [vmem:[%s9175_s28 + $0x58] sm:$0xff]  }
  0xe5   : > { %13227 = vst [vmem:[#allocation67_spill] sm:$0xff] %v9957_v41 }
  0xe6   : > { %3237 = vmatpush1.bf16.msra.mxu1 %v8891_v49  ;;  %v9980_v49 = vld [vmem:[%s9175_s28 + $0xf8] sm:$0xff]  }
  0xe7   : > { %1783 = vmatmul.mubr.bf16.gmra.mrb[76].mxu0 %v9914_v19  ;;  %3238 = vmatprep.subr.bf16.mxu1 %v13186_v24 }
  0xe8   : > { %1790 = vmatprep.mubr.bf16.mxu0 %v9908_v4 }
  0xe9   : > { %2457 = vmatmul.mubr.bf16.gmra.mrb[92].mxu1 %v8988_v1  ;;  %v1042_v1 = vrot.slane %v1040_v7, 1  ;;  %v1051_v7 = vor.u32 %v1049_v17, %v1047_v27 }
  0xea   : > { %2464 = vmatprep.mubr.bf16.mxu1 %v9492_v55  ;;  %3239 = vmatpush1.bf16.msra.mxu1 %v8893_v36  ;;  %v8997_v36 = vld [vmem:[%s9175_s28 + $0x64] sm:$0xff]  }
  0xeb   : > { %v1043_v10 = vor.u32 %v1042_v1, %v1038_v14  ;;  %v1055_v14 = vrot.slane %v1053_v50, 1  ;;  %3240 = vmatprep.subr.bf16.mxu1 %v13186_v24 }
  0xed   : > { %v9996_v15 = vsel %vm776_vm1, %v1051_v7, %v1055_v14 }
  0xee   : > { %13229 = vst [vmem:[#allocation69_spill] sm:$0xff] %v9996_v15  ;;  %3241 = vmatpush1.bf16.msra.mxu1 %v8895_v44 }
  0xef   : > { %1791 = vmatmul.mubr.bf16.gmra.mrb[80].mxu0 %v9927_v52  ;;  %3242 = vmatprep.subr.bf16.mxu1 %v13186_v24 }
  0xf0   : > { %1798 = vmatprep.mubr.bf16.mxu0 %v9922_v57 }
  0xf1   : > { %2465 = vmatmul.mubr.bf16.gmra.mrb[96].mxu1 %v8990_v46  ;;  %v9971_v46 = vsel %vm776_vm1, %v1043_v10, %v1047_v27  ;;  %v1058_v10 = vshrl.u32 %v9628_v9, 16  ;;  %v1065_v27 = vshll.u32 %v9631_v20, 16 }
  0xf2   : > { %2472 = vmatprep.mubr.bf16.mxu1 %v9533_v32  ;;  %13228 = vst [vmem:[#allocation68_spill] sm:$0xff] %v9971_v46 }
  0xf3   : > { %v1067_v14 = vrot.slane %v1065_v27, 1  ;;  %v1075_v27 = vrot.slane %v1073_v25, 1  ;;  %v1078_v25 = vshrl.u32 %v9650_v28, 16 }
  0xf7   : > { %1799 = vmatmul.mubr.bf16.gmra.mrb[84].mxu0 %v9948_v62 }
  0xf8   : > { %1806 = vmatprep.mubr.bf16.mxu0 %v9940_v29 }
  0xf9   : > { %2473 = vmatmul.mubr.bf16.gmra.mrb[100].mxu1 %v8992_v21 }
  0xfa   : > { %2480 = vmatprep.mubr.bf16.mxu1 %v9572_v22  ;;  %v10044_v22 = vld [vmem:[%s9175_s28 + $0x118] sm:$0xff]  }
  0xff   : > { %1807 = vmatmul.mubr.bf16.gmra.mrb[88].mxu0 %v9962_v63 }
 0x100   : > { %1814 = vmatprep.mubr.bf16.mxu0 %v9957_v41 }
 0x101   : > { %2481 = vmatmul.mubr.bf16.gmra.mrb[104].mxu1 %v8994_v12 }
 0x102   : > { %2488 = vmatprep.mubr.bf16.mxu1 %v9607_v33 }
 0x103   : > { %v9968_v5 = vpop.f32.mrb[0].mxu1 }
 0x104   : > { %v9973_v18 = vpop.f32.mrb[1].mxu1 }
 0x105   : > { %v9977_v53 = vpop.f32.mrb[2].mxu1 }
 0x106   : > { %v9983_v21 = vpop.f32.mrb[3].mxu1 }
 0x107   : > { %1815 = vmatmul.mubr.bf16.gmra.mrb[92].mxu0 %v9980_v49 }
 0x108   : > { %1822 = vmatprep.mubr.bf16.mxu0 %v9971_v46 }
 0x109   : > { %2489 = vmatmul.mubr.bf16.gmra.mrb[108].mxu1 %v8996_v47  ;;  %v1062_v47 = vrot.slane %v1060_v31, 1 }
 0x10a   : > { %2496 = vmatprep.mubr.bf16.mxu1 %v9653_v38 }
 0x10b   : > { %v9993_v1 = vpop.f32.mrb[4].mxu1  ;;  %v1063_v7 = vor.u32 %v1062_v47, %v1058_v10  ;;  %v8998_v10 = vld [vmem:[%s9175_s28 + $0x6c] sm:$0xff]  }
 0x10c   : > { %v9998_v12 = vpop.f32.mrb[5].mxu1 }
 0x10d   : > { %v10002_v17 = vpop.f32.mrb[6].mxu1  ;;  %v10013_v9 = vsel %vm776_vm1, %v1063_v7, %v1067_v14  ;;  %v1080_v7 = vshll.u32 %v9650_v28, 16 }
 0x10e   : > { %v10005_v50 = vpop.f32.mrb[7].mxu1  ;;  %13230 = vst [vmem:[#allocation70_spill] sm:$0xff] %v10013_v9 }
 0x10f   : > { %1823 = vmatmul.mubr.bf16.gmra.mrb[96].mxu0 %v9610_v54  ;;  %v1069_v54 = vshrl.u32 %v9631_v20, 16 }
 0x110   : > { %1830 = vmatprep.mubr.bf16.mxu0 %v9996_v15 }
 0x111   : > { %2497 = vmatmul.mubr.bf16.gmra.mrb[112].mxu1 %v8997_v36  ;;  %v1071_v47 = vor.u32 %v1069_v54, %v1067_v14  ;;  %v1082_v14 = vrot.slane %v1080_v7, 1  ;;  %v13232_v54 = vld [vmem:[#allocation32_spill] sm:$0xff] }
 0x112   : > { %2504 = vmatprep.mubr.bf16.mxu1 %v9682_v8  ;;  %v1085_v8 = vshll.u32 %v13232_v54, 16  ;;  %13233 = vst [vmem:[#allocation32_spill] sm:$0xff] %v10044_v22  ;;  %v1089_v55 = vshrl.u32 %v13232_v54, 16  ;;  %v1095_v54 = vrot.slane %v1093_v56, 1 }
 0x113   : > { %v10010_v59 = vpop.f32.mrb[8].mxu1  ;;  %v10035_v20 = vsel %vm776_vm1, %v1071_v47, %v1075_v27  ;;  %v1083_v47 = vor.u32 %v1082_v14, %v1078_v25 }
 0x114   : > { %v10015_v31 = vpop.f32.mrb[9].mxu1  ;;  %13231 = vst [vmem:[#allocation71_spill] sm:$0xff] %v10035_v20  ;;  %v1087_v27 = vrot.slane %v1085_v8, 1 }
 0x115   : > { %v10019_v38 = vpop.f32.mrb[10].mxu1 }
 0x116   : > { %v10022_v36 = vpop.f32.mrb[11].mxu1  ;;  %v10063_v8 = vsel %vm776_vm1, %v1083_v47, %v1087_v27  ;;  %v1091_v23 = vor.u32 %v1089_v55, %v1087_v27 }
 0x117   : > { %1831 = vmatmul.mubr.bf16.gmra.mrb[100].mxu0 %v9616_v34  ;;  %13237 = vst [vmem:[#allocation73_spill] sm:$0xff] %v10063_v8 }
 0x118   : > { %1838 = vmatprep.mubr.bf16.mxu0 %v10013_v9 }
 0x119   : > { %2505 = vmatmul.mubr.bf16.gmra.mrb[116].mxu1 %v8998_v10 }
 0x11a   : > { %2512 = vmatprep.mubr.bf16.mxu1 %v9712_v26  ;;  %v9000_v26 = vld [vmem:[%s9175_s28 + $0x78] sm:$0xff]  }
 0x11b   : > { %v10031_v34 = vpop.f32.mrb[12].mxu1 }
 0x11c   : > { %v10037_v10 = vpop.f32.mrb[13].mxu1 }
 0x11d   : > { %v10041_v33 = vpop.f32.mrb[14].mxu1 }
 0x11e   : > { %v10047_v44 = vpop.f32.mrb[15].mxu1 }
 0x11f   : > { %1839 = vmatmul.mubr.bf16.gmra.mrb[104].mxu0 %v10044_v22  ;;  %v13242_v22 = vld [vmem:[#allocation39_spill] sm:$0xff] }
 0x120   : > { %1846 = vmatprep.mubr.bf16.mxu0 %v10035_v20 }
 0x121   : > { %2513 = vmatmul.mubr.bf16.gmra.mrb[120].mxu1 %v9000_v26 }
 0x122   : > { %v1632_v2 = vpop.f32.mrb[0].mxu0  ;;  %2520 = vmatprep.mubr.bf16.mxu1 %v9735_v16 }
 0x123   : > { %v10053_v28 = vadd.f32 %v9973_v18, %v1632_v2  ;;  %v1634_v7 = vpop.f32.mrb[1].mxu0  ;;  %v10070_v18 = vld [vmem:[%s9175_s28 + $0x120] sm:$0xff]  }
 0x124   : > { %v1635_v32 = vpop.f32.mrb[2].mxu0  ;;  %v10055_v61 = vpop.f32.mrb[16].mxu1  ;;  %13238 = vst [vmem:[#allocation74_spill] sm:$0xff] %v10070_v18 }
 0x125   : > { %13234 = vst [vmem:[#allocation72_spill] sm:$0xff] %v10053_v28  ;;  %v10060_v26 = vadd.f32 %v9983_v21, %v1635_v32  ;;  %v1637_v25 = vpop.f32.mrb[3].mxu0  ;;  %v10065_v14 = vpop.f32.mrb[17].mxu1  ;;  %v9002_v32 = vld [vmem:[%s9175_s28 + $0x80] sm:$0xff]   ;;  %v1100_v21 = vshll.u32 %v9696_v60, 16 }
 0x126   : > { %v10067_v2 = vpop.f32.mrb[18].mxu1 }
 0x127   : > { %13236 = vst [vmem:[#allocation34_spill] sm:$0xff] %v10060_v26  ;;  %1847 = vmatmul.mubr.bf16.gmra.mrb[108].mxu0 %v10070_v18  ;;  %v10073_v7 = vpop.f32.mrb[19].mxu1  ;;  %v10083_v18 = vsel %vm776_vm1, %v1091_v23, %v1095_v54  ;;  %v10100_v54 = vld [vmem:[%s9175_s28 + $0x12c] sm:$0xff]  }
 0x128   : > { %1854 = vmatprep.mubr.bf16.mxu0 %v10063_v8  ;;  %13240 = vst [vmem:[#allocation76_spill] sm:$0xff] %v10083_v18  ;;  %13243 = vst [vmem:[#allocation39_spill] sm:$0xff] %v10100_v54 }
 0x129   : > { %2521 = vmatmul.mubr.bf16.gmra.mrb[124].mxu1 %v9002_v32  ;;  %v1098_v32 = vshrl.u32 %v9696_v60, 16 }
 0x12a   : > { %v1640_v47 = vpop.f32.mrb[4].mxu0  ;;  %2528 = vmatprep.mubr.bf16.mxu1 %v9758_v51  ;;  %v1102_v51 = vrot.slane %v1100_v21, 1 }
 0x12b   : > { %v10080_v25 = vadd.f32 %v9968_v5, %v1640_v47  ;;  %v1642_v16 = vpop.f32.mrb[5].mxu0  ;;  %v1105_v5 = vshll.u32 %v13242_v22, 16 }
 0x12c   : > { %v1643_v20 = vpop.f32.mrb[6].mxu0  ;;  %v10085_v8 = vpop.f32.mrb[20].mxu1  ;;  %v8897_v16 = vld [vmem:[%s12883_s2 + $0x1e0] sm:$0xff]   ;;  %v1103_v21 = vor.u32 %v1102_v51, %v1098_v32 }
 0x12d   : > { %13239 = vst [vmem:[#allocation75_spill] sm:$0xff] %v10080_v25  ;;  %v10088_v56 = vadd.f32 %v9977_v53, %v1643_v20  ;;  %v1645_v55 = vpop.f32.mrb[7].mxu0  ;;  %v10090_v27 = vpop.f32.mrb[21].mxu1  ;;  %3243 = vmatpush1.bf16.msra.mxu1 %v8897_v16  ;;  %v9004_v20 = vld [vmem:[%s9175_s28 + $0x8c] sm:$0xff]   ;;  %v1107_v47 = vrot.slane %v1105_v5, 1  ;;  %v1109_v16 = vshrl.u32 %v13242_v22, 16 }
 0x12e   : > { %v10097_v23 = vpop.f32.mrb[22].mxu1  ;;  %3244 = vmatprep.subr.bf16.mxu1 %v13186_v24 }
 0x12f   : > { %13241 = vst [vmem:[#allocation77_spill] sm:$0xff] %v10088_v56  ;;  %1855 = vmatmul.mubr.bf16.gmra.mrb[112].mxu0 %v10100_v54  ;;  %v10103_v53 = vpop.f32.mrb[23].mxu1  ;;  %v10120_v32 = vsel %vm776_vm1, %v1103_v21, %v1107_v47  ;;  %v1111_v22 = vor.u32 %v1109_v16, %v1107_v47 }
 0x130   : > { %1862 = vmatprep.mubr.bf16.mxu0 %v10083_v18  ;;  %v13245_v18 = vld [vmem:[#allocation40_spill] sm:$0xff]  ;;  %13247 = vst [vmem:[#allocation79_spill] sm:$0xff] %v10120_v32 }
 0x131   : > { %2529 = vmatmul.mubr.bf16.gmra.mrb[128].mxu1 %v9004_v20  ;;  %v1113_v26 = vshll.u32 %v13245_v18, 16 }
 0x132   : > { %v1648_v55 = vpop.f32.mrb[8].mxu0  ;;  %2536 = vmatprep.mubr.bf16.mxu1 %v9781_v40 }
 0x133   : > { %v10110_v56 = vadd.f32 %v9998_v12, %v1648_v55  ;;  %v1650_v25 = vpop.f32.mrb[9].mxu0  ;;  %v1115_v18 = vrot.slane %v1113_v26, 1 }
 0x134   : > { %v1651_v54 = vpop.f32.mrb[10].mxu0  ;;  %v10112_v9 = vpop.f32.mrb[24].mxu1  ;;  %v10127_v25 = vld [vmem:[%s9175_s28 + $0x134] sm:$0xff]  }
 0x135   : > { %13244 = vst [vmem:[#allocation78_spill] sm:$0xff] %v10110_v56  ;;  %v10117_v20 = vadd.f32 %v10005_v50, %v1651_v54  ;;  %v1653_v51 = vpop.f32.mrb[11].mxu0  ;;  %v10122_v5 = vpop.f32.mrb[25].mxu1  ;;  %13248 = vst [vmem:[#allocation80_spill] sm:$0xff] %v10127_v25  ;;  %v9006_v50 = vld [vmem:[%s9175_s28 + $0x94] sm:$0xff]  }
 0x136   : > { %v10124_v12 = vpop.f32.mrb[26].mxu1  ;;  %v13249_v54 = vld [vmem:[#allocation41_spill] sm:$0xff] }
 0x137   : > { %13246 = vst [vmem:[#allocation40_spill] sm:$0xff] %v10117_v20  ;;  %1863 = vmatmul.mubr.bf16.gmra.mrb[116].mxu0 %v10127_v25  ;;  %v10130_v55 = vpop.f32.mrb[27].mxu1  ;;  %v1120_v51 = vshll.u32 %v13249_v54, 16  ;;  %v10140_v25 = vsel %vm776_vm1, %v1111_v22, %v1115_v18 }
 0x138   : > { %1870 = vmatprep.mubr.bf16.mxu0 %v10120_v32  ;;  %13251 = vst [vmem:[#allocation81_spill] sm:$0xff] %v10140_v25  ;;  %v13253_v32 = vld [vmem:[#allocation42_spill] sm:$0xff] }
 0x139   : > { %2537 = vmatmul.mubr.bf16.gmra.mrb[132].mxu1 %v9006_v50  ;;  %v1118_v50 = vshrl.u32 %v13249_v54, 16 }
 0x13a   : > { %v1656_v21 = vpop.f32.mrb[12].mxu0  ;;  %2544 = vmatprep.mubr.bf16.mxu1 %v9801_v43  ;;  %v1122_v43 = vrot.slane %v1120_v51, 1 }
 0x13b   : > { %v10137_v40 = vadd.f32 %v9993_v1, %v1656_v21  ;;  %v1658_v20 = vpop.f32.mrb[13].mxu0  ;;  %v1125_v1 = vshll.u32 %v13253_v32, 16 }
 0x13c   : > { %v1659_v56 = vpop.f32.mrb[14].mxu0  ;;  %v10142_v28 = vpop.f32.mrb[28].mxu1  ;;  %v1123_v22 = vor.u32 %v1122_v43, %v1118_v50  ;;  %v9009_v43 = vld [vmem:[%s9514_s12 + $0x24] ss:$0 sps:$4 sm:$0x11]  }
 0x13d   : > { %13250 = vst [vmem:[#allocation41_spill] sm:$0xff] %v10137_v40  ;;  %v10145_v26 = vadd.f32 %v10002_v17, %v1659_v56  ;;  %v1661_v47 = vpop.f32.mrb[15].mxu0  ;;  %v10147_v16 = vpop.f32.mrb[29].mxu1  ;;  %v8899_v17 = vld [vmem:[%s12883_s2 + $0x1e8] sm:$0xff]   ;;  %v9007_v56 = vld [vmem:[%s9175_s28 + $0xa0] sm:$0xff]   ;;  %v1127_v18 = vrot.slane %v1125_v1, 1 }
 0x13e   : > { %v10151_v21 = vpop.f32.mrb[30].mxu1  ;;  %3245 = vmatpush1.bf16.msra.mxu1 %v8899_v17  ;;  %v1133_v50 = vshll.u32 %v9009_v43, 16 }
 0x13f   : > { %13252 = vst [vmem:[#allocation82_spill] sm:$0xff] %v10145_v26  ;;  %1871 = vmatmul.mubr.bf16.gmra.mrb[120].mxu0 %v9696_v60  ;;  %v10154_v20 = vpop.f32.mrb[31].mxu1  ;;  %3246 = vmatprep.subr.bf16.mxu1 %v13186_v24  ;;  %v10169_v26 = vld [vmem:[%s9514_s12 + $0x1c] sm:$0xff]   ;;  %v10177_v17 = vsel %vm776_vm1, %v1123_v22, %v1127_v18 }
 0x140   : > { %1878 = vmatprep.mubr.bf16.mxu0 %v10140_v25  ;;  %13257 = vst [vmem:[#allocation85_spill] sm:$0xff] %v10177_v17 }
 0x141   : > { %2545 = vmatmul.mubr.bf16.gmra.mrb[136].mxu1 %v9007_v56  ;;  %v1129_v56 = vshrl.u32 %v10169_v26, 16 }
 0x142   : > { %v1664_v54 = vpop.f32.mrb[16].mxu0  ;;  %2552 = vmatprep.mubr.bf16.mxu1 %v9817_v0 }
 0x143   : > { %v10163_v60 = vadd.f32 %v10015_v31, %v1664_v54  ;;  %v1666_v32 = vpop.f32.mrb[17].mxu0  ;;  %v1131_v43 = vor.u32 %v1129_v56, %v1127_v18 }
 0x144   : > { %v1667_v51 = vpop.f32.mrb[18].mxu0  ;;  %v10166_v47 = vpop.f32.mrb[32].mxu1  ;;  %v10184_v32 = vld [vmem:[%s9514_s12 + $0x8] sm:$0xff]  }
 0x145   : > { %13254 = vst [vmem:[#allocation42_spill] sm:$0xff] %v10163_v60  ;;  %13255 = vst [vmem:[#allocation83_spill] sm:$0xff] %v10166_v47  ;;  %v10174_v1 = vadd.f32 %v10022_v36, %v1667_v51  ;;  %v1669_v0 = vpop.f32.mrb[19].mxu0  ;;  %v10179_v31 = vpop.f32.mrb[33].mxu1  ;;  %v1135_v60 = vrot.slane %v1133_v50, 1 }
 0x146   : > { %v10181_v54 = vpop.f32.mrb[34].mxu1  ;;  %13259 = vst [vmem:[#allocation87_spill] sm:$0xff] %v10184_v32  ;;  %v13260_v0 = vld [vmem:[#allocation46_spill] sm:$0xff] }
 0x147   : > { %13256 = vst [vmem:[#allocation84_spill] sm:$0xff] %v10174_v1  ;;  %13258 = vst [vmem:[#allocation86_spill] sm:$0xff] %v10181_v54  ;;  %1879 = vmatmul.mubr.bf16.gmra.mrb[124].mxu0 %v10184_v32  ;;  %v10187_v25 = vpop.f32.mrb[35].mxu1  ;;  %v1140_v36 = vshll.u32 %v13260_v0, 16  ;;  %v10197_v32 = vsel %vm776_vm1, %v1131_v43, %v1135_v60  ;;  %v1138_v50 = vshrl.u32 %v13260_v0, 16 }
 0x148   : > { %1886 = vmatprep.mubr.bf16.mxu0 %v10177_v17  ;;  %13261 = vst [vmem:[#allocation46_spill] sm:$0xff] %v10197_v32 }
 0x149   : > { %2553 = vmatmul.mubr.bf16.gmra.mrb[140].mxu1 %v9835_v42  ;;  %v1142_v17 = vrot.slane %v1140_v36, 1 }
 0x14a   : > { %v1672_v22 = vpop.f32.mrb[20].mxu0  ;;  %2560 = vmatprep.mubr.bf16.mxu1 %v9832_v11  ;;  %v13263_v11 = vld [vmem:[#allocation50_spill] sm:$0xff] }
 0x14b   : > { %v10194_v51 = vadd.f32 %v10010_v59, %v1672_v22  ;;  %v1674_v1 = vpop.f32.mrb[21].mxu0  ;;  %v1145_v47 = vshll.u32 %v13263_v11, 16 }
 0x14c   : > { %v1675_v54 = vpop.f32.mrb[22].mxu0  ;;  %v10199_v40 = vpop.f32.mrb[36].mxu1  ;;  %v10211_v1 = vld [vmem:[%s9514_s12 + $0x14] sm:$0xff]  }
 0x14d   : > { %v10202_v18 = vadd.f32 %v10019_v38, %v1675_v54  ;;  %v1677_v42 = vpop.f32.mrb[23].mxu0  ;;  %v10204_v56 = vpop.f32.mrb[37].mxu1  ;;  %13264 = vst [vmem:[#allocation50_spill] sm:$0xff] %v10211_v1  ;;  %v8901_v38 = vld [vmem:[%s12883_s2 + $0x1f0] sm:$0xff]   ;;  %v1143_v54 = vor.u32 %v1142_v17, %v1138_v50  ;;  %v1147_v43 = vrot.slane %v1145_v47, 1  ;;  %v1149_v17 = vshrl.u32 %v13263_v11, 16 }
 0x14e   : > { %v10208_v59 = vpop.f32.mrb[38].mxu1  ;;  %3247 = vmatpush1.bf16.msra.mxu1 %v8901_v38 }
 0x14f   : > { %13262 = vst [vmem:[#allocation88_spill] sm:$0xff] %v10202_v18  ;;  %1887 = vmatmul.mubr.bf16.gmra.mrb[128].mxu0 %v10211_v1  ;;  %v10214_v60 = vpop.f32.mrb[39].mxu1  ;;  %3248 = vmatprep.subr.bf16.mxu1 %v13186_v24 }
 0x150   : > { %1894 = vmatprep.mubr.bf16.mxu0 %v10197_v32 }
 0x151   : > { %2561 = vmatmul.mubr.bf16.gmra.mrb[144].mxu1 %v9859_v48  ;;  %v10232_v48 = vsel %vm776_vm1, %v1143_v54, %v1147_v43 }
 0x152   : > { %v1680_v0 = vpop.f32.mrb[24].mxu0  ;;  %2568 = vmatprep.mubr.bf16.mxu1 %v9856_v6  ;;  %13265 = vst [vmem:[#allocation89_spill] sm:$0xff] %v10232_v48 }
 0x153   : > { %v10223_v36 = vadd.f32 %v10037_v10, %v1680_v0  ;;  %v1682_v22 = vpop.f32.mrb[25].mxu0  ;;  %v1153_v10 = vshll.u32 %v9753_v58, 16 }
 0x154   : > { %v1683_v42 = vpop.f32.mrb[26].mxu0  ;;  %v10226_v1 = vpop.f32.mrb[40].mxu1 }
 0x155   : > { %v10229_v18 = vadd.f32 %v10047_v44, %v1683_v42  ;;  %v1685_v32 = vpop.f32.mrb[27].mxu0  ;;  %v10234_v47 = vpop.f32.mrb[41].mxu1  ;;  %v1151_v44 = vor.u32 %v1149_v17, %v1147_v43  ;;  %v8903_v42 = vld [vmem:[%s12883_s2 + $0x1f8] sm:$0xff]  }
 0x156   : > { %v10238_v50 = vpop.f32.mrb[42].mxu1  ;;  %v1155_v32 = vrot.slane %v1153_v10, 1  ;;  %3249 = vmatpush1.bf16.msra.mxu1 %v8903_v42 }
 0x157   : > { %1895 = vmatmul.mubr.bf16.gmra.mrb[132].mxu0 %v10169_v26  ;;  %v10241_v38 = vpop.f32.mrb[43].mxu1 }
 0x158   : > { %1902 = vmatprep.mubr.bf16.mxu0 %v10232_v48  ;;  %v10258_v17 = vsel %vm776_vm1, %v1151_v44, %v1155_v32 }
 0x159   : > { %2569 = vmatmul.mubr.bf16.gmra.mrb[148].mxu1 %v9879_v30  ;;  %13266 = vst [vmem:[#allocation90_spill] sm:$0xff] %v10258_v17 }
 0x15a   : > { %v1688_v54 = vpop.f32.mrb[28].mxu0  ;;  %2576 = vmatprep.mubr.bf16.mxu1 %v9871_v45 }
 0x15b   : > { %v10247_v11 = vadd.f32 %v10031_v34, %v1688_v54  ;;  %v1690_v58 = vpop.f32.mrb[29].mxu0  ;;  %v9012_v54 = vld [vmem:[%s9514_s12 + $0x28] sm:$0xff]  }
 0x15c   : > { %v1691_v0 = vpop.f32.mrb[30].mxu0  ;;  %v10249_v22 = vpop.f32.mrb[44].mxu1 }
 0x15d   : > { %v10255_v30 = vadd.f32 %v10041_v33, %v1691_v0  ;;  %v1693_v43 = vpop.f32.mrb[31].mxu0  ;;  %v10260_v10 = vpop.f32.mrb[45].mxu1  ;;  %v9013_v33 = vld [vmem:[%s9175_s28] sm:$0xff]  }
 0x15e   : > { %v10262_v34 = vpop.f32.mrb[46].mxu1  ;;  %v1218_v0 = vrot.slane %v9013_v33, 1  ;;  %v1219_v43 = vrot.slane %v9773_v35, 1  ;;  %v9014_v35 = vld [vmem:[%s9514_s12 + $0x30] sm:$0xff]  }
 0x15f   : > { %1903 = vmatmul.mubr.bf16.gmra.mrb[136].mxu0 %v9012_v54  ;;  %v10265_v58 = vpop.f32.mrb[47].mxu1 }
 0x160   : > { %1910 = vmatprep.mubr.bf16.mxu0 %v10258_v17 }
 0x161   : > { %2577 = vmatmul.mubr.bf16.gmra.mrb[152].mxu1 %v9897_v39  ;;  %v1220_v39 = vsel %vm1217_vm0, %v1218_v0, %v1219_v43 }
 0x162   : > { %v1696_v44 = vpop.f32.mrb[32].mxu0  ;;  %2584 = vmatprep.mubr.bf16.mxu1 %v9892_v3 }
 0x163   : > { %v10273_v32 = vadd.f32 %v10065_v14, %v1696_v44  ;;  %v1698_v42 = vpop.f32.mrb[33].mxu0  ;;  %v1221_v14 = vrot.slane %v9788_v37, 1  ;;  %v8892_v37 = vld [vmem:[%s12883_s2 + $0x208] sm:$0xff]  }
 0x164   : > { %v1699_v48 = vpop.f32.mrb[34].mxu0  ;;  %v10275_v54 = vpop.f32.mrb[48].mxu1 }
 0x165   : > { %v10278_v45 = vadd.f32 %v10073_v7, %v1699_v48  ;;  %v1701_v17 = vpop.f32.mrb[35].mxu0  ;;  %v10281_v6 = vpop.f32.mrb[49].mxu1  ;;  %v1222_v0 = vsel %vm1217_vm0, %v1219_v43, %v1221_v14  ;;  %v13268_v43 = vld [vmem:[#allocation2_spill] sm:$0xff] }
 0x166   : > { %v10283_v33 = vpop.f32.mrb[50].mxu1 }
 0x167   : > { %13267 = vst [vmem:[#allocation91_spill] sm:$0xff] %v10283_v33  ;;  %1911 = vmatmul.mubr.bf16.gmra.mrb[140].mxu0 %v9014_v35  ;;  %v10286_v3 = vpop.f32.mrb[51].mxu1 }
 0x168   : > { %8346 = vmatprep.mubr.bf16.mxu0 %v1220_v39 }
 0x169   : > { %2585 = vmatmul.mubr.bf16.gmra.mrb[156].mxu1 %v9914_v19 }
 0x16a   : > { %v1704_v44 = vpop.f32.mrb[36].mxu0  ;;  %2592 = vmatprep.mubr.bf16.mxu1 %v9908_v4 }
 0x16b   : > { %v10292_v7 = vadd.f32 %v10055_v61, %v1704_v44  ;;  %v1706_v48 = vpop.f32.mrb[37].mxu0 }
 0x16c   : > { %v1707_v17 = vpop.f32.mrb[38].mxu0  ;;  %v10295_v42 = vpop.f32.mrb[52].mxu1 }
 0x16d   : > { %v10298_v35 = vadd.f32 %v10067_v2, %v1707_v17  ;;  %v1709_v39 = vpop.f32.mrb[39].mxu0  ;;  %v10300_v33 = vpop.f32.mrb[53].mxu1  ;;  %v8894_v2 = vld [vmem:[%s12883_s2 + $0x210] sm:$0xff]  }
 0x16e   : > { %v10305_v19 = vpop.f32.mrb[54].mxu1 }
 0x16f   : > { %8347 = vmatmul.mubr.bf16.vlgmr.msra.gmra.mrb[144].mxu0 %v1222_v0  ;;  %v10307_v61 = vpop.f32.mrb[55].mxu1 }
 0x170   : > { %8419 = vmatpush3.bf16.msra.mxu0 %v9933_v13  ;;  %8350 = vmatprep.mubr.bf16.mxu0 %v13268_v43  ;;  %v8896_v43 = vld [vmem:[%s12883_s2 + $0x218] sm:$0xff]  }
 0x171   : > { %2593 = vmatmul.mubr.bf16.gmra.mrb[160].mxu1 %v9927_v52  ;;  %8420 = vmatprep.subr.bf16.mxu0 %v8892_v37 }
 0x172   : > { %v1712_v14 = vpop.f32.mrb[40].mxu0  ;;  %2600 = vmatprep.mubr.bf16.mxu1 %v9922_v57 }
 0x173   : > { %v10317_v44 = vadd.f32 %v10090_v27, %v1712_v14  ;;  %v1714_v48 = vpop.f32.mrb[41].mxu0  ;;  %v13271_v27 = vld [vmem:[#allocation3_spill] sm:$0xff] }
 0x174   : > { %v1715_v17 = vpop.f32.mrb[42].mxu0  ;;  %8421 = vmatpush3.bf16.msra.mxu0 %v8892_v37  ;;  %v10319_v0 = vpop.f32.mrb[56].mxu1  ;;  %v13273_v37 = vld [vmem:[#allocation4_spill] sm:$0xff] }
 0x175   : > { %13269 = vst [vmem:[#allocation2_spill] sm:$0xff] %v10319_v0  ;;  %v10322_v13 = vadd.f32 %v10103_v53, %v1715_v17  ;;  %v1717_v52 = vpop.f32.mrb[43].mxu0  ;;  %v10324_v39 = vpop.f32.mrb[57].mxu1  ;;  %8422 = vmatprep.subr.bf16.mxu0 %v8894_v2  ;;  %v8898_v53 = vld [vmem:[%s12883_s2 + $0x220] sm:$0xff]   ;;  %v8900_v0 = vld [vmem:[%s12883_s2 + $0x228] sm:$0xff]  }
 0x176   : > { %v10329_v57 = vpop.f32.mrb[58].mxu1 }
 0x177   : > { %13270 = vst [vmem:[#allocation92_spill] sm:$0xff] %v10329_v57  ;;  %8351 = vmatmul.mubr.bf16.gmra.mrb[148].mxu0 %v13271_v27  ;;  %v10332_v14 = vpop.f32.mrb[59].mxu1 }
 0x178   : > { %13272 = vst [vmem:[#allocation3_spill] sm:$0xff] %v10332_v14  ;;  %8354 = vmatprep.mubr.bf16.mxu0 %v13273_v37  ;;  %8423 = vmatpush3.bf16.msra.mxu0 %v8894_v2  ;;  %v13298_v14 = vld [vmem:[#allocation70_spill] sm:$0xff] }
 0x179   : > { %2601 = vmatmul.mubr.bf16.gmra.mrb[164].mxu1 %v9948_v62  ;;  %8424 = vmatprep.subr.bf16.mxu0 %v8896_v43 }
 0x17a   : > { %v1720_v48 = vpop.f32.mrb[44].mxu0  ;;  %2608 = vmatprep.mubr.bf16.mxu1 %v9940_v29 }
 0x17b   : > { %v10341_v17 = vadd.f32 %v10085_v8, %v1720_v48  ;;  %v1722_v52 = vpop.f32.mrb[45].mxu0  ;;  %v13277_v8 = vld [vmem:[#allocation5_spill] sm:$0xff] }
 0x17c   : > { %v1723_v27 = vpop.f32.mrb[46].mxu0  ;;  %v10343_v4 = vpop.f32.mrb[60].mxu1  ;;  %8425 = vmatpush3.bf16.msra.mxu0 %v8896_v43  ;;  %v13279_v52 = vld [vmem:[#allocation6_spill] sm:$0xff] }
 0x17d   : > { %13274 = vst [vmem:[#allocation4_spill] sm:$0xff] %v10343_v4  ;;  %v10346_v2 = vadd.f32 %v10097_v23, %v1723_v27  ;;  %v1725_v62 = vpop.f32.mrb[47].mxu0  ;;  %v10348_v57 = vpop.f32.mrb[61].mxu1  ;;  %8426 = vmatprep.subr.bf16.mxu0 %v8898_v53  ;;  %v8902_v23 = vld [vmem:[%s12883_s2 + $0x230] sm:$0xff]  }
 0x17e   : > { %13275 = vst [vmem:[#allocation93_spill] sm:$0xff] %v10348_v57  ;;  %v10353_v29 = vpop.f32.mrb[62].mxu1  ;;  %v8904_v57 = vld [vmem:[%s12883_s2 + $0x238] sm:$0xff]  }
 0x17f   : > { %13276 = vst [vmem:[#allocation94_spill] sm:$0xff] %v10353_v29  ;;  %8355 = vmatmul.mubr.bf16.gmra.mrb[152].mxu0 %v13277_v8  ;;  %v10356_v48 = vpop.f32.mrb[63].mxu1 }
 0x180   : > { %13278 = vst [vmem:[#allocation5_spill] sm:$0xff] %v10356_v48  ;;  %8358 = vmatprep.mubr.bf16.mxu0 %v13279_v52  ;;  %8427 = vmatpush3.bf16.msra.mxu0 %v8898_v53 }
 0x181   : > { %2609 = vmatmul.mubr.bf16.gmra.mrb[168].mxu1 %v9962_v63  ;;  %8428 = vmatprep.subr.bf16.mxu0 %v8900_v0 }
 0x182   : > { %v1728_v43 = vpop.f32.mrb[48].mxu0  ;;  %2616 = vmatprep.mubr.bf16.mxu1 %v9957_v41 }
 0x183   : > { %v10365_v27 = vadd.f32 %v10122_v5, %v1728_v43  ;;  %v1730_v62 = vpop.f32.mrb[49].mxu0  ;;  %v13283_v5 = vld [vmem:[#allocation7_spill] sm:$0xff] }
 0x184   : > { %v1731_v29 = vpop.f32.mrb[50].mxu0  ;;  %v10367_v4 = vpop.f32.mrb[64].mxu1  ;;  %8429 = vmatpush3.bf16.msra.mxu0 %v8900_v0  ;;  %v13285_v62 = vld [vmem:[#allocation8_spill] sm:$0xff] }
 0x185   : > { %13280 = vst [vmem:[#allocation6_spill] sm:$0xff] %v10367_v4  ;;  %v10370_v53 = vadd.f32 %v10130_v55, %v1731_v29  ;;  %v1733_v63 = vpop.f32.mrb[51].mxu0  ;;  %v10372_v48 = vpop.f32.mrb[65].mxu1  ;;  %8430 = vmatprep.subr.bf16.mxu0 %v8902_v23 }
 0x186   : > { %13281 = vst [vmem:[#allocation95_spill] sm:$0xff] %v10372_v48  ;;  %v10377_v41 = vpop.f32.mrb[66].mxu1  ;;  %v13289_v48 = vld [vmem:[#allocation9_spill] sm:$0xff] }
 0x187   : > { %13282 = vst [vmem:[#allocation96_spill] sm:$0xff] %v10377_v41  ;;  %8359 = vmatmul.mubr.bf16.gmra.mrb[156].mxu0 %v13283_v5  ;;  %v10380_v43 = vpop.f32.mrb[67].mxu1  ;;  %v13296_v5 = vld [vmem:[#allocation11_spill] sm:$0xff] }
 0x188   : > { %13284 = vst [vmem:[#allocation97_spill] sm:$0xff] %v10380_v43  ;;  %8362 = vmatprep.mubr.bf16.mxu0 %v13285_v62  ;;  %8431 = vmatpush3.bf16.msra.mxu0 %v8902_v23 }
 0x189   : > { %2617 = vmatmul.mubr.bf16.gmra.mrb[172].mxu1 %v9980_v49  ;;  %8432 = vmatprep.subr.bf16.mxu0 %v8904_v57 }
 0x18a   : > { %v1736_v29 = vpop.f32.mrb[52].mxu0  ;;  %2624 = vmatprep.mubr.bf16.mxu1 %v9971_v46 }
 0x18b   : > { %v10386_v55 = vadd.f32 %v10112_v9, %v1736_v29  ;;  %v1738_v0 = vpop.f32.mrb[53].mxu0  ;;  %v13291_v9 = vld [vmem:[#allocation10_spill] sm:$0xff] }
 0x18c   : > { %v1739_v63 = vpop.f32.mrb[54].mxu0  ;;  %v10388_v41 = vpop.f32.mrb[68].mxu1  ;;  %8433 = vmatpush3.bf16.msra.mxu0 %v8904_v57  ;;  %v9015_v29 = vld [vmem:[%s9175_s28 + $0x104] sm:$0xff]  }
 0x18d   : > { %13286 = vst [vmem:[#allocation98_spill] sm:$0xff] %v10388_v41  ;;  %v10391_v4 = vadd.f32 %v10124_v12, %v1739_v63  ;;  %v1741_v43 = vpop.f32.mrb[55].mxu0  ;;  %v10393_v23 = vpop.f32.mrb[69].mxu1  ;;  %5317 = vmatprep.subr.bf16.mxu0 %v13186_v24  ;;  %v13292_v41 = vld [vmem:[#allocation72_spill] sm:$0xff] }
 0x18e   : > { %13287 = vst [vmem:[#allocation99_spill] sm:$0xff] %v10393_v23  ;;  %v10396_v49 = vpop.f32.mrb[70].mxu1 }
 0x18f   : > { %13288 = vst [vmem:[#allocation100_spill] sm:$0xff] %v10396_v49  ;;  %8363 = vmatmul.mubr.bf16.gmra.mrb[160].mxu0 %v13289_v48  ;;  %v10399_v46 = vpop.f32.mrb[71].mxu1 }
 0x190   : > { %13290 = vst [vmem:[#allocation101_spill] sm:$0xff] %v10399_v46  ;;  %8366 = vmatprep.mubr.bf16.mxu0 %v13291_v9 }
 0x191   : > { %2625 = vmatmul.mubr.bf16.gmra.mrb[176].mxu1 %v9015_v29  ;;  %v13294_v29 = vld [vmem:[#allocation34_spill] sm:$0xff] }
 0x192   : > { %v1744_v57 = vpop.f32.mrb[56].mxu0  ;;  %2632 = vmatprep.mubr.bf16.mxu1 %v9996_v15 }
 0x193   : > { %v10405_v12 = vadd.f32 %v10147_v16, %v1744_v57  ;;  %v1746_v43 = vpop.f32.mrb[57].mxu0  ;;  %v13297_v16 = vld [vmem:[#allocation12_spill] sm:$0xff] }
 0x194   : > { %v2418_v0 = vpop.f32.mrb[72].mxu1  ;;  %v1747_v63 = vpop.f32.mrb[58].mxu0  ;;  %v9016_v57 = vld [vmem:[%s9175_s28 + $0x10c] sm:$0xff]  }
 0x195   : > { %v10408_v49 = vadd.f32 %v2418_v0, %v13292_v41  ;;  %v10411_v23 = vadd.f32 %v10154_v20, %v1747_v63  ;;  %v2420_v46 = vpop.f32.mrb[73].mxu1  ;;  %v1749_v9 = vpop.f32.mrb[59].mxu0  ;;  %v13299_v0 = vld [vmem:[#allocation75_spill] sm:$0xff] }
 0x196   : > { %v2421_v48 = vpop.f32.mrb[74].mxu1 }
 0x197   : > { %13293 = vst [vmem:[#allocation72_spill] sm:$0xff] %v10408_v49  ;;  %v10414_v62 = vadd.f32 %v2421_v48, %v13294_v29  ;;  %8367 = vmatmul.mubr.bf16.gmra.mrb[164].mxu0 %v13296_v5  ;;  %v2423_v15 = vpop.f32.mrb[75].mxu1  ;;  %v13301_v49 = vld [vmem:[#allocation77_spill] sm:$0xff]  ;;  %v13306_v5 = vld [vmem:[#allocation71_spill] sm:$0xff] }
 0x198   : > { %8370 = vmatprep.mubr.bf16.mxu0 %v13297_v16  ;;  %v13303_v16 = vld [vmem:[#allocation14_spill] sm:$0xff] }
 0x199   : > { %13295 = vst [vmem:[#allocation34_spill] sm:$0xff] %v10414_v62  ;;  %2633 = vmatmul.mubr.bf16.gmra.mrb[180].mxu1 %v9016_v57 }
 0x19a   : > { %v1752_v43 = vpop.f32.mrb[60].mxu0  ;;  %2640 = vmatprep.mubr.bf16.mxu1 %v13298_v14 }
 0x19b   : > { %v10421_v41 = vadd.f32 %v10142_v28, %v1752_v43  ;;  %v1754_v20 = vpop.f32.mrb[61].mxu0  ;;  %v13304_v28 = vld [vmem:[#allocation15_spill] sm:$0xff]  ;;  %v13305_v43 = vld [vmem:[#allocation32_spill] sm:$0xff] }
 0x19c   : > { %v2426_v46 = vpop.f32.mrb[76].mxu1  ;;  %v1755_v9 = vpop.f32.mrb[62].mxu0 }
 0x19d   : > { %v10424_v63 = vadd.f32 %v2426_v46, %v13299_v0  ;;  %v10427_v48 = vadd.f32 %v10151_v21, %v1755_v9  ;;  %v2428_v15 = vpop.f32.mrb[77].mxu1  ;;  %v1757_v29 = vpop.f32.mrb[63].mxu0 }
 0x19e   : > { %v2429_v62 = vpop.f32.mrb[78].mxu1  ;;  %v13307_v15 = vld [vmem:[#allocation78_spill] sm:$0xff] }
 0x19f   : > { %13300 = vst [vmem:[#allocation75_spill] sm:$0xff] %v10424_v63  ;;  %v10430_v57 = vadd.f32 %v2429_v62, %v13301_v49  ;;  %8371 = vmatmul.mubr.bf16.gmra.mrb[168].mxu0 %v13303_v16  ;;  %v2431_v14 = vpop.f32.mrb[79].mxu1  ;;  %v13310_v63 = vld [vmem:[#allocation40_spill] sm:$0xff]  ;;  %v13315_v16 = vld [vmem:[#allocation73_spill] sm:$0xff] }
 0x1a0   : > { %8374 = vmatprep.mubr.bf16.mxu0 %v13304_v28  ;;  %v13312_v28 = vld [vmem:[#allocation17_spill] sm:$0xff] }
 0x1a1   : > { %13302 = vst [vmem:[#allocation77_spill] sm:$0xff] %v10430_v57  ;;  %2641 = vmatmul.mubr.bf16.gmra.mrb[184].mxu1 %v13305_v43 }
 0x1a2   : > { %v1760_v20 = vpop.f32.mrb[64].mxu0  ;;  %2648 = vmatprep.mubr.bf16.mxu1 %v13306_v5 }
 0x1a3   : > { %v10437_v46 = vadd.f32 %v10179_v31, %v1760_v20  ;;  %v1762_v21 = vpop.f32.mrb[65].mxu0  ;;  %v13313_v31 = vld [vmem:[#allocation18_spill] sm:$0xff] }
 0x1a4   : > { %v2434_v9 = vpop.f32.mrb[80].mxu1  ;;  %v1763_v0 = vpop.f32.mrb[66].mxu0  ;;  %v13314_v20 = vld [vmem:[#allocation74_spill] sm:$0xff] }
 0x1a5   : > { %v10440_v29 = vadd.f32 %v2434_v9, %v13307_v15  ;;  %v10443_v62 = vadd.f32 %v10187_v25, %v1763_v0  ;;  %v2436_v14 = vpop.f32.mrb[81].mxu1  ;;  %v1765_v49 = vpop.f32.mrb[67].mxu0  ;;  %v13316_v9 = vld [vmem:[#allocation83_spill] sm:$0xff] }
 0x1a6   : > { %v2437_v57 = vpop.f32.mrb[82].mxu1  ;;  %v13318_v49 = vld [vmem:[#allocation41_spill] sm:$0xff] }
 0x1a7   : > { %13308 = vst [vmem:[#allocation32_spill] sm:$0xff] %v10440_v29  ;;  %13309 = vst [vmem:[#allocation78_spill] sm:$0xff] %v10443_v62  ;;  %v10446_v43 = vadd.f32 %v2437_v57, %v13310_v63  ;;  %8375 = vmatmul.mubr.bf16.gmra.mrb[172].mxu0 %v13312_v28  ;;  %v2439_v5 = vpop.f32.mrb[83].mxu1  ;;  %v13320_v63 = vld [vmem:[#allocation86_spill] sm:$0xff]  ;;  %v13323_v62 = vld [vmem:[#allocation20_spill] sm:$0xff] }
 0x1a8   : > { %8378 = vmatprep.mubr.bf16.mxu0 %v13313_v31  ;;  %v13321_v28 = vld [vmem:[#allocation82_spill] sm:$0xff] }
 0x1a9   : > { %13311 = vst [vmem:[#allocation40_spill] sm:$0xff] %v10446_v43  ;;  %2649 = vmatmul.mubr.bf16.gmra.mrb[188].mxu1 %v13314_v20 }
 0x1aa   : > { %v1768_v21 = vpop.f32.mrb[68].mxu0  ;;  %2656 = vmatprep.mubr.bf16.mxu1 %v13315_v16 }
 0x1ab   : > { %v10453_v15 = vadd.f32 %v13316_v9, %v1768_v21  ;;  %v1770_v25 = vpop.f32.mrb[69].mxu0  ;;  %v13324_v21 = vld [vmem:[#allocation21_spill] sm:$0xff]  ;;  %v13325_v9 = vld [vmem:[#allocation39_spill] sm:$0xff] }
 0x1ac   : > { %v2442_v0 = vpop.f32.mrb[84].mxu1  ;;  %v1771_v14 = vpop.f32.mrb[70].mxu0 }
 0x1ad   : > { %13317 = vst [vmem:[#allocation74_spill] sm:$0xff] %v10453_v15  ;;  %v10456_v29 = vadd.f32 %v2442_v0, %v13318_v49  ;;  %v10459_v57 = vadd.f32 %v13320_v63, %v1771_v14  ;;  %v2444_v5 = vpop.f32.mrb[85].mxu1  ;;  %v1773_v43 = vpop.f32.mrb[71].mxu0  ;;  %v13326_v15 = vld [vmem:[#allocation76_spill] sm:$0xff]  ;;  %v13327_v63 = vld [vmem:[#allocation42_spill] sm:$0xff] }
 0x1ae   : > { %v2445_v31 = vpop.f32.mrb[86].mxu1 }
 0x1af   : > { %13319 = vst [vmem:[#allocation83_spill] sm:$0xff] %v10456_v29  ;;  %v10462_v20 = vadd.f32 %v2445_v31, %v13321_v28  ;;  %8379 = vmatmul.mubr.bf16.gmra.mrb[176].mxu0 %v13323_v62  ;;  %v2447_v16 = vpop.f32.mrb[87].mxu1  ;;  %v13329_v29 = vld [vmem:[#allocation84_spill] sm:$0xff] }
 0x1b0   : > { %8382 = vmatprep.mubr.bf16.mxu0 %v13324_v21  ;;  %v13331_v21 = vld [vmem:[#allocation23_spill] sm:$0xff] }
 0x1b1   : > { %13322 = vst [vmem:[#allocation41_spill] sm:$0xff] %v10462_v20  ;;  %2657 = vmatmul.mubr.bf16.gmra.mrb[192].mxu1 %v13325_v9 }
 0x1b2   : > { %v1776_v25 = vpop.f32.mrb[72].mxu0  ;;  %2664 = vmatprep.mubr.bf16.mxu1 %v13326_v15 }
 0x1b3   : > { %v10469_v0 = vadd.f32 %v10204_v56, %v1776_v25  ;;  %v1778_v14 = vpop.f32.mrb[73].mxu0  ;;  %v13332_v56 = vld [vmem:[#allocation24_spill] sm:$0xff] }
 0x1b4   : > { %v2450_v49 = vpop.f32.mrb[88].mxu1  ;;  %v1779_v43 = vpop.f32.mrb[74].mxu0  ;;  %v13333_v25 = vld [vmem:[#allocation80_spill] sm:$0xff] }
 0x1b5   : > { %v10472_v5 = vadd.f32 %v2450_v49, %v13327_v63  ;;  %v10475_v28 = vadd.f32 %v10214_v60, %v1779_v43  ;;  %v2452_v16 = vpop.f32.mrb[89].mxu1  ;;  %v1781_v31 = vpop.f32.mrb[75].mxu0  ;;  %v13334_v49 = vld [vmem:[#allocation79_spill] sm:$0xff] }
 0x1b6   : > { %v2453_v20 = vpop.f32.mrb[90].mxu1 }
 0x1b7   : > { %13328 = vst [vmem:[#allocation86_spill] sm:$0xff] %v10472_v5  ;;  %v10478_v9 = vadd.f32 %v2453_v20, %v13329_v29  ;;  %8383 = vmatmul.mubr.bf16.gmra.mrb[180].mxu0 %v13331_v21  ;;  %v2455_v15 = vpop.f32.mrb[91].mxu1  ;;  %v13340_v21 = vld [vmem:[#allocation81_spill] sm:$0xff] }
 0x1b8   : > { %8386 = vmatprep.mubr.bf16.mxu0 %v13332_v56  ;;  %v13338_v56 = vld [vmem:[#allocation26_spill] sm:$0xff] }
 0x1b9   : > { %13330 = vst [vmem:[#allocation82_spill] sm:$0xff] %v10478_v9  ;;  %2665 = vmatmul.mubr.bf16.gmra.mrb[196].mxu1 %v13333_v25  ;;  %v13336_v25 = vld [vmem:[#allocation88_spill] sm:$0xff] }
 0x1ba   : > { %v1784_v14 = vpop.f32.mrb[76].mxu0  ;;  %2672 = vmatprep.mubr.bf16.mxu1 %v13334_v49 }
 0x1bb   : > { %v10485_v60 = vadd.f32 %v10199_v40, %v1784_v14  ;;  %v1786_v43 = vpop.f32.mrb[77].mxu0  ;;  %v13339_v40 = vld [vmem:[#allocation27_spill] sm:$0xff]  ;;  %v9017_v14 = vld [vmem:[%s9514_s12] sm:$0xff]  }
 0x1bc   : > { %v2458_v63 = vpop.f32.mrb[92].mxu1  ;;  %v1787_v16 = vpop.f32.mrb[78].mxu0 }
 0x1bd   : > { %v10488_v29 = vadd.f32 %v2458_v63, %v10194_v51  ;;  %v10491_v20 = vadd.f32 %v10208_v59, %v1787_v16  ;;  %v2460_v15 = vpop.f32.mrb[93].mxu1  ;;  %v1789_v31 = vpop.f32.mrb[79].mxu0 }
 0x1be   : > { %v2461_v9 = vpop.f32.mrb[94].mxu1 }
 0x1bf   : > { %13335 = vst [vmem:[#allocation20_spill] sm:$0xff] %v10488_v29  ;;  %v10494_v5 = vadd.f32 %v2461_v9, %v13336_v25  ;;  %8387 = vmatmul.mubr.bf16.gmra.mrb[184].mxu0 %v13338_v56  ;;  %v2463_v49 = vpop.f32.mrb[95].mxu1 }
 0x1c0   : > { %8390 = vmatprep.mubr.bf16.mxu0 %v13339_v40 }
 0x1c1   : > { %13337 = vst [vmem:[#allocation39_spill] sm:$0xff] %v10494_v5  ;;  %2673 = vmatmul.mubr.bf16.gmra.mrb[200].mxu1 %v9017_v14  ;;  %v13343_v5 = vld [vmem:[#allocation29_spill] sm:$0xff] }
 0x1c2   : > { %v1792_v43 = vpop.f32.mrb[80].mxu0  ;;  %2680 = vmatprep.mubr.bf16.mxu1 %v13340_v21 }
 0x1c3   : > { %v10501_v51 = vadd.f32 %v10234_v47, %v1792_v43  ;;  %v1794_v59 = vpop.f32.mrb[81].mxu0  ;;  %v13344_v47 = vld [vmem:[#allocation30_spill] sm:$0xff]  ;;  %v13345_v43 = vld [vmem:[#allocation87_spill] sm:$0xff] }
 0x1c4   : > { %v2466_v63 = vpop.f32.mrb[96].mxu1  ;;  %v1795_v16 = vpop.f32.mrb[82].mxu0 }
 0x1c5   : > { %v10504_v15 = vadd.f32 %v2466_v63, %v10223_v36  ;;  %v10507_v9 = vadd.f32 %v10241_v38, %v1795_v16  ;;  %v2468_v49 = vpop.f32.mrb[97].mxu1  ;;  %v1797_v31 = vpop.f32.mrb[83].mxu0  ;;  %v8905_v36 = vld [vmem:[%s12885_s4 + $0x140] sm:$0xff]   ;;  %v13346_v38 = vld [vmem:[#allocation85_spill] sm:$0xff] }
 0x1c6   : > { %v2469_v25 = vpop.f32.mrb[98].mxu1  ;;  %8506 = vmatprep.subr.bf16.mxu1 %v8905_v36 }
 0x1c7   : > { %13341 = vst [vmem:[#allocation42_spill] sm:$0xff] %v10504_v15  ;;  %v10510_v14 = vadd.f32 %v2469_v25, %v10229_v18  ;;  %8391 = vmatmul.mubr.bf16.gmra.mrb[188].mxu0 %v13343_v5  ;;  %v2471_v21 = vpop.f32.mrb[99].mxu1 }
 0x1c8   : > { %8394 = vmatprep.mubr.bf16.mxu0 %v13344_v47  ;;  %v13351_v47 = vld [vmem:[#allocation46_spill] sm:$0xff] }
 0x1c9   : > { %13342 = vst [vmem:[#allocation84_spill] sm:$0xff] %v10510_v14  ;;  %2681 = vmatmul.mubr.bf16.gmra.mrb[204].mxu1 %v13345_v43 }
 0x1ca   : > { %v1800_v59 = vpop.f32.mrb[84].mxu0  ;;  %2688 = vmatprep.mubr.bf16.mxu1 %v13346_v38  ;;  %v13348_v38 = vld [vmem:[#allocation33_spill] sm:$0xff] }
 0x1cb   : > { %v10520_v63 = vadd.f32 %v10226_v1, %v1800_v59  ;;  %v1802_v16 = vpop.f32.mrb[85].mxu0  ;;  %v13349_v59 = vld [vmem:[#allocation35_spill] sm:$0xff] }
 0x1cc   : > { %v2474_v18 = vpop.f32.mrb[100].mxu1  ;;  %v1803_v49 = vpop.f32.mrb[86].mxu0  ;;  %v13350_v16 = vld [vmem:[#allocation50_spill] sm:$0xff] }
 0x1cd   : > { %v10523_v21 = vadd.f32 %v2474_v18, %v10247_v11  ;;  %v10526_v31 = vadd.f32 %v10238_v50, %v1803_v49  ;;  %v2476_v25 = vpop.f32.mrb[101].mxu1  ;;  %v1805_v43 = vpop.f32.mrb[87].mxu0 }
 0x1ce   : > { %v2477_v14 = vpop.f32.mrb[102].mxu1 }
 0x1cf   : > { %v10529_v15 = vadd.f32 %v2477_v14, %v10255_v30  ;;  %8395 = vmatmul.mubr.bf16.gmra.mrb[192].mxu0 %v13348_v38  ;;  %v2479_v1 = vpop.f32.mrb[103].mxu1 }
 0x1d0   : > { %8398 = vmatprep.mubr.bf16.mxu0 %v13349_v59 }
 0x1d1   : > { %13347 = vst [vmem:[#allocation80_spill] sm:$0xff] %v10529_v15  ;;  %2689 = vmatmul.mubr.bf16.gmra.mrb[208].mxu1 %v13350_v16  ;;  %v13354_v15 = vld [vmem:[#allocation37_spill] sm:$0xff] }
 0x1d2   : > { %v1808_v29 = vpop.f32.mrb[88].mxu0  ;;  %2696 = vmatprep.mubr.bf16.mxu1 %v13351_v47 }
 0x1d3   : > { %v10536_v11 = vadd.f32 %v10260_v10, %v1808_v29  ;;  %v1810_v50 = vpop.f32.mrb[89].mxu0  ;;  %v13355_v10 = vld [vmem:[#allocation38_spill] sm:$0xff] }
 0x1d4   : > { %v2482_v18 = vpop.f32.mrb[104].mxu1  ;;  %v1811_v49 = vpop.f32.mrb[90].mxu0 }
 0x1d5   : > { %v10539_v25 = vadd.f32 %v2482_v18, %v10273_v32  ;;  %v10542_v30 = vadd.f32 %v10265_v58, %v1811_v49  ;;  %v2484_v14 = vpop.f32.mrb[105].mxu1  ;;  %v1813_v43 = vpop.f32.mrb[91].mxu0  ;;  %v13356_v32 = vld [vmem:[#allocation13_spill] sm:$0xff] }
 0x1d6   : > { %v2485_v1 = vpop.f32.mrb[106].mxu1 }
 0x1d7   : > { %13352 = vst [vmem:[#allocation88_spill] sm:$0xff] %v10539_v25  ;;  %v10545_v16 = vadd.f32 %v2485_v1, %v10278_v45  ;;  %8399 = vmatmul.mubr.bf16.gmra.mrb[196].mxu0 %v13354_v15  ;;  %v2487_v47 = vpop.f32.mrb[107].mxu1  ;;  %v13360_v25 = vld [vmem:[#allocation16_spill] sm:$0xff] }
 0x1d8   : > { %8402 = vmatprep.mubr.bf16.mxu0 %v13355_v10 }
 0x1d9   : > { %13353 = vst [vmem:[#allocation26_spill] sm:$0xff] %v10545_v16  ;;  %2697 = vmatmul.mubr.bf16.gmra.mrb[212].mxu1 %v10169_v26  ;;  %v13358_v16 = vld [vmem:[#allocation44_spill] sm:$0xff] }
 0x1da   : > { %v1816_v29 = vpop.f32.mrb[92].mxu0  ;;  %3250 = vmatprep.mubr.bf16.mxu1 %v13356_v32 }
 0x1db   : > { %v10552_v58 = vadd.f32 %v10249_v22, %v1816_v29  ;;  %v1818_v50 = vpop.f32.mrb[93].mxu0  ;;  %v13359_v22 = vld [vmem:[#allocation45_spill] sm:$0xff]  ;;  %v9018_v29 = vld [vmem:[%s9175_s28 + $0x28] sm:$0xff]  }
 0x1dc   : > { %v2490_v18 = vpop.f32.mrb[108].mxu1  ;;  %v1819_v49 = vpop.f32.mrb[94].mxu0 }
 0x1dd   : > { %v10555_v45 = vadd.f32 %v2490_v18, %v10292_v7  ;;  %v10558_v14 = vadd.f32 %v10262_v34, %v1819_v49  ;;  %v2492_v47 = vpop.f32.mrb[109].mxu1  ;;  %v1821_v43 = vpop.f32.mrb[95].mxu0 }
 0x1de   : > { %v2493_v1 = vpop.f32.mrb[110].mxu1 }
 0x1df   : > { %v10561_v26 = vadd.f32 %v2493_v1, %v10298_v35  ;;  %8403 = vmatmul.mubr.bf16.gmra.mrb[200].mxu0 %v13358_v16  ;;  %v2495_v32 = vpop.f32.mrb[111].mxu1 }
 0x1e0   : > { %8406 = vmatprep.mubr.bf16.mxu0 %v13359_v22 }
 0x1e1   : > { %13357 = vst [vmem:[#allocation27_spill] sm:$0xff] %v10561_v26  ;;  %3251 = vmatmul.mubr.bf16.vlgmr.msra.gmra.mrb[216].mxu1 %v9018_v29  ;;  %v13365_v26 = vld [vmem:[#allocation19_spill] sm:$0xff] }
 0x1e2   : > { %v1824_v50 = vpop.f32.mrb[96].mxu0  ;;  %3258 = vmatprep.mubr.bf16.mxu1 %v13360_v25  ;;  %8507 = vmatpush3.bf16.msra.mxu1 %v8905_v36  ;;  %v13363_v25 = vld [vmem:[#allocation48_spill] sm:$0xff] }
 0x1e3   : > { %v10568_v34 = vadd.f32 %v10281_v6, %v1824_v50  ;;  %v1826_v7 = vpop.f32.mrb[97].mxu0  ;;  %v13364_v6 = vld [vmem:[#allocation49_spill] sm:$0xff]  ;;  %v9019_v50 = vld [vmem:[%s9175_s28 + $0x30] sm:$0xff]  }
 0x1e4   : > { %v2498_v18 = vpop.f32.mrb[112].mxu1  ;;  %v1827_v49 = vpop.f32.mrb[98].mxu0 }
 0x1e5   : > { %v10571_v35 = vadd.f32 %v2498_v18, %v10317_v44  ;;  %v10574_v47 = vadd.f32 %v10286_v3, %v1827_v49  ;;  %v2500_v43 = vpop.f32.mrb[113].mxu1  ;;  %v1829_v1 = vpop.f32.mrb[99].mxu0 }
 0x1e6   : > { %v2501_v32 = vpop.f32.mrb[114].mxu1  ;;  %v13366_v43 = vld [vmem:[#allocation91_spill] sm:$0xff] }
 0x1e7   : > { %13361 = vst [vmem:[#allocation29_spill] sm:$0xff] %v10571_v35  ;;  %v10577_v29 = vadd.f32 %v2501_v32, %v10322_v13  ;;  %8407 = vmatmul.mubr.bf16.gmra.mrb[204].mxu0 %v13363_v25  ;;  %v2503_v36 = vpop.f32.mrb[115].mxu1  ;;  %v13367_v35 = vld [vmem:[#allocation52_spill] sm:$0xff] }
 0x1e8   : > { %8410 = vmatprep.mubr.bf16.mxu0 %v13364_v6 }
 0x1e9   : > { %13362 = vst [vmem:[#allocation87_spill] sm:$0xff] %v10577_v29  ;;  %3259 = vmatmul.mubr.bf16.gmra.mrb[220].mxu1 %v9019_v50 }
 0x1ea   : > { %v1832_v7 = vpop.f32.mrb[100].mxu0  ;;  %3266 = vmatprep.mubr.bf16.mxu1 %v13365_v26 }
 0x1eb   : > { %v10584_v3 = vadd.f32 %v10275_v54, %v1832_v7  ;;  %v1834_v44 = vpop.f32.mrb[101].mxu0  ;;  %v8908_v54 = vld [vmem:[%s12885_s4 + $0x148] sm:$0xff]   ;;  %v13368_v7 = vld [vmem:[#allocation53_spill] sm:$0xff] }
 0x1ec   : > { %v2506_v18 = vpop.f32.mrb[116].mxu1  ;;  %v1835_v49 = vpop.f32.mrb[102].mxu0  ;;  %8508 = vmatprep.subr.bf16.mxu1 %v8908_v54 }
 0x1ed   : > { %v10587_v13 = vadd.f32 %v2506_v18, %v10341_v17  ;;  %v10590_v1 = vadd.f32 %v13366_v43, %v1835_v49  ;;  %v2508_v32 = vpop.f32.mrb[117].mxu1  ;;  %v1837_v36 = vpop.f32.mrb[103].mxu0  ;;  %v9020_v17 = vld [vmem:[%s9175_s28 + $0x3c] sm:$0xff]   ;;  %8509 = vmatpush3.bf16.msra.mxu1 %v8908_v54 }
 0x1ee   : > { %v2509_v29 = vpop.f32.mrb[118].mxu1  ;;  %v13369_v18 = vld [vmem:[#allocation22_spill] sm:$0xff] }
 0x1ef   : > { %v10593_v50 = vadd.f32 %v2509_v29, %v10346_v2  ;;  %8411 = vmatmul.mubr.bf16.gmra.mrb[208].mxu0 %v13367_v35  ;;  %v2511_v26 = vpop.f32.mrb[119].mxu1 }
 0x1f0   : > { %8414 = vmatprep.mubr.bf16.mxu0 %v13368_v7 }
 0x1f1   : > { %3267 = vmatmul.mubr.bf16.gmra.mrb[224].mxu1 %v9020_v17 }
 0x1f2   : > { %v1840_v44 = vpop.f32.mrb[104].mxu0  ;;  %3274 = vmatprep.mubr.bf16.mxu1 %v13369_v18  ;;  %v13370_v18 = vld [vmem:[#allocation55_spill] sm:$0xff] }
 0x1f3   : > { %v10603_v2 = vadd.f32 %v10300_v33, %v1840_v44  ;;  %v1842_v29 = vpop.f32.mrb[105].mxu0  ;;  %v9021_v33 = vld [vmem:[%s9175_s28 + $0x44] sm:$0xff]  }
 0x1f4   : > { %v2514_v49 = vpop.f32.mrb[120].mxu1  ;;  %v1843_v43 = vpop.f32.mrb[106].mxu0  ;;  %v13371_v29 = vld [vmem:[#allocation25_spill] sm:$0xff] }
 0x1f5   : > { %v10606_v32 = vadd.f32 %v2514_v49, %v10365_v27  ;;  %v10609_v36 = vadd.f32 %v10307_v61, %v1843_v43  ;;  %v2516_v26 = vpop.f32.mrb[121].mxu1  ;;  %v1845_v17 = vpop.f32.mrb[107].mxu0 }
 0x1f6   : > { %v2517_v7 = vpop.f32.mrb[122].mxu1 }
 0x1f7   : > { %v10612_v35 = vadd.f32 %v2517_v7, %v10370_v53  ;;  %8415 = vmatmul.mubr.bf16.gmra.mrb[212].mxu0 %v13370_v18  ;;  %v2519_v54 = vpop.f32.mrb[123].mxu1  ;;  %v8906_v53 = vld [vmem:[%s12885_s4 + $0xc0] sm:$0xff]  }
 0x1f8   : > { %8434 = vmatprep.mubr.bf16.mxu0 %v13273_v37 }
 0x1f9   : > { %3275 = vmatmul.mubr.bf16.gmra.mrb[228].mxu1 %v9021_v33 }
 0x1fa   : > { %v1848_v44 = vpop.f32.mrb[108].mxu0  ;;  %3282 = vmatprep.mubr.bf16.mxu1 %v13371_v29  ;;  %v13372_v29 = vld [vmem:[#allocation28_spill] sm:$0xff] }
 0x1fb   : > { %v10619_v27 = vadd.f32 %v10295_v42, %v1848_v44  ;;  %v1850_v61 = vpop.f32.mrb[109].mxu0  ;;  %v9022_v44 = vld [vmem:[%s9175_s28 + $0x50] sm:$0xff]  }
 0x1fc   : > { %v2522_v49 = vpop.f32.mrb[124].mxu1  ;;  %v1851_v43 = vpop.f32.mrb[110].mxu0 }
 0x1fd   : > { %v10625_v7 = vadd.f32 %v2522_v49, %v10386_v55  ;;  %v10628_v37 = vadd.f32 %v10305_v19, %v1851_v43  ;;  %v2524_v26 = vpop.f32.mrb[125].mxu1  ;;  %v1853_v17 = vpop.f32.mrb[111].mxu0  ;;  %v8907_v55 = vld [vmem:[%s12885_s4 + $0xc8] sm:$0xff]  }
 0x1fe   : > { %v2525_v54 = vpop.f32.mrb[126].mxu1 }
 0x1ff   : > { %v10631_v42 = vadd.f32 %v2525_v54, %v10391_v4  ;;  %8435 = vmatmul.mubr.bf16.vlgmr.msra.gmra.mrb[216].mxu0 %v13277_v8  ;;  %v2527_v33 = vpop.f32.mrb[127].mxu1 }
 0x200   : > { %8438 = vmatprep.mubr.bf16.mxu0 %v13279_v52  ;;  %5318 = vmatpush1.bf16.msra.mxu0 %v8906_v53  ;;  %v8909_v52 = vld [vmem:[%s12885_s4 + $0xd0] sm:$0xff]   ;;  %v13373_v53 = vld [vmem:[#allocation3_spill] sm:$0xff] }
 0x201   : > { %3283 = vmatmul.mubr.bf16.gmra.mrb[232].mxu1 %v9022_v44  ;;  %5319 = vmatprep.subr.bf16.mxu0 %v13186_v24  ;;  %v13375_v44 = vld [vmem:[#allocation7_spill] sm:$0xff] }
 0x202   : > { %v1856_v19 = vpop.f32.mrb[112].mxu0  ;;  %3290 = vmatprep.mubr.bf16.mxu1 %v13372_v29  ;;  %v9023_v29 = vld [vmem:[%s9175_s28 + $0x58] sm:$0xff]  }
 0x203   : > { %v10642_v4 = vadd.f32 %v10324_v39, %v1856_v19  ;;  %v1858_v61 = vpop.f32.mrb[113].mxu0  ;;  %v13376_v19 = vld [vmem:[#allocation8_spill] sm:$0xff] }
 0x204   : > { %v2530_v8 = vpop.f32.mrb[128].mxu1  ;;  %v1859_v49 = vpop.f32.mrb[114].mxu0  ;;  %5320 = vmatpush1.bf16.msra.mxu0 %v8907_v55 }
 0x205   : > { %v10648_v43 = vadd.f32 %v2530_v8, %v10405_v12  ;;  %v10651_v26 = vadd.f32 %v13373_v53, %v1859_v49  ;;  %v2532_v17 = vpop.f32.mrb[129].mxu1  ;;  %v1861_v54 = vpop.f32.mrb[115].mxu0  ;;  %5321 = vmatprep.subr.bf16.mxu0 %v13186_v24  ;;  %v8910_v12 = vld [vmem:[%s12885_s4 + $0xd8] sm:$0xff]   ;;  %v13377_v8 = vld [vmem:[#allocation31_spill] sm:$0xff]  ;;  %v13378_v49 = vld [vmem:[#allocation2_spill] sm:$0xff] }
 0x206   : > { %v2533_v39 = vpop.f32.mrb[130].mxu1 }
 0x207   : > { %v10655_v33 = vadd.f32 %v2533_v39, %v10411_v23  ;;  %8439 = vmatmul.mubr.bf16.gmra.mrb[220].mxu0 %v13375_v44  ;;  %v2535_v55 = vpop.f32.mrb[131].mxu1  ;;  %v13379_v44 = vld [vmem:[#allocation92_spill] sm:$0xff] }
 0x208   : > { %8442 = vmatprep.mubr.bf16.mxu0 %v13376_v19  ;;  %5322 = vmatpush1.bf16.msra.mxu0 %v8909_v52  ;;  %v8911_v52 = vld [vmem:[%s12885_s4 + $0xe0] sm:$0xff]  }
 0x209   : > { %13374 = vst [vmem:[#allocation33_spill] sm:$0xff] %v10655_v33  ;;  %3291 = vmatmul.mubr.bf16.gmra.mrb[236].mxu1 %v9023_v29  ;;  %5323 = vmatprep.subr.bf16.mxu0 %v13186_v24  ;;  %v9024_v33 = vld [vmem:[%s9175_s28 + $0x64] sm:$0xff]  }
 0x20a   : > { %v1864_v61 = vpop.f32.mrb[116].mxu0  ;;  %3298 = vmatprep.mubr.bf16.mxu1 %v13377_v8 }
 0x20b   : > { %v10666_v23 = vadd.f32 %v13378_v49, %v1864_v61  ;;  %v1866_v53 = vpop.f32.mrb[117].mxu0  ;;  %v13382_v49 = vld [vmem:[#allocation9_spill] sm:$0xff] }
 0x20c   : > { %v2538_v17 = vpop.f32.mrb[132].mxu1  ;;  %v1867_v54 = vpop.f32.mrb[118].mxu0  ;;  %5324 = vmatpush1.bf16.msra.mxu0 %v8910_v12  ;;  %v13383_v53 = vld [vmem:[#allocation10_spill] sm:$0xff] }
 0x20d   : > { %v10672_v39 = vadd.f32 %v2538_v17, %v10421_v41  ;;  %v10675_v55 = vadd.f32 %v13379_v44, %v1867_v54  ;;  %v2540_v19 = vpop.f32.mrb[133].mxu1  ;;  %v1869_v29 = vpop.f32.mrb[119].mxu0  ;;  %5325 = vmatprep.subr.bf16.mxu0 %v13186_v24  ;;  %v8912_v41 = vld [vmem:[%s12885_s4 + $0xe8] sm:$0xff]   ;;  %v8913_v17 = vld [vmem:[%s12885_s4 + $0x150] sm:$0xff]   ;;  %v13385_v44 = vld [vmem:[#allocation93_spill] sm:$0xff] }
 0x20e   : > { %v2541_v61 = vpop.f32.mrb[134].mxu1  ;;  %v13384_v54 = vld [vmem:[#allocation36_spill] sm:$0xff]  ;;  %8510 = vmatprep.subr.bf16.mxu1 %v8913_v17 }
 0x20f   : > { %13380 = vst [vmem:[#allocation35_spill] sm:$0xff] %v10675_v55  ;;  %v10679_v8 = vadd.f32 %v2541_v61, %v10427_v48  ;;  %8443 = vmatmul.mubr.bf16.gmra.mrb[224].mxu0 %v13382_v49  ;;  %v2543_v12 = vpop.f32.mrb[135].mxu1  ;;  %8511 = vmatpush3.bf16.msra.mxu1 %v8913_v17  ;;  %v13388_v49 = vld [vmem:[#allocation5_spill] sm:$0xff] }
 0x210   : > { %8446 = vmatprep.mubr.bf16.mxu0 %v13383_v53  ;;  %5326 = vmatpush1.bf16.msra.mxu0 %v8911_v52 }
 0x211   : > { %13381 = vst [vmem:[#allocation50_spill] sm:$0xff] %v10679_v8  ;;  %3299 = vmatmul.mubr.bf16.gmra.mrb[240].mxu1 %v9024_v33  ;;  %5327 = vmatprep.subr.bf16.mxu0 %v13186_v24  ;;  %v13393_v8 = vld [vmem:[#allocation12_spill] sm:$0xff] }
 0x212   : > { %v1872_v48 = vpop.f32.mrb[120].mxu0  ;;  %3306 = vmatprep.mubr.bf16.mxu1 %v13384_v54 }
 0x213   : > { %v10693_v19 = vadd.f32 %v13385_v44, %v1872_v48  ;;  %v1874_v29 = vpop.f32.mrb[121].mxu0  ;;  %v13390_v48 = vld [vmem:[#allocation78_spill] sm:$0xff] }
 0x214   : > { %v2546_v33 = vpop.f32.mrb[136].mxu1  ;;  %v1875_v52 = vpop.f32.mrb[122].mxu0  ;;  %5328 = vmatpush1.bf16.msra.mxu0 %v8912_v41  ;;  %v13392_v29 = vld [vmem:[#allocation11_spill] sm:$0xff] }
 0x215   : > { %13386 = vst [vmem:[#allocation37_spill] sm:$0xff] %v10693_v19  ;;  %v10696_v61 = vadd.f32 %v2546_v33, %v10437_v46  ;;  %v10699_v12 = vadd.f32 %v13388_v49, %v1875_v52  ;;  %v2548_v53 = vpop.f32.mrb[137].mxu1  ;;  %v1877_v55 = vpop.f32.mrb[123].mxu0  ;;  %5329 = vmatprep.subr.bf16.mxu0 %v13186_v24  ;;  %v9025_v41 = vld [vmem:[%s9175_s28 + $0x6c] sm:$0xff]  }
 0x216   : > { %v2549_v54 = vpop.f32.mrb[138].mxu1  ;;  %v8914_v46 = vld [vmem:[%s12885_s4 + $0xf0] sm:$0xff]   ;;  %v13394_v33 = vld [vmem:[#allocation43_spill] sm:$0xff] }
 0x217   : > { %13387 = vst [vmem:[#allocation38_spill] sm:$0xff] %v10696_v61  ;;  %13389 = vst [vmem:[#allocation13_spill] sm:$0xff] %v10699_v12  ;;  %v10703_v44 = vadd.f32 %v2549_v54, %v13390_v48  ;;  %8447 = vmatmul.mubr.bf16.gmra.mrb[228].mxu0 %v13392_v29  ;;  %v2551_v19 = vpop.f32.mrb[139].mxu1  ;;  %v13395_v55 = vld [vmem:[#allocation4_spill] sm:$0xff]  ;;  %v13398_v48 = vld [vmem:[#allocation94_spill] sm:$0xff] }
 0x218   : > { %8450 = vmatprep.mubr.bf16.mxu0 %v13393_v8  ;;  %5330 = vmatpush1.bf16.msra.mxu0 %v8914_v46  ;;  %v13397_v8 = vld [vmem:[#allocation74_spill] sm:$0xff]  ;;  %v13400_v46 = vld [vmem:[#allocation15_spill] sm:$0xff] }
 0x219   : > { %13391 = vst [vmem:[#allocation44_spill] sm:$0xff] %v10703_v44  ;;  %3307 = vmatmul.mubr.bf16.gmra.mrb[244].mxu1 %v9025_v41  ;;  %5331 = vmatprep.subr.bf16.mxu0 %v13186_v24  ;;  %v13401_v61 = vld [vmem:[#allocation47_spill] sm:$0xff] }
 0x21a   : > { %v1880_v17 = vpop.f32.mrb[124].mxu0  ;;  %3314 = vmatprep.mubr.bf16.mxu1 %v13394_v33 }
 0x21b   : > { %v10713_v52 = vadd.f32 %v13395_v55, %v1880_v17  ;;  %v1882_v49 = vpop.f32.mrb[125].mxu0  ;;  %v13399_v17 = vld [vmem:[#allocation14_spill] sm:$0xff] }
 0x21c   : > { %v2554_v53 = vpop.f32.mrb[140].mxu1  ;;  %v1883_v54 = vpop.f32.mrb[126].mxu0  ;;  %v9026_v49 = vld [vmem:[%s9175_s28 + $0x78] sm:$0xff]  }
 0x21d   : > { %13396 = vst [vmem:[#allocation45_spill] sm:$0xff] %v10713_v52  ;;  %v10717_v19 = vadd.f32 %v2554_v53, %v13397_v8  ;;  %v10720_v29 = vadd.f32 %v13398_v48, %v1883_v54  ;;  %v2556_v41 = vpop.f32.mrb[141].mxu1  ;;  %v1885_v12 = vpop.f32.mrb[127].mxu0  ;;  %v13402_v53 = vld [vmem:[#allocation95_spill] sm:$0xff] }
 0x21e   : > { %v2557_v44 = vpop.f32.mrb[142].mxu1  ;;  %v13404_v41 = vld [vmem:[#allocation97_spill] sm:$0xff] }
 0x21f   : > { %v10723_v33 = vadd.f32 %v2557_v44, %v10459_v57  ;;  %8451 = vmatmul.mubr.bf16.gmra.mrb[232].mxu0 %v13399_v17  ;;  %v2559_v55 = vpop.f32.mrb[143].mxu1  ;;  %v8915_v57 = vld [vmem:[%s12885_s4 + $0xf8] sm:$0xff]  }
 0x220   : > { %8454 = vmatprep.mubr.bf16.mxu0 %v13400_v46  ;;  %5332 = vmatpush1.bf16.msra.mxu0 %v8915_v57 }
 0x221   : > { %3315 = vmatmul.mubr.bf16.gmra.mrb[248].mxu1 %v9026_v49  ;;  %5333 = vmatprep.subr.bf16.mxu0 %v13186_v24 }
 0x222   : > { %v1888_v52 = vpop.f32.mrb[128].mxu0  ;;  %3322 = vmatprep.mubr.bf16.mxu1 %v13401_v61 }
 0x223   : > { %v10730_v8 = vadd.f32 %v13402_v53, %v1888_v52  ;;  %v1890_v54 = vpop.f32.mrb[129].mxu0  ;;  %v13406_v53 = vld [vmem:[#allocation17_spill] sm:$0xff] }
 0x224   : > { %v2562_v12 = vpop.f32.mrb[144].mxu1  ;;  %v1891_v44 = vpop.f32.mrb[130].mxu0  ;;  %v13407_v54 = vld [vmem:[#allocation18_spill] sm:$0xff] }
 0x225   : > { %13403 = vst [vmem:[#allocation16_spill] sm:$0xff] %v10730_v8  ;;  %v10736_v48 = vadd.f32 %v2562_v12, %v10469_v0  ;;  %v10739_v17 = vadd.f32 %v13404_v41, %v1891_v44  ;;  %v2564_v55 = vpop.f32.mrb[145].mxu1  ;;  %v1893_v46 = vpop.f32.mrb[131].mxu0  ;;  %v9027_v8 = vld [vmem:[%s9175_s28 + $0x80] sm:$0xff]   ;;  %v13408_v12 = vld [vmem:[#allocation51_spill] sm:$0xff] }
 0x226   : > { %v2565_v61 = vpop.f32.mrb[146].mxu1  ;;  %v13409_v44 = vld [vmem:[#allocation6_spill] sm:$0xff] }
 0x227   : > { %13405 = vst [vmem:[#allocation48_spill] sm:$0xff] %v10739_v17  ;;  %v10743_v52 = vadd.f32 %v2565_v61, %v10475_v28  ;;  %v2567_v49 = vpop.f32.mrb[147].mxu1  ;;  %8455 = vmatmul.mubr.bf16.gmra.mrb[236].mxu0 %v13406_v53  ;;  %v13410_v61 = vld [vmem:[#allocation96_spill] sm:$0xff] }
 0x228   : > { %8458 = vmatprep.mubr.bf16.mxu0 %v13407_v54 }
 0x229   : > { %3323 = vmatmul.mubr.bf16.gmra.mrb[252].mxu1 %v9027_v8  ;;  %v8916_v8 = vld [vmem:[%s12885_s4 + $0x100] sm:$0xff]  }
 0x22a   : > { %v1896_v0 = vpop.f32.mrb[132].mxu0  ;;  %3330 = vmatprep.mubr.bf16.mxu1 %v13408_v12  ;;  %5334 = vmatpush1.bf16.msra.mxu0 %v8916_v8 }
 0x22b   : > { %v10750_v41 = vadd.f32 %v13409_v44, %v1896_v0  ;;  %v1898_v57 = vpop.f32.mrb[133].mxu0  ;;  %v13412_v44 = vld [vmem:[#allocation21_spill] sm:$0xff]  ;;  %5335 = vmatprep.subr.bf16.mxu0 %v13186_v24 }
 0x22c   : > { %v2570_v55 = vpop.f32.mrb[148].mxu1  ;;  %v1899_v46 = vpop.f32.mrb[134].mxu0 }
 0x22d   : > { %v10753_v28 = vadd.f32 %v2570_v55, %v10485_v60  ;;  %v10756_v49 = vadd.f32 %v13410_v61, %v1899_v46  ;;  %v2572_v53 = vpop.f32.mrb[149].mxu1  ;;  %v1901_v54 = vpop.f32.mrb[135].mxu0  ;;  %v9028_v60 = vld [vmem:[%s9175_s28 + $0x8c] sm:$0xff]   ;;  %v13413_v55 = vld [vmem:[#allocation54_spill] sm:$0xff] }
 0x22e   : > { %v2573_v12 = vpop.f32.mrb[150].mxu1  ;;  %v13414_v46 = vld [vmem:[#allocation99_spill] sm:$0xff] }
 0x22f   : > { %13411 = vst [vmem:[#allocation49_spill] sm:$0xff] %v10756_v49  ;;  %v10762_v17 = vadd.f32 %v2573_v12, %v10491_v20  ;;  %v2575_v0 = vpop.f32.mrb[151].mxu1  ;;  %8459 = vmatmul.mubr.bf16.gmra.mrb[240].mxu0 %v13323_v62  ;;  %v13416_v62 = vld [vmem:[#allocation101_spill] sm:$0xff] }
 0x230   : > { %8462 = vmatprep.mubr.bf16.mxu0 %v13412_v44 }
 0x231   : > { %3331 = vmatmul.mubr.bf16.gmra.mrb[0].mxu1 %v9028_v60  ;;  %v8917_v60 = vld [vmem:[%s12885_s4 + $0x108] sm:$0xff]  }
 0x232   : > { %v1904_v57 = vpop.f32.mrb[136].mxu0  ;;  %3338 = vmatprep.mubr.bf16.mxu1 %v13413_v55  ;;  %5336 = vmatpush1.bf16.msra.mxu0 %v8917_v60  ;;  %v13423_v60 = vld [vmem:[#allocation100_spill] sm:$0xff] }
 0x233   : > { %v10770_v61 = vadd.f32 %v13414_v46, %v1904_v57  ;;  %v1906_v53 = vpop.f32.mrb[137].mxu0  ;;  %v8918_v57 = vld [vmem:[%s12885_s4 + $0x158] sm:$0xff]   ;;  %5337 = vmatprep.subr.bf16.mxu0 %v13186_v24 }
 0x234   : > { %v2578_v20 = vpop.f32.mrb[152].mxu1  ;;  %v1907_v54 = vpop.f32.mrb[138].mxu0  ;;  %8512 = vmatprep.subr.bf16.mxu1 %v8918_v57 }
 0x235   : > { %13415 = vst [vmem:[#allocation19_spill] sm:$0xff] %v10770_v61  ;;  %v10773_v12 = vadd.f32 %v2578_v20, %v10501_v51  ;;  %v10776_v0 = vadd.f32 %v13416_v62, %v1907_v54  ;;  %v2580_v8 = vpop.f32.mrb[153].mxu1  ;;  %v1909_v44 = vpop.f32.mrb[139].mxu0  ;;  %v13418_v51 = vld [vmem:[#allocation23_spill] sm:$0xff]  ;;  %v13419_v20 = vld [vmem:[#allocation24_spill] sm:$0xff]  ;;  %8513 = vmatpush3.bf16.msra.mxu1 %v8918_v57 }
 0x236   : > { %v2581_v55 = vpop.f32.mrb[154].mxu1  ;;  %v9029_v54 = vld [vmem:[%s9175_s28 + $0x94] sm:$0xff]   ;;  %v13421_v44 = vld [vmem:[#allocation98_spill] sm:$0xff] }
 0x237   : > { %13417 = vst [vmem:[#allocation91_spill] sm:$0xff] %v10776_v0  ;;  %v10785_v46 = vadd.f32 %v2581_v55, %v10507_v9  ;;  %v2583_v53 = vpop.f32.mrb[155].mxu1  ;;  %8463 = vmatmul.mubr.bf16.gmra.mrb[244].mxu0 %v13418_v51  ;;  %v13420_v8 = vld [vmem:[#allocation57_spill] sm:$0xff]  ;;  %v8919_v57 = vld [vmem:[%s12885_s4 + $0x110] sm:$0xff]  }
 0x238   : > { %8466 = vmatprep.mubr.bf16.mxu0 %v13419_v20  ;;  %5338 = vmatpush1.bf16.msra.mxu0 %v8919_v57  ;;  %v13429_v57 = vld [vmem:[#allocation77_spill] sm:$0xff] }
 0x239   : > { %3339 = vmatmul.mubr.bf16.gmra.mrb[4].mxu1 %v9029_v54  ;;  %5339 = vmatprep.subr.bf16.mxu0 %v13186_v24 }
 0x23a   : > { %v1912_v62 = vpop.f32.mrb[140].mxu0  ;;  %3346 = vmatprep.mubr.bf16.mxu1 %v13420_v8 }
 0x23b   : > { %v10792_v0 = vadd.f32 %v13421_v44, %v1912_v62  ;;  %v1914_v61 = vpop.f32.mrb[141].mxu0  ;;  %v13425_v44 = vld [vmem:[#allocation59_spill] sm:$0xff] }
 0x23c   : > { %v2586_v9 = vpop.f32.mrb[156].mxu1  ;;  %v1915_v55 = vpop.f32.mrb[142].mxu0 }
 0x23d   : > { %13422 = vst [vmem:[#allocation22_spill] sm:$0xff] %v10792_v0  ;;  %v10796_v53 = vadd.f32 %v2586_v9, %v10520_v63  ;;  %v10799_v51 = vadd.f32 %v13423_v60, %v1915_v55  ;;  %v2588_v20 = vpop.f32.mrb[157].mxu1  ;;  %v1917_v54 = vpop.f32.mrb[143].mxu0  ;;  %v9030_v63 = vld [vmem:[%s9175_s28 + $0xa0] sm:$0xff]   ;;  %v13426_v9 = vld [vmem:[#allocation75_spill] sm:$0xff] }
 0x23e   : > { %v2589_v49 = vpop.f32.mrb[158].mxu1 }
 0x23f   : > { %13424 = vst [vmem:[#allocation55_spill] sm:$0xff] %v10799_v51  ;;  %v10805_v62 = vadd.f32 %v2589_v49, %v10526_v31  ;;  %v2591_v61 = vpop.f32.mrb[159].mxu1  ;;  %8467 = vmatmul.mubr.bf16.gmra.mrb[248].mxu0 %v13338_v56  ;;  %v13427_v49 = vld [vmem:[#allocation72_spill] sm:$0xff] }
 0x240   : > { %8470 = vmatprep.mubr.bf16.mxu0 %v13339_v40 }
 0x241   : > { %3347 = vmatmul.mubr.bf16.gmra.mrb[8].mxu1 %v9030_v63 }
 0x242   : > { %v8348_v8 = vpop.f32.mrb[144].mxu0  ;;  %3354 = vmatprep.mubr.bf16.mxu1 %v13425_v44  ;;  %v13431_v44 = vld [vmem:[#allocation34_spill] sm:$0xff] }
 0x243   : > { %v10813_v55 = vadd.f32 %v8348_v8, %v13426_v9  ;;  %v2739_v60 = vpop.f32.mrb[145].mxu0  ;;  %v8920_v8 = vld [vmem:[%s12885_s4 + $0x118] sm:$0xff]  }
 0x244   : > { %v2594_v31 = vpop.f32.mrb[160].mxu1  ;;  %v10816_v20 = vadd.f32 %v2739_v60, %v13427_v49  ;;  %v8349_v56 = vpop.f32.mrb[146].mxu0  ;;  %5340 = vmatpush1.bf16.msra.mxu0 %v8920_v8 }
 0x245   : > { %v10819_v40 = vadd.f32 %v2594_v31, %v10536_v11  ;;  %v2596_v54 = vpop.f32.mrb[161].mxu1  ;;  %v10822_v61 = vadd.f32 %v8349_v56, %v13429_v57  ;;  %v2742_v63 = vpop.f32.mrb[147].mxu0  ;;  %v13433_v11 = vld [vmem:[#allocation30_spill] sm:$0xff]  ;;  %v9031_v31 = vld [vmem:[%s9175_s28 + $0xa8] sm:$0xff]   ;;  %5341 = vmatprep.subr.bf16.mxu0 %v13186_v24  ;;  %v13434_v56 = vld [vmem:[#allocation60_spill] sm:$0xff] }
 0x246   : > { %13428 = vst [vmem:[#allocation25_spill] sm:$0xff] %v10816_v20  ;;  %v2597_v51 = vpop.f32.mrb[162].mxu1  ;;  %v10825_v0 = vadd.f32 %v2742_v63, %v13431_v44  ;;  %v13435_v54 = vld [vmem:[#allocation83_spill] sm:$0xff] }
 0x247   : > { %13430 = vst [vmem:[#allocation28_spill] sm:$0xff] %v10822_v61  ;;  %v10831_v9 = vadd.f32 %v2597_v51, %v10542_v30  ;;  %v2599_v60 = vpop.f32.mrb[163].mxu1  ;;  %8471 = vmatmul.mubr.bf16.gmra.mrb[252].mxu0 %v13343_v5  ;;  %v13436_v51 = vld [vmem:[#allocation32_spill] sm:$0xff] }
 0x248   : > { %13432 = vst [vmem:[#allocation3_spill] sm:$0xff] %v10825_v0  ;;  %8474 = vmatprep.mubr.bf16.mxu0 %v13433_v11  ;;  %v13437_v11 = vld [vmem:[#allocation41_spill] sm:$0xff] }
 0x249   : > { %3355 = vmatmul.mubr.bf16.gmra.mrb[12].mxu1 %v9031_v31 }
 0x24a   : > { %v8352_v49 = vpop.f32.mrb[148].mxu0  ;;  %3362 = vmatprep.mubr.bf16.mxu1 %v13434_v56  ;;  %v13439_v56 = vld [vmem:[#allocation40_spill] sm:$0xff] }
 0x24b   : > { %v10839_v57 = vadd.f32 %v8352_v49, %v13435_v54  ;;  %v2755_v63 = vpop.f32.mrb[149].mxu0  ;;  %v8921_v49 = vld [vmem:[%s12885_s4 + $0x120] sm:$0xff]  }
 0x24c   : > { %v2602_v30 = vpop.f32.mrb[164].mxu1  ;;  %v10842_v44 = vadd.f32 %v2755_v63, %v13436_v51  ;;  %v8353_v5 = vpop.f32.mrb[150].mxu0  ;;  %5342 = vmatpush1.bf16.msra.mxu0 %v8921_v49  ;;  %v13442_v51 = vld [vmem:[#allocation20_spill] sm:$0xff]  ;;  %v13444_v49 = vld [vmem:[#allocation39_spill] sm:$0xff] }
 0x24d   : > { %v10845_v60 = vadd.f32 %v2602_v30, %v10552_v58  ;;  %v2604_v8 = vpop.f32.mrb[165].mxu1  ;;  %v10848_v31 = vadd.f32 %v8353_v5, %v13437_v11  ;;  %v2758_v0 = vpop.f32.mrb[151].mxu0  ;;  %v9032_v58 = vld [vmem:[%s9175_s28 + $0xb4] sm:$0xff]   ;;  %5343 = vmatprep.subr.bf16.mxu0 %v13186_v24 }
 0x24e   : > { %v2605_v61 = vpop.f32.mrb[166].mxu1  ;;  %v10851_v20 = vadd.f32 %v2758_v0, %v13439_v56  ;;  %v13441_v0 = vld [vmem:[#allocation61_spill] sm:$0xff] }
 0x24f   : > { %13438 = vst [vmem:[#allocation7_spill] sm:$0xff] %v10848_v31  ;;  %v10857_v54 = vadd.f32 %v2605_v61, %v10558_v14  ;;  %v2607_v63 = vpop.f32.mrb[167].mxu1  ;;  %8475 = vmatmul.mubr.bf16.gmra.mrb[0].mxu0 %v13348_v38  ;;  %v13443_v61 = vld [vmem:[#allocation86_spill] sm:$0xff] }
 0x250   : > { %13440 = vst [vmem:[#allocation8_spill] sm:$0xff] %v10851_v20  ;;  %8478 = vmatprep.mubr.bf16.mxu0 %v13349_v59 }
 0x251   : > { %3363 = vmatmul.mubr.bf16.gmra.mrb[16].mxu1 %v9032_v58 }
 0x252   : > { %v8356_v30 = vpop.f32.mrb[152].mxu0  ;;  %3370 = vmatprep.mubr.bf16.mxu1 %v13441_v0  ;;  %v13445_v0 = vld [vmem:[#allocation82_spill] sm:$0xff] }
 0x253   : > { %v10865_v5 = vadd.f32 %v8356_v30, %v13442_v51  ;;  %v2771_v8 = vpop.f32.mrb[153].mxu0 }
 0x254   : > { %v2610_v14 = vpop.f32.mrb[168].mxu1  ;;  %v10868_v11 = vadd.f32 %v2771_v8, %v13443_v61  ;;  %v8357_v38 = vpop.f32.mrb[154].mxu0  ;;  %v9033_v8 = vld [vmem:[%s9175_s28 + $0xbc] sm:$0xff]  }
 0x255   : > { %v10871_v59 = vadd.f32 %v2610_v14, %v10568_v34  ;;  %v2612_v56 = vpop.f32.mrb[169].mxu1  ;;  %v10874_v63 = vadd.f32 %v8357_v38, %v13444_v49  ;;  %v2774_v58 = vpop.f32.mrb[155].mxu0  ;;  %v13447_v14 = vld [vmem:[#allocation62_spill] sm:$0xff] }
 0x256   : > { %v2613_v20 = vpop.f32.mrb[170].mxu1  ;;  %v10877_v31 = vadd.f32 %v2774_v58, %v13445_v0  ;;  %v13448_v49 = vld [vmem:[#allocation42_spill] sm:$0xff] }
 0x257   : > { %v10880_v30 = vadd.f32 %v2613_v20, %v10574_v47  ;;  %v2615_v51 = vpop.f32.mrb[171].mxu1  ;;  %8479 = vmatmul.mubr.bf16.gmra.mrb[4].mxu0 %v13354_v15 }
 0x258   : > { %13446 = vst [vmem:[#allocation31_spill] sm:$0xff] %v10877_v31  ;;  %8482 = vmatprep.mubr.bf16.mxu0 %v13355_v10  ;;  %v13449_v10 = vld [vmem:[#allocation80_spill] sm:$0xff] }
 0x259   : > { %3371 = vmatmul.mubr.bf16.gmra.mrb[20].mxu1 %v9033_v8 }
 0x25a   : > { %v8360_v34 = vpop.f32.mrb[156].mxu0  ;;  %3378 = vmatprep.mubr.bf16.mxu1 %v13447_v14  ;;  %v13451_v14 = vld [vmem:[#allocation84_spill] sm:$0xff] }
 0x25b   : > { %v10887_v61 = vadd.f32 %v8360_v34, %v10523_v21  ;;  %v2787_v38 = vpop.f32.mrb[157].mxu0 }
 0x25c   : > { %v2618_v56 = vpop.f32.mrb[172].mxu1  ;;  %v10890_v58 = vadd.f32 %v2787_v38, %v13448_v49  ;;  %v8361_v47 = vpop.f32.mrb[158].mxu0  ;;  %v8923_v38 = vld [vmem:[%s12885_s4 + $0x160] sm:$0xff]  }
 0x25d   : > { %v10893_v20 = vadd.f32 %v2618_v56, %v10584_v3  ;;  %v2620_v15 = vpop.f32.mrb[173].mxu1  ;;  %v10896_v0 = vadd.f32 %v8361_v47, %v13449_v10  ;;  %v2790_v51 = vpop.f32.mrb[159].mxu0  ;;  %v8922_v3 = vld [vmem:[%s12885_s4 + $0x128] sm:$0xff]   ;;  %8514 = vmatprep.subr.bf16.mxu1 %v8923_v38 }
 0x25e   : > { %v2621_v8 = vpop.f32.mrb[174].mxu1  ;;  %v10899_v31 = vadd.f32 %v2790_v51, %v13451_v14  ;;  %v9034_v56 = vld [vmem:[%s9175_s28 + $0xc8] sm:$0xff]   ;;  %5344 = vmatpush1.bf16.msra.mxu0 %v8922_v3  ;;  %v13454_v15 = vld [vmem:[#allocation88_spill] sm:$0xff]  ;;  %8515 = vmatpush3.bf16.msra.mxu1 %v8923_v38 }
 0x25f   : > { %13450 = vst [vmem:[#allocation2_spill] sm:$0xff] %v10896_v0  ;;  %v10902_v21 = vadd.f32 %v2621_v8, %v10590_v1  ;;  %v2623_v34 = vpop.f32.mrb[175].mxu1  ;;  %8483 = vmatmul.mubr.bf16.gmra.mrb[8].mxu0 %v13358_v16  ;;  %v13452_v47 = vld [vmem:[#allocation63_spill] sm:$0xff]  ;;  %5345 = vmatprep.subr.bf16.mxu0 %v13186_v24  ;;  %v9035_v38 = vld [vmem:[%s9175_s28 + $0xd0] sm:$0xff]  }
 0x260   : > { %8486 = vmatprep.mubr.bf16.mxu0 %v13359_v22  ;;  %v13455_v34 = vld [vmem:[#allocation27_spill] sm:$0xff] }
 0x261   : > { %3379 = vmatmul.mubr.bf16.gmra.mrb[24].mxu1 %v9034_v56 }
 0x262   : > { %v8364_v49 = vpop.f32.mrb[160].mxu0  ;;  %3386 = vmatprep.mubr.bf16.mxu1 %v13452_v47 }
 0x263   : > { %v10915_v1 = vadd.f32 %v8364_v49, %v10555_v45  ;;  %v2803_v16 = vpop.f32.mrb[161].mxu0  ;;  %v13456_v49 = vld [vmem:[#allocation26_spill] sm:$0xff] }
 0x264   : > { %v2626_v22 = vpop.f32.mrb[176].mxu1  ;;  %v10919_v10 = vadd.f32 %v2803_v16, %v13454_v15  ;;  %v8365_v51 = vpop.f32.mrb[162].mxu0 }
 0x265   : > { %13453 = vst [vmem:[#allocation92_spill] sm:$0xff] %v10915_v1  ;;  %v10922_v8 = vadd.f32 %v2626_v22, %v10603_v2  ;;  %v2628_v14 = vpop.f32.mrb[177].mxu1  ;;  %v10925_v3 = vadd.f32 %v8365_v51, %v13455_v34  ;;  %v2806_v45 = vpop.f32.mrb[163].mxu0  ;;  %v8924_v2 = vld [vmem:[%s12885_s4 + $0x130] sm:$0xff]  }
 0x266   : > { %v2629_v56 = vpop.f32.mrb[178].mxu1  ;;  %v10928_v47 = vadd.f32 %v2806_v45, %v13456_v49  ;;  %v13457_v22 = vld [vmem:[#allocation64_spill] sm:$0xff]  ;;  %5346 = vmatpush1.bf16.msra.mxu0 %v8924_v2 }
 0x267   : > { %v10931_v1 = vadd.f32 %v2629_v56, %v10609_v36  ;;  %v2631_v0 = vpop.f32.mrb[179].mxu1  ;;  %8487 = vmatmul.mubr.bf16.gmra.mrb[12].mxu0 %v13363_v25  ;;  %5347 = vmatprep.subr.bf16.mxu0 %v13186_v24 }
 0x268   : > { %8490 = vmatprep.mubr.bf16.mxu0 %v13364_v6  ;;  %v13458_v0 = vld [vmem:[#allocation29_spill] sm:$0xff] }
 0x269   : > { %3387 = vmatmul.mubr.bf16.gmra.mrb[28].mxu1 %v9035_v38  ;;  %v8928_v38 = vld [vmem:[%s12885_s4 + $0x138] sm:$0xff]  }
 0x26a   : > { %v8368_v16 = vpop.f32.mrb[164].mxu0  ;;  %3394 = vmatprep.mubr.bf16.mxu1 %v13457_v22  ;;  %5348 = vmatpush1.bf16.msra.mxu0 %v8928_v38 }
 0x26b   : > { %v10941_v15 = vadd.f32 %v8368_v16, %v10587_v13  ;;  %v2819_v36 = vpop.f32.mrb[165].mxu0  ;;  %v13460_v13 = vld [vmem:[#allocation87_spill] sm:$0xff] }
 0x26c   : > { %v2634_v25 = vpop.f32.mrb[180].mxu1  ;;  %v10945_v6 = vadd.f32 %v2819_v36, %v13458_v0  ;;  %v8369_v51 = vpop.f32.mrb[166].mxu0  ;;  %v13461_v36 = vld [vmem:[#allocation52_spill] sm:$0xff]  ;;  %v13463_v0 = vld [vmem:[#allocation65_spill] sm:$0xff] }
 0x26d   : > { %v10948_v14 = vadd.f32 %v2634_v25, %v10619_v27  ;;  %v2636_v34 = vpop.f32.mrb[181].mxu1  ;;  %v10951_v45 = vadd.f32 %v8369_v51, %v10593_v50  ;;  %v2822_v56 = vpop.f32.mrb[167].mxu0  ;;  %v13462_v27 = vld [vmem:[#allocation53_spill] sm:$0xff] }
 0x26e   : > { %v2637_v49 = vpop.f32.mrb[182].mxu1  ;;  %v10954_v2 = vadd.f32 %v2822_v56, %v13460_v13  ;;  %v9036_v50 = vld [vmem:[%s9175_s28 + $0xdc] sm:$0xff]  }
 0x26f   : > { %13459 = vst [vmem:[#allocation9_spill] sm:$0xff] %v10951_v45  ;;  %v10960_v16 = vadd.f32 %v2637_v49, %v10628_v37  ;;  %v2639_v22 = vpop.f32.mrb[183].mxu1  ;;  %8491 = vmatmul.mubr.bf16.gmra.mrb[16].mxu0 %v13461_v36  ;;  %v8930_v37 = vld [vmem:[%s12885_s4 + $0x168] sm:$0xff]   ;;  %v13477_v45 = vld [vmem:[#allocation58_spill] sm:$0xff] }
 0x270   : > { %8494 = vmatprep.mubr.bf16.mxu0 %v13462_v27  ;;  %v10982_v27 = vld [vmem:[%s9514_s12 + $0x3c] sm:$0xff]   ;;  %8516 = vmatprep.subr.bf16.mxu1 %v8930_v37 }
 0x271   : > { %3395 = vmatmul.mubr.bf16.gmra.mrb[32].mxu1 %v9036_v50  ;;  %v10985_v50 = vld [vmem:[%s9514_s12 + $0x44] sm:$0xff]  }
 0x272   : > { %v8372_v25 = vpop.f32.mrb[168].mxu0  ;;  %3402 = vmatprep.mubr.bf16.mxu1 %v13463_v0  ;;  %8517 = vmatpush3.bf16.msra.mxu1 %v8930_v37  ;;  %v13469_v37 = vld [vmem:[#allocation66_spill] sm:$0xff] }
 0x273   : > { %v10967_v51 = vadd.f32 %v8372_v25, %v10625_v7  ;;  %v2835_v34 = vpop.f32.mrb[169].mxu0 }
 0x274   : > { %v2642_v56 = vpop.f32.mrb[184].mxu1  ;;  %v10973_v49 = vadd.f32 %v2835_v34, %v10606_v32  ;;  %v8373_v13 = vpop.f32.mrb[170].mxu0  ;;  %v13468_v34 = vld [vmem:[#allocation56_spill] sm:$0xff] }
 0x275   : > { %13464 = vst [vmem:[#allocation10_spill] sm:$0xff] %v10967_v51  ;;  %v10976_v38 = vadd.f32 %v2642_v56, %v10642_v4  ;;  %v2644_v22 = vpop.f32.mrb[185].mxu1  ;;  %v10979_v36 = vadd.f32 %v8373_v13, %v10631_v42  ;;  %v2838_v7 = vpop.f32.mrb[171].mxu0  ;;  %v8931_v42 = vld [vmem:[%s12885_s4 + $0x170] sm:$0xff]   ;;  %v9037_v56 = vld [vmem:[%s9175_s28 + $0xe4] sm:$0xff]   ;;  %v1313_v13 = vrot.slane %v10982_v27, 1 }
 0x276   : > { %13465 = vst [vmem:[#allocation36_spill] sm:$0xff] %v10973_v49  ;;  %v2645_v25 = vpop.f32.mrb[186].mxu1  ;;  %v10988_v0 = vadd.f32 %v2838_v7, %v10612_v35  ;;  %v1314_v35 = vrot.slane %v10985_v50, 1  ;;  %8518 = vmatprep.subr.bf16.mxu1 %v8931_v42 }
 0x277   : > { %13466 = vst [vmem:[#allocation93_spill] sm:$0xff] %v10979_v36  ;;  %v10991_v32 = vadd.f32 %v2645_v25, %v10651_v26  ;;  %v2647_v4 = vpop.f32.mrb[187].mxu1  ;;  %8495 = vmatmul.mubr.bf16.gmra.mrb[20].mxu0 %v13370_v18  ;;  %v11004_v26 = vld [vmem:[%s12885_s4 + $0x80] sm:$0xff]   ;;  %8519 = vmatpush3.bf16.msra.mxu1 %v8931_v42 }
 0x278   : > { %13467 = vst [vmem:[#allocation5_spill] sm:$0xff] %v10988_v0  ;;  %8498 = vmatprep.mubr.bf16.mxu0 %v13468_v34  ;;  %8586 = vmatprep.subr.bf16.mxu0 %v11004_v26  ;;  %v13474_v0 = vld [vmem:[#allocation33_spill] sm:$0xff] }
 0x279   : > { %3403 = vmatmul.mubr.bf16.gmra.mrb[36].mxu1 %v9037_v56  ;;  %v11015_v56 = vld [vmem:[%s9514_s12 + $0x4c] ss:$0 sps:$4 sm:$0x11]  }
 0x27a   : > { %v8376_v18 = vpop.f32.mrb[172].mxu0  ;;  %3410 = vmatprep.mubr.bf16.mxu1 %v13469_v37  ;;  %v13472_v37 = vld [vmem:[#allocation50_spill] sm:$0xff] }
 0x27b   : > { %v11008_v22 = vadd.f32 %v8376_v18, %v10672_v39  ;;  %v2851_v7 = vpop.f32.mrb[173].mxu0  ;;  %v1315_v18 = vsel %vm1217_vm0, %v1313_v13, %v1314_v35 }
 0x27c   : > { %v2650_v25 = vpop.f32.mrb[188].mxu1  ;;  %v11012_v4 = vadd.f32 %v2851_v7, %v10648_v43  ;;  %v8377_v34 = vpop.f32.mrb[174].mxu0  ;;  %v13476_v43 = vld [vmem:[#allocation35_spill] sm:$0xff] }
 0x27d   : > { %13470 = vst [vmem:[#allocation78_spill] sm:$0xff] %v11008_v22  ;;  %v11018_v36 = vadd.f32 %v2650_v25, %v10666_v23  ;;  %v2652_v51 = vpop.f32.mrb[189].mxu1  ;;  %v11021_v42 = vadd.f32 %v8377_v34, %v13472_v37  ;;  %v2854_v39 = vpop.f32.mrb[175].mxu0  ;;  %v1316_v23 = vrot.slane %v11015_v56, 1  ;;  %v9038_v25 = vld [vmem:[%s9175_s28 + $0xf0] sm:$0xff]   ;;  %v13478_v34 = vld [vmem:[#allocation67_spill] sm:$0xff] }
 0x27e   : > { %13471 = vst [vmem:[#allocation11_spill] sm:$0xff] %v11012_v4  ;;  %v2653_v22 = vpop.f32.mrb[190].mxu1  ;;  %v11025_v49 = vadd.f32 %v2854_v39, %v13474_v0  ;;  %v8932_v51 = vld [vmem:[%s12885_s4 + $0x178] sm:$0xff]  }
 0x27f   : > { %13473 = vst [vmem:[#allocation12_spill] sm:$0xff] %v11021_v42  ;;  %v11028_v7 = vadd.f32 %v2653_v22, %v13476_v43  ;;  %v2655_v4 = vpop.f32.mrb[191].mxu1  ;;  %8499 = vmatmul.mubr.bf16.gmra.mrb[24].mxu0 %v13477_v45  ;;  %8520 = vmatprep.subr.bf16.mxu1 %v8932_v51  ;;  %v13481_v43 = vld [vmem:[#allocation37_spill] sm:$0xff] }
 0x280   : > { %13475 = vst [vmem:[#allocation43_spill] sm:$0xff] %v11025_v49  ;;  %8502 = vmatprep.mubr.bf16.mxu0 %v1315_v18  ;;  %8521 = vmatpush3.bf16.msra.mxu1 %v8932_v51  ;;  %v13480_v4 = vld [vmem:[#allocation38_spill] sm:$0xff]  ;;  %v1317_v18 = vsel %vm1217_vm0, %v1314_v35, %v1316_v23  ;;  %v13483_v49 = vld [vmem:[#allocation13_spill] sm:$0xff] }
 0x281   : > { %3411 = vmatmul.mubr.bf16.gmra.mrb[40].mxu1 %v9038_v25  ;;  %5975 = vmatprep.subr.bf16.mxu1 %v13186_v24  ;;  %v9039_v35 = vld [vmem:[%s9175_s28 + $0xf8] sm:$0xff]  }
 0x282   : > { %v8380_v13 = vpop.f32.mrb[176].mxu0  ;;  %3418 = vmatprep.mubr.bf16.mxu1 %v13478_v34 }
 0x283   : > { %v11038_v0 = vadd.f32 %v8380_v13, %v10717_v19  ;;  %v2867_v22 = vpop.f32.mrb[177].mxu0 }
 0x284   : > { %v2658_v45 = vpop.f32.mrb[192].mxu1  ;;  %v11041_v37 = vadd.f32 %v2867_v22, %v13480_v4  ;;  %v8381_v39 = vpop.f32.mrb[178].mxu0 }
 0x285   : > { %13479 = vst [vmem:[#allocation4_spill] sm:$0xff] %v11038_v0  ;;  %v11046_v25 = vadd.f32 %v2658_v45, %v13481_v43  ;;  %v2660_v34 = vpop.f32.mrb[193].mxu1  ;;  %v11049_v42 = vadd.f32 %v8381_v39, %v10723_v33  ;;  %v2870_v19 = vpop.f32.mrb[179].mxu0  ;;  %v13482_v0 = vld [vmem:[#allocation44_spill] sm:$0xff] }
 0x286   : > { %v2661_v13 = vpop.f32.mrb[194].mxu1  ;;  %v11052_v51 = vadd.f32 %v2870_v19, %v13482_v0  ;;  %v13484_v45 = vld [vmem:[#allocation68_spill] sm:$0xff]  ;;  %v13486_v19 = vld [vmem:[#allocation45_spill] sm:$0xff] }
 0x287   : > { %v11055_v22 = vadd.f32 %v2661_v13, %v13483_v49  ;;  %v2663_v4 = vpop.f32.mrb[195].mxu1  ;;  %8503 = vmatmul.mubr.bf16.gmra.mrb[28].mxu0 %v1317_v18 }
 0x289   : > { %3419 = vmatmul.mubr.bf16.gmra.mrb[44].mxu1 %v9039_v35 }
 0x28a   : > { %v8384_v23 = vpop.f32.mrb[180].mxu0  ;;  %3426 = vmatprep.mubr.bf16.mxu1 %v13484_v45 }
 0x28b   : > { %v11060_v43 = vadd.f32 %v8384_v23, %v10753_v28  ;;  %v2883_v33 = vpop.f32.mrb[181].mxu0 }
 0x28c   : > { %v2666_v39 = vpop.f32.mrb[196].mxu1  ;;  %v11063_v34 = vadd.f32 %v2883_v33, %v10736_v48  ;;  %v8385_v0 = vpop.f32.mrb[182].mxu0  ;;  %v13488_v33 = vld [vmem:[#allocation69_spill] sm:$0xff] }
 0x28d   : > { %13485 = vst [vmem:[#allocation74_spill] sm:$0xff] %v11060_v43  ;;  %v11066_v49 = vadd.f32 %v2666_v39, %v13486_v19  ;;  %v2668_v13 = vpop.f32.mrb[197].mxu1  ;;  %v11069_v18 = vadd.f32 %v8385_v0, %v10762_v17  ;;  %v2886_v4 = vpop.f32.mrb[183].mxu0  ;;  %v9040_v43 = vld [vmem:[%s9175_s28 + $0x104] sm:$0xff]  }
 0x28e   : > { %v2669_v35 = vpop.f32.mrb[198].mxu1  ;;  %v11072_v45 = vadd.f32 %v2886_v4, %v10743_v52  ;;  %v13490_v13 = vld [vmem:[#allocation16_spill] sm:$0xff] }
 0x28f   : > { %13487 = vst [vmem:[#allocation94_spill] sm:$0xff] %v11069_v18  ;;  %v11075_v28 = vadd.f32 %v2669_v35, %v10720_v29  ;;  %v2671_v23 = vpop.f32.mrb[199].mxu1  ;;  %v9041_v18 = vld [vmem:[%s9175_s28 + $0x10c] sm:$0xff]  }
 0x291   : > { %3427 = vmatmul.mubr.bf16.gmra.mrb[48].mxu1 %v9040_v43 }
 0x292   : > { %v8388_v48 = vpop.f32.mrb[184].mxu0  ;;  %3434 = vmatprep.mubr.bf16.mxu1 %v13488_v33 }
 0x293   : > { %v11080_v39 = vadd.f32 %v8388_v48, %v10796_v53  ;;  %v2899_v17 = vpop.f32.mrb[185].mxu0  ;;  %v13491_v53 = vld [vmem:[#allocation48_spill] sm:$0xff] }
 0x294   : > { %v2674_v0 = vpop.f32.mrb[200].mxu1  ;;  %v11083_v19 = vadd.f32 %v2899_v17, %v10773_v12  ;;  %v8389_v52 = vpop.f32.mrb[186].mxu0  ;;  %v13492_v17 = vld [vmem:[#allocation70_spill] sm:$0xff] }
 0x295   : > { %13489 = vst [vmem:[#allocation14_spill] sm:$0xff] %v11080_v39  ;;  %v11086_v4 = vadd.f32 %v2674_v0, %v13490_v13  ;;  %v2676_v29 = vpop.f32.mrb[201].mxu1  ;;  %v11089_v35 = vadd.f32 %v8389_v52, %v10805_v62  ;;  %v2902_v43 = vpop.f32.mrb[187].mxu0 }
 0x296   : > { %v2677_v23 = vpop.f32.mrb[202].mxu1  ;;  %v11092_v33 = vadd.f32 %v2902_v43, %v10785_v46 }
 0x297   : > { %v11095_v48 = vadd.f32 %v2677_v23, %v13491_v53  ;;  %v2679_v39 = vpop.f32.mrb[203].mxu1 }
 0x299   : > { %3435 = vmatmul.mubr.bf16.gmra.mrb[52].mxu1 %v9041_v18 }
 0x29a   : > { %v8392_v12 = vpop.f32.mrb[188].mxu0  ;;  %3442 = vmatprep.mubr.bf16.mxu1 %v13492_v17 }
 0x29b   : > { %v11100_v0 = vadd.f32 %v8392_v12, %v10845_v60  ;;  %v2915_v62 = vpop.f32.mrb[189].mxu0  ;;  %v13495_v60 = vld [vmem:[#allocation49_spill] sm:$0xff] }
 0x29c   : > { %v2682_v52 = vpop.f32.mrb[204].mxu1  ;;  %v11103_v13 = vadd.f32 %v2915_v62, %v10819_v40  ;;  %v8393_v46 = vpop.f32.mrb[190].mxu0  ;;  %v13496_v62 = vld [vmem:[#allocation71_spill] sm:$0xff] }
 0x29d   : > { %13493 = vst [vmem:[#allocation15_spill] sm:$0xff] %v11100_v0  ;;  %v11106_v29 = vadd.f32 %v2682_v52, %v10750_v41  ;;  %v2684_v43 = vpop.f32.mrb[205].mxu1  ;;  %v11109_v39 = vadd.f32 %v8393_v46, %v10857_v54  ;;  %v2918_v18 = vpop.f32.mrb[191].mxu0  ;;  %v9042_v0 = vld [vmem:[%s9175_s28 + $0x118] sm:$0xff]  }
 0x29e   : > { %v2685_v23 = vpop.f32.mrb[206].mxu1  ;;  %v11112_v53 = vadd.f32 %v2918_v18, %v10831_v9  ;;  %v13499_v43 = vld [vmem:[#allocation19_spill] sm:$0xff] }
 0x29f   : > { %13494 = vst [vmem:[#allocation47_spill] sm:$0xff] %v11109_v39  ;;  %v11115_v12 = vadd.f32 %v2685_v23, %v13495_v60  ;;  %v2687_v17 = vpop.f32.mrb[207].mxu1  ;;  %v9043_v39 = vld [vmem:[%s9175_s28 + $0x120] sm:$0xff]  }
 0x2a1   : > { %3443 = vmatmul.mubr.bf16.gmra.mrb[56].mxu1 %v9042_v0 }
 0x2a2   : > { %v8396_v40 = vpop.f32.mrb[192].mxu0  ;;  %3450 = vmatprep.mubr.bf16.mxu1 %v13496_v62 }
 0x2a3   : > { %v11120_v41 = vadd.f32 %v8396_v40, %v10893_v20  ;;  %v2931_v54 = vpop.f32.mrb[193].mxu0  ;;  %v13502_v20 = vld [vmem:[#allocation91_spill] sm:$0xff] }
 0x2a4   : > { %v2690_v52 = vpop.f32.mrb[208].mxu1  ;;  %v11123_v46 = vadd.f32 %v2931_v54, %v10871_v59  ;;  %v8397_v9 = vpop.f32.mrb[194].mxu0  ;;  %v13503_v54 = vld [vmem:[#allocation73_spill] sm:$0xff] }
 0x2a5   : > { %13497 = vst [vmem:[#allocation95_spill] sm:$0xff] %v11120_v41  ;;  %v11126_v18 = vadd.f32 %v2690_v52, %v13499_v43  ;;  %v2692_v23 = vpop.f32.mrb[209].mxu1  ;;  %v11129_v60 = vadd.f32 %v8397_v9, %v10902_v21  ;;  %v2934_v0 = vpop.f32.mrb[195].mxu0 }
 0x2a6   : > { %13498 = vst [vmem:[#allocation97_spill] sm:$0xff] %v11123_v46  ;;  %v2693_v17 = vpop.f32.mrb[210].mxu1  ;;  %v11132_v62 = vadd.f32 %v2934_v0, %v10880_v30  ;;  %v13506_v23 = vld [vmem:[#allocation22_spill] sm:$0xff] }
 0x2a7   : > { %13500 = vst [vmem:[#allocation17_spill] sm:$0xff] %v11129_v60  ;;  %v11135_v40 = vadd.f32 %v2693_v17, %v13502_v20  ;;  %v2695_v41 = vpop.f32.mrb[211].mxu1 }
 0x2a8   : > { %13501 = vst [vmem:[#allocation18_spill] sm:$0xff] %v11132_v62 }
 0x2a9   : > { %3451 = vmatmul.mubr.bf16.gmra.mrb[60].mxu1 %v9043_v39 }
 0x2aa   : > { %v8400_v59 = vpop.f32.mrb[196].mxu0  ;;  %3458 = vmatprep.mubr.bf16.mxu1 %v13503_v54  ;;  %v13509_v54 = vld [vmem:[#allocation55_spill] sm:$0xff] }
 0x2ab   : > { %v11140_v52 = vadd.f32 %v8400_v59, %v10948_v14  ;;  %v2947_v21 = vpop.f32.mrb[197].mxu0 }
 0x2ac   : > { %v2698_v9 = vpop.f32.mrb[212].mxu1  ;;  %v11143_v43 = vadd.f32 %v2947_v21, %v10922_v8  ;;  %v8401_v30 = vpop.f32.mrb[198].mxu0  ;;  %v13510_v21 = vld [vmem:[#allocation76_spill] sm:$0xff] }
 0x2ad   : > { %13504 = vst [vmem:[#allocation51_spill] sm:$0xff] %v11140_v52  ;;  %v2699_v0 = vadd.f32 %v2698_v9, %v13506_v23  ;;  %v2700_v17 = vpop.f32.mrb[213].mxu1  ;;  %v11147_v41 = vadd.f32 %v8401_v30, %v10960_v16  ;;  %v2950_v39 = vpop.f32.mrb[199].mxu0  ;;  %v9044_v52 = vld [vmem:[%s9175_s28 + $0x12c] sm:$0xff]  }
 0x2ae   : > { %13505 = vst [vmem:[#allocation6_spill] sm:$0xff] %v11143_v43  ;;  %v2701_v20 = vpop.f32.mrb[214].mxu1  ;;  %v11150_v60 = vadd.f32 %v2950_v39, %v10931_v1 }
 0x2af   : > { %13507 = vst [vmem:[#allocation96_spill] sm:$0xff] %v11147_v41  ;;  %v2702_v14 = vadd.f32 %v2701_v20, %v13509_v54  ;;  %v2703_v59 = vpop.f32.mrb[215].mxu1 }
 0x2b0   : > { %13508 = vst [vmem:[#allocation21_spill] sm:$0xff] %v11150_v60 }
 0x2b1   : > { %3459 = vmatmul.mubr.bf16.gmra.mrb[64].mxu1 %v9044_v52 }
 0x2b2   : > { %v8404_v8 = vpop.f32.mrb[200].mxu0  ;;  %3466 = vmatprep.mubr.bf16.mxu1 %v13510_v21 }
 0x2b3   : > { %v11156_v9 = vadd.f32 %v8404_v8, %v11018_v36  ;;  %v2963_v23 = vpop.f32.mrb[201].mxu0  ;;  %v9045_v36 = vld [vmem:[%s9175_s28 + $0x134] sm:$0xff]   ;;  %s7862_s28 = sshll.u32 %s13809_s21, 7 }
 0x2b4   : > { %v11159_v16 = vadd.f32 %v2963_v23, %v10976_v38  ;;  %v8405_v30 = vpop.f32.mrb[202].mxu0  ;;  %v11161_v17 = vpop.f32.mrb[216].mxu1  ;;  %v13515_v38 = vld [vmem:[#allocation79_spill] sm:$0xff]  ;;  %s12765_s26 = scalar_lea.vmem %s12887_s6, %s7862_s28 }
 0x2b5   : > { %13511 = vst [vmem:[#allocation54_spill] sm:$0xff] %v11156_v9  ;;  %v11164_v1 = vadd.f32 %v8405_v30, %v11028_v7  ;;  %v2966_v39 = vpop.f32.mrb[203].mxu0  ;;  %v3254_v20 = vpop.f32.mrb[217].mxu1 }
 0x2b6   : > { %13512 = vst [vmem:[#allocation99_spill] sm:$0xff] %v11159_v16  ;;  %v11167_v52 = vadd.f32 %v2966_v39, %v10991_v32  ;;  %v11169_v54 = vpop.f32.mrb[218].mxu1 }
 0x2b7   : > { %13513 = vst [vmem:[#allocation101_spill] sm:$0xff] %v11164_v1  ;;  %v3257_v59 = vpop.f32.mrb[219].mxu1 }
 0x2b8   : > { %13514 = vst [vmem:[#allocation23_spill] sm:$0xff] %v11167_v52 }
 0x2b9   : > { %3467 = vmatmul.mubr.bf16.gmra.mrb[68].mxu1 %v9045_v36 }
 0x2ba   : > { %v8408_v8 = vpop.f32.mrb[204].mxu0  ;;  %3474 = vmatprep.mubr.bf16.mxu1 %v13515_v38  ;;  %v9046_v38 = vld [vmem:[%s9514_s12] sm:$0xff]  }
 0x2bb   : > { %v11174_v21 = vadd.f32 %v8408_v8, %v11066_v49  ;;  %v2979_v23 = vpop.f32.mrb[205].mxu0  ;;  %v13520_v8 = vld [vmem:[#allocation81_spill] sm:$0xff] }
 0x2bc   : > { %v11177_v7 = vadd.f32 %v2979_v23, %v11046_v25  ;;  %v8409_v30 = vpop.f32.mrb[206].mxu0  ;;  %v3260_v20 = vpop.f32.mrb[220].mxu1 }
 0x2bd   : > { %13516 = vst [vmem:[#allocation24_spill] sm:$0xff] %v11174_v21  ;;  %v11180_v32 = vadd.f32 %v8409_v30, %v11075_v28  ;;  %v2982_v39 = vpop.f32.mrb[207].mxu0  ;;  %v3262_v59 = vpop.f32.mrb[221].mxu1 }
 0x2be   : > { %13517 = vst [vmem:[#allocation57_spill] sm:$0xff] %v11177_v7  ;;  %v11183_v1 = vadd.f32 %v2982_v39, %v11055_v22  ;;  %v3263_v36 = vpop.f32.mrb[222].mxu1 }
 0x2bf   : > { %13518 = vst [vmem:[#allocation98_spill] sm:$0xff] %v11180_v32  ;;  %v3265_v9 = vpop.f32.mrb[223].mxu1 }
 0x2c0   : > { %13519 = vst [vmem:[#allocation100_spill] sm:$0xff] %v11183_v1 }
 0x2c1   : > { %3475 = vmatmul.mubr.bf16.gmra.mrb[72].mxu1 %v9046_v38 }
 0x2c2   : > { %v8412_v49 = vpop.f32.mrb[208].mxu0  ;;  %3482 = vmatprep.mubr.bf16.mxu1 %v13520_v8  ;;  %v4102_v8 = vlaneseq }
 0x2c3   : > { %v11188_v25 = vadd.f32 %v8412_v49, %v11106_v29  ;;  %v2995_v23 = vpop.f32.mrb[209].mxu0  ;;  %v9047_v49 = vld [vmem:[%s9514_s12 + $0x8] sm:$0xff]  }
 0x2c4   : > { %v11191_v28 = vadd.f32 %v2995_v23, %v11086_v4  ;;  %v8413_v30 = vpop.f32.mrb[210].mxu0  ;;  %v11193_v59 = vpop.f32.mrb[224].mxu1  ;;  %v13525_v23 = vld [vmem:[#allocation85_spill] sm:$0xff] }
 0x2c5   : > { %13521 = vst [vmem:[#allocation59_spill] sm:$0xff] %v11188_v25  ;;  %v11196_v22 = vadd.f32 %v8413_v30, %v11115_v12  ;;  %v2998_v9 = vpop.f32.mrb[211].mxu0  ;;  %v3270_v39 = vpop.f32.mrb[225].mxu1  ;;  %v4103_v25 = vshrl.u32 %v4102_v8, 7  ;;  %v13530_v8 = vld [vmem:[#allocation46_spill] sm:$0xff] }
 0x2c6   : > { %13522 = vst [vmem:[#allocation75_spill] sm:$0xff] %v11191_v28  ;;  %v11199_v38 = vadd.f32 %v2998_v9, %v11095_v48  ;;  %v11201_v32 = vpop.f32.mrb[226].mxu1 }
 0x2c7   : > { %13523 = vst [vmem:[#allocation72_spill] sm:$0xff] %v11196_v22  ;;  %v3273_v29 = vpop.f32.mrb[227].mxu1  ;;  %v4105_v21 = vadd.s32 16, %v4103_v25 }
 0x2c8   : > { %13524 = vst [vmem:[#allocation77_spill] sm:$0xff] %v11199_v38 }
 0x2c9   : > { %3483 = vmatmul.mubr.bf16.gmra.mrb[76].mxu1 %v9047_v49 }
 0x2ca   : > { %v8416_v4 = vpop.f32.mrb[212].mxu0  ;;  %3490 = vmatprep.mubr.bf16.mxu1 %v13525_v23  ;;  %v9048_v23 = vld [vmem:[%s9514_s12 + $0x14] sm:$0xff]  }
 0x2cb   : > { %v11205_v28 = vadd.f32 %v8416_v4, %v2699_v0  ;;  %v3011_v12 = vpop.f32.mrb[213].mxu0  ;;  %v7719_v4 = vadd.s32 4294967295, %v4105_v21 }
 0x2cc   : > { %v11208_v30 = vadd.f32 %v3011_v12, %v11126_v18  ;;  %v8417_v39 = vpop.f32.mrb[214].mxu0  ;;  %v3276_v48 = vpop.f32.mrb[228].mxu1 }
 0x2cd   : > { %13526 = vst [vmem:[#allocation34_spill] sm:$0xff] %v11205_v28  ;;  %v11210_v9 = vadd.f32 %v8417_v39, %v2702_v14  ;;  %v3014_v22 = vpop.f32.mrb[215].mxu0  ;;  %v3278_v38 = vpop.f32.mrb[229].mxu1  ;;  %v7717_v28 = vadd.s32 4294967295, %v4103_v25  ;;  %v11220_v14 = vld [vmem:[%s12884_s3] ss:$0 sm:$0xff] }
 0x2ce   : > { %13527 = vst [vmem:[#allocation30_spill] sm:$0xff] %v11208_v30  ;;  %v11213_v29 = vadd.f32 %v3014_v22, %v11135_v40  ;;  %v3279_v49 = vpop.f32.mrb[230].mxu1  ;;  %vm4243_vm2 = vcmp.lt.s32.totalorder %v7719_v4, 16 }
 0x2cf   : > { %13528 = vst [vmem:[#allocation60_spill] sm:$0xff] %v11210_v9  ;;  %v3281_v1 = vpop.f32.mrb[231].mxu1  ;;  %vm4165_vm3 = vcmp.ge.s32.totalorder %v7717_v28, 0 }
 0x2d0   : > { %13529 = vst [vmem:[#allocation83_spill] sm:$0xff] %v11213_v29  ;;  %v1160_v1 = vshll.u32 %v10982_v27, 16 }
 0x2d1   : > { %3491 = vmatmul.mubr.bf16.gmra.mrb[80].mxu1 %v9048_v23 }
 0x2d2   : > { %v8436_v0 = vpop.f32.mrb[216].mxu0  ;;  %3498 = vmatprep.mubr.bf16.mxu1 %v13530_v8 }
 0x2d3   : > { %v3582_v18 = vadd.f32 %v8436_v0, %v3260_v20  ;;  %v3573_v12 = vpop.f32.mrb[217].mxu0  ;;  %v13531_v0 = vld [vmem:[#allocation25_spill] sm:$0xff] }
 0x2d4   : > { %v3574_v40 = vadd.f32 %v3573_v12, %v11161_v17  ;;  %v8437_v22 = vpop.f32.mrb[218].mxu0  ;;  %v11223_v38 = vpop.f32.mrb[232].mxu1  ;;  %v13532_v12 = vld [vmem:[#allocation28_spill] sm:$0xff] }
 0x2d5   : > { %v3862_v39 = vadd.f32 %v3582_v18, %v10813_v55  ;;  %v3585_v23 = vadd.f32 %v8437_v22, %v3263_v36  ;;  %v3576_v21 = vpop.f32.mrb[219].mxu0  ;;  %v3286_v20 = vpop.f32.mrb[233].mxu1  ;;  %v13533_v55 = vld [vmem:[#allocation3_spill] sm:$0xff]  ;;  %v1158_v18 = vshrl.u32 %v10982_v27, 16  ;;  %v1162_v22 = vrot.slane %v1160_v1, 1 }
 0x2d6   : > { %v3860_v25 = vadd.f32 %v3574_v40, %v13531_v0  ;;  %v3577_v8 = vadd.f32 %v3576_v21, %v11169_v54  ;;  %v11229_v9 = vpop.f32.mrb[234].mxu1  ;;  %v9049_v20 = vld [vmem:[%s9514_s12 + $0x1c] sm:$0xff]   ;;  %v1165_v54 = vshll.u32 %v10985_v50, 16  ;;  %v9078_v0 = vmov 0.0  }
 0x2d7   : > { %v3941_v17 = vadd.f32 %v11220_v14, %v3862_v39  ;;  %v3863_v29 = vadd.f32 %v3585_v23, %v13532_v12  ;;  %v3289_v30 = vpop.f32.mrb[235].mxu1  ;;  %v7722_v28 = vsel %vm4243_vm2, 1.0, %v9078_v0  ;;  %v13534_v23 = vld [vmem:[#allocation89_spill] sm:$0xff]  ;;  %v1163_v41 = vor.u32 %v1162_v22, %v1158_v18 }
 0x2d8   : > { %v3939_v7 = vadd.f32 %v11220_v14, %v3860_v25  ;;  %v3861_v36 = vadd.f32 %v3577_v8, %v13533_v55  ;;  %v7721_v30 = vsel %vm4165_vm3, 1.0, %v9078_v0  ;;  %v1167_v46 = vrot.slane %v1165_v54, 1  ;;  %v13536_v54 = vld [vmem:[#allocation8_spill] sm:$0xff] }
 0x2d9   : > { %v3942_v40 = vadd.f32 %v11220_v14, %v3863_v29  ;;  %3499 = vmatmul.mubr.bf16.gmra.mrb[84].mxu1 %v9049_v20  ;;  %v4013_v25 = vmax.f32 %v3941_v17, 0.0  ;;  %v11250_v22 = vpack.c.bf16 %v9078_v0, %v7722_v28 }
 0x2da   : > { %v3940_v21 = vadd.f32 %v11220_v14, %v3861_v36  ;;  %v8440_v39 = vpop.f32.mrb[220].mxu0  ;;  %3506 = vmatprep.mubr.bf16.mxu1 %v13534_v23  ;;  %v4011_v1 = vmax.f32 %v3939_v7, 0.0 }
 0x2db   : > { %v4014_v8 = vmax.f32 %v3942_v40, 0.0  ;;  %v3598_v12 = vadd.f32 %v8440_v39, %v3276_v48  ;;  %v3589_v55 = vpop.f32.mrb[221].mxu0  ;;  %v9079_v39 = vmov 1.0  }
 0x2dc   : > { %v4012_v52 = vmax.f32 %v3940_v21, 0.0  ;;  %v3590_v29 = vadd.f32 %v3589_v55, %v11193_v59  ;;  %v8441_v20 = vpop.f32.mrb[222].mxu0  ;;  %v3292_v16 = vpop.f32.mrb[236].mxu1  ;;  %v13535_v21 = vld [vmem:[#allocation7_spill] sm:$0xff]  ;;  %v13537_v55 = vld [vmem:[#allocation90_spill] sm:$0xff] }
 0x2dd   : > { %v4318_v60 = vpack.c.bf16 %v4014_v8, %v4013_v25  ;;  %v3866_v36 = vadd.f32 %v3598_v12, %v10839_v57  ;;  %v3601_v43 = vadd.f32 %v8441_v20, %v3279_v49  ;;  %v3592_v4 = vpop.f32.mrb[223].mxu0  ;;  %v3294_v62 = vpop.f32.mrb[237].mxu1  ;;  %v1168_v25 = vsel %vm776_vm1, %v1163_v41, %v1167_v46 }
 0x2de   : > { %v4317_v23 = vpack.c.bf16 %v4012_v52, %v4011_v1  ;;  %v3864_v17 = vadd.f32 %v3590_v29, %v10842_v44  ;;  %v3593_v48 = vadd.f32 %v3592_v4, %v11201_v32  ;;  %v3295_v7 = vpop.f32.mrb[238].mxu1  ;;  %v11256_v44 = vpack.c.bf16 %v9079_v39, %v7721_v30 }
 0x2df   : > { %v11246_v40 = vmul.bf16 0.0|0.0, %v4318_v60  ;;  %v3945_v59 = vadd.f32 %v11220_v14, %v3866_v36  ;;  %v3867_v18 = vadd.f32 %v3601_v43, %v13535_v21  ;;  %v3297_v57 = vpop.f32.mrb[239].mxu1  ;;  %v9050_v60 = vld [vmem:[%s9514_s12 + $0x28] sm:$0xff]   ;;  %v1169_v43 = vshrl.u32 %v10985_v50, 16 }
 0x2e0   : > { %v11252_v49 = vmul.bf16 0.0|0.0, %v4317_v23  ;;  %v3943_v62 = vadd.f32 %v11220_v14, %v3864_v17  ;;  %v3865_v52 = vadd.f32 %v3593_v48, %v13536_v54  ;;  %v1173_v1 = vshll.u32 %v11015_v56, 16 }
 0x2e1   : > { %v3946_v32 = vadd.f32 %v11220_v14, %v3867_v18  ;;  %3507 = vmatmul.mubr.bf16.gmra.mrb[88].mxu1 %v9050_v60  ;;  %v4577_v0 = vshll.u32 %v11246_v40, 16  ;;  %v4017_v28 = vmax.f32 %v3945_v59, 0.0 }
 0x2e2   : > { %v3944_v8 = vadd.f32 %v11220_v14, %v3865_v52  ;;  %v8444_v12 = vpop.f32.mrb[224].mxu0  ;;  %3514 = vmatprep.mubr.bf16.mxu1 %v13537_v55  ;;  %v4572_v30 = vshll.u32 %v11252_v49, 16  ;;  %v4015_v29 = vmax.f32 %v3943_v62, 0.0  ;;  %v4570_v41 = vshrl.u32 %v11252_v49, 16 }
 0x2e3   : > { %v4018_v20 = vmax.f32 %v3946_v32, 0.0  ;;  %v3614_v36 = vadd.f32 %v8444_v12, %v3292_v16  ;;  %v3605_v4 = vpop.f32.mrb[225].mxu0  ;;  %v11269_v18 = vrot.slane %v4577_v0, 1  ;;  %v4931_v62 = vrot.slane %v11252_v49, 1 }
 0x2e4   : > { %v4016_v23 = vmax.f32 %v3944_v8, 0.0  ;;  %v3606_v17 = vadd.f32 %v3605_v4, %v11223_v38  ;;  %v8445_v48 = vpop.f32.mrb[226].mxu0  ;;  %v3300_v59 = vpop.f32.mrb[240].mxu1  ;;  %v4574_v21 = vrot.slane %v4572_v30, 1  ;;  %v1171_v4 = vor.u32 %v1169_v43, %v1167_v46 }
 0x2e5   : > { %v4320_v57 = vpack.c.bf16 %v4018_v20, %v4017_v28  ;;  %v3870_v54 = vadd.f32 %v3614_v36, %v10865_v5  ;;  %v3617_v56 = vadd.f32 %v8445_v48, %v3295_v7  ;;  %v3608_v52 = vpop.f32.mrb[227].mxu0  ;;  %v3302_v39 = vpop.f32.mrb[241].mxu1  ;;  %v13019_v28 = vrot.slane %v11246_v40, 1  ;;  %v9051_v36 = vld [vmem:[%s9514_s12 + $0x30] sm:$0xff]  }
 0x2e6   : > { %v4319_v16 = vpack.c.bf16 %v4016_v23, %v4015_v29  ;;  %v3868_v32 = vadd.f32 %v3606_v17, %v10868_v11  ;;  %v3609_v60 = vadd.f32 %v3608_v52, %v11229_v9  ;;  %v3303_v38 = vpop.f32.mrb[242].mxu1  ;;  %v4575_v8 = vor.u32 %v4574_v21, %v4570_v41  ;;  %v13539_v11 = vld [vmem:[#allocation31_spill] sm:$0xff] }
 0x2e7   : > { %v11276_v12 = vmul.bf16 %v11250_v22, %v4320_v57  ;;  %v3949_v0 = vadd.f32 %v11220_v14, %v3870_v54  ;;  %v3871_v5 = vadd.f32 %v3617_v56, %v10874_v63  ;;  %v3305_v7 = vpop.f32.mrb[243].mxu1  ;;  %v1175_v41 = vrot.slane %v1173_v1, 1 }
 0x2e8   : > { %v11282_v55 = vmul.bf16 %v11256_v44, %v4319_v16  ;;  %v3947_v30 = vadd.f32 %v11220_v14, %v3868_v32  ;;  %v3869_v29 = vadd.f32 %v3609_v60, %v13539_v11  ;;  %v11288_v9 = vsel %vm776_vm1, %v4575_v8, %v11269_v18 }
 0x2e9   : > { %13538 = vst [vmem:[#allocation32_spill] sm:$0xff] %v11276_v12  ;;  %v3950_v20 = vadd.f32 %v11220_v14, %v3871_v5  ;;  %3515 = vmatmul.mubr.bf16.gmra.mrb[92].mxu1 %v9051_v36  ;;  %v4592_v63 = vshll.u32 %v11276_v12, 16  ;;  %v4021_v23 = vmax.f32 %v3949_v0, 0.0  ;;  %v4596_v57 = vshrl.u32 %v11276_v12, 16 }
 0x2ea   : > { %v3948_v17 = vadd.f32 %v11220_v14, %v3869_v29  ;;  %v8448_v48 = vpop.f32.mrb[228].mxu0  ;;  %3522 = vmatprep.mubr.bf16.mxu1 %v1168_v25  ;;  %v4587_v21 = vshll.u32 %v11282_v55, 16  ;;  %v4019_v54 = vmax.f32 %v3947_v30, 0.0  ;;  %v4585_v39 = vshrl.u32 %v11282_v55, 16 }
 0x2eb   : > { %v4022_v56 = vmax.f32 %v3950_v20, 0.0  ;;  %v3621_v52 = vpop.f32.mrb[229].mxu0  ;;  %v4594_v16 = vrot.slane %v4592_v63, 1  ;;  %v11300_v1 = vsel %vm1217_vm0, %v4931_v62, %v13019_v28 }
 0x2ec   : > { %v4020_v32 = vmax.f32 %v3948_v17, 0.0  ;;  %v3308_v60 = vpop.f32.mrb[244].mxu1  ;;  %v3622_v8 = vadd.f32 %v3621_v52, %v3300_v59  ;;  %v8449_v46 = vpop.f32.mrb[230].mxu0  ;;  %v4589_v43 = vrot.slane %v4587_v21, 1  ;;  %13540 = vst [vmem:[#allocation41_spill] sm:$0xff] %v11300_v1 }
 0x2ed   : > { %v4322_v25 = vpack.c.bf16 %v4022_v56, %v4021_v23  ;;  %v3630_v0 = vadd.f32 %v8448_v48, %v3308_v60  ;;  %v3310_v5 = vpop.f32.mrb[245].mxu1  ;;  %v3624_v7 = vpop.f32.mrb[231].mxu0  ;;  %v4598_v30 = vor.u32 %v4596_v57, %v4594_v16  ;;  %v1176_v23 = vsel %vm776_vm1, %v1171_v4, %v1175_v41  ;;  %v13543_v56 = vld [vmem:[#allocation2_spill] sm:$0xff] }
 0x2ee   : > { %v4321_v11 = vpack.c.bf16 %v4020_v32, %v4019_v54  ;;  %v3872_v29 = vadd.f32 %v3622_v8, %v10890_v58  ;;  %v3311_v20 = vpop.f32.mrb[246].mxu1  ;;  %v3625_v36 = vadd.f32 %v3624_v7, %v3303_v38  ;;  %v4590_v63 = vor.u32 %v4589_v43, %v4585_v39  ;;  %v8933_v38 = vld [vmem:[%s12885_s4 + $0x88] sm:$0xff]  }
 0x2ef   : > { %v11304_v59 = vmul.bf16 %v11250_v22, %v4322_v25  ;;  %v3874_v17 = vadd.f32 %v3630_v0, %v10887_v61  ;;  %v3633_v21 = vadd.f32 %v8449_v46, %v3311_v20  ;;  %v3313_v62 = vpop.f32.mrb[247].mxu1  ;;  %v13544_v4 = vmov 0  ;;  %v8934_v46 = vld [vmem:[%s12885_s4 + $0x90] sm:$0xff]  }
 0x2f0   : > { %v11309_v48 = vmul.bf16 %v11256_v44, %v4321_v11  ;;  %v3951_v57 = vadd.f32 %v11220_v14, %v3872_v29  ;;  %v3873_v54 = vadd.f32 %v3625_v36, %v10899_v31  ;;  %v11314_v58 = vsel %vm776_vm1, %v4590_v63, %v4594_v16 }
 0x2f1   : > { %13541 = vst [vmem:[#allocation40_spill] sm:$0xff] %v11304_v59  ;;  %v3953_v61 = vadd.f32 %v11220_v14, %v3874_v17  ;;  %v3875_v52 = vadd.f32 %v3633_v21, %v13543_v56  ;;  %3523 = vmatmul.mubr.bf16.gmra.mrb[96].mxu1 %v10982_v27  ;;  %5349 = vmatprep.mubr.bf16.mxu0 %v11314_v58  ;;  %v13545_v4 = vsel %vm11325_vm5, 4294967295, %v13544_v4  ;;  %v11333_v39 = vsel %vm11325_vm5, %v4598_v30, 0 }
 0x2f2   : > { %13542 = vst [vmem:[#allocation61_spill] sm:$0xff] %v11309_v48  ;;  %13546 = vst [vmem:[#allocation20_spill] sm:$0xff] %v13545_v4  ;;  %v3952_v31 = vadd.f32 %v11220_v14, %v3873_v54  ;;  %v8452_v41 = vpop.f32.mrb[232].mxu0  ;;  %5350 = vmatmul.mubr.bf16.vlgmr.msra.gmra.mrb[32].mxu0 %v11282_v55  ;;  %3530 = vmatprep.mubr.bf16.mxu1 %v1176_v23  ;;  %v4934_v32 = vrot.slane %v11282_v55, 1  ;;  %v4935_v60 = vrot.slane %v11276_v12, 1  ;;  %v4602_v8 = vshll.u32 %v11309_v48, 16 }
 0x2f3   : > { %13547 = vst [vmem:[#allocation86_spill] sm:$0xff] %v11333_v39  ;;  %v3954_v27 = vadd.f32 %v11220_v14, %v3875_v52  ;;  %v3637_v16 = vpop.f32.mrb[233].mxu0  ;;  %5357 = vmatprep.mubr.bf16.mxu0 %v11333_v39  ;;  %8587 = vmatpush3.bf16.msra.mxu0 %v11004_v26  ;;  %v4023_v43 = vmax.f32 %v3951_v57, 0.0  ;;  %v4600_v7 = vshrl.u32 %v11309_v48, 16  ;;  %v4607_v30 = vshll.u32 %v11304_v59, 16 }
 0x2f4   : > { %v4024_v25 = vmax.f32 %v3952_v31, 0.0  ;;  %v3316_v0 = vpop.f32.mrb[248].mxu1  ;;  %v8453_v5 = vpop.f32.mrb[234].mxu0  ;;  %8588 = vmatprep.subr.bf16.mxu0 %v8933_v38  ;;  %v4025_v26 = vmax.f32 %v3953_v61, 0.0  ;;  %v4604_v63 = vrot.slane %v4602_v8, 1  ;;  %v8935_v61 = vld [vmem:[%s12885_s4 + $0x98] sm:$0xff]  }
 0x2f5   : > { %v4026_v11 = vmax.f32 %v3954_v27, 0.0  ;;  %v3638_v29 = vadd.f32 %v3637_v16, %v3316_v0  ;;  %v3318_v20 = vpop.f32.mrb[249].mxu1  ;;  %v3640_v36 = vpop.f32.mrb[235].mxu0  ;;  %v4609_v52 = vrot.slane %v4607_v30, 1  ;;  %v11354_v16 = vsel %vm1217_vm0, %v4934_v32, %v4935_v60  ;;  %v8938_v30 = vld [vmem:[%s12885_s4 + $0xa0] sm:$0xff]  }
 0x2f6   : > { %v4323_v17 = vpack.c.bf16 %v4024_v25, %v4023_v43  ;;  %v3319_v21 = vpop.f32.mrb[250].mxu1  ;;  %v4605_v56 = vor.u32 %v4604_v63, %v4600_v7  ;;  %13548 = vst [vmem:[#allocation39_spill] sm:$0xff] %v11354_v16  ;;  %v4937_v25 = vrot.slane %v11309_v48, 1  ;;  %v4611_v0 = vshrl.u32 %v11304_v59, 16 }
 0x2f7   : > { %v4324_v62 = vpack.c.bf16 %v4026_v11, %v4025_v26  ;;  %v3876_v23 = vadd.f32 %v3638_v29, %v10919_v10  ;;  %v3641_v57 = vadd.f32 %v3640_v36, %v3319_v21  ;;  %v3321_v54 = vpop.f32.mrb[251].mxu1  ;;  %8589 = vmatpush3.bf16.msra.mxu0 %v8933_v38 }
 0x2f8   : > { %8590 = vmatprep.subr.bf16.mxu0 %v8934_v46  ;;  %v11357_v10 = vmul.bf16 %v11256_v44, %v4323_v17  ;;  %v11362_v38 = vsel %vm776_vm1, %v4605_v56, %v4609_v52  ;;  %v4613_v63 = vor.u32 %v4611_v0, %v4609_v52 }
 0x2f9   : > { %v3955_v31 = vadd.f32 %v11220_v14, %v3876_v23  ;;  %v3877_v27 = vadd.f32 %v3641_v57, %v10928_v47  ;;  %3531 = vmatmul.mubr.bf16.gmra.mrb[100].mxu1 %v10985_v50  ;;  %13550 = vst [vmem:[#allocation62_spill] sm:$0xff] %v11362_v38  ;;  %v5009_v50 = vsel %vm1217_vm0, %v4935_v60, 0  ;;  %v13551_v23 = vld [vmem:[#allocation92_spill] sm:$0xff] }
 0x2fa   : > { %13549 = vst [vmem:[#allocation82_spill] sm:$0xff] %v11357_v10  ;;  %8522 = vmatprep.mubr.bf16.mxu1 %v11354_v16  ;;  %5358 = vmatmul.mubr.bf16.gmra.mrb[36].mxu0 %v11276_v12  ;;  %v11364_v8 = vpop.f32.mrb[236].mxu0  ;;  %v4617_v17 = vshll.u32 %v11357_v10, 16 }
 0x2fb   : > { %v3956_v43 = vadd.f32 %v11220_v14, %v3877_v27  ;;  %5363 = vmatprep.mubr.bf16.mxu0 %v11362_v38  ;;  %v3653_v47 = vpop.f32.mrb[237].mxu0  ;;  %8591 = vmatpush3.bf16.msra.mxu0 %v8934_v46  ;;  %v4027_v26 = vmax.f32 %v3955_v31, 0.0  ;;  %v4938_v46 = vrot.slane %v11304_v59, 1  ;;  %v8936_v31 = vld [vmem:[%s12885_s4] sm:$0xff]   ;;  %v11387_v27 = vsel %vm11325_vm5, %v5009_v50, 0 }
 0x2fc   : > { %v3324_v32 = vpop.f32.mrb[252].mxu1  ;;  %v11371_v7 = vpop.f32.mrb[238].mxu0  ;;  %8592 = vmatprep.subr.bf16.mxu0 %v8935_v61  ;;  %13553 = vst [vmem:[#allocation80_spill] sm:$0xff] %v11387_v27 }
 0x2fd   : > { %v4028_v11 = vmax.f32 %v3956_v43, 0.0  ;;  %v3646_v29 = vadd.f32 %v8452_v41, %v3324_v32  ;;  %v3326_v20 = vpop.f32.mrb[253].mxu1  ;;  %v3656_v36 = vpop.f32.mrb[239].mxu0  ;;  %v11383_v41 = vmul.bf16 %v11250_v22, %v4324_v62  ;;  %v11399_v62 = vsel %vm11325_vm5, %v4613_v63, 0 }
 0x2fe   : > { %v3327_v60 = vpop.f32.mrb[254].mxu1  ;;  %13555 = vst [vmem:[#allocation63_spill] sm:$0xff] %v11399_v62  ;;  %v5012_v0 = vsel %vm1217_vm0, %v4938_v46, 0 }
 0x2ff   : > { %v4325_v21 = vpack.c.bf16 %v4028_v11, %v4027_v26  ;;  %v3878_v57 = vadd.f32 %v3646_v29, %v13551_v23  ;;  %v3649_v54 = vadd.f32 %v8453_v5, %v3327_v60  ;;  %v3329_v56 = vpop.f32.mrb[255].mxu1  ;;  %8593 = vmatpush3.bf16.msra.mxu0 %v8935_v61  ;;  %13552 = vst [vmem:[#allocation42_spill] sm:$0xff] %v11383_v41  ;;  %v4619_v61 = vrot.slane %v4617_v17, 1 }
 0x300   : > { %8594 = vmatprep.subr.bf16.mxu0 %v8938_v30  ;;  %v11393_v5 = vsel %vm1217_vm0, %v4937_v25, %v4938_v46  ;;  %v8937_v25 = vld [vmem:[%s12885_s4 + $0x8] sm:$0xff]   ;;  %v4940_v11 = vrot.slane %v11357_v10, 1  ;;  %v4615_v29 = vshrl.u32 %v11357_v10, 16  ;;  %v4622_v20 = vshll.u32 %v11383_v41, 16 }
 0x301   : > { %v3957_v52 = vadd.f32 %v11220_v14, %v3878_v57  ;;  %v3879_v43 = vadd.f32 %v3649_v54, %v10925_v3  ;;  %8523 = vmatmul.mubr.bf16.vlgmr.msra.gmra.mrb[104].mxu1 %v11387_v27  ;;  %13554 = vst [vmem:[#allocation84_spill] sm:$0xff] %v11393_v5  ;;  %v4941_v54 = vrot.slane %v11383_v41, 1 }
 0x302   : > { %8526 = vmatprep.mubr.bf16.mxu1 %v11393_v5  ;;  %5364 = vmatmul.mubr.bf16.gmra.mrb[40].mxu0 %v11309_v48  ;;  %v11401_v50 = vpop.f32.mrb[240].mxu0 }
 0x303   : > { %v3958_v32 = vadd.f32 %v11220_v14, %v3879_v43  ;;  %5371 = vmatprep.mubr.bf16.mxu0 %v11399_v62  ;;  %v11405_v3 = vpop.f32.mrb[241].mxu0  ;;  %5976 = vmatpush1.bf16.msra.mxu1 %v8936_v31  ;;  %v4029_v63 = vmax.f32 %v3957_v52, 0.0  ;;  %v4620_v31 = vor.u32 %v4619_v61, %v4615_v29  ;;  %v4624_v52 = vrot.slane %v4622_v20, 1 }
 0x304   : > { %v3332_v26 = vpop.f32.mrb[0].mxu1  ;;  %v11414_v60 = vpop.f32.mrb[242].mxu0  ;;  %5977 = vmatprep.subr.bf16.mxu1 %v13186_v24  ;;  %8595 = vmatpush3.bf16.msra.mxu0 %v8938_v30  ;;  %v8939_v30 = vld [vmem:[%s12885_s4 + $0x10] sm:$0xff]   ;;  %v4626_v29 = vshrl.u32 %v11383_v41, 16 }
 0x305   : > { %v4030_v17 = vmax.f32 %v3958_v32, 0.0  ;;  %v3654_v23 = vadd.f32 %v3653_v47, %v3332_v26  ;;  %v3334_v57 = vpop.f32.mrb[1].mxu1  ;;  %v11418_v56 = vpop.f32.mrb[243].mxu0  ;;  %v11426_v47 = vsel %vm11325_vm5, %v5012_v0, 0  ;;  %v11446_v0 = vmul.bf16 %v11256_v44, %v4325_v21 }
 0x306   : > { %v3335_v46 = vpop.f32.mrb[2].mxu1  ;;  %13556 = vst [vmem:[#allocation88_spill] sm:$0xff] %v11426_v47  ;;  %v5015_v26 = vsel %vm1217_vm0, %v4941_v54, 0 }
 0x307   : > { %v4326_v43 = vpack.c.bf16 %v4030_v17, %v4029_v63  ;;  %v3880_v28 = vadd.f32 %v3654_v23, %v10945_v6  ;;  %v3657_v5 = vadd.f32 %v3656_v36, %v3335_v46  ;;  %v3337_v27 = vpop.f32.mrb[3].mxu1  ;;  %5978 = vmatpush1.bf16.msra.mxu1 %v8937_v25  ;;  %v11436_v36 = vsel %vm1217_vm0, %v4940_v11, %v4941_v54 }
 0x308   : > { %5979 = vmatprep.subr.bf16.mxu1 %v13186_v24  ;;  %13558 = vst [vmem:[#allocation26_spill] sm:$0xff] %v11436_v36  ;;  %v11441_v27 = vsel %vm776_vm1, %v4620_v31, %v4624_v52  ;;  %13560 = vst [vmem:[#allocation29_spill] sm:$0xff] %v11446_v0 }
 0x309   : > { %v11430_v32 = vmul.bf16 %v11250_v22, %v4326_v43  ;;  %v3959_v61 = vadd.f32 %v11220_v14, %v3880_v28  ;;  %v3881_v6 = vadd.f32 %v3657_v5, %v10954_v2  ;;  %8527 = vmatmul.mubr.bf16.gmra.mrb[108].mxu1 %v11426_v47  ;;  %13559 = vst [vmem:[#allocation64_spill] sm:$0xff] %v11441_v27  ;;  %v8940_v5 = vld [vmem:[%s12885_s4 + $0x18] sm:$0xff]  }
 0x30a   : > { %8530 = vmatprep.mubr.bf16.mxu1 %v11436_v36  ;;  %5372 = vmatmul.mubr.bf16.gmra.mrb[44].mxu0 %v11304_v59  ;;  %v11443_v25 = vpop.f32.mrb[244].mxu0  ;;  %v4628_v43 = vor.u32 %v4626_v29, %v4624_v52  ;;  %v4943_v36 = vrot.slane %v11446_v0, 1  ;;  %v13562_v52 = vld [vmem:[#allocation9_spill] sm:$0xff] }
 0x30b   : > { %13557 = vst [vmem:[#allocation27_spill] sm:$0xff] %v11430_v32  ;;  %v3960_v28 = vadd.f32 %v11220_v14, %v3881_v6  ;;  %5377 = vmatprep.mubr.bf16.mxu0 %v11441_v27  ;;  %v11450_v2 = vpop.f32.mrb[245].mxu0  ;;  %5980 = vmatpush1.bf16.msra.mxu1 %v8939_v30  ;;  %v4031_v21 = vmax.f32 %v3959_v61, 0.0  ;;  %v4944_v57 = vrot.slane %v11430_v32, 1  ;;  %v11469_v61 = vsel %vm11325_vm5, %v5015_v26, 0 }
 0x30c   : > { %v3340_v11 = vpop.f32.mrb[4].mxu1  ;;  %v11457_v20 = vpop.f32.mrb[246].mxu0  ;;  %5981 = vmatprep.subr.bf16.mxu1 %v13186_v24  ;;  %13561 = vst [vmem:[#allocation87_spill] sm:$0xff] %v11469_v61 }
 0x30d   : > { %v4032_v63 = vmax.f32 %v3960_v28, 0.0  ;;  %v3662_v17 = vadd.f32 %v11364_v8, %v3340_v11  ;;  %v3342_v23 = vpop.f32.mrb[5].mxu1  ;;  %v11462_v46 = vpop.f32.mrb[247].mxu0  ;;  %v4632_v8 = vshll.u32 %v11446_v0, 16 }
 0x30e   : > { %v3343_v31 = vpop.f32.mrb[6].mxu1 }
 0x30f   : > { %v4327_v30 = vpack.c.bf16 %v4032_v63, %v4031_v21  ;;  %v3882_v54 = vadd.f32 %v3662_v17, %v10941_v15  ;;  %v3665_v6 = vadd.f32 %v11371_v7, %v3343_v31  ;;  %v3345_v47 = vpop.f32.mrb[7].mxu1  ;;  %5982 = vmatpush1.bf16.msra.mxu1 %v8940_v5  ;;  %v11477_v15 = vsel %vm1217_vm0, %v4943_v36, %v4944_v57  ;;  %v8941_v7 = vld [vmem:[%s12885_s4 + $0x20] sm:$0xff]  }
 0x310   : > { %5983 = vmatprep.subr.bf16.mxu1 %v13186_v24  ;;  %13563 = vst [vmem:[#allocation52_spill] sm:$0xff] %v11477_v15  ;;  %v11486_v47 = vsel %vm11325_vm5, %v4628_v43, 0  ;;  %v4637_v5 = vshll.u32 %v11430_v32, 16  ;;  %v4634_v63 = vrot.slane %v4632_v8, 1  ;;  %v5018_v43 = vsel %vm1217_vm0, %v4944_v57, 0 }
 0x311   : > { %v3961_v28 = vadd.f32 %v11220_v14, %v3882_v54  ;;  %v3883_v11 = vadd.f32 %v3665_v6, %v13562_v52  ;;  %8531 = vmatmul.mubr.bf16.gmra.mrb[112].mxu1 %v11469_v61  ;;  %13564 = vst [vmem:[#allocation53_spill] sm:$0xff] %v11486_v47  ;;  %v11510_v57 = vsel %vm11325_vm5, %v5018_v43, 0 }
 0x312   : > { %8534 = vmatprep.mubr.bf16.mxu1 %v11477_v15  ;;  %5378 = vmatmul.mubr.bf16.gmra.mrb[48].mxu0 %v11357_v10  ;;  %v11489_v26 = vpop.f32.mrb[248].mxu0  ;;  %v4630_v15 = vshrl.u32 %v11446_v0, 16  ;;  %v4639_v61 = vrot.slane %v4637_v5, 1  ;;  %13567 = vst [vmem:[#allocation56_spill] sm:$0xff] %v11510_v57  ;;  %v13569_v5 = vld [vmem:[#allocation5_spill] sm:$0xff] }
 0x313   : > { %v3962_v29 = vadd.f32 %v11220_v14, %v3883_v11  ;;  %5385 = vmatprep.mubr.bf16.mxu0 %v11486_v47  ;;  %v11493_v36 = vpop.f32.mrb[249].mxu0  ;;  %5984 = vmatpush1.bf16.msra.mxu1 %v8941_v7  ;;  %v4033_v23 = vmax.f32 %v3961_v28, 0.0  ;;  %v11504_v7 = vmul.bf16 %v11256_v44, %v4327_v30  ;;  %v13566_v47 = vld [vmem:[#allocation36_spill] sm:$0xff]  ;;  %v8942_v30 = vld [vmem:[%s12885_s4 + $0x28] sm:$0xff]  }
 0x314   : > { %v3348_v21 = vpop.f32.mrb[8].mxu1  ;;  %v11495_v17 = vpop.f32.mrb[250].mxu0  ;;  %5985 = vmatprep.subr.bf16.mxu1 %v13186_v24 }
 0x315   : > { %v4034_v31 = vmax.f32 %v3962_v29, 0.0  ;;  %v3670_v54 = vadd.f32 %v11405_v3, %v3348_v21  ;;  %v3350_v6 = vpop.f32.mrb[9].mxu1  ;;  %v11500_v52 = vpop.f32.mrb[251].mxu0  ;;  %13565 = vst [vmem:[#allocation65_spill] sm:$0xff] %v11504_v7  ;;  %v4635_v3 = vor.u32 %v4634_v63, %v4630_v15  ;;  %v4946_v63 = vrot.slane %v11504_v7, 1 }
 0x316   : > { %v3351_v11 = vpop.f32.mrb[10].mxu1 }
 0x317   : > { %v4328_v8 = vpack.c.bf16 %v4034_v31, %v4033_v23  ;;  %v3884_v10 = vadd.f32 %v3670_v54, %v13566_v47  ;;  %v3673_v28 = vadd.f32 %v11418_v56, %v3351_v11  ;;  %v3353_v29 = vpop.f32.mrb[11].mxu1  ;;  %v8943_v56 = vld [vmem:[%s12885_s4 + $0xa8] sm:$0xff]   ;;  %v11526_v15 = vsel %vm776_vm1, %v4635_v3, %v4639_v61  ;;  %5986 = vmatpush1.bf16.msra.mxu1 %v8942_v30 }
 0x318   : > { %13570 = vst [vmem:[#allocation50_spill] sm:$0xff] %v11526_v15  ;;  %v4641_v11 = vshrl.u32 %v11430_v32, 16  ;;  %8596 = vmatprep.subr.bf16.mxu0 %v8943_v56  ;;  %5987 = vmatprep.subr.bf16.mxu1 %v13186_v24  ;;  %v13686_v4 = vld [vmem:[#allocation53_spill] sm:$0xff] }
 0x319   : > { %v11513_v21 = vmul.bf16 %v11250_v22, %v4328_v8  ;;  %v3963_v6 = vadd.f32 %v11220_v14, %v3884_v10  ;;  %v3885_v27 = vadd.f32 %v3673_v28, %v13569_v5  ;;  %8535 = vmatmul.mubr.bf16.gmra.mrb[116].mxu1 %v11510_v57  ;;  %8597 = vmatpush3.bf16.msra.mxu0 %v8943_v56 }
 0x31a   : > { %5386 = vmatmul.mubr.bf16.gmra.mrb[52].mxu0 %v11383_v41  ;;  %v11528_v47 = vpop.f32.mrb[252].mxu0  ;;  %v4643_v30 = vor.u32 %v4641_v11, %v4639_v61  ;;  %v13572_v41 = vld [vmem:[#allocation10_spill] sm:$0xff]  ;;  %v8944_v61 = vld [vmem:[%s12885_s4 + $0x30] sm:$0xff]  }
 0x31b   : > { %13568 = vst [vmem:[#allocation66_spill] sm:$0xff] %v11513_v21  ;;  %v3964_v10 = vadd.f32 %v11220_v14, %v3885_v27  ;;  %5391 = vmatprep.mubr.bf16.mxu0 %v11526_v15  ;;  %v4947_v23 = vrot.slane %v11513_v21, 1  ;;  %v11534_v31 = vpop.f32.mrb[253].mxu0  ;;  %v4035_v43 = vmax.f32 %v3963_v6, 0.0  ;;  %5988 = vmatpush1.bf16.msra.mxu1 %v8944_v61 }
 0x31c   : > { %v3356_v54 = vpop.f32.mrb[12].mxu1  ;;  %v11537_v8 = vpop.f32.mrb[254].mxu0  ;;  %5989 = vmatprep.subr.bf16.mxu1 %v13186_v24 }
 0x31d   : > { %v4036_v28 = vmax.f32 %v3964_v10, 0.0  ;;  %v3678_v27 = vadd.f32 %v11401_v50, %v3356_v54  ;;  %v3358_v29 = vpop.f32.mrb[13].mxu1  ;;  %v11542_v3 = vsel %vm1217_vm0, %v4946_v63, %v4947_v23  ;;  %v5021_v5 = vsel %vm1217_vm0, %v4947_v23, 0  ;;  %v11545_v57 = vpop.f32.mrb[255].mxu0  ;;  %v13574_v54 = vld [vmem:[#allocation93_spill] sm:$0xff] }
 0x31e   : > { %13571 = vst [vmem:[#allocation33_spill] sm:$0xff] %v11542_v3  ;;  %v3359_v6 = vpop.f32.mrb[14].mxu1  ;;  %8538 = vmatprep.mubr.bf16.mxu1 %v11542_v3  ;;  %v11552_v50 = vsel %vm11325_vm5, %v5021_v5, 0  ;;  %v4647_v63 = vshll.u32 %v11504_v7, 16 }
 0x31f   : > { %v4329_v15 = vpack.c.bf16 %v4036_v28, %v4035_v43  ;;  %v3886_v59 = vadd.f32 %v3678_v27, %v13572_v41  ;;  %v3681_v10 = vadd.f32 %v11414_v60, %v3359_v6  ;;  %v3361_v62 = vpop.f32.mrb[15].mxu1  ;;  %13573 = vst [vmem:[#allocation35_spill] sm:$0xff] %v11552_v50  ;;  %v11564_v41 = vsel %vm11325_vm5, %v4643_v30, 0 }
 0x320   : > { %13575 = vst [vmem:[#allocation58_spill] sm:$0xff] %v11564_v41  ;;  %v4652_v62 = vshll.u32 %v11513_v21, 16  ;;  %v4649_v28 = vrot.slane %v4647_v63, 1  ;;  %v13577_v63 = vld [vmem:[#allocation11_spill] sm:$0xff] }
 0x321   : > { %v3965_v23 = vadd.f32 %v11220_v14, %v3886_v59  ;;  %v3887_v56 = vadd.f32 %v3681_v10, %v13574_v54  ;;  %8539 = vmatmul.mubr.bf16.gmra.mrb[120].mxu1 %v11552_v50 }
 0x322   : > { %5392 = vmatmul.mubr.bf16.gmra.mrb[56].mxu0 %v11446_v0  ;;  %v11567_v60 = vpop.f32.mrb[0].mxu0  ;;  %v4654_v50 = vrot.slane %v4652_v62, 1  ;;  %v8945_v62 = vld [vmem:[%s12885_s4 + $0x38] sm:$0xff]  }
 0x323   : > { %v3966_v59 = vadd.f32 %v11220_v14, %v3887_v56  ;;  %5399 = vmatprep.mubr.bf16.mxu0 %v11564_v41  ;;  %v11571_v43 = vpop.f32.mrb[1].mxu0  ;;  %v4037_v29 = vmax.f32 %v3965_v23, 0.0  ;;  %v4645_v56 = vshrl.u32 %v11504_v7, 16  ;;  %v11581_v41 = vmul.bf16 %v11256_v44, %v4329_v15  ;;  %5990 = vmatpush1.bf16.msra.mxu1 %v8945_v62 }
 0x324   : > { %v3364_v11 = vpop.f32.mrb[16].mxu1  ;;  %v11573_v27 = vpop.f32.mrb[2].mxu0  ;;  %5991 = vmatprep.subr.bf16.mxu1 %v13186_v24 }
 0x325   : > { %v4038_v5 = vmax.f32 %v3966_v59, 0.0  ;;  %v3686_v6 = vadd.f32 %v11450_v2, %v3364_v11  ;;  %v3366_v30 = vpop.f32.mrb[17].mxu1  ;;  %v11577_v10 = vpop.f32.mrb[3].mxu0  ;;  %13576 = vst [vmem:[#allocation67_spill] sm:$0xff] %v11581_v41  ;;  %v4650_v23 = vor.u32 %v4649_v28, %v4645_v56  ;;  %v13579_v11 = vld [vmem:[#allocation43_spill] sm:$0xff] }
 0x326   : > { %v3367_v54 = vpop.f32.mrb[18].mxu1 }
 0x327   : > { %v4330_v61 = vpack.c.bf16 %v4038_v5, %v4037_v29  ;;  %v3888_v0 = vadd.f32 %v3686_v6, %v13577_v63  ;;  %v3689_v3 = vadd.f32 %v11462_v46, %v3367_v54  ;;  %v3369_v48 = vpop.f32.mrb[19].mxu1  ;;  %v11595_v15 = vsel %vm776_vm1, %v4650_v23, %v4654_v50 }
 0x328   : > { %13580 = vst [vmem:[#allocation37_spill] sm:$0xff] %v11595_v15  ;;  %v4949_v46 = vrot.slane %v11581_v41, 1  ;;  %v4656_v6 = vshrl.u32 %v11513_v21, 16 }
 0x329   : > { %v11586_v59 = vmul.bf16 %v11250_v22, %v4330_v61  ;;  %v3967_v2 = vadd.f32 %v11220_v14, %v3888_v0  ;;  %v3889_v30 = vadd.f32 %v3689_v3, %v13579_v11 }
 0x32a   : > { %5400 = vmatmul.mubr.bf16.gmra.mrb[60].mxu0 %v11430_v32  ;;  %v11597_v29 = vpop.f32.mrb[4].mxu0 }
 0x32b   : > { %13578 = vst [vmem:[#allocation38_spill] sm:$0xff] %v11586_v59  ;;  %v3968_v48 = vadd.f32 %v11220_v14, %v3889_v30  ;;  %5405 = vmatprep.mubr.bf16.mxu0 %v11595_v15  ;;  %v4950_v0 = vrot.slane %v11586_v59, 1  ;;  %v11603_v3 = vpop.f32.mrb[5].mxu0  ;;  %v4039_v28 = vmax.f32 %v3967_v2, 0.0  ;;  %v4658_v15 = vor.u32 %v4656_v6, %v4654_v50 }
 0x32c   : > { %v3372_v5 = vpop.f32.mrb[20].mxu1  ;;  %v11606_v54 = vpop.f32.mrb[6].mxu0 }
 0x32d   : > { %v4040_v56 = vmax.f32 %v3968_v48, 0.0  ;;  %v3694_v61 = vadd.f32 %v11443_v25, %v3372_v5  ;;  %v3374_v63 = vpop.f32.mrb[21].mxu1  ;;  %v11611_v23 = vsel %vm1217_vm0, %v4949_v46, %v4950_v0  ;;  %v5024_v11 = vsel %vm1217_vm0, %v4950_v0, 0  ;;  %v11614_v30 = vpop.f32.mrb[7].mxu0  ;;  %v13583_v48 = vld [vmem:[#allocation78_spill] sm:$0xff] }
 0x32e   : > { %13581 = vst [vmem:[#allocation44_spill] sm:$0xff] %v11611_v23  ;;  %v3375_v62 = vpop.f32.mrb[22].mxu1  ;;  %v11618_v2 = vsel %vm11325_vm5, %v5024_v11, 0  ;;  %8542 = vmatprep.mubr.bf16.mxu1 %v11611_v23  ;;  %v4662_v0 = vshll.u32 %v11581_v41, 16  ;;  %v13584_v63 = vld [vmem:[#allocation12_spill] sm:$0xff]  ;;  %v8946_v11 = vld [vmem:[%s12885_s4 + $0x40] sm:$0xff]  }
 0x32f   : > { %13582 = vst [vmem:[#allocation13_spill] sm:$0xff] %v11618_v2  ;;  %v4331_v32 = vpack.c.bf16 %v4040_v56, %v4039_v28  ;;  %v3890_v16 = vadd.f32 %v3694_v61, %v13583_v48  ;;  %v3697_v25 = vadd.f32 %v11457_v20, %v3375_v62  ;;  %8543 = vmatmul.mubr.bf16.gmra.mrb[124].mxu1 %v11618_v2  ;;  %v3377_v46 = vpop.f32.mrb[23].mxu1  ;;  %v11633_v50 = vsel %vm11325_vm5, %v4658_v15, 0 }
 0x330   : > { %13585 = vst [vmem:[#allocation68_spill] sm:$0xff] %v11633_v50  ;;  %v4667_v20 = vshll.u32 %v11586_v59, 16  ;;  %5992 = vmatpush1.bf16.msra.mxu1 %v8946_v11  ;;  %v4664_v61 = vrot.slane %v4662_v0, 1 }
 0x331   : > { %v3969_v5 = vadd.f32 %v11220_v14, %v3890_v16  ;;  %v3891_v38 = vadd.f32 %v3697_v25, %v13584_v63  ;;  %5993 = vmatprep.subr.bf16.mxu1 %v13186_v24  ;;  %v11650_v2 = vmul.bf16 %v11256_v44, %v4331_v32  ;;  %v8948_v32 = vld [vmem:[%s12885_s4 + $0xb0] sm:$0xff]  }
 0x332   : > { %5406 = vmatmul.mubr.bf16.gmra.mrb[64].mxu0 %v11504_v7  ;;  %v11636_v28 = vpop.f32.mrb[8].mxu0  ;;  %8598 = vmatprep.subr.bf16.mxu0 %v8948_v32 }
 0x333   : > { %v3970_v6 = vadd.f32 %v11220_v14, %v3891_v38  ;;  %5413 = vmatprep.mubr.bf16.mxu0 %v11633_v50  ;;  %v11640_v16 = vpop.f32.mrb[9].mxu0  ;;  %v4041_v48 = vmax.f32 %v3969_v5, 0.0  ;;  %v4660_v38 = vshrl.u32 %v11581_v41, 16  ;;  %v4669_v50 = vrot.slane %v4667_v20, 1  ;;  %13586 = vst [vmem:[#allocation45_spill] sm:$0xff] %v11650_v2  ;;  %v8947_v20 = vld [vmem:[%s12885_s4 + $0x48] sm:$0xff]   ;;  %8599 = vmatpush3.bf16.msra.mxu0 %v8948_v32 }
 0x334   : > { %v3380_v56 = vpop.f32.mrb[24].mxu1  ;;  %v11642_v62 = vpop.f32.mrb[10].mxu0  ;;  %5994 = vmatpush1.bf16.msra.mxu1 %v8947_v20 }
 0x335   : > { %v4042_v15 = vmax.f32 %v3970_v6, 0.0  ;;  %v3702_v25 = vadd.f32 %v11493_v36, %v3380_v56  ;;  %v3382_v46 = vpop.f32.mrb[25].mxu1  ;;  %v11646_v63 = vpop.f32.mrb[11].mxu0  ;;  %v4665_v5 = vor.u32 %v4664_v61, %v4660_v38  ;;  %5995 = vmatprep.subr.bf16.mxu1 %v13186_v24 }
 0x336   : > { %v3383_v7 = vpop.f32.mrb[26].mxu1 }
 0x337   : > { %v4332_v11 = vpack.c.bf16 %v4042_v15, %v4041_v48  ;;  %v3892_v0 = vadd.f32 %v3702_v25, %v11041_v37  ;;  %v3705_v23 = vadd.f32 %v11500_v52, %v3383_v7  ;;  %v3385_v12 = vpop.f32.mrb[27].mxu1  ;;  %v11667_v37 = vsel %vm776_vm1, %v4665_v5, %v4669_v50 }
 0x338   : > { %13588 = vst [vmem:[#allocation16_spill] sm:$0xff] %v11667_v37  ;;  %v4671_v15 = vshrl.u32 %v11586_v59, 16 }
 0x339   : > { %v11655_v6 = vmul.bf16 %v11250_v22, %v4332_v11  ;;  %v3971_v36 = vadd.f32 %v11220_v14, %v3892_v0  ;;  %v3893_v56 = vadd.f32 %v3705_v23, %v11052_v51  ;;  %v4952_v51 = vrot.slane %v11650_v2, 1 }
 0x33a   : > { %5414 = vmatmul.mubr.bf16.gmra.mrb[68].mxu0 %v11513_v21  ;;  %v11669_v12 = vpop.f32.mrb[12].mxu0  ;;  %v13591_v21 = vld [vmem:[#allocation4_spill] sm:$0xff] }
 0x33b   : > { %13587 = vst [vmem:[#allocation69_spill] sm:$0xff] %v11655_v6  ;;  %v3972_v52 = vadd.f32 %v11220_v14, %v3893_v56  ;;  %5419 = vmatprep.mubr.bf16.mxu0 %v11667_v37  ;;  %v4953_v7 = vrot.slane %v11655_v6, 1  ;;  %v11675_v23 = vpop.f32.mrb[13].mxu0  ;;  %v4043_v61 = vmax.f32 %v3971_v36, 0.0  ;;  %v4673_v37 = vor.u32 %v4671_v15, %v4669_v50 }
 0x33c   : > { %v3388_v48 = vpop.f32.mrb[28].mxu1  ;;  %v11678_v25 = vpop.f32.mrb[14].mxu0 }
 0x33d   : > { %v4044_v46 = vmax.f32 %v3972_v52, 0.0  ;;  %v3710_v38 = vadd.f32 %v11489_v26, %v3388_v48  ;;  %v3390_v11 = vpop.f32.mrb[29].mxu1  ;;  %v11683_v0 = vsel %vm1217_vm0, %v4952_v51, %v4953_v7  ;;  %v5027_v5 = vsel %vm1217_vm0, %v4953_v7, 0  ;;  %v11686_v56 = vpop.f32.mrb[15].mxu0 }
 0x33e   : > { %13589 = vst [vmem:[#allocation48_spill] sm:$0xff] %v11683_v0  ;;  %v3391_v36 = vpop.f32.mrb[30].mxu1  ;;  %v11690_v20 = vsel %vm11325_vm5, %v5027_v5, 0  ;;  %8546 = vmatprep.mubr.bf16.mxu1 %v11683_v0  ;;  %v4677_v7 = vshll.u32 %v11650_v2, 16  ;;  %v8949_v5 = vld [vmem:[%s12885_s4 + $0x50] sm:$0xff]  }
 0x33f   : > { %13590 = vst [vmem:[#allocation70_spill] sm:$0xff] %v11690_v20  ;;  %v4333_v52 = vpack.c.bf16 %v4044_v46, %v4043_v61  ;;  %v3894_v26 = vadd.f32 %v3710_v38, %v13591_v21  ;;  %v3713_v48 = vadd.f32 %v11495_v17, %v3391_v36  ;;  %8547 = vmatmul.mubr.bf16.gmra.mrb[128].mxu1 %v11690_v20  ;;  %v3393_v51 = vpop.f32.mrb[31].mxu1  ;;  %v11705_v21 = vsel %vm11325_vm5, %v4673_v37, 0 }
 0x340   : > { %13592 = vst [vmem:[#allocation49_spill] sm:$0xff] %v11705_v21  ;;  %v4682_v17 = vshll.u32 %v11655_v6, 16  ;;  %5996 = vmatpush1.bf16.msra.mxu1 %v8949_v5  ;;  %v4679_v46 = vrot.slane %v4677_v7, 1 }
 0x341   : > { %v3973_v32 = vadd.f32 %v11220_v14, %v3894_v26  ;;  %v3895_v11 = vadd.f32 %v3713_v48, %v11049_v42  ;;  %5997 = vmatprep.subr.bf16.mxu1 %v13186_v24 }
 0x342   : > { %5420 = vmatmul.mubr.bf16.gmra.mrb[72].mxu0 %v11581_v41  ;;  %v11708_v50 = vpop.f32.mrb[16].mxu0 }
 0x343   : > { %v3974_v61 = vadd.f32 %v11220_v14, %v3895_v11  ;;  %5427 = vmatprep.mubr.bf16.mxu0 %v11705_v21  ;;  %v11712_v15 = vpop.f32.mrb[17].mxu0  ;;  %v4045_v36 = vmax.f32 %v3973_v32, 0.0  ;;  %v4675_v14 = vshrl.u32 %v11650_v2, 16  ;;  %v4684_v11 = vrot.slane %v4682_v17, 1  ;;  %v11735_v17 = vld [vmem:[%s12884_s3] ss:$0 sm:$0xff] }
 0x344   : > { %v3396_v42 = vpop.f32.mrb[32].mxu1  ;;  %v11714_v38 = vpop.f32.mrb[18].mxu0  ;;  %v11722_v21 = vmul.bf16 %v11256_v44, %v4333_v52 }
 0x345   : > { %v4046_v37 = vmax.f32 %v3974_v61, 0.0  ;;  %v3718_v26 = vadd.f32 %v11534_v31, %v3396_v42  ;;  %v3398_v48 = vpop.f32.mrb[33].mxu1  ;;  %v11718_v51 = vpop.f32.mrb[19].mxu0  ;;  %v8950_v31 = vld [vmem:[%s12885_s4 + $0x58] sm:$0xff]   ;;  %v4680_v32 = vor.u32 %v4679_v46, %v4675_v14 }
 0x346   : > { %v3399_v41 = vpop.f32.mrb[34].mxu1  ;;  %13593 = vst [vmem:[#allocation71_spill] sm:$0xff] %v11722_v21  ;;  %5998 = vmatpush1.bf16.msra.mxu1 %v8950_v31  ;;  %v4955_v42 = vrot.slane %v11722_v21, 1 }
 0x347   : > { %v4334_v5 = vpack.c.bf16 %v4046_v37, %v4045_v36  ;;  %v3896_v7 = vadd.f32 %v3718_v26, %v11063_v34  ;;  %v3721_v20 = vadd.f32 %v11545_v57, %v3399_v41  ;;  %v3401_v0 = vpop.f32.mrb[35].mxu1  ;;  %v11741_v57 = vsel %vm776_vm1, %v4680_v32, %v4684_v11  ;;  %5999 = vmatprep.subr.bf16.mxu1 %v13186_v24 }
 0x348   : > { %13594 = vst [vmem:[#allocation19_spill] sm:$0xff] %v11741_v57  ;;  %v4686_v26 = vshrl.u32 %v11655_v6, 16 }
 0x349   : > { %v11730_v61 = vmul.bf16 %v11250_v22, %v4334_v5  ;;  %v3975_v52 = vadd.f32 %v11735_v17, %v3896_v7  ;;  %v3897_v34 = vadd.f32 %v3721_v20, %v11072_v45  ;;  %v8951_v45 = vld [vmem:[%s12885_s4 + $0x60] sm:$0xff]  }
 0x34a   : > { %5428 = vmatmul.mubr.bf16.gmra.mrb[76].mxu0 %v11586_v59  ;;  %v11743_v41 = vpop.f32.mrb[20].mxu0  ;;  %6000 = vmatpush1.bf16.msra.mxu1 %v8951_v45  ;;  %v4688_v59 = vor.u32 %v4686_v26, %v4684_v11  ;;  %v8952_v45 = vld [vmem:[%s12885_s4 + $0x68] sm:$0xff]  }
 0x34b   : > { %v3976_v0 = vadd.f32 %v11735_v17, %v3897_v34  ;;  %5433 = vmatprep.mubr.bf16.mxu0 %v11741_v57  ;;  %v4956_v46 = vrot.slane %v11730_v61, 1  ;;  %v11750_v36 = vpop.f32.mrb[21].mxu0  ;;  %v4047_v20 = vmax.f32 %v3975_v52, 0.0  ;;  %6001 = vmatprep.subr.bf16.mxu1 %v13186_v24 }
 0x34c   : > { %v3404_v37 = vpop.f32.mrb[36].mxu1  ;;  %v11756_v48 = vpop.f32.mrb[22].mxu0 }
 0x34d   : > { %v4048_v14 = vmax.f32 %v3976_v0, 0.0  ;;  %v3726_v5 = vadd.f32 %v11528_v47, %v3404_v37  ;;  %v3406_v7 = vpop.f32.mrb[37].mxu1  ;;  %v11760_v31 = vsel %vm1217_vm0, %v4955_v42, %v4956_v46  ;;  %v5030_v32 = vsel %vm1217_vm0, %v4956_v46, 0  ;;  %v11763_v34 = vpop.f32.mrb[23].mxu0  ;;  %v13597_v0 = vld [vmem:[#allocation74_spill] sm:$0xff] }
 0x34e   : > { %13595 = vst [vmem:[#allocation91_spill] sm:$0xff] %v11760_v31  ;;  %v3407_v57 = vpop.f32.mrb[38].mxu1  ;;  %v11767_v52 = vsel %vm11325_vm5, %v5030_v32, 0  ;;  %8550 = vmatprep.mubr.bf16.mxu1 %v11760_v31  ;;  %v4692_v7 = vshll.u32 %v11722_v21, 16  ;;  %v13598_v31 = vld [vmem:[#allocation94_spill] sm:$0xff]  ;;  %6002 = vmatpush1.bf16.msra.mxu1 %v8952_v45 }
 0x34f   : > { %13596 = vst [vmem:[#allocation73_spill] sm:$0xff] %v11767_v52  ;;  %v4335_v47 = vpack.c.bf16 %v4048_v14, %v4047_v20  ;;  %v3898_v37 = vadd.f32 %v3726_v5, %v13597_v0  ;;  %v3729_v42 = vadd.f32 %v11537_v8, %v3407_v57  ;;  %8551 = vmatmul.mubr.bf16.gmra.mrb[132].mxu1 %v11767_v52  ;;  %v3409_v46 = vpop.f32.mrb[39].mxu1  ;;  %v11783_v20 = vsel %vm11325_vm5, %v4688_v59, 0  ;;  %v8953_v5 = vld [vmem:[%s12885_s4 + $0x70] sm:$0xff]  }
 0x350   : > { %13599 = vst [vmem:[#allocation22_spill] sm:$0xff] %v11783_v20  ;;  %v4697_v8 = vshll.u32 %v11730_v61, 16  ;;  %6003 = vmatprep.subr.bf16.mxu1 %v13186_v24  ;;  %v4694_v0 = vrot.slane %v4692_v7, 1 }
 0x351   : > { %v3977_v32 = vadd.f32 %v11735_v17, %v3898_v37  ;;  %v3899_v11 = vadd.f32 %v3729_v42, %v13598_v31  ;;  %v11804_v1 = vmul.bf16 %v11256_v44, %v4335_v47  ;;  %v8954_v47 = vld [vmem:[%s12885_s4 + $0xb8] sm:$0xff]  }
 0x352   : > { %5434 = vmatmul.mubr.bf16.gmra.mrb[80].mxu0 %v11650_v2  ;;  %v11786_v57 = vpop.f32.mrb[24].mxu0  ;;  %6004 = vmatpush1.bf16.msra.mxu1 %v8953_v5  ;;  %v4699_v52 = vrot.slane %v4697_v8, 1 }
 0x353   : > { %v3978_v26 = vadd.f32 %v11735_v17, %v3899_v11  ;;  %5441 = vmatprep.mubr.bf16.mxu0 %v11783_v20  ;;  %v11791_v14 = vpop.f32.mrb[25].mxu0  ;;  %v4049_v37 = vmax.f32 %v3977_v32, 0.0  ;;  %v4690_v20 = vshrl.u32 %v11722_v21, 16  ;;  %6005 = vmatprep.subr.bf16.mxu1 %v13186_v24  ;;  %13600 = vst [vmem:[#allocation55_spill] sm:$0xff] %v11804_v1 }
 0x354   : > { %v3412_v31 = vpop.f32.mrb[40].mxu1  ;;  %v11796_v59 = vpop.f32.mrb[26].mxu0  ;;  %8600 = vmatprep.subr.bf16.mxu0 %v8954_v47 }
 0x355   : > { %v4050_v42 = vmax.f32 %v3978_v26, 0.0  ;;  %v3734_v46 = vadd.f32 %v11571_v43, %v3412_v31  ;;  %v3414_v45 = vpop.f32.mrb[41].mxu1  ;;  %v11799_v2 = vpop.f32.mrb[27].mxu0  ;;  %v8955_v43 = vld [vmem:[%s12885_s4 + $0x78] sm:$0xff]   ;;  %v4695_v5 = vor.u32 %v4694_v0, %v4690_v20  ;;  %8601 = vmatpush3.bf16.msra.mxu0 %v8954_v47 }
 0x356   : > { %v3415_v11 = vpop.f32.mrb[42].mxu1  ;;  %6006 = vmatpush1.bf16.msra.mxu1 %v8955_v43  ;;  %6681 = vmatprep.subr.bf16.mxu0 %v13186_v24 }
 0x357   : > { %v4336_v7 = vpack.c.bf16 %v4050_v42, %v4049_v37  ;;  %v3900_v39 = vadd.f32 %v3734_v46, %v11083_v19  ;;  %v3737_v32 = vadd.f32 %v11577_v10, %v3415_v11  ;;  %v3417_v26 = vpop.f32.mrb[43].mxu1  ;;  %v11821_v19 = vsel %vm776_vm1, %v4695_v5, %v4699_v52 }
 0x358   : > { %13601 = vst [vmem:[#allocation76_spill] sm:$0xff] %v11821_v19  ;;  %v4701_v46 = vshrl.u32 %v11730_v61, 16 }
 0x359   : > { %v11812_v31 = vmul.bf16 %v11250_v22, %v4336_v7  ;;  %v3979_v8 = vadd.f32 %v11735_v17, %v3900_v39  ;;  %v3901_v45 = vadd.f32 %v3737_v32, %v11092_v33  ;;  %v4958_v39 = vrot.slane %v11804_v1, 1 }
 0x35a   : > { %5442 = vmatmul.mubr.bf16.gmra.mrb[84].mxu0 %v11655_v6  ;;  %v11823_v10 = vpop.f32.mrb[28].mxu0  ;;  %v4703_v47 = vor.u32 %v4701_v46, %v4699_v52 }
 0x35b   : > { %v3980_v20 = vadd.f32 %v11735_v17, %v3901_v45  ;;  %5447 = vmatprep.mubr.bf16.mxu0 %v11821_v19  ;;  %v4959_v33 = vrot.slane %v11812_v31, 1  ;;  %v11829_v0 = vpop.f32.mrb[29].mxu0  ;;  %v4051_v37 = vmax.f32 %v3979_v8, 0.0  ;;  %v4712_v52 = vshll.u32 %v11812_v31, 16 }
 0x35c   : > { %v3420_v42 = vpop.f32.mrb[44].mxu1  ;;  %v11832_v11 = vpop.f32.mrb[30].mxu0 }
 0x35d   : > { %v4052_v7 = vmax.f32 %v3980_v20, 0.0  ;;  %v3742_v32 = vadd.f32 %v11567_v60, %v3420_v42  ;;  %v3422_v26 = vpop.f32.mrb[45].mxu1  ;;  %v11836_v43 = vsel %vm1217_vm0, %v4958_v39, %v4959_v33  ;;  %v5033_v5 = vsel %vm1217_vm0, %v4959_v33, 0  ;;  %v11839_v45 = vpop.f32.mrb[31].mxu0  ;;  %v13604_v60 = vld [vmem:[#allocation14_spill] sm:$0xff] }
 0x35e   : > { %13602 = vst [vmem:[#allocation79_spill] sm:$0xff] %v11836_v43  ;;  %v3423_v8 = vpop.f32.mrb[46].mxu1  ;;  %v11844_v19 = vsel %vm11325_vm5, %v5033_v5, 0  ;;  %8554 = vmatprep.mubr.bf16.mxu1 %v11836_v43  ;;  %v4707_v26 = vshll.u32 %v11804_v1, 16  ;;  %v11856_v5 = vsel %vm11325_vm5, %v4703_v47, 0 }
 0x35f   : > { %13603 = vst [vmem:[#allocation81_spill] sm:$0xff] %v11844_v19  ;;  %v4337_v20 = vpack.c.bf16 %v4052_v7, %v4051_v37  ;;  %v3902_v42 = vadd.f32 %v3742_v32, %v13604_v60  ;;  %v3745_v39 = vadd.f32 %v11573_v27, %v3423_v8  ;;  %8555 = vmatmul.mubr.bf16.gmra.mrb[136].mxu1 %v11844_v19  ;;  %v3425_v33 = vpop.f32.mrb[47].mxu1  ;;  %13605 = vst [vmem:[#allocation85_spill] sm:$0xff] %v11856_v5 }
 0x360   : > { %v4709_v46 = vrot.slane %v4707_v26, 1 }
 0x361   : > { %v3981_v6 = vadd.f32 %v11735_v17, %v3902_v42  ;;  %v3903_v24 = vadd.f32 %v3745_v39, %v11089_v35  ;;  %v4705_v42 = vshrl.u32 %v11804_v1, 16  ;;  %v4714_v39 = vrot.slane %v4712_v52, 1 }
 0x362   : > { %5448 = vmatmul.mubr.bf16.gmra.mrb[88].mxu0 %v11722_v21  ;;  %v11864_v47 = vmul.bf16 %v11256_v44, %v4337_v20 }
 0x363   : > { %v3982_v37 = vadd.f32 %v11735_v17, %v3903_v24  ;;  %5455 = vmatprep.mubr.bf16.mxu0 %v11856_v5  ;;  %v4053_v7 = vmax.f32 %v3981_v6, 0.0  ;;  %v4710_v19 = vor.u32 %v4709_v46, %v4705_v42  ;;  %v11871_v6 = vld [vmem:[%s12885_s4 + $0x200] sm:$0xff]  }
 0x364   : > { %v3428_v27 = vpop.f32.mrb[48].mxu1  ;;  %13606 = vst [vmem:[#allocation46_spill] sm:$0xff] %v11864_v47  ;;  %8666 = vmatprep.subr.bf16.mxu1 %v11871_v6 }
 0x365   : > { %v4054_v32 = vmax.f32 %v3982_v37, 0.0  ;;  %v3750_v8 = vadd.f32 %v11603_v3, %v3428_v27  ;;  %v3430_v60 = vpop.f32.mrb[49].mxu1 }
 0x366   : > { %v3431_v35 = vpop.f32.mrb[50].mxu1 }
 0x367   : > { %v4338_v33 = vpack.c.bf16 %v4054_v32, %v4053_v7  ;;  %v3904_v21 = vadd.f32 %v3750_v8, %v11103_v13  ;;  %v3753_v24 = vadd.f32 %v11614_v30, %v3431_v35  ;;  %v3433_v5 = vpop.f32.mrb[51].mxu1  ;;  %v11880_v13 = vsel %vm776_vm1, %v4710_v19, %v4714_v39 }
 0x368   : > { %v4961_v5 = vrot.slane %v11864_v47, 1 }
 0x369   : > { %v11874_v3 = vmul.bf16 %v11250_v22, %v4338_v33  ;;  %v3983_v26 = vadd.f32 %v11735_v17, %v3904_v21  ;;  %v3905_v20 = vadd.f32 %v3753_v24, %v11112_v53  ;;  %v4716_v21 = vshrl.u32 %v11812_v31, 16  ;;  %v13609_v33 = vld [vmem:[#allocation15_spill] sm:$0xff] }
 0x36a   : > { %5456 = vmatmul.mubr.bf16.gmra.mrb[92].mxu0 %v11730_v61 }
 0x36b   : > { %v3984_v30 = vadd.f32 %v11735_v17, %v3905_v20  ;;  %5461 = vmatprep.mubr.bf16.mxu0 %v11880_v13  ;;  %v4962_v52 = vrot.slane %v11874_v3, 1  ;;  %v4055_v37 = vmax.f32 %v3983_v26, 0.0  ;;  %v4718_v35 = vor.u32 %v4716_v21, %v4714_v39 }
 0x36c   : > { %v3436_v27 = vpop.f32.mrb[52].mxu1  ;;  %v4722_v20 = vshll.u32 %v11864_v47, 16  ;;  %v4727_v39 = vshll.u32 %v11874_v3, 16 }
 0x36d   : > { %v4056_v53 = vmax.f32 %v3984_v30, 0.0  ;;  %v3758_v46 = vadd.f32 %v11597_v29, %v3436_v27  ;;  %v3438_v7 = vpop.f32.mrb[53].mxu1  ;;  %v11890_v19 = vsel %vm1217_vm0, %v4961_v5, %v4962_v52  ;;  %v5036_v32 = vsel %vm1217_vm0, %v4962_v52, 0  ;;  %v13610_v5 = vld [vmem:[#allocation47_spill] sm:$0xff] }
 0x36e   : > { %13607 = vst [vmem:[#allocation25_spill] sm:$0xff] %v11890_v19  ;;  %v3439_v8 = vpop.f32.mrb[54].mxu1  ;;  %v11895_v60 = vsel %vm11325_vm5, %v5036_v32, 0  ;;  %8558 = vmatprep.mubr.bf16.mxu1 %v11890_v19  ;;  %v11907_v27 = vsel %vm11325_vm5, %v4718_v35, 0  ;;  %v4724_v21 = vrot.slane %v4722_v20, 1 }
 0x36f   : > { %13608 = vst [vmem:[#allocation28_spill] sm:$0xff] %v11895_v60  ;;  %v4339_v42 = vpack.c.bf16 %v4056_v53, %v4055_v37  ;;  %v3906_v24 = vadd.f32 %v3758_v46, %v13609_v33  ;;  %v3761_v26 = vadd.f32 %v11606_v54, %v3439_v8  ;;  %8559 = vmatmul.mubr.bf16.gmra.mrb[140].mxu1 %v11895_v60  ;;  %v3441_v29 = vpop.f32.mrb[55].mxu1  ;;  %13611 = vst [vmem:[#allocation3_spill] sm:$0xff] %v11907_v27 }
 0x370   : > { %v4720_v33 = vshrl.u32 %v11864_v47, 16  ;;  %v13613_v29 = vld [vmem:[#allocation97_spill] sm:$0xff] }
 0x371   : > { %v3985_v30 = vadd.f32 %v11735_v17, %v3906_v24  ;;  %v3907_v52 = vadd.f32 %v3761_v26, %v13610_v5  ;;  %v4729_v24 = vrot.slane %v4727_v39, 1  ;;  %v11915_v35 = vmul.bf16 %v11256_v44, %v4339_v42 }
 0x372   : > { %5462 = vmatmul.mubr.bf16.gmra.mrb[96].mxu0 %v11804_v1  ;;  %v4725_v1 = vor.u32 %v4724_v21, %v4720_v33 }
 0x373   : > { %v3986_v37 = vadd.f32 %v11735_v17, %v3907_v52  ;;  %5469 = vmatprep.mubr.bf16.mxu0 %v11907_v27  ;;  %v4057_v53 = vmax.f32 %v3985_v30, 0.0  ;;  %13612 = vst [vmem:[#allocation89_spill] sm:$0xff] %v11915_v35  ;;  %v13614_v30 = vld [vmem:[#allocation18_spill] sm:$0xff] }
 0x374   : > { %v3444_v54 = vpop.f32.mrb[56].mxu1  ;;  %v11926_v39 = vsel %vm776_vm1, %v4725_v1, %v4729_v24 }
 0x375   : > { %v4058_v46 = vmax.f32 %v3986_v37, 0.0  ;;  %v3766_v7 = vadd.f32 %v11640_v16, %v3444_v54  ;;  %v3446_v32 = vpop.f32.mrb[57].mxu1 }
 0x376   : > { %v3447_v8 = vpop.f32.mrb[58].mxu1 }
 0x377   : > { %v4340_v26 = vpack.c.bf16 %v4058_v46, %v4057_v53  ;;  %v3908_v5 = vadd.f32 %v3766_v7, %v13613_v29  ;;  %v3769_v52 = vadd.f32 %v11646_v63, %v3447_v8  ;;  %v3449_v27 = vpop.f32.mrb[59].mxu1  ;;  %v4964_v63 = vrot.slane %v11915_v35, 1 }
 0x378   : > { %v4731_v53 = vshrl.u32 %v11874_v3, 16 }
 0x379   : > { %v11920_v20 = vmul.bf16 %v11250_v22, %v4340_v26  ;;  %v3987_v16 = vadd.f32 %v11735_v17, %v3908_v5  ;;  %v3909_v37 = vadd.f32 %v3769_v52, %v13614_v30  ;;  %v13617_v52 = vld [vmem:[#allocation95_spill] sm:$0xff] }
 0x37a   : > { %5470 = vmatmul.mubr.bf16.gmra.mrb[100].mxu0 %v11812_v31  ;;  %v4733_v29 = vor.u32 %v4731_v53, %v4729_v24 }
 0x37b   : > { %v3988_v42 = vadd.f32 %v11735_v17, %v3909_v37  ;;  %5475 = vmatprep.mubr.bf16.mxu0 %v11926_v39  ;;  %v4965_v27 = vrot.slane %v11920_v20, 1  ;;  %v4059_v54 = vmax.f32 %v3987_v16, 0.0  ;;  %v4737_v37 = vshll.u32 %v11915_v35, 16 }
 0x37c   : > { %v3452_v21 = vpop.f32.mrb[60].mxu1  ;;  %v4742_v24 = vshll.u32 %v11920_v20, 16 }
 0x37d   : > { %v4060_v46 = vmax.f32 %v3988_v42, 0.0  ;;  %v3774_v7 = vadd.f32 %v11636_v28, %v3452_v21  ;;  %v3454_v32 = vpop.f32.mrb[61].mxu1  ;;  %v11935_v8 = vsel %vm1217_vm0, %v4964_v63, %v4965_v27  ;;  %v5039_v1 = vsel %vm1217_vm0, %v4965_v27, 0  ;;  %v13618_v63 = vld [vmem:[#allocation17_spill] sm:$0xff] }
 0x37e   : > { %13615 = vst [vmem:[#allocation7_spill] sm:$0xff] %v11935_v8  ;;  %v3455_v33 = vpop.f32.mrb[62].mxu1  ;;  %v11940_v26 = vsel %vm11325_vm5, %v5039_v1, 0  ;;  %8562 = vmatprep.mubr.bf16.mxu1 %v11935_v8  ;;  %v11952_v21 = vsel %vm11325_vm5, %v4733_v29, 0  ;;  %v4739_v53 = vrot.slane %v4737_v37, 1 }
 0x37f   : > { %13616 = vst [vmem:[#allocation8_spill] sm:$0xff] %v11940_v26  ;;  %v4341_v5 = vpack.c.bf16 %v4060_v46, %v4059_v54  ;;  %v3910_v16 = vadd.f32 %v3774_v7, %v13617_v52  ;;  %v3777_v30 = vadd.f32 %v11642_v62, %v3455_v33  ;;  %8563 = vmatmul.mubr.bf16.gmra.mrb[144].mxu1 %v11940_v26  ;;  %v3457_v28 = vpop.f32.mrb[63].mxu1  ;;  %13619 = vst [vmem:[#allocation90_spill] sm:$0xff] %v11952_v21 }
 0x380   : > { %v4735_v52 = vshrl.u32 %v11915_v35, 16  ;;  %v13621_v28 = vld [vmem:[#allocation6_spill] sm:$0xff] }
 0x381   : > { %v3989_v42 = vadd.f32 %v11735_v17, %v3910_v16  ;;  %v3911_v27 = vadd.f32 %v3777_v30, %v13618_v63  ;;  %v4744_v16 = vrot.slane %v4742_v24, 1  ;;  %v11960_v29 = vmul.bf16 %v11256_v44, %v4341_v5 }
 0x382   : > { %5476 = vmatmul.mubr.bf16.gmra.mrb[104].mxu0 %v11864_v47  ;;  %v4740_v47 = vor.u32 %v4739_v53, %v4735_v52 }
 0x383   : > { %v3990_v54 = vadd.f32 %v11735_v17, %v3911_v27  ;;  %5483 = vmatprep.mubr.bf16.mxu0 %v11952_v21  ;;  %v4061_v46 = vmax.f32 %v3989_v42, 0.0  ;;  %13620 = vst [vmem:[#allocation31_spill] sm:$0xff] %v11960_v29  ;;  %v13622_v42 = vld [vmem:[#allocation21_spill] sm:$0xff] }
 0x384   : > { %v3460_v62 = vpop.f32.mrb[64].mxu1  ;;  %v11971_v24 = vsel %vm776_vm1, %v4740_v47, %v4744_v16 }
 0x385   : > { %v4062_v7 = vmax.f32 %v3990_v54, 0.0  ;;  %v3782_v32 = vadd.f32 %v11675_v23, %v3460_v62  ;;  %v3462_v1 = vpop.f32.mrb[65].mxu1 }
 0x386   : > { %v3463_v33 = vpop.f32.mrb[66].mxu1 }
 0x387   : > { %v4342_v30 = vpack.c.bf16 %v4062_v7, %v4061_v46  ;;  %v3912_v63 = vadd.f32 %v3782_v32, %v13621_v28  ;;  %v3785_v27 = vadd.f32 %v11686_v56, %v3463_v33  ;;  %v3465_v21 = vpop.f32.mrb[67].mxu1  ;;  %v4967_v56 = vrot.slane %v11960_v29, 1 }
 0x388   : > { %v4746_v46 = vshrl.u32 %v11920_v20, 16 }
 0x389   : > { %v11965_v37 = vmul.bf16 %v11250_v22, %v4342_v30  ;;  %v3991_v23 = vadd.f32 %v11735_v17, %v3912_v63  ;;  %v3913_v54 = vadd.f32 %v3785_v27, %v13622_v42  ;;  %v13624_v27 = vld [vmem:[#allocation51_spill] sm:$0xff] }
 0x38a   : > { %5484 = vmatmul.mubr.bf16.gmra.mrb[108].mxu0 %v11874_v3  ;;  %v4748_v28 = vor.u32 %v4746_v46, %v4744_v16 }
 0x38b   : > { %v3992_v5 = vadd.f32 %v11735_v17, %v3913_v54  ;;  %5489 = vmatprep.mubr.bf16.mxu0 %v11971_v24  ;;  %v4968_v21 = vrot.slane %v11965_v37, 1  ;;  %v4063_v62 = vmax.f32 %v3991_v23, 0.0  ;;  %v4752_v54 = vshll.u32 %v11960_v29, 16 }
 0x38c   : > { %v3468_v53 = vpop.f32.mrb[68].mxu1  ;;  %v4757_v16 = vshll.u32 %v11965_v37, 16 }
 0x38d   : > { %v4064_v7 = vmax.f32 %v3992_v5, 0.0  ;;  %v3790_v32 = vadd.f32 %v11669_v12, %v3468_v53  ;;  %v3470_v1 = vpop.f32.mrb[69].mxu1  ;;  %v11980_v33 = vsel %vm1217_vm0, %v4967_v56, %v4968_v21  ;;  %v5042_v47 = vsel %vm1217_vm0, %v4968_v21, 0  ;;  %v13625_v56 = vld [vmem:[#allocation96_spill] sm:$0xff] }
 0x38e   : > { %13623 = vst [vmem:[#allocation2_spill] sm:$0xff] %v11980_v33  ;;  %v3471_v52 = vpop.f32.mrb[70].mxu1  ;;  %v11985_v30 = vsel %vm11325_vm5, %v5042_v47, 0  ;;  %8566 = vmatprep.mubr.bf16.mxu1 %v11980_v33  ;;  %v11997_v53 = vsel %vm11325_vm5, %v4748_v28, 0  ;;  %v4754_v46 = vrot.slane %v4752_v54, 1 }
 0x38f   : > { %v4343_v63 = vpack.c.bf16 %v4064_v7, %v4063_v62  ;;  %v3914_v23 = vadd.f32 %v3790_v32, %v13624_v27  ;;  %v3793_v42 = vadd.f32 %v11678_v25, %v3471_v52  ;;  %8567 = vmatmul.mubr.bf16.gmra.mrb[148].mxu1 %v11985_v30  ;;  %v3473_v12 = vpop.f32.mrb[71].mxu1  ;;  %13626 = vst [vmem:[#allocation92_spill] sm:$0xff] %v11997_v53  ;;  %v4750_v27 = vshrl.u32 %v11960_v29, 16 }
 0x390   : > { %v13628_v12 = vld [vmem:[#allocation99_spill] sm:$0xff] }
 0x391   : > { %v3993_v5 = vadd.f32 %v11735_v17, %v3914_v23  ;;  %v3915_v21 = vadd.f32 %v3793_v42, %v13625_v56  ;;  %v4759_v23 = vrot.slane %v4757_v16, 1  ;;  %v12005_v28 = vmul.bf16 %v11256_v44, %v4343_v63 }
 0x392   : > { %5490 = vmatmul.mubr.bf16.gmra.mrb[112].mxu0 %v11915_v35  ;;  %v4755_v35 = vor.u32 %v4754_v46, %v4750_v27 }
 0x393   : > { %v3994_v62 = vadd.f32 %v11735_v17, %v3915_v21  ;;  %5497 = vmatprep.mubr.bf16.mxu0 %v11997_v53  ;;  %v4065_v7 = vmax.f32 %v3993_v5, 0.0  ;;  %13627 = vst [vmem:[#allocation9_spill] sm:$0xff] %v12005_v28  ;;  %v13629_v5 = vld [vmem:[#allocation23_spill] sm:$0xff] }
 0x394   : > { %v3476_v25 = vpop.f32.mrb[72].mxu1  ;;  %v12016_v16 = vsel %vm776_vm1, %v4755_v35, %v4759_v23 }
 0x395   : > { %v4066_v32 = vmax.f32 %v3994_v62, 0.0  ;;  %v3798_v1 = vadd.f32 %v11712_v15, %v3476_v25  ;;  %v3478_v47 = vpop.f32.mrb[73].mxu1 }
 0x396   : > { %v3479_v52 = vpop.f32.mrb[74].mxu1 }
 0x397   : > { %v4344_v42 = vpack.c.bf16 %v4066_v32, %v4065_v7  ;;  %v3916_v56 = vadd.f32 %v3798_v1, %v13628_v12  ;;  %v3801_v21 = vadd.f32 %v11718_v51, %v3479_v52  ;;  %v3481_v53 = vpop.f32.mrb[75].mxu1  ;;  %v4970_v51 = vrot.slane %v12005_v28, 1 }
 0x398   : > { %v4761_v7 = vshrl.u32 %v11965_v37, 16 }
 0x399   : > { %v12010_v54 = vmul.bf16 %v11250_v22, %v4344_v42  ;;  %v3995_v15 = vadd.f32 %v11735_v17, %v3916_v56  ;;  %v3917_v62 = vadd.f32 %v3801_v21, %v13629_v5  ;;  %v13631_v21 = vld [vmem:[#allocation54_spill] sm:$0xff] }
 0x39a   : > { %5498 = vmatmul.mubr.bf16.gmra.mrb[116].mxu0 %v11920_v20  ;;  %v4763_v12 = vor.u32 %v4761_v7, %v4759_v23 }
 0x39b   : > { %v3996_v63 = vadd.f32 %v11735_v17, %v3917_v62  ;;  %5503 = vmatprep.mubr.bf16.mxu0 %v12016_v16  ;;  %v4971_v53 = vrot.slane %v12010_v54, 1  ;;  %v4067_v25 = vmax.f32 %v3995_v15, 0.0  ;;  %v4767_v62 = vshll.u32 %v12005_v28, 16 }
 0x39c   : > { %v3484_v46 = vpop.f32.mrb[76].mxu1  ;;  %v4772_v23 = vshll.u32 %v12010_v54, 16 }
 0x39d   : > { %v4068_v32 = vmax.f32 %v3996_v63, 0.0  ;;  %v3806_v1 = vadd.f32 %v11708_v50, %v3484_v46  ;;  %v3486_v47 = vpop.f32.mrb[77].mxu1  ;;  %v12025_v52 = vsel %vm1217_vm0, %v4970_v51, %v4971_v53  ;;  %v5045_v35 = vsel %vm1217_vm0, %v4971_v53, 0  ;;  %v13632_v51 = vld [vmem:[#allocation101_spill] sm:$0xff] }
 0x39e   : > { %13630 = vst [vmem:[#allocation36_spill] sm:$0xff] %v12025_v52  ;;  %v3487_v27 = vpop.f32.mrb[78].mxu1  ;;  %v12030_v42 = vsel %vm11325_vm5, %v5045_v35, 0  ;;  %8570 = vmatprep.mubr.bf16.mxu1 %v12025_v52  ;;  %v12042_v46 = vsel %vm11325_vm5, %v4763_v12, 0  ;;  %v4769_v7 = vrot.slane %v4767_v62, 1 }
 0x39f   : > { %v4345_v56 = vpack.c.bf16 %v4068_v32, %v4067_v25  ;;  %v3918_v15 = vadd.f32 %v3806_v1, %v13631_v21  ;;  %v3809_v5 = vadd.f32 %v11714_v38, %v3487_v27  ;;  %8571 = vmatmul.mubr.bf16.gmra.mrb[152].mxu1 %v12030_v42  ;;  %v3489_v50 = vpop.f32.mrb[79].mxu1  ;;  %13633 = vst [vmem:[#allocation5_spill] sm:$0xff] %v12042_v46  ;;  %v4765_v21 = vshrl.u32 %v12005_v28, 16 }
 0x3a0   : > { %v13635_v50 = vld [vmem:[#allocation57_spill] sm:$0xff] }
 0x3a1   : > { %v3997_v63 = vadd.f32 %v11735_v17, %v3918_v15  ;;  %v3919_v53 = vadd.f32 %v3809_v5, %v13632_v51  ;;  %v4774_v15 = vrot.slane %v4772_v23, 1  ;;  %v12050_v12 = vmul.bf16 %v11256_v44, %v4345_v56 }
 0x3a2   : > { %5504 = vmatmul.mubr.bf16.gmra.mrb[120].mxu0 %v11960_v29  ;;  %v4770_v29 = vor.u32 %v4769_v7, %v4765_v21 }
 0x3a3   : > { %v3998_v25 = vadd.f32 %v11735_v17, %v3919_v53  ;;  %5511 = vmatprep.mubr.bf16.mxu0 %v12042_v46  ;;  %v4069_v32 = vmax.f32 %v3997_v63, 0.0  ;;  %13634 = vst [vmem:[#allocation10_spill] sm:$0xff] %v12050_v12  ;;  %v13636_v63 = vld [vmem:[#allocation100_spill] sm:$0xff] }
 0x3a4   : > { %v3492_v38 = vpop.f32.mrb[80].mxu1  ;;  %v12061_v23 = vsel %vm776_vm1, %v4770_v29, %v4774_v15 }
 0x3a5   : > { %v4070_v1 = vmax.f32 %v3998_v25, 0.0  ;;  %v3814_v47 = vadd.f32 %v11750_v36, %v3492_v38  ;;  %v3494_v35 = vpop.f32.mrb[81].mxu1 }
 0x3a6   : > { %v3495_v27 = vpop.f32.mrb[82].mxu1 }
 0x3a7   : > { %v4346_v5 = vpack.c.bf16 %v4070_v1, %v4069_v32  ;;  %v3920_v51 = vadd.f32 %v3814_v47, %v13635_v50  ;;  %v3817_v53 = vadd.f32 %v11763_v34, %v3495_v27  ;;  %v3497_v46 = vpop.f32.mrb[83].mxu1  ;;  %v4973_v34 = vrot.slane %v12050_v12, 1 }
 0x3a8   : > { %v4776_v32 = vshrl.u32 %v12010_v54, 16 }
 0x3a9   : > { %v12055_v62 = vmul.bf16 %v11250_v22, %v4346_v5  ;;  %v3999_v36 = vadd.f32 %v11735_v17, %v3920_v51  ;;  %v3921_v25 = vadd.f32 %v3817_v53, %v13636_v63  ;;  %v13638_v53 = vld [vmem:[#allocation24_spill] sm:$0xff] }
 0x3aa   : > { %5512 = vmatmul.mubr.bf16.gmra.mrb[124].mxu0 %v11965_v37  ;;  %v4778_v50 = vor.u32 %v4776_v32, %v4774_v15 }
 0x3ab   : > { %v4000_v56 = vadd.f32 %v11735_v17, %v3921_v25  ;;  %5517 = vmatprep.mubr.bf16.mxu0 %v12061_v23  ;;  %v4974_v46 = vrot.slane %v12055_v62, 1  ;;  %v4071_v38 = vmax.f32 %v3999_v36, 0.0  ;;  %v4782_v25 = vshll.u32 %v12050_v12, 16 }
 0x3ac   : > { %v3500_v7 = vpop.f32.mrb[84].mxu1  ;;  %v4787_v15 = vshll.u32 %v12055_v62, 16 }
 0x3ad   : > { %v4072_v1 = vmax.f32 %v4000_v56, 0.0  ;;  %v3822_v47 = vadd.f32 %v11743_v41, %v3500_v7  ;;  %v3502_v35 = vpop.f32.mrb[85].mxu1  ;;  %v12070_v27 = vsel %vm1217_vm0, %v4973_v34, %v4974_v46  ;;  %v5048_v29 = vsel %vm1217_vm0, %v4974_v46, 0  ;;  %v13639_v34 = vld [vmem:[#allocation98_spill] sm:$0xff] }
 0x3ae   : > { %13637 = vst [vmem:[#allocation93_spill] sm:$0xff] %v12070_v27  ;;  %v3503_v21 = vpop.f32.mrb[86].mxu1  ;;  %v12075_v5 = vsel %vm11325_vm5, %v5048_v29, 0  ;;  %8574 = vmatprep.mubr.bf16.mxu1 %v12070_v27  ;;  %v12087_v7 = vsel %vm11325_vm5, %v4778_v50, 0  ;;  %v4784_v32 = vrot.slane %v4782_v25, 1 }
 0x3af   : > { %v4347_v51 = vpack.c.bf16 %v4072_v1, %v4071_v38  ;;  %v3922_v36 = vadd.f32 %v3822_v47, %v13638_v53  ;;  %v3825_v63 = vadd.f32 %v11756_v48, %v3503_v21  ;;  %8575 = vmatmul.mubr.bf16.gmra.mrb[156].mxu1 %v12075_v5  ;;  %v3505_v41 = vpop.f32.mrb[87].mxu1  ;;  %13640 = vst [vmem:[#allocation11_spill] sm:$0xff] %v12087_v7  ;;  %v4780_v53 = vshrl.u32 %v12050_v12, 16 }
 0x3b0   : > { %v13642_v41 = vld [vmem:[#allocation75_spill] sm:$0xff] }
 0x3b1   : > { %v4001_v56 = vadd.f32 %v11735_v17, %v3922_v36  ;;  %v3923_v46 = vadd.f32 %v3825_v63, %v13639_v34  ;;  %v4789_v36 = vrot.slane %v4787_v15, 1  ;;  %v12095_v50 = vmul.bf16 %v11256_v44, %v4347_v51 }
 0x3b2   : > { %5518 = vmatmul.mubr.bf16.gmra.mrb[128].mxu0 %v12005_v28  ;;  %v4785_v28 = vor.u32 %v4784_v32, %v4780_v53 }
 0x3b3   : > { %v4002_v38 = vadd.f32 %v11735_v17, %v3923_v46  ;;  %5525 = vmatprep.mubr.bf16.mxu0 %v12087_v7  ;;  %v4073_v1 = vmax.f32 %v4001_v56, 0.0  ;;  %13641 = vst [vmem:[#allocation43_spill] sm:$0xff] %v12095_v50  ;;  %v13644_v56 = vld [vmem:[#allocation77_spill] sm:$0xff] }
 0x3b4   : > { %v3508_v48 = vpop.f32.mrb[88].mxu1  ;;  %v12106_v15 = vsel %vm776_vm1, %v4785_v28, %v4789_v36 }
 0x3b5   : > { %v4074_v47 = vmax.f32 %v4002_v38, 0.0  ;;  %v3830_v35 = vadd.f32 %v11791_v14, %v3508_v48  ;;  %v3510_v29 = vpop.f32.mrb[89].mxu1 }
 0x3b6   : > { %v3511_v21 = vpop.f32.mrb[90].mxu1 }
 0x3b7   : > { %v4348_v63 = vpack.c.bf16 %v4074_v47, %v4073_v1  ;;  %v3924_v34 = vadd.f32 %v3830_v35, %v13642_v41  ;;  %v3833_v46 = vadd.f32 %v11799_v2, %v3511_v21  ;;  %v3513_v7 = vpop.f32.mrb[91].mxu1  ;;  %v4976_v2 = vrot.slane %v12095_v50, 1 }
 0x3b8   : > { %v4791_v1 = vshrl.u32 %v12055_v62, 16 }
 0x3b9   : > { %v12100_v25 = vmul.bf16 %v11250_v22, %v4348_v63  ;;  %v4003_v14 = vadd.f32 %v11735_v17, %v3924_v34  ;;  %v3925_v38 = vadd.f32 %v3833_v46, %v13644_v56  ;;  %v13646_v46 = vld [vmem:[#allocation59_spill] sm:$0xff] }
 0x3ba   : > { %5526 = vmatmul.mubr.bf16.gmra.mrb[132].mxu0 %v12010_v54  ;;  %v4793_v41 = vor.u32 %v4791_v1, %v4789_v36 }
 0x3bb   : > { %13643 = vst [vmem:[#allocation78_spill] sm:$0xff] %v12100_v25  ;;  %v4004_v51 = vadd.f32 %v11735_v17, %v3925_v38  ;;  %5531 = vmatprep.mubr.bf16.mxu0 %v12106_v15  ;;  %v4977_v7 = vrot.slane %v12100_v25, 1  ;;  %v4075_v48 = vmax.f32 %v4003_v14, 0.0  ;;  %v4797_v38 = vshll.u32 %v12095_v50, 16 }
 0x3bc   : > { %v3516_v32 = vpop.f32.mrb[92].mxu1  ;;  %v4802_v36 = vshll.u32 %v12100_v25, 16 }
 0x3bd   : > { %v4076_v47 = vmax.f32 %v4004_v51, 0.0  ;;  %v3838_v35 = vadd.f32 %v11786_v57, %v3516_v32  ;;  %v3518_v29 = vpop.f32.mrb[93].mxu1  ;;  %v12115_v21 = vsel %vm1217_vm0, %v4976_v2, %v4977_v7  ;;  %v5051_v28 = vsel %vm1217_vm0, %v4977_v7, 0  ;;  %v13647_v2 = vld [vmem:[#allocation72_spill] sm:$0xff] }
 0x3be   : > { %13645 = vst [vmem:[#allocation12_spill] sm:$0xff] %v12115_v21  ;;  %v3519_v53 = vpop.f32.mrb[94].mxu1  ;;  %v12120_v63 = vsel %vm11325_vm5, %v5051_v28, 0  ;;  %8578 = vmatprep.mubr.bf16.mxu1 %v12115_v21  ;;  %v12132_v32 = vsel %vm11325_vm5, %v4793_v41, 0  ;;  %v4799_v1 = vrot.slane %v4797_v38, 1  ;;  %v4795_v41 = vshrl.u32 %v12095_v50, 16 }
 0x3bf   : > { %v4349_v34 = vpack.c.bf16 %v4076_v47, %v4075_v48  ;;  %v3926_v14 = vadd.f32 %v3838_v35, %v13646_v46  ;;  %v3841_v56 = vadd.f32 %v11796_v59, %v3519_v53  ;;  %8579 = vmatmul.mubr.bf16.gmra.mrb[160].mxu1 %v12120_v63  ;;  %v3521_v57 = vpop.f32.mrb[95].mxu1  ;;  %13648 = vst [vmem:[#allocation4_spill] sm:$0xff] %v12132_v32 }
 0x3c1   : > { %v4005_v51 = vadd.f32 %v11735_v17, %v3926_v14  ;;  %v3927_v7 = vadd.f32 %v3841_v56, %v13647_v2  ;;  %v4804_v56 = vrot.slane %v4802_v36, 1  ;;  %v12142_v57 = vmul.bf16 %v11256_v44, %v4349_v34 }
 0x3c2   : > { %5532 = vmatmul.mubr.bf16.gmra.mrb[136].mxu0 %v12050_v12  ;;  %v13652_v12 = vld [vmem:[#allocation83_spill] sm:$0xff] }
 0x3c3   : > { %v4006_v48 = vadd.f32 %v11735_v17, %v3927_v7  ;;  %5539 = vmatprep.mubr.bf16.mxu0 %v12132_v32  ;;  %v4077_v47 = vmax.f32 %v4005_v51, 0.0  ;;  %13649 = vst [vmem:[#allocation74_spill] sm:$0xff] %v12142_v57  ;;  %v13650_v7 = vld [vmem:[#allocation30_spill] sm:$0xff] }
 0x3c4   : > { %v3524_v59 = vpop.f32.mrb[96].mxu1 }
 0x3c5   : > { %v4078_v35 = vmax.f32 %v4006_v48, 0.0  ;;  %v3846_v29 = vadd.f32 %v11829_v0, %v3524_v59  ;;  %v3526_v28 = vpop.f32.mrb[97].mxu1  ;;  %v12138_v53 = vpop.f32.mrb[32].mxu0  ;;  %v4800_v59 = vor.u32 %v4799_v1, %v4795_v41 }
 0x3c6   : > { %v3527_v46 = vpop.f32.mrb[98].mxu1  ;;  %v5353_v14 = vpop.f32.mrb[33].mxu0 }
 0x3c7   : > { %v4350_v2 = vpack.c.bf16 %v4078_v35, %v4077_v47  ;;  %v3928_v32 = vadd.f32 %v3846_v29, %v13650_v7  ;;  %v3849_v38 = vadd.f32 %v11839_v45, %v3527_v46  ;;  %v12146_v51 = vpop.f32.mrb[34].mxu0  ;;  %v3529_v48 = vpop.f32.mrb[99].mxu1  ;;  %v12155_v44 = vsel %vm776_vm1, %v4800_v59, %v4804_v56 }
 0x3c8   : > { %v5356_v0 = vpop.f32.mrb[35].mxu0  ;;  %v4979_v45 = vrot.slane %v12142_v57, 1  ;;  %v4806_v35 = vshrl.u32 %v12100_v25, 16 }
 0x3c9   : > { %v12149_v28 = vmul.bf16 %v11250_v22, %v4350_v2  ;;  %v4007_v14 = vadd.f32 %v11735_v17, %v3928_v32  ;;  %v3929_v36 = vadd.f32 %v3849_v38, %v13652_v12 }
 0x3ca   : > { %5540 = vmatmul.mubr.bf16.gmra.mrb[140].mxu0 %v12055_v62  ;;  %v4808_v0 = vor.u32 %v4806_v35, %v4804_v56 }
 0x3cb   : > { %13651 = vst [vmem:[#allocation94_spill] sm:$0xff] %v12149_v28  ;;  %v4008_v34 = vadd.f32 %v11735_v17, %v3929_v36  ;;  %5545 = vmatprep.mubr.bf16.mxu0 %v12155_v44  ;;  %v4980_v1 = vrot.slane %v12149_v28, 1  ;;  %v4079_v47 = vmax.f32 %v4007_v14, 0.0  ;;  %v13655_v14 = vld [vmem:[#allocation34_spill] sm:$0xff]  ;;  %v4817_v35 = vshll.u32 %v12149_v28, 16 }
 0x3cc   : > { %v3532_v22 = vpop.f32.mrb[100].mxu1 }
 0x3cd   : > { %v4080_v32 = vmax.f32 %v4008_v34, 0.0  ;;  %v3854_v12 = vadd.f32 %v11823_v10, %v3532_v22  ;;  %v3534_v29 = vpop.f32.mrb[101].mxu1  ;;  %v5359_v46 = vpop.f32.mrb[36].mxu0  ;;  %v12164_v41 = vsel %vm1217_vm0, %v4979_v45, %v4980_v1  ;;  %v5054_v2 = vsel %vm1217_vm0, %v4980_v1, 0 }
 0x3ce   : > { %13653 = vst [vmem:[#allocation14_spill] sm:$0xff] %v12164_v41  ;;  %v3535_v7 = vpop.f32.mrb[102].mxu1  ;;  %v12169_v38 = vsel %vm11325_vm5, %v5054_v2, 0  ;;  %8582 = vmatprep.mubr.bf16.mxu1 %v12164_v41  ;;  %v5360_v48 = vpop.f32.mrb[37].mxu0  ;;  %v4812_v22 = vshll.u32 %v12142_v57, 16  ;;  %v13657_v2 = vld [vmem:[#allocation60_spill] sm:$0xff] }
 0x3cf   : > { %13654 = vst [vmem:[#allocation15_spill] sm:$0xff] %v12169_v38  ;;  %v4351_v59 = vpack.c.bf16 %v4080_v32, %v4079_v47  ;;  %v3930_v36 = vadd.f32 %v3854_v12, %v13655_v14  ;;  %v3857_v10 = vadd.f32 %v11832_v11, %v3535_v7  ;;  %8583 = vmatmul.mubr.bf16.gmra.mrb[164].mxu1 %v12169_v38  ;;  %v5361_v34 = vpop.f32.mrb[38].mxu0  ;;  %v3537_v45 = vpop.f32.mrb[103].mxu1  ;;  %v4581_v47 = vshrl.u32 %v11246_v40, 16  ;;  %v13690_v38 = vld [vmem:[#allocation42_spill] sm:$0xff] }
 0x3d0   : > { %6007 = vmatprep.mubr.bf16.mxu1 %v11288_v9  ;;  %v5362_v1 = vpop.f32.mrb[39].mxu0  ;;  %v12185_v11 = vsel %vm11325_vm5, %v4808_v0, 0  ;;  %v4814_v7 = vrot.slane %v4812_v22, 1 }
 0x3d1   : > { %v12177_v29 = vmul.bf16 0.0|0.0, %v4351_v59  ;;  %v4009_v46 = vadd.f32 %v11735_v17, %v3930_v36  ;;  %v3931_v56 = vadd.f32 %v3857_v10, %v13657_v2  ;;  %13658 = vst [vmem:[#allocation97_spill] sm:$0xff] %v12185_v11  ;;  %v4583_v32 = vor.u32 %v4581_v47, %v11269_v18  ;;  %v8960_v10 = vld [vmem:[%s12885_s4 + $0x208] sm:$0xff]  }
 0x3d2   : > { %5546 = vmatmul.mubr.bf16.gmra.mrb[144].mxu0 %v12095_v50  ;;  %v4810_v1 = vshrl.u32 %v12142_v57, 16  ;;  %v4819_v18 = vrot.slane %v4817_v35, 1  ;;  %v8965_v35 = vld [vmem:[%s12885_s4 + $0x210] sm:$0xff]  }
 0x3d3   : > { %13656 = vst [vmem:[#allocation47_spill] sm:$0xff] %v12177_v29  ;;  %v4010_v9 = vadd.f32 %v11735_v17, %v3931_v56  ;;  %5553 = vmatprep.mubr.bf16.mxu0 %v12185_v11  ;;  %v4081_v48 = vmax.f32 %v4009_v46, 0.0  ;;  %v4827_v0 = vshll.u32 %v12177_v29, 16  ;;  %v4877_v56 = vsel %vm11325_vm5, %v4583_v32, 0 }
 0x3d4   : > { %v8524_v12 = vpop.f32.mrb[104].mxu1 }
 0x3d5   : > { %v4082_v59 = vmax.f32 %v4010_v9, 0.0  ;;  %v5608_v14 = vpop.f32.mrb[105].mxu1  ;;  %v5365_v36 = vpop.f32.mrb[40].mxu0 }
 0x3d6   : > { %v12196_v34 = vadd.f32 %v5608_v14, %v12138_v53  ;;  %v8525_v17 = vpop.f32.mrb[106].mxu1  ;;  %v5367_v45 = vpop.f32.mrb[41].mxu0  ;;  %v4815_v53 = vor.u32 %v4814_v7, %v4810_v1  ;;  %v4821_v14 = vshrl.u32 %v12149_v28, 16 }
 0x3d7   : > { %v4352_v2 = vpack.c.bf16 %v4082_v59, %v4081_v48  ;;  %v5611_v22 = vpop.f32.mrb[107].mxu1  ;;  %6008 = vmatmul.mubr.bf16.vlgmr.msra.gmra.mrb[168].mxu1 %v11252_v49  ;;  %v5368_v46 = vpop.f32.mrb[42].mxu0  ;;  %v4829_v49 = vrot.slane %v4827_v0, 1  ;;  %v8970_v45 = vld [vmem:[%s12885_s4 + $0x218] sm:$0xff]  }
 0x3d8   : > { %v12203_v47 = vadd.f32 %v5611_v22, %v12146_v51  ;;  %6015 = vmatprep.mubr.bf16.mxu1 %v4877_v56  ;;  %v5370_v9 = vpop.f32.mrb[43].mxu0  ;;  %8667 = vmatpush3.bf16.msra.mxu1 %v11871_v6  ;;  %v12213_v32 = vsel %vm776_vm1, %v4815_v53, %v4819_v18  ;;  %v4982_v51 = vrot.slane %v12177_v29, 1  ;;  %v4825_v6 = vshrl.u32 %v12177_v29, 16 }
 0x3d9   : > { %v12206_v12 = vmul.bf16 0.0|0.0, %v4352_v2  ;;  %8668 = vmatprep.subr.bf16.mxu1 %v8960_v10  ;;  %13660 = vst [vmem:[#allocation95_spill] sm:$0xff] %v12213_v32 }
 0x3da   : > { %5554 = vmatmul.mubr.bf16.gmra.mrb[148].mxu0 %v12100_v25  ;;  %v4830_v2 = vor.u32 %v4829_v49, %v4825_v6  ;;  %v13708_v25 = vld [vmem:[#allocation70_spill] sm:$0xff] }
 0x3db   : > { %13659 = vst [vmem:[#allocation18_spill] sm:$0xff] %v12206_v12  ;;  %5559 = vmatprep.mubr.bf16.mxu0 %v12213_v32  ;;  %v13135_v7 = vrot.slane %v12206_v12, 1  ;;  %v4832_v48 = vshll.u32 %v12206_v12, 16 }
 0x3dc   : > { %v8528_v59 = vpop.f32.mrb[108].mxu1  ;;  %8669 = vmatpush3.bf16.msra.mxu1 %v8960_v10  ;;  %v4823_v10 = vor.u32 %v4821_v14, %v4819_v18 }
 0x3dd   : > { %v5622_v0 = vpop.f32.mrb[109].mxu1  ;;  %v5373_v17 = vpop.f32.mrb[44].mxu0  ;;  %8670 = vmatprep.subr.bf16.mxu1 %v8965_v35  ;;  %v12227_v1 = vsel %vm1217_vm0, %v4982_v51, %v13135_v7  ;;  %v12229_v22 = vrot.slane %v4832_v48, 1  ;;  %v13680_v7 = vld [vmem:[#allocation40_spill] sm:$0xff] }
 0x3de   : > { %13661 = vst [vmem:[#allocation17_spill] sm:$0xff] %v12227_v1  ;;  %v12231_v56 = vadd.f32 %v5622_v0, %v5365_v36  ;;  %v8529_v9 = vpop.f32.mrb[110].mxu1  ;;  %v5374_v53 = vpop.f32.mrb[45].mxu0  ;;  %v12244_v36 = vsel %vm11325_vm5, %v4823_v10, 0  ;;  %v13666_v0 = vld [vmem:[#allocation86_spill] sm:$0xff] }
 0x3df   : > { %13662 = vst [vmem:[#allocation6_spill] sm:$0xff] %v12229_v22  ;;  %v5625_v59 = vpop.f32.mrb[111].mxu1  ;;  %6016 = vmatmul.mubr.bf16.gmra.mrb[172].mxu1 %v11246_v40  ;;  %v5375_v17 = vpop.f32.mrb[46].mxu0  ;;  %v12236_v29 = vsel %vm776_vm1, %v4830_v2, %v12229_v22  ;;  %13664 = vst [vmem:[#allocation51_spill] sm:$0xff] %v12244_v36  ;;  %v8975_v9 = vld [vmem:[%s12885_s4 + $0x220] sm:$0xff]   ;;  %v13682_v22 = vld [vmem:[#allocation88_spill] sm:$0xff] }
 0x3e0   : > { %13663 = vst [vmem:[#allocation21_spill] sm:$0xff] %v12236_v29  ;;  %v12238_v32 = vadd.f32 %v5625_v59, %v5368_v46  ;;  %6021 = vmatprep.mubr.bf16.mxu1 %v11314_v58  ;;  %v5376_v49 = vpop.f32.mrb[47].mxu0  ;;  %8671 = vmatpush3.bf16.msra.mxu1 %v8965_v35 }
 0x3e1   : > { %8672 = vmatprep.subr.bf16.mxu1 %v8970_v45 }
 0x3e2   : > { %5560 = vmatmul.mubr.bf16.gmra.mrb[152].mxu0 %v12142_v57  ;;  %v13685_v57 = vld [vmem:[#allocation82_spill] sm:$0xff] }
 0x3e3   : > { %5567 = vmatprep.mubr.bf16.mxu0 %v12244_v36 }
 0x3e4   : > { %v8532_v18 = vpop.f32.mrb[112].mxu1  ;;  %8673 = vmatpush3.bf16.msra.mxu1 %v8970_v45  ;;  %v13668_v45 = vld [vmem:[#allocation41_spill] sm:$0xff] }
 0x3e5   : > { %v5636_v51 = vpop.f32.mrb[113].mxu1  ;;  %v5379_v6 = vpop.f32.mrb[48].mxu0  ;;  %8674 = vmatprep.subr.bf16.mxu1 %v8975_v9 }
 0x3e6   : > { %v8533_v48 = vpop.f32.mrb[114].mxu1  ;;  %v5381_v46 = vpop.f32.mrb[49].mxu0  ;;  %v12247_v14 = vadd.f32 %v5636_v51, %v5379_v6 }
 0x3e7   : > { %v5639_v58 = vpop.f32.mrb[115].mxu1  ;;  %6022 = vmatmul.mubr.bf16.gmra.mrb[176].mxu1 %v11282_v55  ;;  %v5382_v35 = vpop.f32.mrb[50].mxu0  ;;  %v13669_v55 = vrot.slane %v11246_v40, 1  ;;  %v13670_v48 = vld [vmem:[#allocation32_spill] sm:$0xff]  ;;  %v13672_v40 = vld [vmem:[#allocation39_spill] sm:$0xff] }
 0x3e8   : > { %13665 = vst [vmem:[#allocation96_spill] sm:$0xff] %v12247_v14  ;;  %6029 = vmatprep.mubr.bf16.mxu1 %v13666_v0  ;;  %v5384_v2 = vpop.f32.mrb[51].mxu0  ;;  %v12254_v53 = vadd.f32 %v5639_v58, %v5382_v35  ;;  %8675 = vmatpush3.bf16.msra.mxu1 %v8975_v9  ;;  %v8957_v58 = vld [vmem:[%s12885_s4 + $0x180] sm:$0xff]   ;;  %v8958_v9 = vld [vmem:[%s12885_s4 + $0x188] sm:$0xff]  }
 0x3e9   : > { %v5006_v49 = vsel %vm1217_vm0, %v13669_v55, 0  ;;  %v13671_v35 = vld [vmem:[#allocation62_spill] sm:$0xff] }
 0x3ea   : > { %13667 = vst [vmem:[#allocation99_spill] sm:$0xff] %v12254_v53  ;;  %5568 = vmatmul.mubr.bf16.gmra.mrb[156].mxu0 %v12149_v28  ;;  %v5059_v2 = vsel %vm11325_vm5, %v5006_v49, 0  ;;  %v13683_v28 = vld [vmem:[#allocation26_spill] sm:$0xff] }
 0x3eb   : > { %8602 = vmatprep.mubr.bf16.mxu0 %v13668_v45 }
 0x3ec   : > { %v8536_v10 = vpop.f32.mrb[116].mxu1 }
 0x3ed   : > { %v5650_v59 = vpop.f32.mrb[117].mxu1  ;;  %v5387_v17 = vpop.f32.mrb[52].mxu0  ;;  %v13673_v10 = vmov 0  }
 0x3ee   : > { %v8537_v18 = vpop.f32.mrb[118].mxu1  ;;  %v5388_v51 = vpop.f32.mrb[53].mxu0 }
 0x3ef   : > { %v5653_v6 = vpop.f32.mrb[119].mxu1  ;;  %6030 = vmatmul.mubr.bf16.gmra.mrb[180].mxu1 %v13670_v48  ;;  %v5389_v46 = vpop.f32.mrb[54].mxu0 }
 0x3f0   : > { %6035 = vmatprep.mubr.bf16.mxu1 %v13671_v35  ;;  %v5390_v0 = vpop.f32.mrb[55].mxu0 }
 0x3f1   : > { %v13675_v0 = vld [vmem:[#allocation61_spill] sm:$0xff] }
 0x3f2   : > { %8603 = vmatmul.mubr.bf16.vlgmr.msra.gmra.mrb[160].mxu0 %v5059_v2  ;;  %v13676_v2 = vld [vmem:[#allocation63_spill] sm:$0xff] }
 0x3f3   : > { %8606 = vmatprep.mubr.bf16.mxu0 %v13672_v40  ;;  %6682 = vmatpush1.bf16.msra.mxu0 %v8957_v58  ;;  %v8959_v58 = vld [vmem:[%s12885_s4 + $0x190] sm:$0xff]  }
 0x3f4   : > { %v8540_v45 = vpop.f32.mrb[120].mxu1  ;;  %6683 = vmatprep.subr.bf16.mxu0 %v13673_v10 }
 0x3f5   : > { %v5664_v17 = vpop.f32.mrb[121].mxu1  ;;  %v5393_v55 = vpop.f32.mrb[56].mxu0 }
 0x3f6   : > { %v8541_v18 = vpop.f32.mrb[122].mxu1  ;;  %v5395_v51 = vpop.f32.mrb[57].mxu0  ;;  %v12273_v48 = vadd.f32 %v5650_v59, %v5393_v55  ;;  %v13679_v59 = vld [vmem:[#allocation84_spill] sm:$0xff] }
 0x3f7   : > { %v5667_v46 = vpop.f32.mrb[123].mxu1  ;;  %6036 = vmatmul.mubr.bf16.gmra.mrb[184].mxu1 %v13675_v0  ;;  %v5396_v49 = vpop.f32.mrb[58].mxu0  ;;  %6684 = vmatpush1.bf16.msra.mxu0 %v8958_v9  ;;  %v13678_v18 = vld [vmem:[#allocation80_spill] sm:$0xff]  ;;  %v8961_v9 = vld [vmem:[%s12885_s4 + $0x198] sm:$0xff]  }
 0x3f8   : > { %13674 = vst [vmem:[#allocation23_spill] sm:$0xff] %v12273_v48  ;;  %6043 = vmatprep.mubr.bf16.mxu1 %v13676_v2  ;;  %v5398_v40 = vpop.f32.mrb[59].mxu0  ;;  %6685 = vmatprep.subr.bf16.mxu0 %v13673_v10  ;;  %v12281_v45 = vadd.f32 %v5653_v6, %v5396_v49  ;;  %v8962_v6 = vld [vmem:[%s12885_s4 + $0x1a0] sm:$0xff]   ;;  %v13681_v49 = vld [vmem:[#allocation64_spill] sm:$0xff]  ;;  %v13698_v48 = vld [vmem:[#allocation35_spill] sm:$0xff] }
 0x3fa   : > { %13677 = vst [vmem:[#allocation54_spill] sm:$0xff] %v12281_v45  ;;  %8607 = vmatmul.mubr.bf16.gmra.mrb[164].mxu0 %v13678_v18  ;;  %v13695_v45 = vld [vmem:[#allocation29_spill] sm:$0xff] }
 0x3fb   : > { %8610 = vmatprep.mubr.bf16.mxu0 %v13679_v59  ;;  %6686 = vmatpush1.bf16.msra.mxu0 %v8959_v58  ;;  %v13705_v59 = vld [vmem:[#allocation65_spill] sm:$0xff] }
 0x3fc   : > { %6687 = vmatprep.subr.bf16.mxu0 %v13673_v10 }
 0x3fd   : > { %v5401_v55 = vpop.f32.mrb[60].mxu0 }
 0x3fe   : > { %v5402_v51 = vpop.f32.mrb[61].mxu0 }
 0x3ff   : > { %6044 = vmatmul.mubr.bf16.gmra.mrb[188].mxu1 %v13680_v7  ;;  %v5403_v40 = vpop.f32.mrb[62].mxu0  ;;  %6688 = vmatpush1.bf16.msra.mxu0 %v8961_v9  ;;  %v8963_v9 = vld [vmem:[%s12885_s4 + $0x1a8] sm:$0xff]  }
 0x400   : > { %6049 = vmatprep.mubr.bf16.mxu1 %v13681_v49  ;;  %v5404_v18 = vpop.f32.mrb[63].mxu0  ;;  %6689 = vmatprep.subr.bf16.mxu0 %v13673_v10 }
 0x402   : > { %v8544_v58 = vpop.f32.mrb[124].mxu1  ;;  %8611 = vmatmul.mubr.bf16.gmra.mrb[168].mxu0 %v13682_v22 }
 0x403   : > { %v5678_v29 = vpop.f32.mrb[125].mxu1  ;;  %8614 = vmatprep.mubr.bf16.mxu0 %v13683_v28  ;;  %6690 = vmatpush1.bf16.msra.mxu0 %v8962_v6  ;;  %v8964_v6 = vld [vmem:[%s12885_s4 + $0x1b0] sm:$0xff]  }
 0x404   : > { %v8545_v55 = vpop.f32.mrb[126].mxu1  ;;  %6691 = vmatprep.subr.bf16.mxu0 %v13673_v10  ;;  %v13703_v28 = vld [vmem:[#allocation48_spill] sm:$0xff] }
 0x405   : > { %v5681_v51 = vpop.f32.mrb[127].mxu1  ;;  %v5407_v40 = vpop.f32.mrb[64].mxu0  ;;  %v8977_v55 = vld [vmem:[%s12885_s4 + $0x228] sm:$0xff]  }
 0x406   : > { %v5409_v36 = vpop.f32.mrb[65].mxu0  ;;  %v12301_v18 = vadd.f32 %v5664_v17, %v5407_v40  ;;  %v13688_v17 = vld [vmem:[#allocation87_spill] sm:$0xff]  ;;  %8676 = vmatprep.subr.bf16.mxu1 %v8977_v55  ;;  %v13689_v40 = vld [vmem:[#allocation52_spill] sm:$0xff] }
 0x407   : > { %6050 = vmatmul.mubr.bf16.gmra.mrb[192].mxu1 %v13685_v57  ;;  %v5410_v58 = vpop.f32.mrb[66].mxu0  ;;  %6692 = vmatpush1.bf16.msra.mxu0 %v8963_v9  ;;  %v8966_v9 = vld [vmem:[%s12885_s4 + $0x1b8] sm:$0xff]  }
 0x408   : > { %13684 = vst [vmem:[#allocation101_spill] sm:$0xff] %v12301_v18  ;;  %6057 = vmatprep.mubr.bf16.mxu1 %v13686_v4  ;;  %v5412_v12 = vpop.f32.mrb[67].mxu0  ;;  %6693 = vmatprep.subr.bf16.mxu0 %v13673_v10  ;;  %v12312_v36 = vadd.f32 %v5667_v46, %v5410_v58  ;;  %v8967_v46 = vld [vmem:[%s12885_s4 + $0x1c0] sm:$0xff]   ;;  %v13692_v18 = vld [vmem:[#allocation56_spill] sm:$0xff] }
 0x409   : > { %8677 = vmatpush3.bf16.msra.mxu1 %v8977_v55  ;;  %v13691_v58 = vld [vmem:[#allocation50_spill] sm:$0xff]  ;;  %v13693_v55 = vld [vmem:[#allocation33_spill] sm:$0xff] }
 0x40a   : > { %13687 = vst [vmem:[#allocation57_spill] sm:$0xff] %v12312_v36  ;;  %8615 = vmatmul.mubr.bf16.gmra.mrb[172].mxu0 %v13688_v17 }
 0x40b   : > { %8618 = vmatprep.mubr.bf16.mxu0 %v13689_v40  ;;  %6694 = vmatpush1.bf16.msra.mxu0 %v8964_v6 }
 0x40c   : > { %6695 = vmatprep.subr.bf16.mxu0 %v13673_v10 }
 0x40d   : > { %v5415_v12 = vpop.f32.mrb[68].mxu0 }
 0x40e   : > { %v5416_v1 = vpop.f32.mrb[69].mxu0 }
 0x40f   : > { %6058 = vmatmul.mubr.bf16.gmra.mrb[196].mxu1 %v13690_v38  ;;  %v5417_v41 = vpop.f32.mrb[70].mxu0  ;;  %6696 = vmatpush1.bf16.msra.mxu0 %v8966_v9 }
 0x410   : > { %6063 = vmatprep.mubr.bf16.mxu1 %v13691_v58  ;;  %v5418_v6 = vpop.f32.mrb[71].mxu0  ;;  %6697 = vmatprep.subr.bf16.mxu0 %v13673_v10  ;;  %v8968_v41 = vld [vmem:[%s12885_s4 + $0x1c8] sm:$0xff]  }
 0x412   : > { %v8548_v36 = vpop.f32.mrb[128].mxu1  ;;  %8619 = vmatmul.mubr.bf16.gmra.mrb[176].mxu0 %v13692_v18 }
 0x413   : > { %v5692_v40 = vpop.f32.mrb[129].mxu1  ;;  %8622 = vmatprep.mubr.bf16.mxu0 %v13693_v55  ;;  %6698 = vmatpush1.bf16.msra.mxu0 %v8967_v46  ;;  %v8969_v46 = vld [vmem:[%s12885_s4 + $0x1d0] sm:$0xff]   ;;  %v13696_v55 = vld [vmem:[#allocation58_spill] sm:$0xff] }
 0x414   : > { %v8549_v1 = vpop.f32.mrb[130].mxu1  ;;  %6699 = vmatprep.subr.bf16.mxu0 %v13673_v10 }
 0x415   : > { %v5695_v9 = vpop.f32.mrb[131].mxu1  ;;  %v5421_v12 = vpop.f32.mrb[72].mxu0 }
 0x416   : > { %v5423_v17 = vpop.f32.mrb[73].mxu0  ;;  %v12332_v6 = vadd.f32 %v5678_v29, %v5421_v12  ;;  %v8971_v29 = vld [vmem:[%s12885_s4 + $0x1d8] sm:$0xff]  }
 0x417   : > { %6064 = vmatmul.mubr.bf16.gmra.mrb[200].mxu1 %v13695_v45  ;;  %v5424_v36 = vpop.f32.mrb[74].mxu0  ;;  %6700 = vmatpush1.bf16.msra.mxu0 %v8968_v41  ;;  %v13699_v17 = vld [vmem:[#allocation44_spill] sm:$0xff] }
 0x418   : > { %13694 = vst [vmem:[#allocation100_spill] sm:$0xff] %v12332_v6  ;;  %6071 = vmatprep.mubr.bf16.mxu1 %v13696_v55  ;;  %v5426_v18 = vpop.f32.mrb[75].mxu0  ;;  %6701 = vmatprep.subr.bf16.mxu0 %v13673_v10  ;;  %v12340_v1 = vadd.f32 %v5681_v51, %v5424_v36  ;;  %v13700_v6 = vld [vmem:[#allocation27_spill] sm:$0xff]  ;;  %v8972_v51 = vld [vmem:[%s12885_s4 + $0x1e0] sm:$0xff]   ;;  %v13701_v36 = vld [vmem:[#allocation37_spill] sm:$0xff] }
 0x41a   : > { %13697 = vst [vmem:[#allocation24_spill] sm:$0xff] %v12340_v1  ;;  %8623 = vmatmul.mubr.bf16.gmra.mrb[180].mxu0 %v13698_v48 }
 0x41b   : > { %8626 = vmatprep.mubr.bf16.mxu0 %v13699_v17  ;;  %6702 = vmatpush1.bf16.msra.mxu0 %v8969_v46  ;;  %v13702_v17 = vld [vmem:[#allocation13_spill] sm:$0xff] }
 0x41c   : > { %6703 = vmatprep.subr.bf16.mxu0 %v13673_v10 }
 0x41d   : > { %v5429_v41 = vpop.f32.mrb[76].mxu0 }
 0x41e   : > { %v5430_v12 = vpop.f32.mrb[77].mxu0 }
 0x41f   : > { %6072 = vmatmul.mubr.bf16.gmra.mrb[204].mxu1 %v13700_v6  ;;  %v5431_v18 = vpop.f32.mrb[78].mxu0  ;;  %6704 = vmatpush1.bf16.msra.mxu0 %v8971_v29  ;;  %v8973_v29 = vld [vmem:[%s12885_s4 + $0x1e8] sm:$0xff]  }
 0x420   : > { %6077 = vmatprep.mubr.bf16.mxu1 %v13701_v36  ;;  %v5432_v1 = vpop.f32.mrb[79].mxu0  ;;  %6705 = vmatprep.subr.bf16.mxu0 %v13673_v10 }
 0x422   : > { %v8552_v46 = vpop.f32.mrb[132].mxu1  ;;  %8627 = vmatmul.mubr.bf16.gmra.mrb[184].mxu0 %v13702_v17 }
 0x423   : > { %v5706_v48 = vpop.f32.mrb[133].mxu1  ;;  %8630 = vmatprep.mubr.bf16.mxu0 %v13703_v28  ;;  %6706 = vmatpush1.bf16.msra.mxu0 %v8972_v51  ;;  %v8974_v51 = vld [vmem:[%s12885_s4 + $0x1f0] sm:$0xff]  }
 0x424   : > { %v8553_v41 = vpop.f32.mrb[134].mxu1  ;;  %6707 = vmatprep.subr.bf16.mxu0 %v13673_v10  ;;  %v13706_v28 = vld [vmem:[#allocation68_spill] sm:$0xff] }
 0x425   : > { %v5709_v12 = vpop.f32.mrb[135].mxu1  ;;  %v5435_v18 = vpop.f32.mrb[80].mxu0 }
 0x426   : > { %v5437_v22 = vpop.f32.mrb[81].mxu0  ;;  %v12360_v1 = vadd.f32 %v5692_v40, %v5435_v18  ;;  %v8976_v40 = vld [vmem:[%s12885_s4 + $0x1f8] sm:$0xff]  }
 0x427   : > { %6078 = vmatmul.mubr.bf16.gmra.mrb[208].mxu1 %v13705_v59  ;;  %v5438_v46 = vpop.f32.mrb[82].mxu0  ;;  %6708 = vmatpush1.bf16.msra.mxu0 %v8973_v29  ;;  %v13709_v22 = vld [vmem:[#allocation91_spill] sm:$0xff]  ;;  %v8978_v29 = vld [vmem:[%s12885_s4 + $0x230] sm:$0xff]  }
 0x428   : > { %13704 = vst [vmem:[#allocation98_spill] sm:$0xff] %v12360_v1  ;;  %6085 = vmatprep.mubr.bf16.mxu1 %v13706_v28  ;;  %v5440_v17 = vpop.f32.mrb[83].mxu0  ;;  %6709 = vmatprep.subr.bf16.mxu0 %v13673_v10  ;;  %v12368_v41 = vadd.f32 %v5695_v9, %v5438_v46  ;;  %v13710_v9 = vld [vmem:[#allocation66_spill] sm:$0xff] }
 0x429   : > { %8678 = vmatprep.subr.bf16.mxu1 %v8978_v29 }
 0x42a   : > { %13707 = vst [vmem:[#allocation75_spill] sm:$0xff] %v12368_v41  ;;  %8631 = vmatmul.mubr.bf16.gmra.mrb[188].mxu0 %v13708_v25  ;;  %8679 = vmatpush3.bf16.msra.mxu1 %v8978_v29  ;;  %v13711_v41 = vld [vmem:[#allocation16_spill] sm:$0xff]  ;;  %v13714_v29 = vld [vmem:[#allocation67_spill] sm:$0xff] }
 0x42b   : > { %8634 = vmatprep.mubr.bf16.mxu0 %v13709_v22  ;;  %6710 = vmatpush1.bf16.msra.mxu0 %v8974_v51  ;;  %v13712_v22 = vld [vmem:[#allocation73_spill] sm:$0xff] }
 0x42c   : > { %6711 = vmatprep.subr.bf16.mxu0 %v13673_v10 }
 0x42d   : > { %v5443_v17 = vpop.f32.mrb[84].mxu0 }
 0x42e   : > { %v5444_v18 = vpop.f32.mrb[85].mxu0 }
 0x42f   : > { %6086 = vmatmul.mubr.bf16.gmra.mrb[212].mxu1 %v13710_v9  ;;  %v5445_v46 = vpop.f32.mrb[86].mxu0  ;;  %6712 = vmatpush1.bf16.msra.mxu0 %v8976_v40 }
 0x430   : > { %6091 = vmatprep.mubr.bf16.mxu1 %v13711_v41  ;;  %v5446_v51 = vpop.f32.mrb[87].mxu0  ;;  %v13715_v46 = vld [vmem:[#allocation49_spill] sm:$0xff] }
 0x432   : > { %v8556_v1 = vpop.f32.mrb[136].mxu1  ;;  %8635 = vmatmul.mubr.bf16.gmra.mrb[192].mxu0 %v13712_v22 }
 0x433   : > { %v5720_v25 = vpop.f32.mrb[137].mxu1  ;;  %8638 = vmatprep.mubr.bf16.mxu0 %v11836_v43  ;;  %v13717_v1 = vld [vmem:[#allocation81_spill] sm:$0xff] }
 0x434   : > { %v8557_v53 = vpop.f32.mrb[138].mxu1 }
 0x435   : > { %v5723_v14 = vpop.f32.mrb[139].mxu1  ;;  %v5449_v10 = vpop.f32.mrb[88].mxu0  ;;  %v13718_v53 = vld [vmem:[#allocation38_spill] sm:$0xff] }
 0x436   : > { %v5451_v17 = vpop.f32.mrb[89].mxu0  ;;  %v12383_v11 = vadd.f32 %v5706_v48, %v5449_v10 }
 0x437   : > { %6092 = vmatmul.mubr.bf16.gmra.mrb[216].mxu1 %v13714_v29  ;;  %v5452_v18 = vpop.f32.mrb[90].mxu0  ;;  %v13719_v17 = vld [vmem:[#allocation19_spill] sm:$0xff] }
 0x438   : > { %13713 = vst [vmem:[#allocation77_spill] sm:$0xff] %v12383_v11  ;;  %6099 = vmatprep.mubr.bf16.mxu1 %v13715_v46  ;;  %v5454_v40 = vpop.f32.mrb[91].mxu0  ;;  %v12387_v50 = vadd.f32 %v5709_v12, %v5452_v18 }
 0x43a   : > { %13716 = vst [vmem:[#allocation59_spill] sm:$0xff] %v12387_v50  ;;  %8639 = vmatmul.mubr.bf16.gmra.mrb[196].mxu0 %v13717_v1 }
 0x43b   : > { %8642 = vmatprep.mubr.bf16.mxu0 %v11890_v19 }
 0x43d   : > { %v5457_v51 = vpop.f32.mrb[92].mxu0 }
 0x43e   : > { %v5458_v43 = vpop.f32.mrb[93].mxu0  ;;  %v13721_v51 = vld [vmem:[#allocation45_spill] sm:$0xff] }
 0x43f   : > { %6100 = vmatmul.mubr.bf16.gmra.mrb[220].mxu1 %v13718_v53  ;;  %v5459_v22 = vpop.f32.mrb[94].mxu0 }
 0x440   : > { %6105 = vmatprep.mubr.bf16.mxu1 %v13719_v17  ;;  %v5460_v48 = vpop.f32.mrb[95].mxu0  ;;  %v13723_v22 = vld [vmem:[#allocation22_spill] sm:$0xff] }
 0x442   : > { %v8560_v10 = vpop.f32.mrb[140].mxu1  ;;  %8643 = vmatmul.mubr.bf16.gmra.mrb[200].mxu0 %v11895_v60 }
 0x443   : > { %v5734_v11 = vpop.f32.mrb[141].mxu1  ;;  %8646 = vmatprep.mubr.bf16.mxu0 %v11935_v8  ;;  %v8979_v10 = vld [vmem:[%s12885_s4 + $0x238] sm:$0xff]  }
 0x444   : > { %v8561_v12 = vpop.f32.mrb[142].mxu1  ;;  %8680 = vmatprep.subr.bf16.mxu1 %v8979_v10 }
 0x445   : > { %v5737_v18 = vpop.f32.mrb[143].mxu1  ;;  %v5463_v40 = vpop.f32.mrb[96].mxu0  ;;  %8681 = vmatpush3.bf16.msra.mxu1 %v8979_v10 }
 0x446   : > { %v12395_v50 = vadd.f32 %v5720_v25, %v5463_v40  ;;  %v5465_v19 = vpop.f32.mrb[97].mxu0 }
 0x447   : > { %6106 = vmatmul.mubr.bf16.gmra.mrb[224].mxu1 %v13721_v51  ;;  %v5466_v43 = vpop.f32.mrb[98].mxu0  ;;  %v13724_v19 = vld [vmem:[#allocation69_spill] sm:$0xff] }
 0x448   : > { %13720 = vst [vmem:[#allocation72_spill] sm:$0xff] %v12395_v50  ;;  %v12398_v1 = vadd.f32 %v5723_v14, %v5466_v43  ;;  %6113 = vmatprep.mubr.bf16.mxu1 %v13723_v22  ;;  %v5468_v48 = vpop.f32.mrb[99].mxu0  ;;  %v13725_v14 = vld [vmem:[#allocation76_spill] sm:$0xff] }
 0x44a   : > { %13722 = vst [vmem:[#allocation30_spill] sm:$0xff] %v12398_v1  ;;  %8647 = vmatmul.mubr.bf16.gmra.mrb[204].mxu0 %v11940_v26 }
 0x44b   : > { %8650 = vmatprep.mubr.bf16.mxu0 %v11980_v33 }
 0x44d   : > { %v5471_v12 = vpop.f32.mrb[100].mxu0 }
 0x44e   : > { %v5472_v25 = vpop.f32.mrb[101].mxu0 }
 0x44f   : > { %6114 = vmatmul.mubr.bf16.gmra.mrb[228].mxu1 %v13724_v19  ;;  %v5473_v40 = vpop.f32.mrb[102].mxu0  ;;  %v13727_v25 = vld [vmem:[#allocation71_spill] sm:$0xff] }
 0x450   : > { %6119 = vmatprep.mubr.bf16.mxu1 %v13725_v14  ;;  %v5474_v43 = vpop.f32.mrb[103].mxu0  ;;  %v13729_v40 = vld [vmem:[#allocation85_spill] sm:$0xff] }
 0x452   : > { %v8564_v1 = vpop.f32.mrb[144].mxu1  ;;  %8651 = vmatmul.mubr.bf16.gmra.mrb[208].mxu0 %v11985_v30 }
 0x453   : > { %v5748_v48 = vpop.f32.mrb[145].mxu1  ;;  %8654 = vmatprep.mubr.bf16.mxu0 %v12025_v52 }
 0x454   : > { %v8565_v50 = vpop.f32.mrb[146].mxu1 }
 0x455   : > { %v5751_v33 = vpop.f32.mrb[147].mxu1  ;;  %v5477_v26 = vpop.f32.mrb[104].mxu0 }
 0x456   : > { %v12410_v8 = vadd.f32 %v5734_v11, %v5477_v26  ;;  %v5479_v12 = vpop.f32.mrb[105].mxu0 }
 0x457   : > { %6120 = vmatmul.mubr.bf16.gmra.mrb[232].mxu1 %v13727_v25  ;;  %v5480_v10 = vpop.f32.mrb[106].mxu0 }
 0x458   : > { %13726 = vst [vmem:[#allocation83_spill] sm:$0xff] %v12410_v8  ;;  %v12413_v60 = vadd.f32 %v5737_v18, %v5480_v10  ;;  %6127 = vmatprep.mubr.bf16.mxu1 %v13729_v40  ;;  %v5482_v43 = vpop.f32.mrb[107].mxu0 }
 0x45a   : > { %13728 = vst [vmem:[#allocation34_spill] sm:$0xff] %v12413_v60  ;;  %8655 = vmatmul.mubr.bf16.gmra.mrb[212].mxu0 %v12030_v42 }
 0x45b   : > { %8658 = vmatprep.mubr.bf16.mxu0 %v12070_v27 }
 0x45d   : > { %v5485_v1 = vpop.f32.mrb[108].mxu0 }
 0x45e   : > { %v5486_v52 = vpop.f32.mrb[109].mxu0  ;;  %v13731_v1 = vld [vmem:[#allocation55_spill] sm:$0xff] }
 0x45f   : > { %6128 = vmatmul.mubr.bf16.gmra.mrb[236].mxu1 %v11730_v61  ;;  %v5487_v50 = vpop.f32.mrb[110].mxu0 }
 0x460   : > { %6133 = vmatprep.mubr.bf16.mxu1 %v11880_v13  ;;  %v5488_v26 = vpop.f32.mrb[111].mxu0  ;;  %v13733_v50 = vld [vmem:[#allocation3_spill] sm:$0xff] }
 0x462   : > { %v8568_v11 = vpop.f32.mrb[148].mxu1  ;;  %8659 = vmatmul.mubr.bf16.gmra.mrb[216].mxu0 %v12075_v5 }
 0x463   : > { %v5762_v18 = vpop.f32.mrb[149].mxu1  ;;  %8662 = vmatprep.mubr.bf16.mxu0 %v12115_v21 }
 0x464   : > { %v8569_v12 = vpop.f32.mrb[150].mxu1 }
 0x465   : > { %v5765_v10 = vpop.f32.mrb[151].mxu1  ;;  %v5491_v43 = vpop.f32.mrb[112].mxu0 }
 0x466   : > { %v12422_v60 = vadd.f32 %v5748_v48, %v5491_v43  ;;  %v5493_v8 = vpop.f32.mrb[113].mxu0 }
 0x467   : > { %6134 = vmatmul.mubr.bf16.gmra.mrb[240].mxu1 %v13731_v1  ;;  %v5494_v52 = vpop.f32.mrb[114].mxu0 }
 0x468   : > { %13730 = vst [vmem:[#allocation60_spill] sm:$0xff] %v12422_v60  ;;  %v12425_v27 = vadd.f32 %v5751_v33, %v5494_v52  ;;  %6141 = vmatprep.mubr.bf16.mxu1 %v13733_v50  ;;  %v5496_v26 = vpop.f32.mrb[115].mxu0 }
 0x46a   : > { %13732 = vst [vmem:[#allocation86_spill] sm:$0xff] %v12425_v27  ;;  %8663 = vmatmul.mubr.bf16.gmra.mrb[220].mxu0 %v12120_v63 }
 0x46b   : > { %6713 = vmatprep.mubr.bf16.mxu0 %v13671_v35 }
 0x46d   : > { %v5499_v11 = vpop.f32.mrb[116].mxu0 }
 0x46e   : > { %v5500_v21 = vpop.f32.mrb[117].mxu0  ;;  %v13734_v11 = vld [vmem:[#allocation46_spill] sm:$0xff] }
 0x46f   : > { %6142 = vmatmul.mubr.bf16.gmra.mrb[244].mxu1 %v11812_v31  ;;  %v5501_v12 = vpop.f32.mrb[118].mxu0 }
 0x470   : > { %6147 = vmatprep.mubr.bf16.mxu1 %v11926_v39  ;;  %v5502_v8 = vpop.f32.mrb[119].mxu0  ;;  %v13735_v12 = vld [vmem:[#allocation90_spill] sm:$0xff] }
 0x472   : > { %v8572_v48 = vpop.f32.mrb[152].mxu1  ;;  %6714 = vmatmul.mubr.bf16.vlgmr.msra.gmra.mrb[224].mxu0 %v13675_v0 }
 0x473   : > { %v5776_v33 = vpop.f32.mrb[153].mxu1  ;;  %6721 = vmatprep.mubr.bf16.mxu0 %v13676_v2 }
 0x474   : > { %v8573_v43 = vpop.f32.mrb[154].mxu1 }
 0x475   : > { %v5779_v52 = vpop.f32.mrb[155].mxu1  ;;  %v5505_v26 = vpop.f32.mrb[120].mxu0 }
 0x476   : > { %v12434_v27 = vadd.f32 %v5762_v18, %v5505_v26  ;;  %v5507_v35 = vpop.f32.mrb[121].mxu0 }
 0x477   : > { %6148 = vmatmul.mubr.bf16.gmra.mrb[248].mxu1 %v13734_v11  ;;  %v5508_v21 = vpop.f32.mrb[122].mxu0 }
 0x478   : > { %v12437_v60 = vadd.f32 %v5765_v10, %v5508_v21  ;;  %6155 = vmatprep.mubr.bf16.mxu1 %v13735_v12  ;;  %v5510_v8 = vpop.f32.mrb[123].mxu0 }
 0x479   : > { %v13736_v8 = vld [vmem:[#allocation89_spill] sm:$0xff] }
 0x47a   : > { %6722 = vmatmul.mubr.bf16.gmra.mrb[228].mxu0 %v13680_v7 }
 0x47b   : > { %6727 = vmatprep.mubr.bf16.mxu0 %v13681_v49 }
 0x47d   : > { %v5513_v0 = vpop.f32.mrb[124].mxu0 }
 0x47e   : > { %v5514_v2 = vpop.f32.mrb[125].mxu0 }
 0x47f   : > { %6156 = vmatmul.mubr.bf16.gmra.mrb[252].mxu1 %v11874_v3  ;;  %v5515_v48 = vpop.f32.mrb[126].mxu0 }
 0x480   : > { %6161 = vmatprep.mubr.bf16.mxu1 %v11971_v24  ;;  %v5516_v18 = vpop.f32.mrb[127].mxu0  ;;  %v13737_v48 = vld [vmem:[#allocation92_spill] sm:$0xff] }
 0x482   : > { %v8576_v43 = vpop.f32.mrb[156].mxu1  ;;  %6728 = vmatmul.mubr.bf16.gmra.mrb[232].mxu0 %v13685_v57 }
 0x483   : > { %v5790_v10 = vpop.f32.mrb[157].mxu1  ;;  %6735 = vmatprep.mubr.bf16.mxu0 %v13686_v4 }
 0x484   : > { %v8577_v26 = vpop.f32.mrb[158].mxu1 }
 0x485   : > { %v5793_v35 = vpop.f32.mrb[159].mxu1  ;;  %v5519_v21 = vpop.f32.mrb[128].mxu0 }
 0x486   : > { %v12446_v7 = vadd.f32 %v5776_v33, %v5519_v21  ;;  %v5521_v49 = vpop.f32.mrb[129].mxu0 }
 0x487   : > { %6162 = vmatmul.mubr.bf16.gmra.mrb[0].mxu1 %v13736_v8  ;;  %v5522_v0 = vpop.f32.mrb[130].mxu0 }
 0x488   : > { %v12449_v2 = vadd.f32 %v5779_v52, %v5522_v0  ;;  %6169 = vmatprep.mubr.bf16.mxu1 %v13737_v48  ;;  %v5524_v18 = vpop.f32.mrb[131].mxu0 }
 0x489   : > { %v13738_v18 = vld [vmem:[#allocation31_spill] sm:$0xff] }
 0x48a   : > { %6736 = vmatmul.mubr.bf16.gmra.mrb[236].mxu0 %v13690_v38 }
 0x48b   : > { %6741 = vmatprep.mubr.bf16.mxu0 %v13691_v58 }
 0x48d   : > { %v5527_v57 = vpop.f32.mrb[132].mxu0 }
 0x48e   : > { %v5528_v4 = vpop.f32.mrb[133].mxu0 }
 0x48f   : > { %6170 = vmatmul.mubr.bf16.gmra.mrb[4].mxu1 %v11920_v20  ;;  %v5529_v43 = vpop.f32.mrb[134].mxu0 }
 0x490   : > { %6175 = vmatprep.mubr.bf16.mxu1 %v12016_v16  ;;  %v5530_v33 = vpop.f32.mrb[135].mxu0  ;;  %v13739_v43 = vld [vmem:[#allocation5_spill] sm:$0xff] }
 0x492   : > { %v8580_v26 = vpop.f32.mrb[160].mxu1  ;;  %6742 = vmatmul.mubr.bf16.gmra.mrb[240].mxu0 %v13695_v45 }
 0x493   : > { %v5804_v52 = vpop.f32.mrb[161].mxu1  ;;  %6749 = vmatprep.mubr.bf16.mxu0 %v13696_v55 }
 0x494   : > { %v8581_v21 = vpop.f32.mrb[162].mxu1 }
 0x495   : > { %v5807_v49 = vpop.f32.mrb[163].mxu1  ;;  %v5533_v0 = vpop.f32.mrb[136].mxu0 }
 0x496   : > { %v12458_v38 = vadd.f32 %v5790_v10, %v5533_v0  ;;  %v5535_v58 = vpop.f32.mrb[137].mxu0 }
 0x497   : > { %6176 = vmatmul.mubr.bf16.gmra.mrb[8].mxu1 %v13738_v18  ;;  %v5536_v57 = vpop.f32.mrb[138].mxu0 }
 0x498   : > { %v12461_v4 = vadd.f32 %v5793_v35, %v5536_v57  ;;  %6183 = vmatprep.mubr.bf16.mxu1 %v13739_v43  ;;  %v5538_v33 = vpop.f32.mrb[139].mxu0 }
 0x499   : > { %v13741_v33 = vld [vmem:[#allocation9_spill] sm:$0xff] }
 0x49a   : > { %6750 = vmatmul.mubr.bf16.gmra.mrb[244].mxu0 %v13700_v6 }
 0x49b   : > { %6755 = vmatprep.mubr.bf16.mxu0 %v13701_v36 }
 0x49d   : > { %v5541_v45 = vpop.f32.mrb[140].mxu0 }
 0x49e   : > { %v5542_v55 = vpop.f32.mrb[141].mxu0 }
 0x49f   : > { %6184 = vmatmul.mubr.bf16.gmra.mrb[12].mxu1 %v11965_v37  ;;  %v5543_v26 = vpop.f32.mrb[142].mxu0 }
 0x4a0   : > { %6189 = vmatprep.mubr.bf16.mxu1 %v12061_v23  ;;  %v5544_v10 = vpop.f32.mrb[143].mxu0  ;;  %v13742_v26 = vld [vmem:[#allocation11_spill] sm:$0xff] }
 0x4a2   : > { %v8584_v21 = vpop.f32.mrb[164].mxu1  ;;  %6756 = vmatmul.mubr.bf16.gmra.mrb[248].mxu0 %v13705_v59 }
 0x4a3   : > { %v5818_v35 = vpop.f32.mrb[165].mxu1  ;;  %6763 = vmatprep.mubr.bf16.mxu0 %v13706_v28 }
 0x4a4   : > { %v8585_v0 = vpop.f32.mrb[166].mxu1 }
 0x4a5   : > { %v5821_v58 = vpop.f32.mrb[167].mxu1  ;;  %v5547_v57 = vpop.f32.mrb[144].mxu0 }
 0x4a6   : > { %v12470_v6 = vadd.f32 %v5804_v52, %v5547_v57  ;;  %v5549_v36 = vpop.f32.mrb[145].mxu0 }
 0x4a7   : > { %6190 = vmatmul.mubr.bf16.gmra.mrb[16].mxu1 %v13741_v33  ;;  %v5550_v45 = vpop.f32.mrb[146].mxu0 }
 0x4a8   : > { %13740 = vst [vmem:[#allocation41_spill] sm:$0xff] %v12470_v6  ;;  %v12473_v55 = vadd.f32 %v5807_v49, %v5550_v45  ;;  %6197 = vmatprep.mubr.bf16.mxu1 %v13742_v26  ;;  %v5552_v10 = vpop.f32.mrb[147].mxu0 }
 0x4aa   : > { %v6009_v21 = vpop.f32.mrb[168].mxu1  ;;  %6764 = vmatmul.mubr.bf16.gmra.mrb[252].mxu0 %v13710_v9 }
 0x4ab   : > { %v6010_v59 = vadd.f32 %v6009_v21, %v12196_v34  ;;  %v6011_v28 = vpop.f32.mrb[169].mxu1  ;;  %6769 = vmatprep.mubr.bf16.mxu0 %v13711_v41 }
 0x4ac   : > { %v6012_v0 = vpop.f32.mrb[170].mxu1 }
 0x4ad   : > { %v6013_v52 = vadd.f32 %v6012_v0, %v12203_v47  ;;  %v6014_v57 = vpop.f32.mrb[171].mxu1  ;;  %v5555_v36 = vpop.f32.mrb[148].mxu0  ;;  %v13743_v0 = vld [vmem:[#allocation10_spill] sm:$0xff] }
 0x4ae   : > { %v5556_v6 = vpop.f32.mrb[149].mxu0  ;;  %v13744_v36 = vld [vmem:[#allocation4_spill] sm:$0xff] }
 0x4af   : > { %6198 = vmatmul.mubr.bf16.gmra.mrb[20].mxu1 %v12010_v54  ;;  %v5557_v49 = vpop.f32.mrb[150].mxu0 }
 0x4b0   : > { %6203 = vmatprep.mubr.bf16.mxu1 %v12106_v15  ;;  %v5558_v45 = vpop.f32.mrb[151].mxu0 }
 0x4b2   : > { %v6017_v10 = vpop.f32.mrb[172].mxu1  ;;  %6770 = vmatmul.mubr.bf16.gmra.mrb[0].mxu0 %v13714_v29 }
 0x4b3   : > { %v6018_v9 = vpop.f32.mrb[173].mxu1  ;;  %6777 = vmatprep.mubr.bf16.mxu0 %v13715_v46 }
 0x4b4   : > { %v6019_v34 = vpop.f32.mrb[174].mxu1 }
 0x4b5   : > { %v6020_v41 = vpop.f32.mrb[175].mxu1  ;;  %v5561_v21 = vpop.f32.mrb[152].mxu0 }
 0x4b6   : > { %v12484_v28 = vadd.f32 %v5818_v35, %v5561_v21  ;;  %v5563_v47 = vpop.f32.mrb[153].mxu0 }
 0x4b7   : > { %6204 = vmatmul.mubr.bf16.gmra.mrb[24].mxu1 %v13743_v0  ;;  %v5564_v6 = vpop.f32.mrb[154].mxu0 }
 0x4b8   : > { %v12487_v57 = vadd.f32 %v5821_v58, %v5564_v6  ;;  %6211 = vmatprep.mubr.bf16.mxu1 %v13744_v36  ;;  %v5566_v49 = vpop.f32.mrb[155].mxu0 }
 0x4ba   : > { %v6023_v45 = vpop.f32.mrb[176].mxu1  ;;  %6778 = vmatmul.mubr.bf16.gmra.mrb[4].mxu0 %v13718_v53 }
 0x4bb   : > { %v6024_v29 = vadd.f32 %v6023_v45, %v12231_v56  ;;  %v6025_v46 = vpop.f32.mrb[177].mxu1  ;;  %6783 = vmatprep.mubr.bf16.mxu0 %v13719_v17 }
 0x4bc   : > { %v6026_v10 = vpop.f32.mrb[178].mxu1 }
 0x4bd   : > { %v6027_v35 = vadd.f32 %v6026_v10, %v12238_v32  ;;  %v6028_v9 = vpop.f32.mrb[179].mxu1  ;;  %v5569_v34 = vpop.f32.mrb[156].mxu0  ;;  %v13745_v32 = vld [vmem:[#allocation43_spill] sm:$0xff]  ;;  %v13746_v10 = vld [vmem:[#allocation97_spill] sm:$0xff] }
 0x4be   : > { %v5570_v41 = vpop.f32.mrb[157].mxu0 }
 0x4bf   : > { %6212 = vmatmul.mubr.bf16.gmra.mrb[28].mxu1 %v12055_v62  ;;  %v5571_v58 = vpop.f32.mrb[158].mxu0 }
 0x4c0   : > { %6217 = vmatprep.mubr.bf16.mxu1 %v12155_v44  ;;  %v5572_v21 = vpop.f32.mrb[159].mxu0 }
 0x4c2   : > { %v6031_v47 = vpop.f32.mrb[180].mxu1  ;;  %6784 = vmatmul.mubr.bf16.gmra.mrb[8].mxu0 %v13721_v51  ;;  %v13747_v51 = vld [vmem:[#allocation96_spill] sm:$0xff] }
 0x4c3   : > { %v6032_v53 = vpop.f32.mrb[181].mxu1  ;;  %6791 = vmatprep.mubr.bf16.mxu0 %v13723_v22  ;;  %v13748_v47 = vld [vmem:[#allocation99_spill] sm:$0xff] }
 0x4c4   : > { %v6033_v56 = vpop.f32.mrb[182].mxu1 }
 0x4c5   : > { %v6034_v17 = vpop.f32.mrb[183].mxu1  ;;  %v8604_v6 = vpop.f32.mrb[160].mxu0 }
 0x4c6   : > { %v6266_v49 = vpop.f32.mrb[161].mxu0  ;;  %v13749_v6 = vld [vmem:[#allocation78_spill] sm:$0xff] }
 0x4c7   : > { %6218 = vmatmul.mubr.bf16.gmra.mrb[32].mxu1 %v13745_v32  ;;  %v12499_v45 = vadd.f32 %v6266_v49, %v6010_v59  ;;  %v8605_v46 = vpop.f32.mrb[162].mxu0 }
 0x4c8   : > { %6225 = vmatprep.mubr.bf16.mxu1 %v13746_v10  ;;  %v6269_v9 = vpop.f32.mrb[163].mxu0  ;;  %v13750_v46 = vld [vmem:[#allocation84_spill] sm:$0xff] }
 0x4c9   : > { %v12502_v34 = vadd.f32 %v6269_v9, %v6013_v52 }
 0x4ca   : > { %v6037_v41 = vpop.f32.mrb[184].mxu1  ;;  %6792 = vmatmul.mubr.bf16.gmra.mrb[12].mxu0 %v13724_v19 }
 0x4cb   : > { %v6038_v58 = vadd.f32 %v6037_v41, %v13747_v51  ;;  %v6039_v22 = vpop.f32.mrb[185].mxu1  ;;  %6797 = vmatprep.mubr.bf16.mxu0 %v13725_v14 }
 0x4cc   : > { %v6040_v21 = vpop.f32.mrb[186].mxu1 }
 0x4cd   : > { %v6041_v53 = vadd.f32 %v6040_v21, %v13748_v47  ;;  %v6042_v56 = vpop.f32.mrb[187].mxu1  ;;  %v8608_v59 = vpop.f32.mrb[164].mxu0 }
 0x4ce   : > { %v6280_v17 = vpop.f32.mrb[165].mxu0 }
 0x4cf   : > { %6226 = vmatmul.mubr.bf16.gmra.mrb[36].mxu1 %v13749_v6  ;;  %v12509_v49 = vadd.f32 %v6280_v17, %v6024_v29  ;;  %v8609_v52 = vpop.f32.mrb[166].mxu0  ;;  %v13751_v29 = vld [vmem:[#allocation88_spill] sm:$0xff]  ;;  %v13752_v17 = vld [vmem:[#allocation26_spill] sm:$0xff] }
 0x4d0   : > { %8682 = vmatprep.mubr.bf16.mxu1 %v13750_v46  ;;  %v6283_v9 = vpop.f32.mrb[167].mxu0 }
 0x4d1   : > { %v12512_v19 = vadd.f32 %v6283_v9, %v6027_v35 }
 0x4d2   : > { %v6045_v41 = vpop.f32.mrb[188].mxu1  ;;  %6798 = vmatmul.mubr.bf16.gmra.mrb[16].mxu0 %v13727_v25  ;;  %v13753_v25 = vld [vmem:[#allocation23_spill] sm:$0xff] }
 0x4d3   : > { %v6046_v14 = vpop.f32.mrb[189].mxu1  ;;  %6805 = vmatprep.mubr.bf16.mxu0 %v13729_v40 }
 0x4d4   : > { %v6047_v51 = vpop.f32.mrb[190].mxu1  ;;  %v13754_v14 = vld [vmem:[#allocation54_spill] sm:$0xff] }
 0x4d5   : > { %v6048_v22 = vpop.f32.mrb[191].mxu1  ;;  %v8612_v21 = vpop.f32.mrb[168].mxu0 }
 0x4d6   : > { %v6294_v47 = vpop.f32.mrb[169].mxu0 }
 0x4d7   : > { %v12516_v56 = vadd.f32 %v6294_v47, %v6038_v58  ;;  %8683 = vmatmul.mubr.bf16.vlgmr.msra.gmra.mrb[40].mxu1 %v13751_v29  ;;  %v8613_v59 = vpop.f32.mrb[170].mxu0  ;;  %v13755_v29 = vld [vmem:[#allocation87_spill] sm:$0xff] }
 0x4d8   : > { %8686 = vmatprep.mubr.bf16.mxu1 %v13752_v17  ;;  %v6297_v52 = vpop.f32.mrb[171].mxu0  ;;  %v13756_v59 = vld [vmem:[#allocation52_spill] sm:$0xff] }
 0x4d9   : > { %v12520_v35 = vadd.f32 %v6297_v52, %v6041_v53 }
 0x4da   : > { %v6051_v46 = vpop.f32.mrb[192].mxu1  ;;  %6806 = vmatmul.mubr.bf16.gmra.mrb[20].mxu0 %v11730_v61 }
 0x4db   : > { %v6052_v9 = vadd.f32 %v6051_v46, %v13753_v25  ;;  %v6053_v40 = vpop.f32.mrb[193].mxu1  ;;  %6811 = vmatprep.mubr.bf16.mxu0 %v11880_v13 }
 0x4dc   : > { %v6054_v41 = vpop.f32.mrb[194].mxu1 }
 0x4dd   : > { %v6055_v58 = vadd.f32 %v6054_v41, %v13754_v14  ;;  %v6056_v51 = vpop.f32.mrb[195].mxu1  ;;  %v8616_v22 = vpop.f32.mrb[172].mxu0 }
 0x4de   : > { %v6308_v21 = vpop.f32.mrb[173].mxu0  ;;  %v13758_v51 = vld [vmem:[#allocation33_spill] sm:$0xff] }
 0x4df   : > { %v12526_v47 = vadd.f32 %v6308_v21, %v6052_v9  ;;  %8687 = vmatmul.mubr.bf16.gmra.mrb[44].mxu1 %v13755_v29  ;;  %v8617_v53 = vpop.f32.mrb[174].mxu0  ;;  %v13757_v9 = vld [vmem:[#allocation56_spill] sm:$0xff] }
 0x4e0   : > { %8690 = vmatprep.mubr.bf16.mxu1 %v13756_v59  ;;  %v6311_v17 = vpop.f32.mrb[175].mxu0  ;;  %v13760_v59 = vld [vmem:[#allocation57_spill] sm:$0xff] }
 0x4e1   : > { %v12530_v61 = vadd.f32 %v6311_v17, %v6055_v58  ;;  %v13759_v58 = vld [vmem:[#allocation101_spill] sm:$0xff] }
 0x4e2   : > { %v6059_v52 = vpop.f32.mrb[196].mxu1  ;;  %6812 = vmatmul.mubr.bf16.gmra.mrb[24].mxu0 %v13731_v1 }
 0x4e3   : > { %v6060_v13 = vpop.f32.mrb[197].mxu1  ;;  %6819 = vmatprep.mubr.bf16.mxu0 %v13733_v50 }
 0x4e4   : > { %v6061_v46 = vpop.f32.mrb[198].mxu1 }
 0x4e5   : > { %v6062_v25 = vpop.f32.mrb[199].mxu1  ;;  %v8620_v40 = vpop.f32.mrb[176].mxu0 }
 0x4e6   : > { %v6322_v41 = vpop.f32.mrb[177].mxu0  ;;  %v13761_v40 = vld [vmem:[#allocation35_spill] sm:$0xff] }
 0x4e7   : > { %8691 = vmatmul.mubr.bf16.gmra.mrb[48].mxu1 %v13757_v9  ;;  %v8621_v14 = vpop.f32.mrb[178].mxu0 }
 0x4e8   : > { %8694 = vmatprep.mubr.bf16.mxu1 %v13758_v51  ;;  %v6325_v22 = vpop.f32.mrb[179].mxu0  ;;  %v13762_v14 = vld [vmem:[#allocation44_spill] sm:$0xff] }
 0x4ea   : > { %v6065_v21 = vpop.f32.mrb[200].mxu1  ;;  %6820 = vmatmul.mubr.bf16.gmra.mrb[28].mxu0 %v11812_v31 }
 0x4eb   : > { %v6066_v29 = vadd.f32 %v6065_v21, %v13759_v58  ;;  %v6067_v53 = vpop.f32.mrb[201].mxu1  ;;  %6825 = vmatprep.mubr.bf16.mxu0 %v11926_v39 }
 0x4ec   : > { %v6068_v1 = vpop.f32.mrb[202].mxu1  ;;  %v13763_v53 = vld [vmem:[#allocation13_spill] sm:$0xff] }
 0x4ed   : > { %v12539_v50 = vadd.f32 %v6322_v41, %v6066_v29  ;;  %v6069_v17 = vadd.f32 %v6068_v1, %v13760_v59  ;;  %v6070_v52 = vpop.f32.mrb[203].mxu1  ;;  %v8624_v13 = vpop.f32.mrb[180].mxu0  ;;  %v13764_v1 = vld [vmem:[#allocation48_spill] sm:$0xff] }
 0x4ee   : > { %v6336_v46 = vpop.f32.mrb[181].mxu0  ;;  %v13765_v52 = vld [vmem:[#allocation100_spill] sm:$0xff] }
 0x4ef   : > { %v12542_v25 = vadd.f32 %v6325_v22, %v6069_v17  ;;  %8695 = vmatmul.mubr.bf16.gmra.mrb[52].mxu1 %v13761_v40  ;;  %v8625_v9 = vpop.f32.mrb[182].mxu0 }
 0x4f0   : > { %8698 = vmatprep.mubr.bf16.mxu1 %v13762_v14  ;;  %v6339_v31 = vpop.f32.mrb[183].mxu0  ;;  %v13766_v9 = vld [vmem:[#allocation24_spill] sm:$0xff] }
 0x4f2   : > { %v6073_v51 = vpop.f32.mrb[204].mxu1  ;;  %6826 = vmatmul.mubr.bf16.gmra.mrb[32].mxu0 %v13734_v11 }
 0x4f3   : > { %v6074_v39 = vpop.f32.mrb[205].mxu1  ;;  %6833 = vmatprep.mubr.bf16.mxu0 %v13735_v12 }
 0x4f4   : > { %v6075_v41 = vpop.f32.mrb[206].mxu1 }
 0x4f5   : > { %v6076_v21 = vpop.f32.mrb[207].mxu1  ;;  %v8628_v58 = vpop.f32.mrb[184].mxu0 }
 0x4f6   : > { %v6350_v29 = vpop.f32.mrb[185].mxu0  ;;  %v13767_v58 = vld [vmem:[#allocation70_spill] sm:$0xff] }
 0x4f7   : > { %8699 = vmatmul.mubr.bf16.gmra.mrb[56].mxu1 %v13763_v53  ;;  %v8629_v22 = vpop.f32.mrb[186].mxu0 }
 0x4f8   : > { %8702 = vmatprep.mubr.bf16.mxu1 %v13764_v1  ;;  %v6353_v59 = vpop.f32.mrb[187].mxu0  ;;  %v13768_v22 = vld [vmem:[#allocation91_spill] sm:$0xff] }
 0x4fa   : > { %v6079_v17 = vpop.f32.mrb[208].mxu1  ;;  %6834 = vmatmul.mubr.bf16.gmra.mrb[36].mxu0 %v11874_v3 }
 0x4fb   : > { %v6080_v13 = vadd.f32 %v6079_v17, %v13765_v52  ;;  %v6081_v40 = vpop.f32.mrb[209].mxu1  ;;  %6839 = vmatprep.mubr.bf16.mxu0 %v11971_v24 }
 0x4fc   : > { %v6082_v11 = vpop.f32.mrb[210].mxu1  ;;  %v13769_v40 = vld [vmem:[#allocation73_spill] sm:$0xff] }
 0x4fd   : > { %v12553_v12 = vadd.f32 %v6336_v46, %v6080_v13  ;;  %v6083_v14 = vadd.f32 %v6082_v11, %v13766_v9  ;;  %v6084_v51 = vpop.f32.mrb[211].mxu1  ;;  %v8632_v39 = vpop.f32.mrb[188].mxu0  ;;  %v13770_v11 = vld [vmem:[#allocation79_spill] sm:$0xff] }
 0x4fe   : > { %v6364_v41 = vpop.f32.mrb[189].mxu0  ;;  %v13771_v51 = vld [vmem:[#allocation98_spill] sm:$0xff] }
 0x4ff   : > { %v12556_v21 = vadd.f32 %v6339_v31, %v6083_v14  ;;  %8703 = vmatmul.mubr.bf16.gmra.mrb[60].mxu1 %v13767_v58  ;;  %v8633_v53 = vpop.f32.mrb[190].mxu0 }
 0x500   : > { %8706 = vmatprep.mubr.bf16.mxu1 %v13768_v22  ;;  %v6367_v3 = vpop.f32.mrb[191].mxu0  ;;  %v13772_v53 = vld [vmem:[#allocation75_spill] sm:$0xff] }
 0x502   : > { %v6087_v1 = vpop.f32.mrb[212].mxu1  ;;  %6840 = vmatmul.mubr.bf16.gmra.mrb[40].mxu0 %v13736_v8 }
 0x503   : > { %v6088_v24 = vpop.f32.mrb[213].mxu1  ;;  %6847 = vmatprep.mubr.bf16.mxu0 %v13737_v48 }
 0x504   : > { %v6089_v46 = vpop.f32.mrb[214].mxu1 }
 0x505   : > { %v6090_v17 = vpop.f32.mrb[215].mxu1  ;;  %v8636_v52 = vpop.f32.mrb[192].mxu0 }
 0x506   : > { %v12562_v13 = vpop.f32.mrb[193].mxu0  ;;  %v13773_v52 = vld [vmem:[#allocation81_spill] sm:$0xff] }
 0x507   : > { %8707 = vmatmul.mubr.bf16.gmra.mrb[64].mxu1 %v13769_v40  ;;  %v8637_v31 = vpop.f32.mrb[194].mxu0 }
 0x508   : > { %8710 = vmatprep.mubr.bf16.mxu1 %v13770_v11  ;;  %v12566_v9 = vpop.f32.mrb[195].mxu0 }
 0x50a   : > { %v6093_v14 = vpop.f32.mrb[216].mxu1  ;;  %6848 = vmatmul.mubr.bf16.gmra.mrb[44].mxu0 %v11920_v20  ;;  %v13774_v20 = vld [vmem:[#allocation25_spill] sm:$0xff] }
 0x50b   : > { %v6094_v8 = vadd.f32 %v6093_v14, %v13771_v51  ;;  %v6095_v39 = vpop.f32.mrb[217].mxu1  ;;  %6853 = vmatprep.mubr.bf16.mxu0 %v12016_v16 }
 0x50c   : > { %v6096_v48 = vpop.f32.mrb[218].mxu1 }
 0x50d   : > { %v12571_v58 = vadd.f32 %v6350_v29, %v6094_v8  ;;  %v6097_v22 = vadd.f32 %v6096_v48, %v13772_v53  ;;  %v6098_v1 = vpop.f32.mrb[219].mxu1  ;;  %v8640_v24 = vpop.f32.mrb[196].mxu0  ;;  %v13776_v48 = vld [vmem:[#allocation7_spill] sm:$0xff] }
 0x50e   : > { %v12574_v46 = vpop.f32.mrb[197].mxu0  ;;  %v13777_v1 = vld [vmem:[#allocation77_spill] sm:$0xff] }
 0x50f   : > { %v12576_v17 = vadd.f32 %v6353_v59, %v6097_v22  ;;  %8711 = vmatmul.mubr.bf16.gmra.mrb[68].mxu1 %v13773_v52  ;;  %v8641_v40 = vpop.f32.mrb[198].mxu0  ;;  %v13775_v59 = vld [vmem:[#allocation28_spill] sm:$0xff] }
 0x510   : > { %8714 = vmatprep.mubr.bf16.mxu1 %v13774_v20  ;;  %v12580_v31 = vpop.f32.mrb[199].mxu0  ;;  %v13778_v40 = vld [vmem:[#allocation59_spill] sm:$0xff] }
 0x512   : > { %v6101_v11 = vpop.f32.mrb[220].mxu1  ;;  %6854 = vmatmul.mubr.bf16.gmra.mrb[48].mxu0 %v13738_v18 }
 0x513   : > { %v6102_v16 = vpop.f32.mrb[221].mxu1  ;;  %6861 = vmatprep.mubr.bf16.mxu0 %v13739_v43 }
 0x514   : > { %v6103_v29 = vpop.f32.mrb[222].mxu1 }
 0x515   : > { %v6104_v14 = vpop.f32.mrb[223].mxu1  ;;  %v8644_v51 = vpop.f32.mrb[200].mxu0 }
 0x516   : > { %v12584_v8 = vpop.f32.mrb[201].mxu0  ;;  %v13779_v51 = vld [vmem:[#allocation8_spill] sm:$0xff] }
 0x517   : > { %8715 = vmatmul.mubr.bf16.gmra.mrb[72].mxu1 %v13775_v59  ;;  %v8645_v39 = vpop.f32.mrb[202].mxu0 }
 0x518   : > { %8718 = vmatprep.mubr.bf16.mxu1 %v13776_v48  ;;  %v12588_v53 = vpop.f32.mrb[203].mxu0 }
 0x51a   : > { %v6107_v22 = vpop.f32.mrb[224].mxu1  ;;  %6862 = vmatmul.mubr.bf16.gmra.mrb[52].mxu0 %v11965_v37  ;;  %v13780_v37 = vld [vmem:[#allocation2_spill] sm:$0xff] }
 0x51b   : > { %v6108_v18 = vadd.f32 %v6107_v22, %v13777_v1  ;;  %v6109_v24 = vpop.f32.mrb[225].mxu1  ;;  %6867 = vmatprep.mubr.bf16.mxu0 %v12061_v23 }
 0x51c   : > { %v6110_v43 = vpop.f32.mrb[226].mxu1  ;;  %v13781_v24 = vld [vmem:[#allocation36_spill] sm:$0xff] }
 0x51d   : > { %v12593_v52 = vadd.f32 %v6364_v41, %v6108_v18  ;;  %v6111_v20 = vadd.f32 %v6110_v43, %v13778_v40  ;;  %v6112_v11 = vpop.f32.mrb[227].mxu1  ;;  %v8648_v16 = vpop.f32.mrb[204].mxu0 }
 0x51e   : > { %v12596_v29 = vpop.f32.mrb[205].mxu0 }
 0x51f   : > { %v12598_v14 = vadd.f32 %v6367_v3, %v6111_v20  ;;  %8719 = vmatmul.mubr.bf16.gmra.mrb[76].mxu1 %v13779_v51  ;;  %v8649_v59 = vpop.f32.mrb[206].mxu0  ;;  %v13782_v20 = vld [vmem:[#allocation72_spill] sm:$0xff]  ;;  %v13783_v51 = vld [vmem:[#allocation30_spill] sm:$0xff] }
 0x520   : > { %8722 = vmatprep.mubr.bf16.mxu1 %v13780_v37  ;;  %v12602_v39 = vpop.f32.mrb[207].mxu0 }
 0x522   : > { %v6115_v48 = vpop.f32.mrb[228].mxu1  ;;  %6868 = vmatmul.mubr.bf16.gmra.mrb[56].mxu0 %v13741_v33 }
 0x523   : > { %v6116_v23 = vpop.f32.mrb[229].mxu1  ;;  %6875 = vmatprep.mubr.bf16.mxu0 %v13742_v26 }
 0x524   : > { %v6117_v41 = vpop.f32.mrb[230].mxu1 }
 0x525   : > { %v6118_v22 = vpop.f32.mrb[231].mxu1  ;;  %v8652_v1 = vpop.f32.mrb[208].mxu0  ;;  %v13784_v41 = vld [vmem:[#allocation93_spill] sm:$0xff] }
 0x526   : > { %v12606_v18 = vpop.f32.mrb[209].mxu0 }
 0x527   : > { %8723 = vmatmul.mubr.bf16.gmra.mrb[80].mxu1 %v11985_v30  ;;  %v8653_v3 = vpop.f32.mrb[210].mxu0 }
 0x528   : > { %8726 = vmatprep.mubr.bf16.mxu1 %v13781_v24  ;;  %v12610_v43 = vpop.f32.mrb[211].mxu0 }
 0x52a   : > { %v6121_v40 = vpop.f32.mrb[232].mxu1  ;;  %6876 = vmatmul.mubr.bf16.gmra.mrb[60].mxu0 %v12010_v54 }
 0x52b   : > { %v6122_v33 = vadd.f32 %v6121_v40, %v13782_v20  ;;  %v6123_v11 = vpop.f32.mrb[233].mxu1  ;;  %6881 = vmatprep.mubr.bf16.mxu0 %v12106_v15 }
 0x52c   : > { %v6124_v26 = vpop.f32.mrb[234].mxu1  ;;  %v13786_v11 = vld [vmem:[#allocation83_spill] sm:$0xff] }
 0x52d   : > { %v12616_v16 = vadd.f32 %v12562_v13, %v6122_v33  ;;  %v6125_v59 = vadd.f32 %v6124_v26, %v13783_v51  ;;  %v6126_v30 = vpop.f32.mrb[235].mxu1  ;;  %v8656_v37 = vpop.f32.mrb[212].mxu0 }
 0x52e   : > { %v12619_v48 = vpop.f32.mrb[213].mxu0 }
 0x52f   : > { %v12622_v23 = vadd.f32 %v12566_v9, %v6125_v59  ;;  %8727 = vmatmul.mubr.bf16.gmra.mrb[84].mxu1 %v12030_v42  ;;  %v8657_v54 = vpop.f32.mrb[214].mxu0  ;;  %v13785_v42 = vld [vmem:[#allocation12_spill] sm:$0xff]  ;;  %v13787_v59 = vld [vmem:[#allocation34_spill] sm:$0xff] }
 0x530   : > { %8730 = vmatprep.mubr.bf16.mxu1 %v13784_v41  ;;  %v12626_v22 = vpop.f32.mrb[215].mxu0 }
 0x532   : > { %v6129_v15 = vpop.f32.mrb[236].mxu1  ;;  %6882 = vmatmul.mubr.bf16.gmra.mrb[64].mxu0 %v13743_v0 }
 0x533   : > { %v6130_v13 = vpop.f32.mrb[237].mxu1  ;;  %6889 = vmatprep.mubr.bf16.mxu0 %v13744_v36  ;;  %v13788_v15 = vld [vmem:[#allocation14_spill] sm:$0xff] }
 0x534   : > { %v6131_v1 = vpop.f32.mrb[238].mxu1 }
 0x535   : > { %v6132_v3 = vpop.f32.mrb[239].mxu1  ;;  %v8660_v24 = vpop.f32.mrb[216].mxu0 }
 0x536   : > { %v12630_v40 = vpop.f32.mrb[217].mxu0 }
 0x537   : > { %8731 = vmatmul.mubr.bf16.gmra.mrb[88].mxu1 %v12075_v5  ;;  %v8661_v9 = vpop.f32.mrb[218].mxu0 }
 0x538   : > { %8734 = vmatprep.mubr.bf16.mxu1 %v13785_v42  ;;  %v12634_v20 = vpop.f32.mrb[219].mxu0 }
 0x53a   : > { %v6135_v33 = vpop.f32.mrb[240].mxu1  ;;  %6890 = vmatmul.mubr.bf16.gmra.mrb[68].mxu0 %v12055_v62 }
 0x53b   : > { %v6136_v0 = vadd.f32 %v6135_v33, %v13786_v11  ;;  %v6137_v26 = vpop.f32.mrb[241].mxu1  ;;  %6895 = vmatprep.mubr.bf16.mxu0 %v12155_v44 }
 0x53c   : > { %v6138_v36 = vpop.f32.mrb[242].mxu1 }
 0x53d   : > { %v12640_v51 = vadd.f32 %v12574_v46, %v6136_v0  ;;  %v6139_v30 = vadd.f32 %v6138_v36, %v13787_v59  ;;  %v6140_v5 = vpop.f32.mrb[243].mxu1  ;;  %v8664_v37 = vpop.f32.mrb[220].mxu0  ;;  %v13791_v0 = vld [vmem:[#allocation18_spill] sm:$0xff] }
 0x53e   : > { %v12643_v54 = vpop.f32.mrb[221].mxu0 }
 0x53f   : > { %v12646_v41 = vadd.f32 %v12580_v31, %v6139_v30  ;;  %8735 = vmatmul.mubr.bf16.gmra.mrb[92].mxu1 %v12120_v63  ;;  %v8665_v62 = vpop.f32.mrb[222].mxu0  ;;  %v13789_v31 = vld [vmem:[#allocation15_spill] sm:$0xff]  ;;  %v13790_v63 = vld [vmem:[#allocation17_spill] sm:$0xff] }
 0x540   : > { %8738 = vmatprep.mubr.bf16.mxu1 %v13788_v15  ;;  %v12650_v13 = vpop.f32.mrb[223].mxu0  ;;  %v13794_v30 = vld [vmem:[#allocation95_spill] sm:$0xff]  ;;  %v13795_v62 = vld [vmem:[#allocation86_spill] sm:$0xff] }
 0x542   : > { %v6143_v44 = vpop.f32.mrb[244].mxu1  ;;  %6896 = vmatmul.mubr.bf16.gmra.mrb[72].mxu0 %v13745_v32  ;;  %v13792_v32 = vrot.slane %v13791_v0, 1 }
 0x543   : > { %v6144_v46 = vpop.f32.mrb[245].mxu1  ;;  %6903 = vmatprep.mubr.bf16.mxu0 %v13746_v10  ;;  %v13793_v10 = vld [vmem:[#allocation60_spill] sm:$0xff] }
 0x544   : > { %v6145_v1 = vpop.f32.mrb[246].mxu1  ;;  %v5057_v26 = vsel %vm1217_vm0, %v13792_v32, 0 }
 0x545   : > { %v6146_v3 = vpop.f32.mrb[247].mxu1  ;;  %v12654_v24 = vpop.f32.mrb[224].mxu0 }
 0x546   : > { %v6717_v9 = vpop.f32.mrb[225].mxu0 }
 0x547   : > { %8739 = vmatmul.mubr.bf16.gmra.mrb[96].mxu1 %v13789_v31  ;;  %v12657_v42 = vpop.f32.mrb[226].mxu0 }
 0x548   : > { %8742 = vmatprep.mubr.bf16.mxu1 %v13790_v63  ;;  %v6720_v33 = vpop.f32.mrb[227].mxu0 }
 0x54a   : > { %v6149_v11 = vpop.f32.mrb[248].mxu1  ;;  %6904 = vmatmul.mubr.bf16.gmra.mrb[76].mxu0 %v13749_v6  ;;  %v5076_v6 = vsel %vm11325_vm5, %v5057_v26, 0 }
 0x54b   : > { %v6150_v36 = vadd.f32 %v6149_v11, %v13793_v10  ;;  %v6151_v59 = vpop.f32.mrb[249].mxu1  ;;  %6909 = vmatprep.mubr.bf16.mxu0 %v13794_v30  ;;  %v13797_v11 = vld [vmem:[#allocation74_spill] sm:$0xff] }
 0x54c   : > { %v6152_v5 = vpop.f32.mrb[250].mxu1 }
 0x54d   : > { %v12667_v37 = vadd.f32 %v12584_v8, %v6150_v36  ;;  %v6153_v15 = vadd.f32 %v6152_v5, %v13795_v62  ;;  %v6154_v44 = vpop.f32.mrb[251].mxu1  ;;  %v6723_v46 = vpop.f32.mrb[228].mxu0  ;;  %v13798_v8 = vld [vmem:[#allocation51_spill] sm:$0xff] }
 0x54e   : > { %v6724_v3 = vpop.f32.mrb[229].mxu0  ;;  %v13800_v46 = vld [vmem:[#allocation21_spill] sm:$0xff] }
 0x54f   : > { %v12673_v9 = vadd.f32 %v12588_v53, %v6153_v15  ;;  %8743 = vmatmul.mubr.bf16.gmra.mrb[100].mxu1 %v5076_v6  ;;  %v6725_v31 = vpop.f32.mrb[230].mxu0  ;;  %v13799_v53 = vld [vmem:[#allocation94_spill] sm:$0xff]  ;;  %v4836_v3 = vshrl.u32 %v13791_v0, 16 }
 0x550   : > { %v6726_v63 = vpop.f32.mrb[231].mxu0 }
 0x552   : > { %v6157_v33 = vpop.f32.mrb[252].mxu1  ;;  %6910 = vmatmul.mubr.bf16.gmra.mrb[80].mxu0 %v13797_v11 }
 0x553   : > { %v6158_v32 = vpop.f32.mrb[253].mxu1  ;;  %6917 = vmatprep.mubr.bf16.mxu0 %v13798_v8  ;;  %v13801_v8 = vld [vmem:[#allocation6_spill] sm:$0xff] }
 0x554   : > { %v6159_v10 = vpop.f32.mrb[254].mxu1 }
 0x555   : > { %v6160_v36 = vpop.f32.mrb[255].mxu1  ;;  %v12677_v59 = vpop.f32.mrb[232].mxu0  ;;  %v4838_v10 = vor.u32 %v4836_v3, %v13801_v8 }
 0x556   : > { %v6731_v30 = vpop.f32.mrb[233].mxu0 }
 0x557   : > { %v12679_v5 = vpop.f32.mrb[234].mxu0 }
 0x558   : > { %v6734_v26 = vpop.f32.mrb[235].mxu0 }
 0x55a   : > { %v6163_v62 = vpop.f32.mrb[0].mxu1  ;;  %6918 = vmatmul.mubr.bf16.gmra.mrb[84].mxu0 %v13799_v53  ;;  %v4894_v53 = vsel %vm11325_vm5, %v4838_v10, 0 }
 0x55b   : > { %v6164_v15 = vadd.f32 %v6163_v62, %v12434_v27  ;;  %v6165_v44 = vpop.f32.mrb[1].mxu1  ;;  %6923 = vmatprep.mubr.bf16.mxu0 %v13800_v46  ;;  %v13802_v62 = vld [vmem:[#allocation47_spill] sm:$0xff] }
 0x55c   : > { %v6166_v6 = vpop.f32.mrb[2].mxu1 }
 0x55d   : > { %v12686_v31 = vadd.f32 %v12596_v29, %v6164_v15  ;;  %v6167_v63 = vadd.f32 %v6166_v6, %v12437_v60  ;;  %v6168_v33 = vpop.f32.mrb[3].mxu1  ;;  %v6737_v11 = vpop.f32.mrb[236].mxu0 }
 0x55e   : > { %v6738_v32 = vpop.f32.mrb[237].mxu0 }
 0x55f   : > { %v12691_v36 = vadd.f32 %v12602_v39, %v6167_v63  ;;  %v6739_v27 = vpop.f32.mrb[238].mxu0 }
 0x560   : > { %v6740_v30 = vpop.f32.mrb[239].mxu0 }
 0x562   : > { %v6171_v26 = vpop.f32.mrb[4].mxu1  ;;  %6924 = vmatmul.mubr.bf16.gmra.mrb[88].mxu0 %v13802_v62 }
 0x563   : > { %v6172_v29 = vpop.f32.mrb[5].mxu1  ;;  %6931 = vmatprep.mubr.bf16.mxu0 %v4894_v53 }
 0x564   : > { %v6173_v15 = vpop.f32.mrb[6].mxu1 }
 0x565   : > { %v6174_v60 = vpop.f32.mrb[7].mxu1  ;;  %v12696_v44 = vpop.f32.mrb[240].mxu0 }
 0x566   : > { %v6745_v46 = vpop.f32.mrb[241].mxu0 }
 0x567   : > { %v12698_v6 = vpop.f32.mrb[242].mxu0 }
 0x568   : > { %v6748_v3 = vpop.f32.mrb[243].mxu0 }
 0x56a   : > { %v6177_v39 = vpop.f32.mrb[8].mxu1  ;;  %6932 = vmatmul.mubr.bf16.gmra.mrb[92].mxu0 %v13791_v0 }
 0x56b   : > { %v6178_v63 = vadd.f32 %v6177_v39, %v12446_v7  ;;  %v6179_v33 = vpop.f32.mrb[9].mxu1 }
 0x56c   : > { %v6180_v11 = vpop.f32.mrb[10].mxu1 }
 0x56d   : > { %v12703_v1 = vadd.f32 %v12606_v18, %v6178_v63  ;;  %v6181_v32 = vadd.f32 %v6180_v11, %v12449_v2  ;;  %v6182_v8 = vpop.f32.mrb[11].mxu1  ;;  %v6751_v10 = vpop.f32.mrb[244].mxu0 }
 0x56e   : > { %v6752_v27 = vpop.f32.mrb[245].mxu0 }
 0x56f   : > { %v12707_v30 = vadd.f32 %v12610_v43, %v6181_v32  ;;  %v6753_v26 = vpop.f32.mrb[246].mxu0 }
 0x570   : > { %v6754_v62 = vpop.f32.mrb[247].mxu0 }
 0x572   : > { %v6185_v53 = vpop.f32.mrb[12].mxu1 }
 0x573   : > { %v6186_v29 = vpop.f32.mrb[13].mxu1 }
 0x574   : > { %v6187_v0 = vpop.f32.mrb[14].mxu1 }
 0x575   : > { %v6188_v15 = vpop.f32.mrb[15].mxu1  ;;  %v12709_v7 = vpop.f32.mrb[248].mxu0 }
 0x576   : > { %v6759_v60 = vpop.f32.mrb[249].mxu0 }
 0x577   : > { %v12711_v46 = vpop.f32.mrb[250].mxu0 }
 0x578   : > { %v6762_v18 = vpop.f32.mrb[251].mxu0 }
 0x57a   : > { %v6191_v3 = vpop.f32.mrb[16].mxu1 }
 0x57b   : > { %v6192_v2 = vadd.f32 %v6191_v3, %v12458_v38  ;;  %v6193_v39 = vpop.f32.mrb[17].mxu1 }
 0x57c   : > { %v6194_v63 = vpop.f32.mrb[18].mxu1 }
 0x57d   : > { %v12715_v43 = vadd.f32 %v12619_v48, %v6192_v2  ;;  %v6195_v33 = vadd.f32 %v6194_v63, %v12461_v4  ;;  %v6196_v11 = vpop.f32.mrb[19].mxu1  ;;  %v6765_v32 = vpop.f32.mrb[252].mxu0  ;;  %v13803_v4 = vld [vmem:[#allocation41_spill] sm:$0xff] }
 0x57e   : > { %v6766_v8 = vpop.f32.mrb[253].mxu0 }
 0x57f   : > { %v12719_v10 = vadd.f32 %v12626_v22, %v6195_v33  ;;  %v6767_v27 = vpop.f32.mrb[254].mxu0 }
 0x580   : > { %v6768_v26 = vpop.f32.mrb[255].mxu0 }
 0x582   : > { %v6199_v62 = vpop.f32.mrb[20].mxu1 }
 0x583   : > { %v6200_v53 = vpop.f32.mrb[21].mxu1 }
 0x584   : > { %v6201_v29 = vpop.f32.mrb[22].mxu1 }
 0x585   : > { %v6202_v0 = vpop.f32.mrb[23].mxu1  ;;  %v12721_v38 = vpop.f32.mrb[0].mxu0 }
 0x586   : > { %v6773_v15 = vpop.f32.mrb[1].mxu0 }
 0x587   : > { %v12723_v60 = vpop.f32.mrb[2].mxu0 }
 0x588   : > { %v6776_v48 = vpop.f32.mrb[3].mxu0 }
 0x58a   : > { %v6205_v18 = vpop.f32.mrb[24].mxu1 }
 0x58b   : > { %v6206_v3 = vadd.f32 %v6205_v18, %v13803_v4  ;;  %v6207_v2 = vpop.f32.mrb[25].mxu1 }
 0x58c   : > { %v6208_v39 = vpop.f32.mrb[26].mxu1 }
 0x58d   : > { %v12727_v22 = vadd.f32 %v12630_v40, %v6206_v3  ;;  %v6209_v63 = vadd.f32 %v6208_v39, %v12473_v55  ;;  %v6210_v33 = vpop.f32.mrb[27].mxu1  ;;  %v6779_v11 = vpop.f32.mrb[4].mxu0 }
 0x58e   : > { %v6780_v32 = vpop.f32.mrb[5].mxu0 }
 0x58f   : > { %v12731_v8 = vadd.f32 %v12634_v20, %v6209_v63  ;;  %v6781_v27 = vpop.f32.mrb[6].mxu0 }
 0x590   : > { %v6782_v26 = vpop.f32.mrb[7].mxu0 }
 0x592   : > { %v6213_v62 = vpop.f32.mrb[28].mxu1 }
 0x593   : > { %v6214_v53 = vpop.f32.mrb[29].mxu1 }
 0x594   : > { %v6215_v29 = vpop.f32.mrb[30].mxu1 }
 0x595   : > { %v6216_v0 = vpop.f32.mrb[31].mxu1  ;;  %v12733_v15 = vpop.f32.mrb[8].mxu0 }
 0x596   : > { %v6787_v48 = vpop.f32.mrb[9].mxu0 }
 0x597   : > { %v12735_v18 = vpop.f32.mrb[10].mxu0 }
 0x598   : > { %v6790_v40 = vpop.f32.mrb[11].mxu0 }
 0x59a   : > { %v6219_v4 = vpop.f32.mrb[32].mxu1 }
 0x59b   : > { %v6220_v55 = vadd.f32 %v6219_v4, %v12484_v28  ;;  %v6221_v3 = vpop.f32.mrb[33].mxu1 }
 0x59c   : > { %v6222_v2 = vpop.f32.mrb[34].mxu1 }
 0x59d   : > { %v12739_v20 = vadd.f32 %v12643_v54, %v6220_v55  ;;  %v6223_v39 = vadd.f32 %v6222_v2, %v12487_v57  ;;  %v6224_v63 = vpop.f32.mrb[35].mxu1  ;;  %v6793_v33 = vpop.f32.mrb[12].mxu0 }
 0x59e   : > { %v6794_v11 = vpop.f32.mrb[13].mxu0 }
 0x59f   : > { %v12743_v32 = vadd.f32 %v12650_v13, %v6223_v39  ;;  %v6795_v27 = vpop.f32.mrb[14].mxu0  ;;  %v12753_v13 = vld [vmem:[%s12886_s5] ss:$0 sm:$0xff] }
 0x5a0   : > { %v6796_v26 = vpop.f32.mrb[15].mxu0 }
 0x5a2   : > { %v6227_v62 = vpop.f32.mrb[36].mxu1 }
 0x5a3   : > { %v6228_v53 = vpop.f32.mrb[37].mxu1 }
 0x5a4   : > { %v6229_v29 = vpop.f32.mrb[38].mxu1 }
 0x5a5   : > { %v6230_v0 = vpop.f32.mrb[39].mxu1  ;;  %v12745_v28 = vpop.f32.mrb[16].mxu0 }
 0x5a6   : > { %v6801_v48 = vpop.f32.mrb[17].mxu0 }
 0x5a7   : > { %v12747_v40 = vpop.f32.mrb[18].mxu0 }
 0x5a8   : > { %v6804_v54 = vpop.f32.mrb[19].mxu0 }
 0x5aa   : > { %v8684_v57 = vpop.f32.mrb[40].mxu1 }
 0x5ab   : > { %v6972_v4 = vpop.f32.mrb[41].mxu1 }
 0x5ac   : > { %v6973_v55 = vadd.f32 %v6972_v4, %v12654_v24  ;;  %v8685_v3 = vpop.f32.mrb[42].mxu1 }
 0x5ad   : > { %v6975_v2 = vpop.f32.mrb[43].mxu1  ;;  %v6807_v39 = vpop.f32.mrb[20].mxu0 }
 0x5ae   : > { %v7195_v63 = vadd.f32 %v6973_v55, %v12499_v45  ;;  %v6976_v33 = vadd.f32 %v6975_v2, %v12657_v42  ;;  %v6808_v11 = vpop.f32.mrb[21].mxu0 }
 0x5af   : > { %v6809_v27 = vpop.f32.mrb[22].mxu0 }
 0x5b0   : > { %v7234_v26 = vadd.f32 %v12753_v13, %v7195_v63  ;;  %v7196_v62 = vadd.f32 %v6976_v33, %v12502_v34  ;;  %v6810_v53 = vpop.f32.mrb[23].mxu0 }
 0x5b2   : > { %v7235_v24 = vadd.f32 %v12753_v13, %v7196_v62  ;;  %v8688_v29 = vpop.f32.mrb[44].mxu1  ;;  %v7266_v48 = vmax.f32 %v7234_v26, 0.0 }
 0x5b3   : > { %v6986_v0 = vpop.f32.mrb[45].mxu1 }
 0x5b4   : > { %v7267_v54 = vmax.f32 %v7235_v24, 0.0  ;;  %v6987_v57 = vadd.f32 %v6986_v0, %v12677_v59  ;;  %v8689_v4 = vpop.f32.mrb[46].mxu1 }
 0x5b5   : > { %v6989_v45 = vpop.f32.mrb[47].mxu1  ;;  %v12767_v42 = vpop.f32.mrb[24].mxu0 }
 0x5b6   : > { %v7898_v34 = vpack.c.bf16 %v7267_v54, %v7266_v48  ;;  %v7197_v55 = vadd.f32 %v6987_v57, %v12509_v49  ;;  %v6990_v3 = vadd.f32 %v6989_v45, %v12679_v5  ;;  %v6815_v2 = vpop.f32.mrb[25].mxu0 }
 0x5b7   : > { %v12771_v39 = vpop.f32.mrb[26].mxu0 }
 0x5b8   : > { %7899 = vst [vmem:[%s12765_s26] sm:$0xff] %v7898_v34   ;;  %v7236_v59 = vadd.f32 %v12753_v13, %v7197_v55  ;;  %v7198_v63 = vadd.f32 %v6990_v3, %v12512_v19  ;;  %v6818_v33 = vpop.f32.mrb[27].mxu0 }
 0x5ba   : > { %v7237_v11 = vadd.f32 %v12753_v13, %v7198_v63  ;;  %v8692_v27 = vpop.f32.mrb[48].mxu1  ;;  %v7268_v62 = vmax.f32 %v7236_v59, 0.0 }
 0x5bb   : > { %v7000_v26 = vpop.f32.mrb[49].mxu1 }
 0x5bc   : > { %v7269_v53 = vmax.f32 %v7237_v11, 0.0  ;;  %v7001_v49 = vadd.f32 %v7000_v26, %v12696_v44  ;;  %v8693_v24 = vpop.f32.mrb[50].mxu1 }
 0x5bd   : > { %v7003_v5 = vpop.f32.mrb[51].mxu1  ;;  %v6821_v29 = vpop.f32.mrb[28].mxu0 }
 0x5be   : > { %v7903_v0 = vpack.c.bf16 %v7269_v53, %v7268_v62  ;;  %v7199_v48 = vadd.f32 %v7001_v49, %v12516_v56  ;;  %v7004_v54 = vadd.f32 %v7003_v5, %v12698_v6  ;;  %v6822_v57 = vpop.f32.mrb[29].mxu0 }
 0x5bf   : > { %v6823_v19 = vpop.f32.mrb[30].mxu0 }
 0x5c0   : > { %7975 = vst [vmem:[%s12765_s26 + $0x8] sm:$0xff] %v7903_v0   ;;  %v7238_v4 = vadd.f32 %v12753_v13, %v7199_v48  ;;  %v7200_v45 = vadd.f32 %v7004_v54, %v12520_v35  ;;  %v6824_v34 = vpop.f32.mrb[31].mxu0 }
 0x5c2   : > { %v7239_v55 = vadd.f32 %v12753_v13, %v7200_v45  ;;  %v8696_v44 = vpop.f32.mrb[52].mxu1  ;;  %v7270_v2 = vmax.f32 %v7238_v4, 0.0 }
 0x5c3   : > { %v7014_v3 = vpop.f32.mrb[53].mxu1 }
 0x5c4   : > { %v7271_v59 = vmax.f32 %v7239_v55, 0.0  ;;  %v7015_v63 = vadd.f32 %v7014_v3, %v12709_v7  ;;  %v8697_v56 = vpop.f32.mrb[54].mxu1 }
 0x5c5   : > { %v7017_v33 = vpop.f32.mrb[55].mxu1  ;;  %v12785_v6 = vpop.f32.mrb[32].mxu0 }
 0x5c6   : > { %v7908_v11 = vpack.c.bf16 %v7271_v59, %v7270_v2  ;;  %v7201_v27 = vadd.f32 %v7015_v63, %v12526_v47  ;;  %v7018_v26 = vadd.f32 %v7017_v33, %v12711_v46  ;;  %v6829_v35 = vpop.f32.mrb[33].mxu0 }
 0x5c7   : > { %v12789_v62 = vpop.f32.mrb[34].mxu0 }
 0x5c8   : > { %7976 = vst [vmem:[%s12765_s26 + $0x10] sm:$0xff] %v7908_v11   ;;  %v7240_v53 = vadd.f32 %v12753_v13, %v7201_v27  ;;  %v7202_v49 = vadd.f32 %v7018_v26, %v12530_v61  ;;  %v6832_v24 = vpop.f32.mrb[35].mxu0 }
 0x5ca   : > { %v7241_v7 = vadd.f32 %v12753_v13, %v7202_v49  ;;  %v8700_v5 = vpop.f32.mrb[56].mxu1  ;;  %v7272_v0 = vmax.f32 %v7240_v53, 0.0 }
 0x5cb   : > { %v7028_v29 = vpop.f32.mrb[57].mxu1 }
 0x5cc   : > { %v7273_v48 = vmax.f32 %v7241_v7, 0.0  ;;  %v7029_v47 = vadd.f32 %v7028_v29, %v12721_v38  ;;  %v8701_v54 = vpop.f32.mrb[58].mxu1 }
 0x5cd   : > { %v7031_v46 = vpop.f32.mrb[59].mxu1  ;;  %v6835_v57 = vpop.f32.mrb[36].mxu0 }
 0x5ce   : > { %v7913_v19 = vpack.c.bf16 %v7273_v48, %v7272_v0  ;;  %v7203_v4 = vadd.f32 %v7029_v47, %v12539_v50  ;;  %v7032_v45 = vadd.f32 %v7031_v46, %v12723_v60  ;;  %v6836_v34 = vpop.f32.mrb[37].mxu0 }
 0x5cf   : > { %v6837_v61 = vpop.f32.mrb[38].mxu0 }
 0x5d0   : > { %7977 = vst [vmem:[%s12765_s26 + $0x18] sm:$0xff] %v7913_v19   ;;  %v7242_v55 = vadd.f32 %v12753_v13, %v7203_v4  ;;  %v7204_v44 = vadd.f32 %v7032_v45, %v12542_v25  ;;  %v6838_v3 = vpop.f32.mrb[39].mxu0 }
 0x5d2   : > { %v7243_v2 = vadd.f32 %v12753_v13, %v7204_v44  ;;  %v8704_v38 = vpop.f32.mrb[60].mxu1  ;;  %v7274_v63 = vmax.f32 %v7242_v55, 0.0 }
 0x5d3   : > { %v7042_v59 = vpop.f32.mrb[61].mxu1 }
 0x5d4   : > { %v7275_v56 = vmax.f32 %v7243_v2, 0.0  ;;  %v7043_v33 = vadd.f32 %v7042_v59, %v12733_v15  ;;  %v8705_v50 = vpop.f32.mrb[62].mxu1 }
 0x5d5   : > { %v7045_v11 = vpop.f32.mrb[63].mxu1  ;;  %v12803_v60 = vpop.f32.mrb[40].mxu0 }
 0x5d6   : > { %v7918_v27 = vpack.c.bf16 %v7275_v56, %v7274_v63  ;;  %v7205_v26 = vadd.f32 %v7043_v33, %v12553_v12  ;;  %v7046_v35 = vadd.f32 %v7045_v11, %v12735_v18  ;;  %v6843_v25 = vpop.f32.mrb[41].mxu0 }
 0x5d7   : > { %v12807_v53 = vpop.f32.mrb[42].mxu0 }
 0x5d8   : > { %7978 = vst [vmem:[%s12765_s26 + $0x20] sm:$0xff] %v7918_v27   ;;  %v7244_v49 = vadd.f32 %v12753_v13, %v7205_v26  ;;  %v7206_v24 = vadd.f32 %v7046_v35, %v12556_v21  ;;  %v6846_v7 = vpop.f32.mrb[43].mxu0 }
 0x5da   : > { %v7245_v15 = vadd.f32 %v12753_v13, %v7206_v24  ;;  %v8708_v5 = vpop.f32.mrb[64].mxu1  ;;  %v7276_v0 = vmax.f32 %v7244_v49, 0.0 }
 0x5db   : > { %v7056_v29 = vpop.f32.mrb[65].mxu1 }
 0x5dc   : > { %v7277_v48 = vmax.f32 %v7245_v15, 0.0  ;;  %v7057_v12 = vadd.f32 %v7056_v29, %v12745_v28  ;;  %v8709_v47 = vpop.f32.mrb[66].mxu1 }
 0x5dd   : > { %v7059_v18 = vpop.f32.mrb[67].mxu1  ;;  %v6849_v54 = vpop.f32.mrb[44].mxu0 }
 0x5de   : > { %v7923_v46 = vpack.c.bf16 %v7277_v48, %v7276_v0  ;;  %v7207_v57 = vadd.f32 %v7057_v12, %v12571_v58  ;;  %v7060_v19 = vadd.f32 %v7059_v18, %v12747_v40  ;;  %v6850_v4 = vpop.f32.mrb[45].mxu0 }
 0x5df   : > { %v6851_v21 = vpop.f32.mrb[46].mxu0 }
 0x5e0   : > { %7979 = vst [vmem:[%s12765_s26 + $0x28] sm:$0xff] %v7923_v46   ;;  %v7246_v45 = vadd.f32 %v12753_v13, %v7207_v57  ;;  %v7208_v34 = vadd.f32 %v7060_v19, %v12576_v17  ;;  %v6852_v61 = vpop.f32.mrb[47].mxu0 }
 0x5e2   : > { %v7247_v55 = vadd.f32 %v12753_v13, %v7208_v34  ;;  %v8712_v28 = vpop.f32.mrb[68].mxu1  ;;  %v7278_v3 = vmax.f32 %v7246_v45, 0.0 }
 0x5e3   : > { %v7070_v44 = vpop.f32.mrb[69].mxu1 }
 0x5e4   : > { %v7279_v2 = vmax.f32 %v7247_v55, 0.0  ;;  %v7071_v38 = vadd.f32 %v7070_v44, %v12767_v42  ;;  %v8713_v58 = vpop.f32.mrb[70].mxu1 }
 0x5e5   : > { %v7073_v59 = vpop.f32.mrb[71].mxu1  ;;  %v6855_v40 = vpop.f32.mrb[48].mxu0 }
 0x5e6   : > { %v7928_v63 = vpack.c.bf16 %v7279_v2, %v7278_v3  ;;  %v7209_v56 = vadd.f32 %v7071_v38, %v12593_v52  ;;  %v7074_v33 = vadd.f32 %v7073_v59, %v12771_v39  ;;  %v6857_v50 = vpop.f32.mrb[49].mxu0 }
 0x5e7   : > { %v6858_v17 = vpop.f32.mrb[50].mxu0 }
 0x5e8   : > { %7980 = vst [vmem:[%s12765_s26 + $0x30] sm:$0xff] %v7928_v63   ;;  %v7248_v11 = vadd.f32 %v12753_v13, %v7209_v56  ;;  %v7210_v27 = vadd.f32 %v7074_v33, %v12598_v14  ;;  %v6860_v26 = vpop.f32.mrb[51].mxu0 }
 0x5ea   : > { %v7249_v35 = vadd.f32 %v12753_v13, %v7210_v27  ;;  %v8716_v42 = vpop.f32.mrb[72].mxu1  ;;  %v7280_v49 = vmax.f32 %v7248_v11, 0.0 }
 0x5eb   : > { %v7084_v25 = vpop.f32.mrb[73].mxu1 }
 0x5ec   : > { %v7281_v24 = vmax.f32 %v7249_v35, 0.0  ;;  %v7085_v7 = vadd.f32 %v7084_v25, %v12785_v6  ;;  %v8717_v52 = vpop.f32.mrb[74].mxu1 }
 0x5ed   : > { %v7087_v15 = vpop.f32.mrb[75].mxu1  ;;  %v6863_v39 = vpop.f32.mrb[52].mxu0 }
 0x5ee   : > { %v7933_v5 = vpack.c.bf16 %v7281_v24, %v7280_v49  ;;  %v7211_v29 = vadd.f32 %v7085_v7, %v12616_v16  ;;  %v7088_v0 = vadd.f32 %v7087_v15, %v12789_v62  ;;  %v6864_v48 = vpop.f32.mrb[53].mxu0 }
 0x5ef   : > { %v6865_v14 = vpop.f32.mrb[54].mxu0 }
 0x5f0   : > { %7981 = vst [vmem:[%s12765_s26 + $0x38] sm:$0xff] %v7933_v5   ;;  %v7250_v12 = vadd.f32 %v12753_v13, %v7211_v29  ;;  %v7212_v47 = vadd.f32 %v7088_v0, %v12622_v23  ;;  %v6866_v18 = vpop.f32.mrb[55].mxu0 }
 0x5f2   : > { %v7251_v54 = vadd.f32 %v12753_v13, %v7212_v47  ;;  %v8720_v6 = vpop.f32.mrb[76].mxu1  ;;  %v7282_v57 = vmax.f32 %v7250_v12, 0.0 }
 0x5f3   : > { %v7098_v46 = vpop.f32.mrb[77].mxu1 }
 0x5f4   : > { %v7283_v19 = vmax.f32 %v7251_v54, 0.0  ;;  %v7099_v4 = vadd.f32 %v7098_v46, %v12803_v60  ;;  %v8721_v16 = vpop.f32.mrb[78].mxu1 }
 0x5f5   : > { %v7101_v21 = vpop.f32.mrb[79].mxu1  ;;  %v6869_v62 = vpop.f32.mrb[56].mxu0 }
 0x5f6   : > { %v7938_v45 = vpack.c.bf16 %v7283_v19, %v7282_v57  ;;  %v7213_v34 = vadd.f32 %v7099_v4, %v12640_v51  ;;  %v7102_v61 = vadd.f32 %v7101_v21, %v12807_v53  ;;  %v6871_v55 = vpop.f32.mrb[57].mxu0 }
 0x5f7   : > { %v6872_v23 = vpop.f32.mrb[58].mxu0 }
 0x5f8   : > { %7982 = vst [vmem:[%s12765_s26 + $0x40] sm:$0xff] %v7938_v45   ;;  %v7252_v28 = vadd.f32 %v12753_v13, %v7213_v34  ;;  %v7214_v44 = vadd.f32 %v7102_v61, %v12646_v41  ;;  %v6874_v3 = vpop.f32.mrb[59].mxu0 }
 0x5fa   : > { %v7253_v2 = vadd.f32 %v12753_v13, %v7214_v44  ;;  %v8724_v60 = vpop.f32.mrb[80].mxu1  ;;  %v7284_v58 = vmax.f32 %v7252_v28, 0.0 }
 0x5fb   : > { %v7112_v38 = vpop.f32.mrb[81].mxu1 }
 0x5fc   : > { %v7285_v59 = vmax.f32 %v7253_v2, 0.0  ;;  %v7113_v63 = vadd.f32 %v7112_v38, %v6855_v40  ;;  %v8725_v56 = vpop.f32.mrb[82].mxu1 }
 0x5fd   : > { %v7115_v51 = vpop.f32.mrb[83].mxu1  ;;  %v6877_v33 = vpop.f32.mrb[60].mxu0 }
 0x5fe   : > { %v7943_v53 = vpack.c.bf16 %v7285_v59, %v7284_v58  ;;  %v7215_v50 = vadd.f32 %v7113_v63, %v12667_v37  ;;  %v7116_v11 = vadd.f32 %v7115_v51, %v6858_v17  ;;  %v6878_v27 = vpop.f32.mrb[61].mxu0 }
 0x5ff   : > { %v6879_v26 = vpop.f32.mrb[62].mxu0 }
 0x600   : > { %7983 = vst [vmem:[%s12765_s26 + $0x48] sm:$0xff] %v7943_v53   ;;  %v7254_v41 = vadd.f32 %v12753_v13, %v7215_v50  ;;  %v7216_v35 = vadd.f32 %v7116_v11, %v12673_v9  ;;  %v6880_v42 = vpop.f32.mrb[63].mxu0 }
 0x602   : > { %v7255_v25 = vadd.f32 %v12753_v13, %v7216_v35  ;;  %v8728_v49 = vpop.f32.mrb[84].mxu1  ;;  %v7286_v24 = vmax.f32 %v7254_v41, 0.0 }
 0x603   : > { %v7126_v40 = vpop.f32.mrb[85].mxu1 }
 0x604   : > { %v7287_v7 = vmax.f32 %v7255_v25, 0.0  ;;  %v7127_v52 = vadd.f32 %v7126_v40, %v6869_v62  ;;  %v8729_v15 = vpop.f32.mrb[86].mxu1 }
 0x605   : > { %v7129_v39 = vpop.f32.mrb[87].mxu1  ;;  %v6883_v37 = vpop.f32.mrb[64].mxu0 }
 0x606   : > { %v7948_v17 = vpack.c.bf16 %v7287_v7, %v7286_v24  ;;  %v7217_v5 = vadd.f32 %v7127_v52, %v12686_v31  ;;  %v7130_v29 = vadd.f32 %v7129_v39, %v6872_v23  ;;  %v6885_v0 = vpop.f32.mrb[65].mxu0 }
 0x607   : > { %v6886_v48 = vpop.f32.mrb[66].mxu0 }
 0x608   : > { %7984 = vst [vmem:[%s12765_s26 + $0x50] sm:$0xff] %v7948_v17   ;;  %v7256_v9 = vadd.f32 %v12753_v13, %v7217_v5  ;;  %v7218_v14 = vadd.f32 %v7130_v29, %v12691_v36  ;;  %v6888_v12 = vpop.f32.mrb[67].mxu0 }
 0x60a   : > { %v7257_v47 = vadd.f32 %v12753_v13, %v7218_v14  ;;  %v8732_v18 = vpop.f32.mrb[88].mxu1  ;;  %v7288_v6 = vmax.f32 %v7256_v9, 0.0 }
 0x60b   : > { %v7140_v54 = vpop.f32.mrb[89].mxu1 }
 0x60c   : > { %v7289_v46 = vmax.f32 %v7257_v47, 0.0  ;;  %v7141_v57 = vadd.f32 %v7140_v54, %v6883_v37  ;;  %v8733_v19 = vpop.f32.mrb[90].mxu1 }
 0x60d   : > { %v7143_v4 = vpop.f32.mrb[91].mxu1  ;;  %v6891_v31 = vpop.f32.mrb[68].mxu0 }
 0x60e   : > { %v7953_v16 = vpack.c.bf16 %v7289_v46, %v7288_v6  ;;  %v7219_v21 = vadd.f32 %v7141_v57, %v12703_v1  ;;  %v7144_v62 = vadd.f32 %v7143_v4, %v6886_v48  ;;  %v6892_v45 = vpop.f32.mrb[69].mxu0 }
 0x60f   : > { %v6893_v34 = vpop.f32.mrb[70].mxu0 }
 0x610   : > { %7985 = vst [vmem:[%s12765_s26 + $0x58] sm:$0xff] %v7953_v16   ;;  %v7258_v36 = vadd.f32 %v12753_v13, %v7219_v21  ;;  %v7220_v61 = vadd.f32 %v7144_v62, %v12707_v30  ;;  %v6894_v55 = vpop.f32.mrb[71].mxu0 }
 0x612   : > { %v7259_v23 = vadd.f32 %v12753_v13, %v7220_v61  ;;  %v8736_v28 = vpop.f32.mrb[92].mxu1  ;;  %v7290_v3 = vmax.f32 %v7258_v36, 0.0 }
 0x613   : > { %v7154_v44 = vpop.f32.mrb[93].mxu1 }
 0x614   : > { %v7291_v2 = vmax.f32 %v7259_v23, 0.0  ;;  %v8737_v60 = vpop.f32.mrb[94].mxu1 }
 0x615   : > { %v7157_v38 = vpop.f32.mrb[95].mxu1  ;;  %v6897_v58 = vpop.f32.mrb[72].mxu0 }
 0x616   : > { %v7958_v1 = vpack.c.bf16 %v7291_v2, %v7290_v3  ;;  %v7155_v59 = vadd.f32 %v7154_v44, %v6897_v58  ;;  %v6899_v63 = vpop.f32.mrb[73].mxu0 }
 0x617   : > { %v6900_v56 = vpop.f32.mrb[74].mxu0 }
 0x618   : > { %7986 = vst [vmem:[%s12765_s26 + $0x60] sm:$0xff] %v7958_v1   ;;  %v7221_v51 = vadd.f32 %v7155_v59, %v12715_v43  ;;  %v7158_v33 = vadd.f32 %v7157_v38, %v6900_v56  ;;  %v6902_v30 = vpop.f32.mrb[75].mxu0 }
 0x61a   : > { %v7260_v53 = vadd.f32 %v12753_v13, %v7221_v51  ;;  %v7222_v50 = vadd.f32 %v7158_v33, %v12719_v10  ;;  %v8740_v11 = vpop.f32.mrb[96].mxu1 }
 0x61b   : > { %v7168_v27 = vpop.f32.mrb[97].mxu1 }
 0x61c   : > { %v7261_v26 = vadd.f32 %v12753_v13, %v7222_v50  ;;  %v8741_v41 = vpop.f32.mrb[98].mxu1  ;;  %v7292_v25 = vmax.f32 %v7260_v53, 0.0 }
 0x61d   : > { %v7171_v35 = vpop.f32.mrb[99].mxu1  ;;  %v6905_v42 = vpop.f32.mrb[76].mxu0 }
 0x61e   : > { %v7293_v49 = vmax.f32 %v7261_v26, 0.0  ;;  %v6906_v40 = vpop.f32.mrb[77].mxu0 }
 0x61f   : > { %v6907_v24 = vpop.f32.mrb[78].mxu0 }
 0x620   : > { %v7963_v7 = vpack.c.bf16 %v7293_v49, %v7292_v25  ;;  %v6908_v43 = vpop.f32.mrb[79].mxu0 }
 0x622   : > { %7987 = vst [vmem:[%s12765_s26 + $0x68] sm:$0xff] %v7963_v7   ;;  %v8744_v52 = vpop.f32.mrb[100].mxu1 }
 0x623   : > { %v7182_v15 = vpop.f32.mrb[101].mxu1 }
 0x624   : > { %v8745_v39 = vpop.f32.mrb[102].mxu1 }
 0x625   : > { %v7185_v37 = vpop.f32.mrb[103].mxu1  ;;  %v6911_v17 = vpop.f32.mrb[80].mxu0 }
 0x626   : > { %v7169_v10 = vadd.f32 %v7168_v27, %v6911_v17  ;;  %v6913_v5 = vpop.f32.mrb[81].mxu0 }
 0x627   : > { %v6914_v29 = vpop.f32.mrb[82].mxu0 }
 0x628   : > { %v7223_v0 = vadd.f32 %v7169_v10, %v12727_v22  ;;  %v7172_v48 = vadd.f32 %v7171_v35, %v6914_v29  ;;  %v6916_v9 = vpop.f32.mrb[83].mxu0 }
 0x62a   : > { %v7262_v14 = vadd.f32 %v12753_v13, %v7223_v0  ;;  %v7224_v12 = vadd.f32 %v7172_v48, %v12731_v8 }
 0x62c   : > { %v7263_v47 = vadd.f32 %v12753_v13, %v7224_v12  ;;  %v7294_v54 = vmax.f32 %v7262_v14, 0.0 }
 0x62d   : > { %v6919_v18 = vpop.f32.mrb[84].mxu0 }
 0x62e   : > { %v7295_v6 = vmax.f32 %v7263_v47, 0.0  ;;  %v6920_v46 = vpop.f32.mrb[85].mxu0 }
 0x62f   : > { %v6921_v57 = vpop.f32.mrb[86].mxu0 }
 0x630   : > { %v7968_v19 = vpack.c.bf16 %v7295_v6, %v7294_v54  ;;  %v6922_v4 = vpop.f32.mrb[87].mxu0 }
 0x632   : > { %7988 = vst [vmem:[%s12765_s26 + $0x70] sm:$0xff] %v7968_v19  }
 0x635   : > { %v6925_v31 = vpop.f32.mrb[88].mxu0 }
 0x636   : > { %v7183_v16 = vadd.f32 %v7182_v15, %v6925_v31  ;;  %v6927_v22 = vpop.f32.mrb[89].mxu0 }
 0x637   : > { %v6928_v21 = vpop.f32.mrb[90].mxu0 }
 0x638   : > { %v7225_v62 = vadd.f32 %v7183_v16, %v12739_v20  ;;  %v7186_v45 = vadd.f32 %v7185_v37, %v6928_v21  ;;  %v6930_v34 = vpop.f32.mrb[91].mxu0 }
 0x63a   : > { %v7264_v8 = vadd.f32 %v12753_v13, %v7225_v62  ;;  %v7226_v36 = vadd.f32 %v7186_v45, %v12743_v32 }
 0x63c   : > { %v7265_v61 = vadd.f32 %v12753_v13, %v7226_v36  ;;  %v7296_v23 = vmax.f32 %v7264_v8, 0.0 }
 0x63d   : > { %v6933_v55 = vpop.f32.mrb[92].mxu0 }
 0x63e   : > { %v7297_v28 = vmax.f32 %v7265_v61, 0.0  ;;  %v6934_v44 = vpop.f32.mrb[93].mxu0 }
 0x63f   : > { %v6935_v3 = vpop.f32.mrb[94].mxu0 }
 0x640   : > { %v7973_v2 = vpack.c.bf16 %v7297_v28, %v7296_v23  ;;  %v6936_v60 = vpop.f32.mrb[95].mxu0 }
 0x642   : > { %7989 = vst [vmem:[%s12765_s26 + $0x78] sm:$0xff] %v7973_v2  }
 0x643 PF: > { %s16_s23 = sadd.s32 1, %s9075_s23   ;;  %s13804_s21 = smov %s9071_s22 }
 0x644   : > { %p13_p5 = scmp.ge.s32.totalorder %s16_s23, 4   ;;  %s13805_s22 = smov %s13807_s24 }
 0x646   :  { %15 = sbr.rel (!%p13_p5) target bundleno = 2 (0x2), region = 77 }

</bundles_post_ra>
